<compile_context>
chip_gen: v6e
topology: v6e:2x2x1
jax: 0.10.0
libtpu: 0.0.40
codegen_flags: <defaults>
</compile_context>

<pallas_src>
import functools

import numpy as np

import jax
import jax.numpy as jnp
from jax.experimental import pallas as pl
from jax.experimental.pallas import tpu as pltpu

Fm1 = 16      # feature maps conv1
Fm2 = 32      # feature maps conv2
Ks = 3        # conv kernel size (kernel code assumes 3)
POOL = 2
NO = 10
BN_EPS = 1e-5


# ------------------------------ fused Pallas kernel ------------------------------ #

def _net_kernel(xe_ref, xo_ref, w1_ref, bst1_ref, w2_ref, bst2_ref,
                fw1_ref, bst3_ref, fw2_ref, fb2_ref, o_ref, *, bt, hp1, hp2):
    """Fused Net forward for one batch tile of `bt` samples.

    xe_ref/xo_ref : (hp1+1, bt, W*Cin) even / odd input rows, (row, batch, lane) order.
    w1_ref/w2_ref : (3, K, 2*wp*Cout) packed parity-Toeplitz conv weights (bf16).
    bst*_ref      : (3, N) rows = [bias, bn_scale, bn_shift] tiled per lane (f32).
    fw1_ref       : (hp2, wp2*Fm2, Nh1) fc1 weight, permuted to the slab flatten order.
    fw2_ref       : (Nh1, NO) fc2 weight.   fb2_ref : (1, NO) fc2 bias.
    o_ref         : (bt, NO) log-probabilities.
    """
    f32 = jnp.float32
    act_dt = xe_ref.dtype
    cat = lambda parts: jnp.concatenate(parts, axis=0)

    def conv_pool(l0, l1, l2, w_ref, bst_ref, half_m):
        # 3 packed MXU matmuls (row parities stacked along M, column parities along N),
        # then bias -> ReLU -> BN(eval) -> 2x2 maxpool as a 4-quadrant elementwise max.
        half_n = w_ref.shape[2] // 2
        acc = (jnp.dot(l0, w_ref[0], preferred_element_type=f32)
               + jnp.dot(l1, w_ref[1], preferred_element_type=f32)
               + jnp.dot(l2, w_ref[2], preferred_element_type=f32))
        # BN must be applied before the pool max (scale may be negative).
        z = jnp.maximum(acc + bst_ref[0:1, :], 0.0) * bst_ref[1:2, :] + bst_ref[2:3, :]
        ze, zo = z[:half_m, :], z[half_m:, :]                # even / odd conv rows
        return jnp.maximum(jnp.maximum(ze[:, :half_n], ze[:, half_n:]),
                           jnp.maximum(zo[:, :half_n], zo[:, half_n:]))

    # ---------------- conv1 block: M packed as (pooled row, batch) ---------------- #
    xe = xe_ref[...]                                   # (hp1+1, bt, W)
    xo = xo_ref[...]
    xe_i = [xe[i] for i in range(hp1 + 1)]             # each (bt, W), tile-aligned
    xo_i = [xo[i] for i in range(hp1 + 1)]
    m1 = hp1 * bt
    l0 = cat([xe_i[i] for i in range(hp1)] + [xo_i[i] for i in range(hp1)])
    l1 = cat([xo_i[i] for i in range(hp1)] + [xe_i[i + 1] for i in range(hp1)])
    l2 = cat([xe_i[i + 1] for i in range(hp1)] + [xo_i[i + 1] for i in range(hp1)])
    y1 = conv_pool(l0, l1, l2, w1_ref, bst1_ref, m1).astype(act_dt)   # (hp1*bt, wp1*Fm1)

    # ---------------- conv2 block (reads y1 directly from VMEM values) ------------ #
    m2 = hp2 * bt
    row = lambda r: y1[r * bt:(r + 1) * bt, :]          # pooled conv1 row r, all bt samples
    l0 = cat([row(2 * j) for j in range(hp2)] + [row(2 * j + 1) for j in range(hp2)])
    l1 = cat([row(2 * j + 1) for j in range(hp2)] + [row(2 * j + 2) for j in range(hp2)])
    l2 = cat([row(2 * j + 2) for j in range(hp2)] + [row(2 * j + 3) for j in range(hp2)])
    y2 = conv_pool(l0, l1, l2, w2_ref, bst2_ref, m2).astype(act_dt)   # (hp2*bt, wp2*Fm2)

    # ---------------- fc1 (+ReLU+BN1d) and fc2 (+log_softmax) --------------------- #
    # fc1 as a sum of hp2 matmuls -> no flatten/reshape needed; rows of y2 are already
    # grouped by pooled row r (all bt samples), matching fw1's per-row blocks.
    h = jnp.dot(y2[0:bt, :], fw1_ref[0], preferred_element_type=f32)
    for r in range(1, hp2):
        h = h + jnp.dot(y2[r * bt:(r + 1) * bt, :], fw1_ref[r],
                        preferred_element_type=f32)
    h = jnp.maximum(h + bst3_ref[0:1, :], 0.0) * bst3_ref[1:2, :] + bst3_ref[2:3, :]

    logits = jnp.dot(h.astype(act_dt), fw2_ref[...],
                     preferred_element_type=f32) + fb2_ref[...]
    mx = jnp.max(logits, axis=-1, keepdims=True)
    sh = logits - mx
    lse = jnp.log(jnp.sum(jnp.exp(sh), axis=-1, keepdims=True))
    o_ref[...] = (sh - lse).astype(o_ref.dtype)


# ------------------------------- kernel wrapper ---------------------------------- #

def _pick_batch_tile(n):
    # Multiple of 16 (bf16 sublane tile); bigger tiles for bigger batches.
    return 16 if n <= 128 else 32


def net_pallas_call(xe, xo, prep, *, bt, hp1, wp1, hp2, wp2):
    he, n_pad, w_in = xe.shape
    wc1p = prep["c1_w"].shape[2]                      # 2 * wp1 * Fm1
    wc2p = prep["c2_w"].shape[2]                      # 2 * wp2 * Fm2
    nh1 = prep["fc1_w"].shape[2]
    grid = (n_pad // bt,)

    kern = functools.partial(_net_kernel, bt=bt, hp1=hp1, hp2=hp2)

    flops_ps = (2 * (2 * hp1) * w_in * wc1p * 3
                + 2 * (2 * hp2) * (wp1 * Fm1) * wc2p * 3
                + 2 * (hp2 * wp2 * Fm2) * nh1
                + 2 * nh1 * NO)
    act_bytes_ps = xe.dtype.itemsize * 2 * he * w_in + 4 * NO
    w_bytes = sum(int(np.prod(prep[k].shape)) * prep[k].dtype.itemsize for k in prep)

    return pl.pallas_call(
        kern,
        out_shape=jax.ShapeDtypeStruct((n_pad, NO), jnp.float32),
        grid=grid,
        in_specs=[
            pl.BlockSpec((he, bt, w_in), lambda i: (0, i, 0)),
            pl.BlockSpec((he, bt, w_in), lambda i: (0, i, 0)),
            pl.BlockSpec(prep["c1_w"].shape, lambda i: (0, 0, 0)),
            pl.BlockSpec(prep["c1_bst"].shape, lambda i: (0, 0)),
            pl.BlockSpec(prep["c2_w"].shape, lambda i: (0, 0, 0)),
            pl.BlockSpec(prep["c2_bst"].shape, lambda i: (0, 0)),
            pl.BlockSpec(prep["fc1_w"].shape, lambda i: (0, 0, 0)),
            pl.BlockSpec(prep["fc1_bst"].shape, lambda i: (0, 0)),
            pl.BlockSpec(prep["fc2_w"].shape, lambda i: (0, 0)),
            pl.BlockSpec(prep["fc2_b"].shape, lambda i: (0, 0)),
        ],
        out_specs=pl.BlockSpec((bt, NO), lambda i: (i, 0)),
        compiler_params=pltpu.CompilerParams(
            dimension_semantics=("parallel",),
            vmem_limit_bytes=32 * 1024 * 1024),
        cost_estimate=pl.CostEstimate(
            flops=int(flops_ps) * int(n_pad),
            transcendentals=11 * int(n_pad),
            bytes_accessed=int(act_bytes_ps) * int(n_pad) + int(w_bytes)),
    )(xe, xo, prep["c1_w"], prep["c1_bst"], prep["c2_w"], prep["c2_bst"],
      prep["fc1_w"], prep["fc1_bst"], prep["fc2_w"], prep["fc2_b"])


# -------------------------- one-time parameter preparation ------------------------ #

def fold_bn(gamma, beta, mean, var, eps=BN_EPS):
    scale = gamma / jnp.sqrt(var + eps)
    shift = beta - mean * scale
    return scale, shift


def build_conv_toeplitz(w, win, wp):
    """Conv weight (Cout, Cin, Kh, Kw) -> (Kh, Win*Cin, 2*wp*Cout) packed parity Toeplitz.

    Row index = w_in*Cin + cin (matches the (H, W*Cin) activation slab).  Column index =
    par*(wp*Cout) + j*Cout + c produces conv output column w_out = 2j + par.
    """
    w = np.asarray(jax.device_get(w)).astype(np.float32)
    cout, cin, kh, kw = w.shape
    wk = np.transpose(w, (2, 3, 1, 0))                         # (kh, kw, cin, cout)
    mats = np.zeros((kh, win, cin, 2, wp, cout), np.float32)
    for par in range(2):
        for ky in range(kh):
            for kx in range(kw):
                for j in range(wp):
                    w_out = 2 * j + par
                    mats[ky, w_out + kx, :, par, j, :] = wk[ky, kx]
    return jnp.asarray(mats.reshape(kh, win * cin, 2 * wp * cout), dtype=jnp.bfloat16)


def bn_bst(bias, bn, reps):
    """Stack [bias, bn_scale, bn_shift], each tiled `reps` times along lanes -> (3, reps*C)."""
    scale, shift = fold_bn(*bn)
    tile = lambda v: jnp.tile(v, reps).reshape(1, -1)
    return jnp.concatenate([tile(bias), tile(scale), tile(shift)],
                           axis=0).astype(jnp.float32)


def permute_fc1_weight(fc1_w, hp, wp, cout):
    """PyTorch fc1 weight (Nh1, C*H*W NCHW order) -> (hp, wp*C, Nh1) slab-order blocks."""
    w = np.asarray(jax.device_get(fc1_w)).astype(np.float32)   # (nh1, cout*hp*wp)
    nh1 = w.shape[0]
    w = w.reshape(nh1, cout, hp, wp).transpose(2, 3, 1, 0)      # (hp, wp, cout, nh1)
    return jnp.asarray(w.reshape(hp, wp * cout, nh1), dtype=jnp.bfloat16)


def prepare_params(params, h_in=28, w_in=28):
    """Precompute (outside jit) all weight transforms, BN folds and per-lane tilings."""
    hp1 = (h_in - Ks + 1) // POOL
    wp1 = (w_in - Ks + 1) // POOL
    hp2 = (hp1 - Ks + 1) // POOL
    wp2 = (wp1 - Ks + 1) // POOL
    return {
        "c1_w": build_conv_toeplitz(params["conv1_w"], w_in, wp1),
        "c1_bst": bn_bst(params["conv1_b"], params["bn1"], 2 * wp1),
        "c2_w": build_conv_toeplitz(params["conv2_w"], wp1, wp2),
        "c2_bst": bn_bst(params["conv2_b"], params["bn2"], 2 * wp2),
        "fc1_w": permute_fc1_weight(params["fc1_w"], hp2, wp2, Fm2),
        "fc1_bst": bn_bst(params["fc1_b"], params["bn3"], 1),
        "fc2_w": params["fc2_w"].T.astype(jnp.bfloat16),
        "fc2_b": params["fc2_b"].reshape(1, -1).astype(jnp.float32),
    }


# ------------------------------------ forward ------------------------------------- #

@jax.jit
def net_forward(x_nchw, prep):
    n, cin, h, w = x_nchw.shape
    hp1 = (h - Ks + 1) // POOL
    wp1 = (w - Ks + 1) // POOL
    hp2 = (hp1 - Ks + 1) // POOL
    wp2 = (wp1 - Ks + 1) // POOL

    bt = _pick_batch_tile(n)
    n_pad = ((n + bt - 1) // bt) * bt

    # NCHW -> per-sample (H, W*Cin) slab (channels fastest in lanes).
    x2 = jnp.transpose(x_nchw, (0, 2, 3, 1)).reshape(n, h, w * cin).astype(jnp.float32)
    if n_pad != n:
        x2 = jnp.pad(x2, ((0, n_pad - n), (0, 0), (0, 0)))

    # Even/odd input-row slabs in (row, batch, lane) order (cheap XLA plumbing on the raw
    # input only); everything downstream stays inside the single fused kernel.
    xe = jnp.transpose(x2[:, 0::2, :][:, :hp1 + 1, :], (1, 0, 2)).astype(jnp.bfloat16)
    xo = jnp.transpose(x2[:, 1::2, :][:, :hp1 + 1, :], (1, 0, 2)).astype(jnp.bfloat16)

    out = net_pallas_call(xe, xo, prep, bt=bt, hp1=hp1, wp1=wp1, hp2=hp2, wp2=wp2)
    return out[:n]


# ------------------------------- pure-XLA reference -------------------------------- #

def reference_forward(x_nchw, params):
    x = jnp.transpose(x_nchw, (0, 2, 3, 1)).astype(jnp.float32)

    def block(xx, w, b, bn):
        y = jax.lax.conv_general_dilated(
            xx, jnp.transpose(w, (2, 3, 1, 0)), (1, 1), "VALID",
            dimension_numbers=("NHWC", "HWIO", "NHWC"),
            precision=jax.lax.Precision.HIGHEST)
        y = jnp.maximum(y + b, 0.0)
        s, t = fold_bn(*bn)
        y = y * s + t
        nn_, hh, ww, c = y.shape
        hp, wp = hh // POOL, ww // POOL
        y = y[:, :POOL * hp, :POOL * wp, :].reshape(nn_, hp, POOL, wp, POOL, c).max(axis=(2, 4))
        return y

    y = block(x, params["conv1_w"], params["conv1_b"], params["bn1"])
    y = block(y, params["conv2_w"], params["conv2_b"], params["bn2"])
    feat = jnp.transpose(y, (0, 3, 1, 2)).reshape(y.shape[0], -1)
    s3, t3 = fold_bn(*params["bn3"])
    h1 = jnp.maximum(
        jnp.dot(feat, params["fc1_w"].T, precision=jax.lax.Precision.HIGHEST)
        + params["fc1_b"], 0.0) * s3 + t3
    logits = jnp.dot(h1, params["fc2_w"].T, precision=jax.lax.Precision.HIGHEST) + params["fc2_b"]
    return jax.nn.log_softmax(logits, axis=-1)


# ------------------------------------- params -------------------------------------- #

def init_params(key, h_in=28, w_in=28):
    s1 = (h_in - Ks + 1) // POOL
    s2 = (s1 - Ks + 1) // POOL
    ni = s2 * s2 * Fm2
    nh1 = ni // 2

    ks_ = jax.random.split(key, 12)
    u = lambda k, shape, s: (jax.random.normal(k, shape, jnp.float32) * s)

    def bn(k, c):
        kg, kb, km, kv = jax.random.split(k, 4)
        gamma = 0.5 + jax.random.uniform(kg, (c,), jnp.float32)
        beta = u(kb, (c,), 0.1)
        mean = u(km, (c,), 0.1)
        var = 0.5 + jax.random.uniform(kv, (c,), jnp.float32)
        return (gamma, beta, mean, var)

    return {
        "conv1_w": u(ks_[0], (Fm1, 1, Ks, Ks), 0.3),
        "conv1_b": u(ks_[1], (Fm1,), 0.1),
        "bn1": bn(ks_[2], Fm1),
        "conv2_w": u(ks_[3], (Fm2, Fm1, Ks, Ks), 0.1),
        "conv2_b": u(ks_[4], (Fm2,), 0.1),
        "bn2": bn(ks_[5], Fm2),
        "fc1_w": u(ks_[6], (nh1, ni), 0.05),
        "fc1_b": u(ks_[7], (nh1,), 0.05),
        "bn3": bn(ks_[8], nh1),
        "fc2_w": u(ks_[9], (NO, nh1), 0.05),
        "fc2_b": u(ks_[10], (NO,), 0.05),
    }


if __name__ == "__main__":
    root = jax.random.PRNGKey(0)
    kx, kp = jax.random.split(root)

    params = init_params(kp, 28, 28)
    prep = prepare_params(params, 28, 28)

    # MNIST-like input: batch=2, 1 channel, 28x28 (NCHW, as PyTorch).
    x = jax.random.normal(kx, (2, 1, 28, 28), jnp.float32)
    out = jax.block_until_ready(net_forward(x, prep))

    assert out.shape == (2, 10), out.shape
    # log_softmax rows must exponentiate-sum to ~1 (normalization done in f32).
    assert jnp.allclose(jnp.sum(jnp.exp(out), axis=1), 1.0, atol=1e-3)

    # Numerical check against a pure-XLA f32 reference (tolerance absorbs bf16 weights/acts).
    ref = reference_forward(x, params)
    err = float(jnp.max(jnp.abs(out - ref)))
    assert err < 1.5e-1, f"max abs error vs reference (batch=2): {err}"

    # Exercise batch padding + multi-step "parallel" grid path.
    kx2 = jax.random.fold_in(kx, 1)
    x_big = jax.random.normal(kx2, (37, 1, 28, 28), jnp.float32)
    out_big = jax.block_until_ready(net_forward(x_big, prep))
    assert out_big.shape == (37, 10), out_big.shape
    ref_big = reference_forward(x_big, params)
    err_big = float(jnp.max(jnp.abs(out_big - ref_big)))
    assert err_big < 1.5e-1, f"max abs error vs reference (batch=37): {err_big}"

    print("KERNEL_OK")
</pallas_src>

<mosaic_0001>
module attributes {stable_mosaic.version = 11 : i64} {
  func.func @_net_kernel(%arg0: i32, %arg1: memref<14x16x28xbf16, #tpu.memory_space<vmem>>, %arg2: memref<14x16x28xbf16, #tpu.memory_space<vmem>>, %arg3: memref<3x28x416xbf16, #tpu.memory_space<vmem>>, %arg4: memref<3x416xf32, #tpu.memory_space<vmem>>, %arg5: memref<3x208x320xbf16, #tpu.memory_space<vmem>>, %arg6: memref<3x320xf32, #tpu.memory_space<vmem>>, %arg7: memref<5x160x400xbf16, #tpu.memory_space<vmem>>, %arg8: memref<3x400xf32, #tpu.memory_space<vmem>>, %arg9: memref<400x10xbf16, #tpu.memory_space<vmem>>, %arg10: memref<1x10xf32, #tpu.memory_space<vmem>>, %arg11: memref<16x10xf32, #tpu.memory_space<vmem>>) attributes {dimension_semantics = [#tpu.dimension_semantics<parallel>], iteration_bounds = array<i64: 1>, scalar_prefetch = 0 : i64, scratch_operands = 0 : i64, tpu.core_type = #tpu.core_type<tc>, window_params = [{transform_indices = @transform_0, window_bounds = array<i64: 14, 16, 28>}, {transform_indices = @transform_1, window_bounds = array<i64: 14, 16, 28>}, {pipeline_mode = #tpu.pipeline_mode<synchronous>, transform_indices = @transform_2, window_bounds = array<i64: 3, 28, 416>}, {pipeline_mode = #tpu.pipeline_mode<synchronous>, transform_indices = @transform_3, window_bounds = array<i64: 3, 416>}, {pipeline_mode = #tpu.pipeline_mode<synchronous>, transform_indices = @transform_4, window_bounds = array<i64: 3, 208, 320>}, {pipeline_mode = #tpu.pipeline_mode<synchronous>, transform_indices = @transform_5, window_bounds = array<i64: 3, 320>}, {pipeline_mode = #tpu.pipeline_mode<synchronous>, transform_indices = @transform_6, window_bounds = array<i64: 5, 160, 400>}, {pipeline_mode = #tpu.pipeline_mode<synchronous>, transform_indices = @transform_7, window_bounds = array<i64: 3, 400>}, {pipeline_mode = #tpu.pipeline_mode<synchronous>, transform_indices = @transform_8, window_bounds = array<i64: 400, 10>}, {pipeline_mode = #tpu.pipeline_mode<synchronous>, transform_indices = @transform_9, window_bounds = array<i64: 1, 10>}, {transform_indices = @transform_10, window_bounds = array<i64: 16, 10>}]} {
    %c0 = arith.constant 0 : index
    %c0_0 = arith.constant 0 : index
    %c0_1 = arith.constant 0 : index
    %0 = vector.load %arg1[%c0, %c0_0, %c0_1] : memref<14x16x28xbf16, #tpu.memory_space<vmem>>, vector<14x16x28xbf16>
    %c0_2 = arith.constant 0 : index
    %c0_3 = arith.constant 0 : index
    %c0_4 = arith.constant 0 : index
    %1 = vector.load %arg2[%c0_2, %c0_3, %c0_4] : memref<14x16x28xbf16, #tpu.memory_space<vmem>>, vector<14x16x28xbf16>
    %2 = vector.extract_strided_slice %0 {offsets = [0, 0, 0], sizes = [1, 16, 28], strides = [1, 1, 1]} : vector<14x16x28xbf16> to vector<1x16x28xbf16>
    %3 = vector.shape_cast %2 : vector<1x16x28xbf16> to vector<16x28xbf16>
    %4 = vector.extract_strided_slice %0 {offsets = [1, 0, 0], sizes = [1, 16, 28], strides = [1, 1, 1]} : vector<14x16x28xbf16> to vector<1x16x28xbf16>
    %5 = vector.shape_cast %4 : vector<1x16x28xbf16> to vector<16x28xbf16>
    %6 = vector.extract_strided_slice %0 {offsets = [2, 0, 0], sizes = [1, 16, 28], strides = [1, 1, 1]} : vector<14x16x28xbf16> to vector<1x16x28xbf16>
    %7 = vector.shape_cast %6 : vector<1x16x28xbf16> to vector<16x28xbf16>
    %8 = vector.extract_strided_slice %0 {offsets = [3, 0, 0], sizes = [1, 16, 28], strides = [1, 1, 1]} : vector<14x16x28xbf16> to vector<1x16x28xbf16>
    %9 = vector.shape_cast %8 : vector<1x16x28xbf16> to vector<16x28xbf16>
    %10 = vector.extract_strided_slice %0 {offsets = [4, 0, 0], sizes = [1, 16, 28], strides = [1, 1, 1]} : vector<14x16x28xbf16> to vector<1x16x28xbf16>
    %11 = vector.shape_cast %10 : vector<1x16x28xbf16> to vector<16x28xbf16>
    %12 = vector.extract_strided_slice %0 {offsets = [5, 0, 0], sizes = [1, 16, 28], strides = [1, 1, 1]} : vector<14x16x28xbf16> to vector<1x16x28xbf16>
    %13 = vector.shape_cast %12 : vector<1x16x28xbf16> to vector<16x28xbf16>
    %14 = vector.extract_strided_slice %0 {offsets = [6, 0, 0], sizes = [1, 16, 28], strides = [1, 1, 1]} : vector<14x16x28xbf16> to vector<1x16x28xbf16>
    %15 = vector.shape_cast %14 : vector<1x16x28xbf16> to vector<16x28xbf16>
    %16 = vector.extract_strided_slice %0 {offsets = [7, 0, 0], sizes = [1, 16, 28], strides = [1, 1, 1]} : vector<14x16x28xbf16> to vector<1x16x28xbf16>
    %17 = vector.shape_cast %16 : vector<1x16x28xbf16> to vector<16x28xbf16>
    %18 = vector.extract_strided_slice %0 {offsets = [8, 0, 0], sizes = [1, 16, 28], strides = [1, 1, 1]} : vector<14x16x28xbf16> to vector<1x16x28xbf16>
    %19 = vector.shape_cast %18 : vector<1x16x28xbf16> to vector<16x28xbf16>
    %20 = vector.extract_strided_slice %0 {offsets = [9, 0, 0], sizes = [1, 16, 28], strides = [1, 1, 1]} : vector<14x16x28xbf16> to vector<1x16x28xbf16>
    %21 = vector.shape_cast %20 : vector<1x16x28xbf16> to vector<16x28xbf16>
    %22 = vector.extract_strided_slice %0 {offsets = [10, 0, 0], sizes = [1, 16, 28], strides = [1, 1, 1]} : vector<14x16x28xbf16> to vector<1x16x28xbf16>
    %23 = vector.shape_cast %22 : vector<1x16x28xbf16> to vector<16x28xbf16>
    %24 = vector.extract_strided_slice %0 {offsets = [11, 0, 0], sizes = [1, 16, 28], strides = [1, 1, 1]} : vector<14x16x28xbf16> to vector<1x16x28xbf16>
    %25 = vector.shape_cast %24 : vector<1x16x28xbf16> to vector<16x28xbf16>
    %26 = vector.extract_strided_slice %0 {offsets = [12, 0, 0], sizes = [1, 16, 28], strides = [1, 1, 1]} : vector<14x16x28xbf16> to vector<1x16x28xbf16>
    %27 = vector.shape_cast %26 : vector<1x16x28xbf16> to vector<16x28xbf16>
    %28 = vector.extract_strided_slice %0 {offsets = [13, 0, 0], sizes = [1, 16, 28], strides = [1, 1, 1]} : vector<14x16x28xbf16> to vector<1x16x28xbf16>
    %29 = vector.shape_cast %28 : vector<1x16x28xbf16> to vector<16x28xbf16>
    %30 = vector.extract_strided_slice %1 {offsets = [0, 0, 0], sizes = [1, 16, 28], strides = [1, 1, 1]} : vector<14x16x28xbf16> to vector<1x16x28xbf16>
    %31 = vector.shape_cast %30 : vector<1x16x28xbf16> to vector<16x28xbf16>
    %32 = vector.extract_strided_slice %1 {offsets = [1, 0, 0], sizes = [1, 16, 28], strides = [1, 1, 1]} : vector<14x16x28xbf16> to vector<1x16x28xbf16>
    %33 = vector.shape_cast %32 : vector<1x16x28xbf16> to vector<16x28xbf16>
    %34 = vector.extract_strided_slice %1 {offsets = [2, 0, 0], sizes = [1, 16, 28], strides = [1, 1, 1]} : vector<14x16x28xbf16> to vector<1x16x28xbf16>
    %35 = vector.shape_cast %34 : vector<1x16x28xbf16> to vector<16x28xbf16>
    %36 = vector.extract_strided_slice %1 {offsets = [3, 0, 0], sizes = [1, 16, 28], strides = [1, 1, 1]} : vector<14x16x28xbf16> to vector<1x16x28xbf16>
    %37 = vector.shape_cast %36 : vector<1x16x28xbf16> to vector<16x28xbf16>
    %38 = vector.extract_strided_slice %1 {offsets = [4, 0, 0], sizes = [1, 16, 28], strides = [1, 1, 1]} : vector<14x16x28xbf16> to vector<1x16x28xbf16>
    %39 = vector.shape_cast %38 : vector<1x16x28xbf16> to vector<16x28xbf16>
    %40 = vector.extract_strided_slice %1 {offsets = [5, 0, 0], sizes = [1, 16, 28], strides = [1, 1, 1]} : vector<14x16x28xbf16> to vector<1x16x28xbf16>
    %41 = vector.shape_cast %40 : vector<1x16x28xbf16> to vector<16x28xbf16>
    %42 = vector.extract_strided_slice %1 {offsets = [6, 0, 0], sizes = [1, 16, 28], strides = [1, 1, 1]} : vector<14x16x28xbf16> to vector<1x16x28xbf16>
    %43 = vector.shape_cast %42 : vector<1x16x28xbf16> to vector<16x28xbf16>
    %44 = vector.extract_strided_slice %1 {offsets = [7, 0, 0], sizes = [1, 16, 28], strides = [1, 1, 1]} : vector<14x16x28xbf16> to vector<1x16x28xbf16>
    %45 = vector.shape_cast %44 : vector<1x16x28xbf16> to vector<16x28xbf16>
    %46 = vector.extract_strided_slice %1 {offsets = [8, 0, 0], sizes = [1, 16, 28], strides = [1, 1, 1]} : vector<14x16x28xbf16> to vector<1x16x28xbf16>
    %47 = vector.shape_cast %46 : vector<1x16x28xbf16> to vector<16x28xbf16>
    %48 = vector.extract_strided_slice %1 {offsets = [9, 0, 0], sizes = [1, 16, 28], strides = [1, 1, 1]} : vector<14x16x28xbf16> to vector<1x16x28xbf16>
    %49 = vector.shape_cast %48 : vector<1x16x28xbf16> to vector<16x28xbf16>
    %50 = vector.extract_strided_slice %1 {offsets = [10, 0, 0], sizes = [1, 16, 28], strides = [1, 1, 1]} : vector<14x16x28xbf16> to vector<1x16x28xbf16>
    %51 = vector.shape_cast %50 : vector<1x16x28xbf16> to vector<16x28xbf16>
    %52 = vector.extract_strided_slice %1 {offsets = [11, 0, 0], sizes = [1, 16, 28], strides = [1, 1, 1]} : vector<14x16x28xbf16> to vector<1x16x28xbf16>
    %53 = vector.shape_cast %52 : vector<1x16x28xbf16> to vector<16x28xbf16>
    %54 = vector.extract_strided_slice %1 {offsets = [12, 0, 0], sizes = [1, 16, 28], strides = [1, 1, 1]} : vector<14x16x28xbf16> to vector<1x16x28xbf16>
    %55 = vector.shape_cast %54 : vector<1x16x28xbf16> to vector<16x28xbf16>
    %56 = vector.extract_strided_slice %1 {offsets = [13, 0, 0], sizes = [1, 16, 28], strides = [1, 1, 1]} : vector<14x16x28xbf16> to vector<1x16x28xbf16>
    %57 = vector.shape_cast %56 : vector<1x16x28xbf16> to vector<16x28xbf16>
    %58 = tpu.concatenate %3, %5, %7, %9, %11, %13, %15, %17, %19, %21, %23, %25, %27, %31, %33, %35 in 0 : vector<16x28xbf16>, vector<16x28xbf16>, vector<16x28xbf16>, vector<16x28xbf16>, vector<16x28xbf16>, vector<16x28xbf16>, vector<16x28xbf16>, vector<16x28xbf16>, vector<16x28xbf16>, vector<16x28xbf16>, vector<16x28xbf16>, vector<16x28xbf16>, vector<16x28xbf16>, vector<16x28xbf16>, vector<16x28xbf16>, vector<16x28xbf16> -> vector<256x28xbf16>
    %59 = tpu.concatenate %37, %39, %41, %43, %45, %47, %49, %51, %53, %55 in 0 : vector<16x28xbf16>, vector<16x28xbf16>, vector<16x28xbf16>, vector<16x28xbf16>, vector<16x28xbf16>, vector<16x28xbf16>, vector<16x28xbf16>, vector<16x28xbf16>, vector<16x28xbf16>, vector<16x28xbf16> -> vector<160x28xbf16>
    %60 = tpu.concatenate %58, %59 in 0 : vector<256x28xbf16>, vector<160x28xbf16> -> vector<416x28xbf16>
    %61 = tpu.concatenate %31, %33, %35, %37, %39, %41, %43, %45, %47, %49, %51, %53, %55, %5, %7, %9 in 0 : vector<16x28xbf16>, vector<16x28xbf16>, vector<16x28xbf16>, vector<16x28xbf16>, vector<16x28xbf16>, vector<16x28xbf16>, vector<16x28xbf16>, vector<16x28xbf16>, vector<16x28xbf16>, vector<16x28xbf16>, vector<16x28xbf16>, vector<16x28xbf16>, vector<16x28xbf16>, vector<16x28xbf16>, vector<16x28xbf16>, vector<16x28xbf16> -> vector<256x28xbf16>
    %62 = tpu.concatenate %11, %13, %15, %17, %19, %21, %23, %25, %27, %29 in 0 : vector<16x28xbf16>, vector<16x28xbf16>, vector<16x28xbf16>, vector<16x28xbf16>, vector<16x28xbf16>, vector<16x28xbf16>, vector<16x28xbf16>, vector<16x28xbf16>, vector<16x28xbf16>, vector<16x28xbf16> -> vector<160x28xbf16>
    %63 = tpu.concatenate %61, %62 in 0 : vector<256x28xbf16>, vector<160x28xbf16> -> vector<416x28xbf16>
    %64 = tpu.concatenate %5, %7, %9, %11, %13, %15, %17, %19, %21, %23, %25, %27, %29, %33, %35, %37 in 0 : vector<16x28xbf16>, vector<16x28xbf16>, vector<16x28xbf16>, vector<16x28xbf16>, vector<16x28xbf16>, vector<16x28xbf16>, vector<16x28xbf16>, vector<16x28xbf16>, vector<16x28xbf16>, vector<16x28xbf16>, vector<16x28xbf16>, vector<16x28xbf16>, vector<16x28xbf16>, vector<16x28xbf16>, vector<16x28xbf16>, vector<16x28xbf16> -> vector<256x28xbf16>
    %65 = tpu.concatenate %39, %41, %43, %45, %47, %49, %51, %53, %55, %57 in 0 : vector<16x28xbf16>, vector<16x28xbf16>, vector<16x28xbf16>, vector<16x28xbf16>, vector<16x28xbf16>, vector<16x28xbf16>, vector<16x28xbf16>, vector<16x28xbf16>, vector<16x28xbf16>, vector<16x28xbf16> -> vector<160x28xbf16>
    %66 = tpu.concatenate %64, %65 in 0 : vector<256x28xbf16>, vector<160x28xbf16> -> vector<416x28xbf16>
    %c0_5 = arith.constant 0 : index
    %c0_6 = arith.constant 0 : index
    %c0_7 = arith.constant 0 : index
    %67 = vector.load %arg3[%c0_5, %c0_6, %c0_7] : memref<3x28x416xbf16, #tpu.memory_space<vmem>>, vector<1x28x416xbf16>
    %68 = vector.shape_cast %67 : vector<1x28x416xbf16> to vector<28x416xbf16>
    %cst = arith.constant dense<0.000000e+00> : vector<416x416xf32>
    %69 = tpu.matmul %60, %68, %cst {dimension_numbers = #tpu.dot_dimension_numbers<[1], [0], [0], [1], [0, 0, 1, 1], [], []>} : vector<416x28xbf16>, vector<28x416xbf16>, vector<416x416xf32> -> vector<416x416xf32>
    %c1 = arith.constant 1 : index
    %c0_8 = arith.constant 0 : index
    %c0_9 = arith.constant 0 : index
    %70 = vector.load %arg3[%c1, %c0_8, %c0_9] : memref<3x28x416xbf16, #tpu.memory_space<vmem>>, vector<1x28x416xbf16>
    %71 = vector.shape_cast %70 : vector<1x28x416xbf16> to vector<28x416xbf16>
    %cst_10 = arith.constant dense<0.000000e+00> : vector<416x416xf32>
    %72 = tpu.matmul %63, %71, %cst_10 {dimension_numbers = #tpu.dot_dimension_numbers<[1], [0], [0], [1], [0, 0, 1, 1], [], []>} : vector<416x28xbf16>, vector<28x416xbf16>, vector<416x416xf32> -> vector<416x416xf32>
    %73 = arith.addf %69, %72 : vector<416x416xf32>
    %c2 = arith.constant 2 : index
    %c0_11 = arith.constant 0 : index
    %c0_12 = arith.constant 0 : index
    %74 = vector.load %arg3[%c2, %c0_11, %c0_12] : memref<3x28x416xbf16, #tpu.memory_space<vmem>>, vector<1x28x416xbf16>
    %75 = vector.shape_cast %74 : vector<1x28x416xbf16> to vector<28x416xbf16>
    %cst_13 = arith.constant dense<0.000000e+00> : vector<416x416xf32>
    %76 = tpu.matmul %66, %75, %cst_13 {dimension_numbers = #tpu.dot_dimension_numbers<[1], [0], [0], [1], [0, 0, 1, 1], [], []>} : vector<416x28xbf16>, vector<28x416xbf16>, vector<416x416xf32> -> vector<416x416xf32>
    %77 = arith.addf %73, %76 : vector<416x416xf32>
    %c0_14 = arith.constant 0 : index
    %c0_15 = arith.constant 0 : index
    %78 = vector.load %arg4[%c0_14, %c0_15] : memref<3x416xf32, #tpu.memory_space<vmem>>, vector<1x416xf32>
    %79 = vector.broadcast %78 : vector<1x416xf32> to vector<416x416xf32>
    %80 = arith.addf %77, %79 : vector<416x416xf32>
    %cst_16 = arith.constant 0.000000e+00 : f32
    %81 = vector.broadcast %cst_16 : f32 to vector<416x416xf32>
    %82 = arith.maximumf %80, %81 : vector<416x416xf32>
    %c1_17 = arith.constant 1 : index
    %c0_18 = arith.constant 0 : index
    %83 = vector.load %arg4[%c1_17, %c0_18] : memref<3x416xf32, #tpu.memory_space<vmem>>, vector<1x416xf32>
    %84 = vector.broadcast %83 : vector<1x416xf32> to vector<416x416xf32>
    %85 = arith.mulf %82, %84 : vector<416x416xf32>
    %c2_19 = arith.constant 2 : index
    %c0_20 = arith.constant 0 : index
    %86 = vector.load %arg4[%c2_19, %c0_20] : memref<3x416xf32, #tpu.memory_space<vmem>>, vector<1x416xf32>
    %87 = vector.broadcast %86 : vector<1x416xf32> to vector<416x416xf32>
    %88 = arith.addf %85, %87 : vector<416x416xf32>
    %89 = vector.extract_strided_slice %88 {offsets = [0, 0], sizes = [208, 416], strides = [1, 1]} : vector<416x416xf32> to vector<208x416xf32>
    %90 = vector.extract_strided_slice %88 {offsets = [208, 0], sizes = [208, 416], strides = [1, 1]} : vector<416x416xf32> to vector<208x416xf32>
    %91 = vector.extract_strided_slice %89 {offsets = [0, 0], sizes = [208, 208], strides = [1, 1]} : vector<208x416xf32> to vector<208x208xf32>
    %92 = vector.extract_strided_slice %89 {offsets = [0, 208], sizes = [208, 208], strides = [1, 1]} : vector<208x416xf32> to vector<208x208xf32>
    %93 = arith.maximumf %91, %92 : vector<208x208xf32>
    %94 = vector.extract_strided_slice %90 {offsets = [0, 0], sizes = [208, 208], strides = [1, 1]} : vector<208x416xf32> to vector<208x208xf32>
    %95 = vector.extract_strided_slice %90 {offsets = [0, 208], sizes = [208, 208], strides = [1, 1]} : vector<208x416xf32> to vector<208x208xf32>
    %96 = arith.maximumf %94, %95 : vector<208x208xf32>
    %97 = arith.maximumf %93, %96 : vector<208x208xf32>
    %98 = arith.truncf %97 : vector<208x208xf32> to vector<208x208xbf16>
    %99 = vector.extract_strided_slice %98 {offsets = [0, 0], sizes = [16, 208], strides = [1, 1]} : vector<208x208xbf16> to vector<16x208xbf16>
    %100 = vector.extract_strided_slice %98 {offsets = [32, 0], sizes = [16, 208], strides = [1, 1]} : vector<208x208xbf16> to vector<16x208xbf16>
    %101 = vector.extract_strided_slice %98 {offsets = [64, 0], sizes = [16, 208], strides = [1, 1]} : vector<208x208xbf16> to vector<16x208xbf16>
    %102 = vector.extract_strided_slice %98 {offsets = [96, 0], sizes = [16, 208], strides = [1, 1]} : vector<208x208xbf16> to vector<16x208xbf16>
    %103 = vector.extract_strided_slice %98 {offsets = [128, 0], sizes = [16, 208], strides = [1, 1]} : vector<208x208xbf16> to vector<16x208xbf16>
    %104 = vector.extract_strided_slice %98 {offsets = [16, 0], sizes = [16, 208], strides = [1, 1]} : vector<208x208xbf16> to vector<16x208xbf16>
    %105 = vector.extract_strided_slice %98 {offsets = [48, 0], sizes = [16, 208], strides = [1, 1]} : vector<208x208xbf16> to vector<16x208xbf16>
    %106 = vector.extract_strided_slice %98 {offsets = [80, 0], sizes = [16, 208], strides = [1, 1]} : vector<208x208xbf16> to vector<16x208xbf16>
    %107 = vector.extract_strided_slice %98 {offsets = [112, 0], sizes = [16, 208], strides = [1, 1]} : vector<208x208xbf16> to vector<16x208xbf16>
    %108 = vector.extract_strided_slice %98 {offsets = [144, 0], sizes = [16, 208], strides = [1, 1]} : vector<208x208xbf16> to vector<16x208xbf16>
    %109 = tpu.concatenate %99, %100, %101, %102, %103, %104, %105, %106, %107, %108 in 0 : vector<16x208xbf16>, vector<16x208xbf16>, vector<16x208xbf16>, vector<16x208xbf16>, vector<16x208xbf16>, vector<16x208xbf16>, vector<16x208xbf16>, vector<16x208xbf16>, vector<16x208xbf16>, vector<16x208xbf16> -> vector<160x208xbf16>
    %110 = vector.extract_strided_slice %98 {offsets = [16, 0], sizes = [16, 208], strides = [1, 1]} : vector<208x208xbf16> to vector<16x208xbf16>
    %111 = vector.extract_strided_slice %98 {offsets = [48, 0], sizes = [16, 208], strides = [1, 1]} : vector<208x208xbf16> to vector<16x208xbf16>
    %112 = vector.extract_strided_slice %98 {offsets = [80, 0], sizes = [16, 208], strides = [1, 1]} : vector<208x208xbf16> to vector<16x208xbf16>
    %113 = vector.extract_strided_slice %98 {offsets = [112, 0], sizes = [16, 208], strides = [1, 1]} : vector<208x208xbf16> to vector<16x208xbf16>
    %114 = vector.extract_strided_slice %98 {offsets = [144, 0], sizes = [16, 208], strides = [1, 1]} : vector<208x208xbf16> to vector<16x208xbf16>
    %115 = vector.extract_strided_slice %98 {offsets = [32, 0], sizes = [16, 208], strides = [1, 1]} : vector<208x208xbf16> to vector<16x208xbf16>
    %116 = vector.extract_strided_slice %98 {offsets = [64, 0], sizes = [16, 208], strides = [1, 1]} : vector<208x208xbf16> to vector<16x208xbf16>
    %117 = vector.extract_strided_slice %98 {offsets = [96, 0], sizes = [16, 208], strides = [1, 1]} : vector<208x208xbf16> to vector<16x208xbf16>
    %118 = vector.extract_strided_slice %98 {offsets = [128, 0], sizes = [16, 208], strides = [1, 1]} : vector<208x208xbf16> to vector<16x208xbf16>
    %119 = vector.extract_strided_slice %98 {offsets = [160, 0], sizes = [16, 208], strides = [1, 1]} : vector<208x208xbf16> to vector<16x208xbf16>
    %120 = tpu.concatenate %110, %111, %112, %113, %114, %115, %116, %117, %118, %119 in 0 : vector<16x208xbf16>, vector<16x208xbf16>, vector<16x208xbf16>, vector<16x208xbf16>, vector<16x208xbf16>, vector<16x208xbf16>, vector<16x208xbf16>, vector<16x208xbf16>, vector<16x208xbf16>, vector<16x208xbf16> -> vector<160x208xbf16>
    %121 = vector.extract_strided_slice %98 {offsets = [32, 0], sizes = [16, 208], strides = [1, 1]} : vector<208x208xbf16> to vector<16x208xbf16>
    %122 = vector.extract_strided_slice %98 {offsets = [64, 0], sizes = [16, 208], strides = [1, 1]} : vector<208x208xbf16> to vector<16x208xbf16>
    %123 = vector.extract_strided_slice %98 {offsets = [96, 0], sizes = [16, 208], strides = [1, 1]} : vector<208x208xbf16> to vector<16x208xbf16>
    %124 = vector.extract_strided_slice %98 {offsets = [128, 0], sizes = [16, 208], strides = [1, 1]} : vector<208x208xbf16> to vector<16x208xbf16>
    %125 = vector.extract_strided_slice %98 {offsets = [160, 0], sizes = [16, 208], strides = [1, 1]} : vector<208x208xbf16> to vector<16x208xbf16>
    %126 = vector.extract_strided_slice %98 {offsets = [48, 0], sizes = [16, 208], strides = [1, 1]} : vector<208x208xbf16> to vector<16x208xbf16>
    %127 = vector.extract_strided_slice %98 {offsets = [80, 0], sizes = [16, 208], strides = [1, 1]} : vector<208x208xbf16> to vector<16x208xbf16>
    %128 = vector.extract_strided_slice %98 {offsets = [112, 0], sizes = [16, 208], strides = [1, 1]} : vector<208x208xbf16> to vector<16x208xbf16>
    %129 = vector.extract_strided_slice %98 {offsets = [144, 0], sizes = [16, 208], strides = [1, 1]} : vector<208x208xbf16> to vector<16x208xbf16>
    %130 = vector.extract_strided_slice %98 {offsets = [176, 0], sizes = [16, 208], strides = [1, 1]} : vector<208x208xbf16> to vector<16x208xbf16>
    %131 = tpu.concatenate %121, %122, %123, %124, %125, %126, %127, %128, %129, %130 in 0 : vector<16x208xbf16>, vector<16x208xbf16>, vector<16x208xbf16>, vector<16x208xbf16>, vector<16x208xbf16>, vector<16x208xbf16>, vector<16x208xbf16>, vector<16x208xbf16>, vector<16x208xbf16>, vector<16x208xbf16> -> vector<160x208xbf16>
    %c0_21 = arith.constant 0 : index
    %c0_22 = arith.constant 0 : index
    %c0_23 = arith.constant 0 : index
    %132 = vector.load %arg5[%c0_21, %c0_22, %c0_23] : memref<3x208x320xbf16, #tpu.memory_space<vmem>>, vector<1x208x320xbf16>
    %133 = vector.shape_cast %132 : vector<1x208x320xbf16> to vector<208x320xbf16>
    %cst_24 = arith.constant dense<0.000000e+00> : vector<160x320xf32>
    %134 = tpu.matmul %109, %133, %cst_24 {dimension_numbers = #tpu.dot_dimension_numbers<[1], [0], [0], [1], [0, 0, 1, 1], [], []>} : vector<160x208xbf16>, vector<208x320xbf16>, vector<160x320xf32> -> vector<160x320xf32>
    %c1_25 = arith.constant 1 : index
    %c0_26 = arith.constant 0 : index
    %c0_27 = arith.constant 0 : index
    %135 = vector.load %arg5[%c1_25, %c0_26, %c0_27] : memref<3x208x320xbf16, #tpu.memory_space<vmem>>, vector<1x208x320xbf16>
    %136 = vector.shape_cast %135 : vector<1x208x320xbf16> to vector<208x320xbf16>
    %cst_28 = arith.constant dense<0.000000e+00> : vector<160x320xf32>
    %137 = tpu.matmul %120, %136, %cst_28 {dimension_numbers = #tpu.dot_dimension_numbers<[1], [0], [0], [1], [0, 0, 1, 1], [], []>} : vector<160x208xbf16>, vector<208x320xbf16>, vector<160x320xf32> -> vector<160x320xf32>
    %138 = arith.addf %134, %137 : vector<160x320xf32>
    %c2_29 = arith.constant 2 : index
    %c0_30 = arith.constant 0 : index
    %c0_31 = arith.constant 0 : index
    %139 = vector.load %arg5[%c2_29, %c0_30, %c0_31] : memref<3x208x320xbf16, #tpu.memory_space<vmem>>, vector<1x208x320xbf16>
    %140 = vector.shape_cast %139 : vector<1x208x320xbf16> to vector<208x320xbf16>
    %cst_32 = arith.constant dense<0.000000e+00> : vector<160x320xf32>
    %141 = tpu.matmul %131, %140, %cst_32 {dimension_numbers = #tpu.dot_dimension_numbers<[1], [0], [0], [1], [0, 0, 1, 1], [], []>} : vector<160x208xbf16>, vector<208x320xbf16>, vector<160x320xf32> -> vector<160x320xf32>
    %142 = arith.addf %138, %141 : vector<160x320xf32>
    %c0_33 = arith.constant 0 : index
    %c0_34 = arith.constant 0 : index
    %143 = vector.load %arg6[%c0_33, %c0_34] : memref<3x320xf32, #tpu.memory_space<vmem>>, vector<1x320xf32>
    %144 = vector.broadcast %143 : vector<1x320xf32> to vector<160x320xf32>
    %145 = arith.addf %142, %144 : vector<160x320xf32>
    %cst_35 = arith.constant 0.000000e+00 : f32
    %146 = vector.broadcast %cst_35 : f32 to vector<160x320xf32>
    %147 = arith.maximumf %145, %146 : vector<160x320xf32>
    %c1_36 = arith.constant 1 : index
    %c0_37 = arith.constant 0 : index
    %148 = vector.load %arg6[%c1_36, %c0_37] : memref<3x320xf32, #tpu.memory_space<vmem>>, vector<1x320xf32>
    %149 = vector.broadcast %148 : vector<1x320xf32> to vector<160x320xf32>
    %150 = arith.mulf %147, %149 : vector<160x320xf32>
    %c2_38 = arith.constant 2 : index
    %c0_39 = arith.constant 0 : index
    %151 = vector.load %arg6[%c2_38, %c0_39] : memref<3x320xf32, #tpu.memory_space<vmem>>, vector<1x320xf32>
    %152 = vector.broadcast %151 : vector<1x320xf32> to vector<160x320xf32>
    %153 = arith.addf %150, %152 : vector<160x320xf32>
    %154 = vector.extract_strided_slice %153 {offsets = [0, 0], sizes = [80, 320], strides = [1, 1]} : vector<160x320xf32> to vector<80x320xf32>
    %155 = vector.extract_strided_slice %153 {offsets = [80, 0], sizes = [80, 320], strides = [1, 1]} : vector<160x320xf32> to vector<80x320xf32>
    %156 = vector.extract_strided_slice %154 {offsets = [0, 0], sizes = [80, 160], strides = [1, 1]} : vector<80x320xf32> to vector<80x160xf32>
    %157 = vector.extract_strided_slice %154 {offsets = [0, 160], sizes = [80, 160], strides = [1, 1]} : vector<80x320xf32> to vector<80x160xf32>
    %158 = arith.maximumf %156, %157 : vector<80x160xf32>
    %159 = vector.extract_strided_slice %155 {offsets = [0, 0], sizes = [80, 160], strides = [1, 1]} : vector<80x320xf32> to vector<80x160xf32>
    %160 = vector.extract_strided_slice %155 {offsets = [0, 160], sizes = [80, 160], strides = [1, 1]} : vector<80x320xf32> to vector<80x160xf32>
    %161 = arith.maximumf %159, %160 : vector<80x160xf32>
    %162 = arith.maximumf %158, %161 : vector<80x160xf32>
    %163 = arith.truncf %162 : vector<80x160xf32> to vector<80x160xbf16>
    %164 = vector.extract_strided_slice %163 {offsets = [0, 0], sizes = [16, 160], strides = [1, 1]} : vector<80x160xbf16> to vector<16x160xbf16>
    %c0_40 = arith.constant 0 : index
    %c0_41 = arith.constant 0 : index
    %c0_42 = arith.constant 0 : index
    %165 = vector.load %arg7[%c0_40, %c0_41, %c0_42] : memref<5x160x400xbf16, #tpu.memory_space<vmem>>, vector<1x160x400xbf16>
    %166 = vector.shape_cast %165 : vector<1x160x400xbf16> to vector<160x400xbf16>
    %cst_43 = arith.constant dense<0.000000e+00> : vector<16x400xf32>
    %167 = tpu.matmul %164, %166, %cst_43 {dimension_numbers = #tpu.dot_dimension_numbers<[1], [0], [0], [1], [0, 0, 1, 1], [], []>} : vector<16x160xbf16>, vector<160x400xbf16>, vector<16x400xf32> -> vector<16x400xf32>
    %168 = vector.extract_strided_slice %163 {offsets = [16, 0], sizes = [16, 160], strides = [1, 1]} : vector<80x160xbf16> to vector<16x160xbf16>
    %c1_44 = arith.constant 1 : index
    %c0_45 = arith.constant 0 : index
    %c0_46 = arith.constant 0 : index
    %169 = vector.load %arg7[%c1_44, %c0_45, %c0_46] : memref<5x160x400xbf16, #tpu.memory_space<vmem>>, vector<1x160x400xbf16>
    %170 = vector.shape_cast %169 : vector<1x160x400xbf16> to vector<160x400xbf16>
    %cst_47 = arith.constant dense<0.000000e+00> : vector<16x400xf32>
    %171 = tpu.matmul %168, %170, %cst_47 {dimension_numbers = #tpu.dot_dimension_numbers<[1], [0], [0], [1], [0, 0, 1, 1], [], []>} : vector<16x160xbf16>, vector<160x400xbf16>, vector<16x400xf32> -> vector<16x400xf32>
    %172 = arith.addf %167, %171 : vector<16x400xf32>
    %173 = vector.extract_strided_slice %163 {offsets = [32, 0], sizes = [16, 160], strides = [1, 1]} : vector<80x160xbf16> to vector<16x160xbf16>
    %c2_48 = arith.constant 2 : index
    %c0_49 = arith.constant 0 : index
    %c0_50 = arith.constant 0 : index
    %174 = vector.load %arg7[%c2_48, %c0_49, %c0_50] : memref<5x160x400xbf16, #tpu.memory_space<vmem>>, vector<1x160x400xbf16>
    %175 = vector.shape_cast %174 : vector<1x160x400xbf16> to vector<160x400xbf16>
    %cst_51 = arith.constant dense<0.000000e+00> : vector<16x400xf32>
    %176 = tpu.matmul %173, %175, %cst_51 {dimension_numbers = #tpu.dot_dimension_numbers<[1], [0], [0], [1], [0, 0, 1, 1], [], []>} : vector<16x160xbf16>, vector<160x400xbf16>, vector<16x400xf32> -> vector<16x400xf32>
    %177 = arith.addf %172, %176 : vector<16x400xf32>
    %178 = vector.extract_strided_slice %163 {offsets = [48, 0], sizes = [16, 160], strides = [1, 1]} : vector<80x160xbf16> to vector<16x160xbf16>
    %c3 = arith.constant 3 : index
    %c0_52 = arith.constant 0 : index
    %c0_53 = arith.constant 0 : index
    %179 = vector.load %arg7[%c3, %c0_52, %c0_53] : memref<5x160x400xbf16, #tpu.memory_space<vmem>>, vector<1x160x400xbf16>
    %180 = vector.shape_cast %179 : vector<1x160x400xbf16> to vector<160x400xbf16>
    %cst_54 = arith.constant dense<0.000000e+00> : vector<16x400xf32>
    %181 = tpu.matmul %178, %180, %cst_54 {dimension_numbers = #tpu.dot_dimension_numbers<[1], [0], [0], [1], [0, 0, 1, 1], [], []>} : vector<16x160xbf16>, vector<160x400xbf16>, vector<16x400xf32> -> vector<16x400xf32>
    %182 = arith.addf %177, %181 : vector<16x400xf32>
    %183 = vector.extract_strided_slice %163 {offsets = [64, 0], sizes = [16, 160], strides = [1, 1]} : vector<80x160xbf16> to vector<16x160xbf16>
    %c4 = arith.constant 4 : index
    %c0_55 = arith.constant 0 : index
    %c0_56 = arith.constant 0 : index
    %184 = vector.load %arg7[%c4, %c0_55, %c0_56] : memref<5x160x400xbf16, #tpu.memory_space<vmem>>, vector<1x160x400xbf16>
    %185 = vector.shape_cast %184 : vector<1x160x400xbf16> to vector<160x400xbf16>
    %cst_57 = arith.constant dense<0.000000e+00> : vector<16x400xf32>
    %186 = tpu.matmul %183, %185, %cst_57 {dimension_numbers = #tpu.dot_dimension_numbers<[1], [0], [0], [1], [0, 0, 1, 1], [], []>} : vector<16x160xbf16>, vector<160x400xbf16>, vector<16x400xf32> -> vector<16x400xf32>
    %187 = arith.addf %182, %186 : vector<16x400xf32>
    %c0_58 = arith.constant 0 : index
    %c0_59 = arith.constant 0 : index
    %188 = vector.load %arg8[%c0_58, %c0_59] : memref<3x400xf32, #tpu.memory_space<vmem>>, vector<1x400xf32>
    %189 = vector.broadcast %188 : vector<1x400xf32> to vector<16x400xf32>
    %190 = arith.addf %187, %189 : vector<16x400xf32>
    %cst_60 = arith.constant 0.000000e+00 : f32
    %191 = vector.broadcast %cst_60 : f32 to vector<16x400xf32>
    %192 = arith.maximumf %190, %191 : vector<16x400xf32>
    %c1_61 = arith.constant 1 : index
    %c0_62 = arith.constant 0 : index
    %193 = vector.load %arg8[%c1_61, %c0_62] : memref<3x400xf32, #tpu.memory_space<vmem>>, vector<1x400xf32>
    %194 = vector.broadcast %193 : vector<1x400xf32> to vector<16x400xf32>
    %195 = arith.mulf %192, %194 : vector<16x400xf32>
    %c2_63 = arith.constant 2 : index
    %c0_64 = arith.constant 0 : index
    %196 = vector.load %arg8[%c2_63, %c0_64] : memref<3x400xf32, #tpu.memory_space<vmem>>, vector<1x400xf32>
    %197 = vector.broadcast %196 : vector<1x400xf32> to vector<16x400xf32>
    %198 = arith.addf %195, %197 : vector<16x400xf32>
    %199 = arith.truncf %198 : vector<16x400xf32> to vector<16x400xbf16>
    %c0_65 = arith.constant 0 : index
    %c0_66 = arith.constant 0 : index
    %200 = vector.load %arg9[%c0_65, %c0_66] : memref<400x10xbf16, #tpu.memory_space<vmem>>, vector<400x10xbf16>
    %cst_67 = arith.constant dense<0.000000e+00> : vector<16x10xf32>
    %201 = tpu.matmul %199, %200, %cst_67 {dimension_numbers = #tpu.dot_dimension_numbers<[1], [0], [0], [1], [0, 0, 1, 1], [], []>} : vector<16x400xbf16>, vector<400x10xbf16>, vector<16x10xf32> -> vector<16x10xf32>
    %c0_68 = arith.constant 0 : index
    %c0_69 = arith.constant 0 : index
    %202 = vector.load %arg10[%c0_68, %c0_69] : memref<1x10xf32, #tpu.memory_space<vmem>>, vector<1x10xf32>
    %203 = vector.broadcast %202 : vector<1x10xf32> to vector<16x10xf32>
    %204 = arith.addf %201, %203 : vector<16x10xf32>
    %cst_70 = arith.constant dense<0xFF800000> : vector<16xf32>
    %205 = vector.multi_reduction <maximumf>, %204, %cst_70 [1] : vector<16x10xf32> to vector<16xf32>
    %206 = vector.shape_cast %205 : vector<16xf32> to vector<16x1xf32>
    %207 = vector.broadcast %206 : vector<16x1xf32> to vector<16x10xf32>
    %208 = arith.subf %204, %207 : vector<16x10xf32>
    %209 = math.exp %208 : vector<16x10xf32>
    %cst_71 = arith.constant dense<0.000000e+00> : vector<16xf32>
    %210 = vector.multi_reduction <add>, %209, %cst_71 [1] : vector<16x10xf32> to vector<16xf32>
    %211 = vector.shape_cast %210 : vector<16xf32> to vector<16x1xf32>
    %212 = math.log %211 : vector<16x1xf32>
    %213 = vector.broadcast %212 : vector<16x1xf32> to vector<16x10xf32>
    %214 = arith.subf %208, %213 : vector<16x10xf32>
    %c0_72 = arith.constant 0 : index
    %c0_73 = arith.constant 0 : index
    %215 = vector.load %arg11[%c0_72, %c0_73] : memref<16x10xf32, #tpu.memory_space<vmem>>, vector<16x10xf32>
    tpu.vector_store %arg11[%c0_72, %c0_73], %214 {strides = array<i32>} : memref<16x10xf32, #tpu.memory_space<vmem>>, vector<16x10xf32>,
    return
  }
  func.func @transform_0(%arg0: i32) -> (i32, i32, i32) {
    %c0_i32 = arith.constant 0 : i32
    %c0_i32_0 = arith.constant 0 : i32
    %c0_i32_1 = arith.constant 0 : i32
    return %c0_i32, %arg0, %c0_i32_0 : i32, i32, i32
  }
  func.func @transform_1(%arg0: i32) -> (i32, i32, i32) {
    %c0_i32 = arith.constant 0 : i32
    %c0_i32_0 = arith.constant 0 : i32
    %c0_i32_1 = arith.constant 0 : i32
    return %c0_i32, %arg0, %c0_i32_0 : i32, i32, i32
  }
  func.func @transform_2(%arg0: i32) -> (i32, i32, i32) {
    %c0_i32 = arith.constant 0 : i32
    %c0_i32_0 = arith.constant 0 : i32
    %c0_i32_1 = arith.constant 0 : i32
    %c0_i32_2 = arith.constant 0 : i32
    return %c0_i32, %c0_i32_0, %c0_i32_1 : i32, i32, i32
  }
  func.func @transform_3(%arg0: i32) -> (i32, i32) {
    %c0_i32 = arith.constant 0 : i32
    %c0_i32_0 = arith.constant 0 : i32
    %c0_i32_1 = arith.constant 0 : i32
    return %c0_i32, %c0_i32_0 : i32, i32
  }
  func.func @transform_4(%arg0: i32) -> (i32, i32, i32) {
    %c0_i32 = arith.constant 0 : i32
    %c0_i32_0 = arith.constant 0 : i32
    %c0_i32_1 = arith.constant 0 : i32
    %c0_i32_2 = arith.constant 0 : i32
    return %c0_i32, %c0_i32_0, %c0_i32_1 : i32, i32, i32
  }
  func.func @transform_5(%arg0: i32) -> (i32, i32) {
    %c0_i32 = arith.constant 0 : i32
    %c0_i32_0 = arith.constant 0 : i32
    %c0_i32_1 = arith.constant 0 : i32
    return %c0_i32, %c0_i32_0 : i32, i32
  }
  func.func @transform_6(%arg0: i32) -> (i32, i32, i32) {
    %c0_i32 = arith.constant 0 : i32
    %c0_i32_0 = arith.constant 0 : i32
    %c0_i32_1 = arith.constant 0 : i32
    %c0_i32_2 = arith.constant 0 : i32
    return %c0_i32, %c0_i32_0, %c0_i32_1 : i32, i32, i32
  }
  func.func @transform_7(%arg0: i32) -> (i32, i32) {
    %c0_i32 = arith.constant 0 : i32
    %c0_i32_0 = arith.constant 0 : i32
    %c0_i32_1 = arith.constant 0 : i32
    return %c0_i32, %c0_i32_0 : i32, i32
  }
  func.func @transform_8(%arg0: i32) -> (i32, i32) {
    %c0_i32 = arith.constant 0 : i32
    %c0_i32_0 = arith.constant 0 : i32
    %c0_i32_1 = arith.constant 0 : i32
    return %c0_i32, %c0_i32_0 : i32, i32
  }
  func.func @transform_9(%arg0: i32) -> (i32, i32) {
    %c0_i32 = arith.constant 0 : i32
    %c0_i32_0 = arith.constant 0 : i32
    %c0_i32_1 = arith.constant 0 : i32
    return %c0_i32, %c0_i32_0 : i32, i32
  }
  func.func @transform_10(%arg0: i32) -> (i32, i32) {
    %c0_i32 = arith.constant 0 : i32
    %c0_i32_0 = arith.constant 0 : i32
    return %arg0, %c0_i32 : i32, i32
  }
}

</mosaic_0001>

<bundles_post_ra>
// kernel: net_forward.1
= control target key start
LH: loop header
LB: loop body
LE: loop exit
PB: predicated region body
PF: predicated region fallthrough
CT: control target
= control target key end

     0   :  { %15 = vsyncpa [#allocation3], 0  ;;  %s16740_s0 = inlined_call_operand.vmem [shape: bf16[14,16,28], index: 0, kind: input, shape index: {}]   ;;  %s16741_s1 = inlined_call_operand.vmem [shape: bf16[14,16,28], index: 1, kind: input, shape index: {}]   ;;  %s16742_s2 = inlined_call_operand.hbm [shape: bf16[3,28,416], index: 2, kind: input, shape index: {}]   ;;  %s16743_s3 = inlined_call_operand.vmem [shape: f32[3,416], index: 3, kind: input, shape index: {}]   ;;  %s16744_s4 = inlined_call_operand.vmem [shape: bf16[3,208,320], index: 4, kind: input, shape index: {}]   ;;  %s16745_s5 = inlined_call_operand.vmem [shape: f32[3,320], index: 5, kind: input, shape index: {}]   ;;  %s16746_s6 = inlined_call_operand.hbm [shape: bf16[5,160,400], index: 6, kind: input, shape index: {}]   ;;  %s16747_s7 = inlined_call_operand.vmem [shape: f32[3,400], index: 7, kind: input, shape index: {}]   ;;  %s16748_s8 = inlined_call_operand.vmem [shape: bf16[400,10], index: 8, kind: input, shape index: {}]   ;;  %s16749_s9 = inlined_call_operand.vmem [shape: f32[1,10], index: 9, kind: input, shape index: {}]   ;;  %s16750_s10 = inlined_call_operand.vmem [shape: f32[16,10], index: 10, kind: output, shape index: {}]  }
   0x1   :  { %16 = vsyncpa [#allocation5], 0  ;;  %s10156_s13 = smov [#allocation2]  }
   0x2   :  { %s26_s14 = sshll.u32 %s10156_s13, 4  ;;  %s27_s14 = int_to_ptr.vmem [resolvable:$true] %s26_s14 }
   0x3   :  { %s10120_s15 = scalar_lea.vmem %s27_s14, 3072  ;;  %p10125_p1 = scmp.lt.s32.totalorder %s27_s14, %s27_s14 }
   0x4   :  { %p10121_p0 = scmp.ne.s32.totalorder %s27_s14, %s10120_s15  ;;  %p10126_p2 = scmp.lt.s32.totalorder %s10120_s15, %s10120_s15 }
   0x6   :  { %p10127_p3 = por %p10126_p2, %p10125_p1 }
   0x8   :  { %p10128_p4 = pnand %p10127_p3, %p10121_p0 }
   0xa   :  { %10131 = shalt.err (!%p10128_p4)
}
   0xb   :  { %s10157_s16 = smov 256   ;;  %s10158_s17 = smov 16  }
   0xc   :  { %32 = dma.hbm_to_vmem [thread:$0]  %s16742_s2, 3072, %s27_s14, [#allocation3], %s10157_s16, %s10157_s16, %s10158_s17  }
   0xd   :  { %s10159_s20 = smov [#allocation4]  }
   0xe   :  { %s44_s21 = sshll.u32 %s10159_s20, 4  ;;  %s45_s21 = int_to_ptr.vmem [resolvable:$true] %s44_s21 }
   0xf   :  { %s10140_s22 = scalar_lea.vmem %s45_s21, 25600  ;;  %p10145_p6 = scmp.lt.s32.totalorder %s45_s21, %s45_s21 }
  0x10   :  { %p10141_p5 = scmp.ne.s32.totalorder %s45_s21, %s10140_s22  ;;  %p10146_p7 = scmp.lt.s32.totalorder %s10140_s22, %s10140_s22 }
  0x12   :  { %p10147_p8 = por %p10146_p7, %p10145_p6 }
  0x14   :  { %p10148_p9 = pnand %p10147_p8, %p10141_p5 }
  0x16   :  { %10151 = shalt.err (!%p10148_p9)
}
  0x17   :  { %50 = dma.hbm_to_vmem [thread:$0]  %s16746_s6, 25600, %s45_s21, [#allocation5], %s10157_s16, %s10157_s16, %s10158_s17  }
  0x18   :  { %10152 = dma.done.wait [#allocation3], 3072  }
  0x19   :  { %10153 = vsyncadd [#allocation3], 4294964224 }
  0x1a   :  { %10154 = dma.done.wait [#allocation5], 25600  }
  0x1b   :  { %10155 = vsyncadd [#allocation5], 4294941696  ;;  %v16751_v0 = vmov 0   ;;  %vm392_vm0 = vcmask 1045504   ;;  %v9545_v5 = vld [vmem:[#allocation2 + $0x44] ss:$16 sps:$4 sm:$0xff]  }
  0x1c   :  { %437 = vmatprep.mubr.bf16.mxu0 %v16751_v0  ;;  %722 = vmatprep.mubr.bf16.mxu1 %v16751_v0  ;;  %v9539_v1 = vld [vmem:[#allocation2 + $0x64] ss:$16 sps:$4 sm:$0x3f]   ;;  %v9541_v2 = vld [vmem:[#allocation2 + $0x6c] ss:$16 sps:$4 sm:$0x3f]  }
  0x1d   :  { %8348 = vmatprep.subr.msk.bf16.mxu0 %vm392_vm0, %v9539_v1  ;;  %v9543_v3 = vld [vmem:[#allocation2 + $0x60] ss:$16 sps:$4 sm:$0x3f]   ;;  %v9544_v4 = vld [vmem:[#allocation2 + $0x68] ss:$16 sps:$4 sm:$0x3f]   ;;  %8375 = vmatprep.subr.msk.bf16.mxu1 %vm392_vm0, %v9541_v2 }
  0x1e   :  { %v394_v6 = vsel %vm392_vm0, %v9543_v3, 0  ;;  %v400_v7 = vsel %vm392_vm0, %v9544_v4, 0  ;;  %v9547_v8 = vld [vmem:[#allocation2 + $0x4c] ss:$16 sps:$4 sm:$0xff]   ;;  %v9549_v9 = vld [vmem:[#allocation2 + $0x40] ss:$16 sps:$4 sm:$0xff]  }
  0x1f   :  { %418 = vmatpush1.bf16.msra.mxu0 %v394_v6  ;;  %703 = vmatpush1.bf16.msra.mxu1 %v400_v7  ;;  %v9550_v10 = vld [vmem:[#allocation2 + $0x48] ss:$16 sps:$4 sm:$0xff]   ;;  %vm313_vm1 = vcmask 228352   ;;  %v9552_v11 = vld [vmem:[#allocation2 + $0x2c] ss:$16 sps:$4 sm:$0x3f]  }
  0x20   :  { %419 = vmatprep.subr.bf16.mxu0 %v9545_v5  ;;  %704 = vmatprep.subr.bf16.mxu1 %v9547_v8  ;;  %v9551_v12 = vld [vmem:[%s16741_s1] sm:$0xff]   ;;  %v9555_v14 = vld [vmem:[#allocation2 + $0x24] ss:$16 sps:$4 sm:$0x3f]   ;;  %v9559_v21 = vld [vmem:[%s16741_s1 + $0x10] sm:$0xff]   ;;  %s10161_s14 = smov 48  }
  0x21   :  { %v9554_v13 = vld [vmem:[#allocation2 + $0x28] ss:$16 sps:$4 sm:$0x3f]   ;;  %v9557_v15 = vld [vmem:[#allocation2 + $0x20] ss:$16 sps:$4 sm:$0x3f]  }
  0x22   :  { %v1021_v16 = vsel %vm392_vm0, %v9554_v13, 0  ;;  %v1015_v17 = vsel %vm392_vm0, %v9557_v15, 0  ;;  %v9558_v18 = vld [vmem:[%s16741_s1 + $0x8] sm:$0xff]   ;;  %v9571_v19 = vld [vmem:[#allocation2 + $0x8] ss:$16 sps:$4 sm:$0xff]   ;;  %v9560_v24 = vld [vmem:[%s16741_s1 + $0x18] sm:$0xff]  }
  0x23   :  { %420 = vmatpush1.bf16.msra.mxu0 %v9549_v9  ;;  %705 = vmatpush1.bf16.msra.mxu1 %v9550_v10  ;;  %v9573_v20 = vld [vmem:[#allocation2 + $0xc] ss:$16 sps:$4 sm:$0xff]   ;;  %v9576_v22 = vld [vmem:[#allocation2 + $0x4] ss:$16 sps:$4 sm:$0xff]   ;;  %v9574_v23 = vld [vmem:[#allocation2] ss:$16 sps:$4 sm:$0xff]  }
  0x24   :  { %8437 = vmatprep.subr.msk.bf16.mxu1 %vm392_vm0, %v9552_v11  ;;  %8410 = vmatprep.subr.msk.bf16.mxu0 %vm392_vm0, %v9555_v14  ;;  %v9561_v25 = vld [vmem:[%s16741_s1 + $0x20] sm:$0xff]   ;;  %v9562_v26 = vld [vmem:[%s16741_s1 + $0x28] sm:$0xff]   ;;  %v9563_v27 = vld [vmem:[%s16741_s1 + $0x30] sm:$0xff]   ;;  %vm3470_vm2 = vcmask 392192   ;;  %vm4360_vm3 = vcmask 654336   ;;  %vm6017_vm4 = vcmask 785408  }
  0x25   :  { %v9564_v28 = vld [vmem:[%s16741_s1 + $0x38] sm:$0xff]   ;;  %v9565_v29 = vld [vmem:[%s16741_s1 + $0x40] sm:$0xff]   ;;  %v9566_v30 = vld [vmem:[%s16741_s1 + $0x48] sm:$0xff]   ;;  %vm6489_vm5 = vcmask 261120   ;;  %vm8193_vm6 = vcmask 130048   ;;  %vm8279_vm7 = vcmask 80896  }
  0x26   :  { %8349 = vmatmul.mubr.msk.bf16.vlgmr.msra.gmra.mxu0 %vm313_vm1, %v9551_v12  ;;  %8376 = vmatmul.mubr.msk.bf16.vlgmr.msra.gmra.mxu1 %vm313_vm1, %v9551_v12  ;;  %v9567_v31 = vld [vmem:[%s16741_s1 + $0x50] sm:$0xff]   ;;  %v9568_v33 = vld [vmem:[%s16741_s1 + $0x58] sm:$0xff]   ;;  %v9569_v35 = vld [vmem:[%s16741_s1 + $0x60] sm:$0xff]  }
  0x27   :  { %1324 = vmatpush1.bf16.msra.mxu1 %v1021_v16  ;;  %1039 = vmatpush1.bf16.msra.mxu0 %v1015_v17  ;;  %v9590_v32 = vld [vmem:[#allocation2 + $0xac] ss:$16 sps:$4 sm:$0x3f]   ;;  %v9593_v34 = vld [vmem:[#allocation2 + $0xa4] ss:$16 sps:$4 sm:$0x3f]  }
  0x28   :  { %447 = vmatprep.mubr.bf16.mxu0 %v16751_v0  ;;  %732 = vmatprep.mubr.bf16.mxu1 %v16751_v0  ;;  %v10330_v36 = vld [vmem:[%s16740_s0 + $0x8] sm:$0xff]   ;;  %v10341_v37 = vld [vmem:[%s16740_s0 + $0x10] sm:$0xff]   ;;  %v10352_v38 = vld [vmem:[%s16740_s0 + $0x18] sm:$0xff]  }
  0x29   :  { %1325 = vmatprep.subr.bf16.mxu1 %v9573_v20  ;;  %1040 = vmatprep.subr.bf16.mxu0 %v9576_v22  ;;  %v10363_v39 = vld [vmem:[%s16740_s0 + $0x20] sm:$0xff]   ;;  %v10374_v40 = vld [vmem:[%s16740_s0 + $0x28] sm:$0xff]   ;;  %v10385_v41 = vld [vmem:[%s16740_s0 + $0x30] sm:$0xff]  }
  0x2a   :  { %v10396_v42 = vld [vmem:[%s16740_s0 + $0x38] sm:$0xff]   ;;  %v10407_v43 = vld [vmem:[%s16740_s0 + $0x40] sm:$0xff]   ;;  %v10418_v44 = vld [vmem:[%s16740_s0 + $0x48] sm:$0xff]  }
  0x2b   :  { %1326 = vmatpush1.bf16.msra.mxu1 %v9571_v19  ;;  %1041 = vmatpush1.bf16.msra.mxu0 %v9574_v23  ;;  %v10429_v45 = vld [vmem:[%s16740_s0 + $0x50] sm:$0xff]   ;;  %v10440_v46 = vld [vmem:[%s16740_s0 + $0x58] sm:$0xff]   ;;  %v10451_v47 = vld [vmem:[%s16740_s0 + $0x60] sm:$0xff]  }
  0x2c   :  { %8499 = vmatprep.subr.msk.bf16.mxu1 %vm392_vm0, %v9590_v32  ;;  %8472 = vmatprep.subr.msk.bf16.mxu0 %vm392_vm0, %v9593_v34  ;;  %v10474_v54 = vld [vmem:[%s16740_s0 + $0x68] sm:$0xff]   ;;  %v9592_v61 = vld [vmem:[#allocation2 + $0xa8] ss:$16 sps:$4 sm:$0x3f]   ;;  %v9598_v7 = vld [vmem:[#allocation2 + $0x8c] ss:$16 sps:$4 sm:$0xff]  }
  0x2d   :  { %v9595_v62 = vld [vmem:[#allocation2 + $0xa0] ss:$16 sps:$4 sm:$0x3f]   ;;  %v9589_v2 = vld [vmem:[%s16740_s0] sm:$0xff]   ;;  %v1651_v5 = vsel %vm392_vm0, %v9592_v61, 0 }
  0x2e   :  { %8350 = vmatmul.mubr.msk.bf16.gmra.mxu0 %vm313_vm1, %v9558_v18  ;;  %8377 = vmatmul.mubr.msk.bf16.gmra.mxu1 %vm313_vm1, %v9558_v18  ;;  %v1645_v6 = vsel %vm392_vm0, %v9595_v62, 0  ;;  %v9601_v8 = vld [vmem:[#allocation2 + $0x84] ss:$16 sps:$4 sm:$0xff]   ;;  %v9596_v11 = vld [vmem:[#allocation2 + $0x88] ss:$16 sps:$4 sm:$0xff]  }
  0x2f   :  { %457 = vmatprep.mubr.bf16.mxu0 %v16751_v0  ;;  %742 = vmatprep.mubr.bf16.mxu1 %v16751_v0  ;;  %v9599_v12 = vld [vmem:[#allocation2 + $0x80] ss:$16 sps:$4 sm:$0xff]  }
  0x36   :  { %8351 = vmatmul.mubr.msk.bf16.gmra.mxu0 %vm313_vm1, %v9559_v21  ;;  %8378 = vmatmul.mubr.msk.bf16.gmra.mxu1 %vm313_vm1, %v9559_v21 }
  0x37   :  { %467 = vmatprep.mubr.bf16.mxu0 %v16751_v0  ;;  %752 = vmatprep.mubr.bf16.mxu1 %v16751_v0 }
  0x3e   :  { %8352 = vmatmul.mubr.msk.bf16.gmra.mxu0 %vm313_vm1, %v9560_v24  ;;  %8379 = vmatmul.mubr.msk.bf16.gmra.mxu1 %vm313_vm1, %v9560_v24 }
  0x3f   :  { %477 = vmatprep.mubr.bf16.mxu0 %v16751_v0  ;;  %762 = vmatprep.mubr.bf16.mxu1 %v16751_v0 }
  0x46   :  { %8353 = vmatmul.mubr.msk.bf16.gmra.mxu0 %vm313_vm1, %v9561_v25  ;;  %8380 = vmatmul.mubr.msk.bf16.gmra.mxu1 %vm313_vm1, %v9561_v25 }
  0x47   :  { %487 = vmatprep.mubr.bf16.mxu0 %v16751_v0  ;;  %772 = vmatprep.mubr.bf16.mxu1 %v16751_v0 }
  0x4e   :  { %8354 = vmatmul.mubr.msk.bf16.gmra.mxu0 %vm313_vm1, %v9562_v26  ;;  %8381 = vmatmul.mubr.msk.bf16.gmra.mxu1 %vm313_vm1, %v9562_v26 }
  0x4f   :  { %497 = vmatprep.mubr.bf16.mxu0 %v16751_v0  ;;  %782 = vmatprep.mubr.bf16.mxu1 %v16751_v0 }
  0x56   :  { %8355 = vmatmul.mubr.msk.bf16.gmra.mxu0 %vm313_vm1, %v9563_v27  ;;  %8382 = vmatmul.mubr.msk.bf16.gmra.mxu1 %vm313_vm1, %v9563_v27 }
  0x57   :  { %507 = vmatprep.mubr.bf16.mxu0 %v16751_v0  ;;  %792 = vmatprep.mubr.bf16.mxu1 %v16751_v0 }
  0x5e   :  { %8356 = vmatmul.mubr.msk.bf16.gmra.mxu0 %vm313_vm1, %v9564_v28  ;;  %8383 = vmatmul.mubr.msk.bf16.gmra.mxu1 %vm313_vm1, %v9564_v28 }
  0x5f   :  { %517 = vmatprep.mubr.bf16.mxu0 %v16751_v0  ;;  %802 = vmatprep.mubr.bf16.mxu1 %v16751_v0 }
  0x66   :  { %8357 = vmatmul.mubr.msk.bf16.gmra.mxu0 %vm313_vm1, %v9565_v29  ;;  %8384 = vmatmul.mubr.msk.bf16.gmra.mxu1 %vm313_vm1, %v9565_v29 }
  0x67   :  { %527 = vmatprep.mubr.bf16.mxu0 %v16751_v0  ;;  %812 = vmatprep.mubr.bf16.mxu1 %v16751_v0 }
  0x6e   :  { %8358 = vmatmul.mubr.msk.bf16.gmra.mxu0 %vm313_vm1, %v9566_v30  ;;  %8385 = vmatmul.mubr.msk.bf16.gmra.mxu1 %vm313_vm1, %v9566_v30 }
  0x6f   :  { %537 = vmatprep.mubr.bf16.mxu0 %v16751_v0  ;;  %822 = vmatprep.mubr.bf16.mxu1 %v16751_v0 }
  0x76   :  { %8359 = vmatmul.mubr.msk.bf16.gmra.mxu0 %vm313_vm1, %v9567_v31  ;;  %8386 = vmatmul.mubr.msk.bf16.gmra.mxu1 %vm313_vm1, %v9567_v31 }
  0x77   :  { %547 = vmatprep.mubr.bf16.mxu0 %v16751_v0  ;;  %832 = vmatprep.mubr.bf16.mxu1 %v16751_v0 }
  0x7e   :  { %8360 = vmatmul.mubr.msk.bf16.gmra.mxu0 %vm313_vm1, %v9568_v33  ;;  %8387 = vmatmul.mubr.msk.bf16.gmra.mxu1 %vm313_vm1, %v9568_v33 }
  0x7f   :  { %557 = vmatprep.mubr.bf16.mxu0 %v16751_v0  ;;  %842 = vmatprep.mubr.bf16.mxu1 %v16751_v0 }
  0x86   :  { %8361 = vmatmul.mubr.msk.bf16.gmra.mxu0 %vm313_vm1, %v9569_v35  ;;  %8388 = vmatmul.mubr.msk.bf16.gmra.mxu1 %vm313_vm1, %v9569_v35 }
  0x87   :  { %563 = vmatprep.mubr.bf16.mxu0 %v16751_v0  ;;  %848 = vmatprep.mubr.bf16.mxu1 %v16751_v0 }
  0x8e   :  { %8362 = vmatmul.mubr.msk.bf16.gmra.mxu0 %vm313_vm1, %v10330_v36  ;;  %8389 = vmatmul.mubr.msk.bf16.gmra.mxu1 %vm313_vm1, %v10330_v36 }
  0x8f   :  { %573 = vmatprep.mubr.bf16.mxu0 %v16751_v0  ;;  %858 = vmatprep.mubr.bf16.mxu1 %v16751_v0 }
  0x96   :  { %8363 = vmatmul.mubr.msk.bf16.gmra.mxu0 %vm313_vm1, %v10341_v37  ;;  %8390 = vmatmul.mubr.msk.bf16.gmra.mxu1 %vm313_vm1, %v10341_v37 }
  0x97   :  { %583 = vmatprep.mubr.bf16.mxu0 %v16751_v0  ;;  %868 = vmatprep.mubr.bf16.mxu1 %v16751_v0 }
  0x9e   :  { %8364 = vmatmul.mubr.msk.bf16.gmra.mxu0 %vm313_vm1, %v10352_v38  ;;  %8391 = vmatmul.mubr.msk.bf16.gmra.mxu1 %vm313_vm1, %v10352_v38 }
  0x9f   :  { %593 = vmatprep.mubr.bf16.mxu0 %v16751_v0  ;;  %878 = vmatprep.mubr.bf16.mxu1 %v16751_v0 }
  0xa6   :  { %8365 = vmatmul.mubr.msk.bf16.gmra.mxu0 %vm313_vm1, %v10363_v39  ;;  %8392 = vmatmul.mubr.msk.bf16.gmra.mxu1 %vm313_vm1, %v10363_v39 }
  0xa7   :  { %603 = vmatprep.mubr.bf16.mxu0 %v16751_v0  ;;  %888 = vmatprep.mubr.bf16.mxu1 %v16751_v0 }
  0xae   :  { %8366 = vmatmul.mubr.msk.bf16.gmra.mxu0 %vm313_vm1, %v10374_v40  ;;  %8393 = vmatmul.mubr.msk.bf16.gmra.mxu1 %vm313_vm1, %v10374_v40 }
  0xaf   :  { %613 = vmatprep.mubr.bf16.mxu0 %v16751_v0  ;;  %898 = vmatprep.mubr.bf16.mxu1 %v16751_v0 }
  0xb6   :  { %8367 = vmatmul.mubr.msk.bf16.gmra.mxu0 %vm313_vm1, %v10385_v41  ;;  %8394 = vmatmul.mubr.msk.bf16.gmra.mxu1 %vm313_vm1, %v10385_v41 }
  0xb7   :  { %623 = vmatprep.mubr.bf16.mxu0 %v16751_v0  ;;  %908 = vmatprep.mubr.bf16.mxu1 %v16751_v0 }
  0xbe   :  { %8368 = vmatmul.mubr.msk.bf16.gmra.mxu0 %vm313_vm1, %v10396_v42  ;;  %8395 = vmatmul.mubr.msk.bf16.gmra.mxu1 %vm313_vm1, %v10396_v42 }
  0xbf   :  { %633 = vmatprep.mubr.bf16.mxu0 %v16751_v0  ;;  %918 = vmatprep.mubr.bf16.mxu1 %v16751_v0 }
  0xc6   :  { %8369 = vmatmul.mubr.msk.bf16.gmra.mxu0 %vm313_vm1, %v10407_v43  ;;  %8396 = vmatmul.mubr.msk.bf16.gmra.mxu1 %vm313_vm1, %v10407_v43 }
  0xc7   :  { %643 = vmatprep.mubr.bf16.mxu0 %v16751_v0  ;;  %928 = vmatprep.mubr.bf16.mxu1 %v16751_v0 }
  0xce   :  { %8370 = vmatmul.mubr.msk.bf16.gmra.mxu0 %vm313_vm1, %v10418_v44  ;;  %8397 = vmatmul.mubr.msk.bf16.gmra.mxu1 %vm313_vm1, %v10418_v44 }
  0xcf   :  { %653 = vmatprep.mubr.bf16.mxu0 %v16751_v0  ;;  %938 = vmatprep.mubr.bf16.mxu1 %v16751_v0 }
  0xd6   :  { %8371 = vmatmul.mubr.msk.bf16.gmra.mxu0 %vm313_vm1, %v10429_v45  ;;  %8398 = vmatmul.mubr.msk.bf16.gmra.mxu1 %vm313_vm1, %v10429_v45 }
  0xd7   :  { %663 = vmatprep.mubr.bf16.mxu0 %v16751_v0  ;;  %948 = vmatprep.mubr.bf16.mxu1 %v16751_v0 }
  0xde   :  { %8372 = vmatmul.mubr.msk.bf16.gmra.mxu0 %vm313_vm1, %v10440_v46  ;;  %8399 = vmatmul.mubr.msk.bf16.gmra.mxu1 %vm313_vm1, %v10440_v46 }
  0xdf   :  { %673 = vmatprep.mubr.bf16.mxu0 %v16751_v0  ;;  %958 = vmatprep.mubr.bf16.mxu1 %v16751_v0 }
  0xe6   :  { %v10453_v48 = vpop.f32.mrf.mxu0  ;;  %8373 = vmatmul.mubr.msk.bf16.gmra.mxu0 %vm313_vm1, %v10451_v47  ;;  %v10457_v49 = vpop.f32.mrf.mxu1  ;;  %8400 = vmatmul.mubr.msk.bf16.gmra.mxu1 %vm313_vm1, %v10451_v47 }
  0xe7   :  { %683 = vmatprep.mubr.bf16.mxu0 %v16751_v0  ;;  %968 = vmatprep.mubr.bf16.mxu1 %v16751_v0 }
  0xe8   :  { %v10463_v50 = vpop.f32.mrf.mxu0  ;;  %v10465_v51 = vpop.f32.mrf.mxu1 }
  0xea   :  { %v10467_v52 = vpop.f32.mrf.mxu0  ;;  %v10469_v53 = vpop.f32.mrf.mxu1 }
  0xec   :  { %v10476_v55 = vpop.f32.mrf.mxu0  ;;  %v10478_v56 = vpop.f32.mrf.mxu1 }
  0xee   :  { %v10480_v57 = vpop.f32.mrf.mxu0  ;;  %8374 = vmatmul.mubr.msk.bf16.gmra.mxu0 %vm313_vm1, %v10474_v54  ;;  %v10484_v58 = vpop.f32.mrf.mxu1  ;;  %8401 = vmatmul.mubr.msk.bf16.gmra.mxu1 %vm313_vm1, %v10474_v54 }
  0xef   :  { %1058 = vmatprep.mubr.bf16.mxu0 %v16751_v0  ;;  %1343 = vmatprep.mubr.bf16.mxu1 %v16751_v0 }
  0xf0   :  { %v10490_v59 = vpop.f32.mrf.mxu0  ;;  %v10492_v60 = vpop.f32.mrf.mxu1 }
  0xf2   :  { %v10494_v63 = vpop.f32.mrf.mxu0  ;;  %v10496_v1 = vpop.f32.mrf.mxu1 }
  0xf4   :  { %v10501_v3 = vpop.f32.mrf.mxu0  ;;  %v10503_v4 = vpop.f32.mrf.mxu1 }
  0xf6   :  { %v10507_v9 = vpop.f32.mrf.mxu0  ;;  %v10509_v10 = vpop.f32.mrf.mxu1  ;;  %8411 = vmatmul.mubr.msk.bf16.vlgmr.msra.gmra.mxu0 %vm313_vm1, %v9589_v2  ;;  %8438 = vmatmul.mubr.msk.bf16.vlgmr.msra.gmra.mxu1 %vm313_vm1, %v9589_v2 }
  0xf7   :  { %1954 = vmatpush1.bf16.msra.mxu1 %v1651_v5  ;;  %1669 = vmatpush1.bf16.msra.mxu0 %v1645_v6 }
  0xf8   :  { %v10513_v13 = vpop.f32.mrf.mxu0  ;;  %v10515_v14 = vpop.f32.mrf.mxu1  ;;  %1068 = vmatprep.mubr.bf16.mxu0 %v16751_v0  ;;  %1353 = vmatprep.mubr.bf16.mxu1 %v16751_v0 }
  0xf9   :  { %16866 = vst [vmem:[#allocation8_spill] sm:$0xff] %v10513_v13  ;;  %16867 = vst [vmem:[#allocation9_spill] sm:$0xff] %v10515_v14  ;;  %1955 = vmatprep.subr.bf16.mxu1 %v9598_v7  ;;  %1670 = vmatprep.subr.bf16.mxu0 %v9601_v8 }
  0xfa   :  { %v10519_v15 = vpop.f32.mrf.mxu0  ;;  %v10521_v16 = vpop.f32.mrf.mxu1 }
  0xfb   :  { %16868 = vst [vmem:[#allocation10_spill] sm:$0xff] %v10519_v15  ;;  %16869 = vst [vmem:[#allocation11_spill] sm:$0xff] %v10521_v16  ;;  %1956 = vmatpush1.bf16.msra.mxu1 %v9596_v11  ;;  %1671 = vmatpush1.bf16.msra.mxu0 %v9599_v12 }
  0xfc   :  { %v10523_v17 = vpop.f32.mrf.mxu0  ;;  %v10525_v18 = vpop.f32.mrf.mxu1  ;;  %4524 = vmatprep.subr.bf16.mxu1 %v16751_v0 }
  0xfd   :  { %16870 = vst [vmem:[#allocation12_spill] sm:$0xff] %v10523_v17  ;;  %16871 = vst [vmem:[#allocation13_spill] sm:$0xff] %v10525_v18 }
  0xfe   :  { %v10528_v19 = vpop.f32.mrf.mxu0  ;;  %v10530_v20 = vpop.f32.mrf.mxu1  ;;  %8412 = vmatmul.mubr.msk.bf16.gmra.mxu0 %vm313_vm1, %v10330_v36  ;;  %8439 = vmatmul.mubr.msk.bf16.gmra.mxu1 %vm313_vm1, %v10330_v36 }
  0xff   :  { %16872 = vst [vmem:[#allocation14_spill] sm:$0xff] %v10528_v19  ;;  %16873 = vst [vmem:[#allocation15_spill] sm:$0xff] %v10530_v20  ;;  %1078 = vmatprep.mubr.bf16.mxu0 %v16751_v0  ;;  %1363 = vmatprep.mubr.bf16.mxu1 %v16751_v0 }
 0x100   :  { %v10538_v21 = vpop.f32.mrf.mxu0  ;;  %v10540_v22 = vpop.f32.mrf.mxu1 }
 0x101   :  { %16874 = vst [vmem:[#allocation16_spill] sm:$0xff] %v10538_v21  ;;  %16875 = vst [vmem:[#allocation17_spill] sm:$0xff] %v10540_v22  ;;  %v10105_v21 = vld [vmem:[%s16740_s0 + $0x8] sm:$0xff]  }
 0x102   :  { %v10542_v23 = vpop.f32.mrf.mxu0  ;;  %v10544_v24 = vpop.f32.mrf.mxu1 }
 0x103   :  { %16876 = vst [vmem:[#allocation18_spill] sm:$0xff] %v10542_v23  ;;  %16877 = vst [vmem:[#allocation19_spill] sm:$0xff] %v10544_v24 }
 0x104   :  { %v10546_v25 = vpop.f32.mrf.mxu0  ;;  %v10548_v26 = vpop.f32.mrf.mxu1 }
 0x105   :  { %16878 = vst [vmem:[#allocation20_spill] sm:$0xff] %v10546_v25  ;;  %16879 = vst [vmem:[#allocation21_spill] sm:$0xff] %v10548_v26 }
 0x106   :  { %v10550_v27 = vpop.f32.mrf.mxu0  ;;  %v10552_v28 = vpop.f32.mrf.mxu1  ;;  %8413 = vmatmul.mubr.msk.bf16.gmra.mxu0 %vm313_vm1, %v10341_v37  ;;  %8440 = vmatmul.mubr.msk.bf16.gmra.mxu1 %vm313_vm1, %v10341_v37 }
 0x107   :  { %16880 = vst [vmem:[#allocation22_spill] sm:$0xff] %v10550_v27  ;;  %16881 = vst [vmem:[#allocation23_spill] sm:$0xff] %v10552_v28  ;;  %1088 = vmatprep.mubr.bf16.mxu0 %v16751_v0  ;;  %1373 = vmatprep.mubr.bf16.mxu1 %v16751_v0 }
 0x108   :  { %v10560_v29 = vpop.f32.mrf.mxu0  ;;  %v10562_v30 = vpop.f32.mrf.mxu1 }
 0x109   :  { %16882 = vst [vmem:[#allocation24_spill] sm:$0xff] %v10560_v29  ;;  %16883 = vst [vmem:[#allocation25_spill] sm:$0xff] %v10562_v30 }
 0x10a   :  { %v10564_v31 = vpop.f32.mrf.mxu0  ;;  %v10566_v32 = vpop.f32.mrf.mxu1 }
 0x10b   :  { %16884 = vst [vmem:[#allocation26_spill] sm:$0xff] %v10564_v31  ;;  %16885 = vst [vmem:[#allocation27_spill] sm:$0xff] %v10566_v32  ;;  %v11085_v31 = vld [vmem:[%s16741_s1 + $0x60] sm:$0xff]  }
 0x10c   :  { %v10568_v33 = vpop.f32.mrf.mxu0  ;;  %v10570_v34 = vpop.f32.mrf.mxu1 }
 0x10d   :  { %16886 = vst [vmem:[#allocation28_spill] sm:$0xff] %v10568_v33  ;;  %16887 = vst [vmem:[#allocation29_spill] sm:$0xff] %v10570_v34  ;;  %v11045_v34 = vld [vmem:[%s16741_s1 + $0x50] sm:$0xff]  }
 0x10e   :  { %v10572_v35 = vpop.f32.mrf.mxu0  ;;  %v10574_v36 = vpop.f32.mrf.mxu1  ;;  %8414 = vmatmul.mubr.msk.bf16.gmra.mxu0 %vm313_vm1, %v10352_v38  ;;  %8441 = vmatmul.mubr.msk.bf16.gmra.mxu1 %vm313_vm1, %v10352_v38 }
 0x10f   :  { %16888 = vst [vmem:[#allocation30_spill] sm:$0xff] %v10572_v35  ;;  %16889 = vst [vmem:[#allocation31_spill] sm:$0xff] %v10574_v36  ;;  %1098 = vmatprep.mubr.bf16.mxu0 %v16751_v0  ;;  %1383 = vmatprep.mubr.bf16.mxu1 %v16751_v0  ;;  %v10995_v36 = vld [vmem:[%s16741_s1 + $0x40] sm:$0xff]   ;;  %v11022_v35 = vld [vmem:[%s16741_s1 + $0x48] sm:$0xff]  }
 0x110   :  { %v10582_v37 = vpop.f32.mrf.mxu0  ;;  %v10584_v61 = vpop.f32.mrf.mxu1 }
 0x111   :  { %16890 = vst [vmem:[#allocation32_spill] sm:$0xff] %v10582_v37  ;;  %16891 = vst [vmem:[#allocation33_spill] sm:$0xff] %v10584_v61  ;;  %v10941_v61 = vld [vmem:[%s16741_s1 + $0x30] sm:$0xff]   ;;  %v10968_v37 = vld [vmem:[%s16741_s1 + $0x38] sm:$0xff]  }
 0x112   :  { %v10586_v62 = vpop.f32.mrf.mxu0  ;;  %v10588_v2 = vpop.f32.mrf.mxu1 }
 0x113   :  { %16892 = vst [vmem:[#allocation34_spill] sm:$0xff] %v10586_v62  ;;  %16893 = vst [vmem:[#allocation35_spill] sm:$0xff] %v10588_v2  ;;  %v10914_v62 = vld [vmem:[%s16741_s1 + $0x28] sm:$0xff]  }
 0x114   :  { %v10590_v5 = vpop.f32.mrf.mxu0  ;;  %v10592_v6 = vpop.f32.mrf.mxu1 }
 0x115   :  { %16894 = vst [vmem:[#allocation36_spill] sm:$0xff] %v10590_v5  ;;  %16895 = vst [vmem:[#allocation37_spill] sm:$0xff] %v10592_v6 }
 0x116   :  { %v10594_v7 = vpop.f32.mrf.mxu0  ;;  %v10596_v8 = vpop.f32.mrf.mxu1  ;;  %8415 = vmatmul.mubr.msk.bf16.gmra.mxu0 %vm313_vm1, %v10363_v39  ;;  %8442 = vmatmul.mubr.msk.bf16.gmra.mxu1 %vm313_vm1, %v10363_v39 }
 0x117   :  { %16896 = vst [vmem:[#allocation38_spill] sm:$0xff] %v10594_v7  ;;  %16897 = vst [vmem:[#allocation39_spill] sm:$0xff] %v10596_v8  ;;  %1108 = vmatprep.mubr.bf16.mxu0 %v16751_v0  ;;  %1393 = vmatprep.mubr.bf16.mxu1 %v16751_v0 }
 0x118   :  { %v10604_v38 = vpop.f32.mrf.mxu0  ;;  %v10606_v11 = vpop.f32.mrf.mxu1 }
 0x119   :  { %16898 = vst [vmem:[#allocation40_spill] sm:$0xff] %v10604_v38  ;;  %16899 = vst [vmem:[#allocation41_spill] sm:$0xff] %v10606_v11  ;;  %v10887_v38 = vld [vmem:[%s16741_s1 + $0x20] sm:$0xff]  }
 0x11a   :  { %v10608_v12 = vpop.f32.mrf.mxu0  ;;  %v10610_v6 = vpop.f32.mrf.mxu1 }
 0x11b   :  { %16900 = vst [vmem:[#allocation42_spill] sm:$0xff] %v10608_v12  ;;  %16901 = vst [vmem:[#allocation43_spill] sm:$0xff] %v10610_v6 }
 0x11c   :  { %v10612_v7 = vpop.f32.mrf.mxu0  ;;  %v10614_v8 = vpop.f32.mrf.mxu1 }
 0x11d   :  { %16902 = vst [vmem:[#allocation44_spill] sm:$0xff] %v10612_v7  ;;  %16903 = vst [vmem:[#allocation45_spill] sm:$0xff] %v10614_v8 }
 0x11e   :  { %v10616_v5 = vpop.f32.mrf.mxu0  ;;  %v10618_v2 = vpop.f32.mrf.mxu1  ;;  %8416 = vmatmul.mubr.msk.bf16.gmra.mxu0 %vm313_vm1, %v10374_v40  ;;  %8443 = vmatmul.mubr.msk.bf16.gmra.mxu1 %vm313_vm1, %v10374_v40 }
 0x11f   :  { %16904 = vst [vmem:[#allocation46_spill] sm:$0xff] %v10616_v5  ;;  %16905 = vst [vmem:[#allocation47_spill] sm:$0xff] %v10618_v2  ;;  %1118 = vmatprep.mubr.bf16.mxu0 %v16751_v0  ;;  %1403 = vmatprep.mubr.bf16.mxu1 %v16751_v0 }
 0x120   :  { %v10626_v39 = vpop.f32.mrf.mxu0  ;;  %v10628_v6 = vpop.f32.mrf.mxu1 }
 0x121   :  { %16906 = vst [vmem:[#allocation48_spill] sm:$0xff] %v10626_v39  ;;  %16907 = vst [vmem:[#allocation49_spill] sm:$0xff] %v10628_v6  ;;  %v10860_v39 = vld [vmem:[%s16741_s1 + $0x18] sm:$0xff]  }
 0x122   :  { %v10630_v7 = vpop.f32.mrf.mxu0  ;;  %v10632_v8 = vpop.f32.mrf.mxu1 }
 0x123   :  { %16908 = vst [vmem:[#allocation50_spill] sm:$0xff] %v10630_v7  ;;  %16909 = vst [vmem:[#allocation51_spill] sm:$0xff] %v10632_v8 }
 0x124   :  { %v10634_v5 = vpop.f32.mrf.mxu0  ;;  %v10636_v2 = vpop.f32.mrf.mxu1 }
 0x125   :  { %16910 = vst [vmem:[#allocation52_spill] sm:$0xff] %v10634_v5  ;;  %16911 = vst [vmem:[#allocation53_spill] sm:$0xff] %v10636_v2 }
 0x126   :  { %v10638_v12 = vpop.f32.mrf.mxu0  ;;  %v10640_v11 = vpop.f32.mrf.mxu1  ;;  %8417 = vmatmul.mubr.msk.bf16.gmra.mxu0 %vm313_vm1, %v10385_v41  ;;  %8444 = vmatmul.mubr.msk.bf16.gmra.mxu1 %vm313_vm1, %v10385_v41 }
 0x127   :  { %16912 = vst [vmem:[#allocation54_spill] sm:$0xff] %v10638_v12  ;;  %16913 = vst [vmem:[#allocation55_spill] sm:$0xff] %v10640_v11  ;;  %1128 = vmatprep.mubr.bf16.mxu0 %v16751_v0  ;;  %1413 = vmatprep.mubr.bf16.mxu1 %v16751_v0 }
 0x128   :  { %v10648_v40 = vpop.f32.mrf.mxu0  ;;  %v10650_v8 = vpop.f32.mrf.mxu1 }
 0x129   :  { %16914 = vst [vmem:[#allocation56_spill] sm:$0xff] %v10648_v40  ;;  %16915 = vst [vmem:[#allocation57_spill] sm:$0xff] %v10650_v8 }
 0x12a   :  { %v10652_v5 = vpop.f32.mrf.mxu0  ;;  %v10654_v2 = vpop.f32.mrf.mxu1 }
 0x12b   :  { %16916 = vst [vmem:[#allocation58_spill] sm:$0xff] %v10652_v5  ;;  %16917 = vst [vmem:[#allocation59_spill] sm:$0xff] %v10654_v2 }
 0x12c   :  { %v10656_v12 = vpop.f32.mrf.mxu0  ;;  %v10658_v11 = vpop.f32.mrf.mxu1 }
 0x12d   :  { %16918 = vst [vmem:[#allocation60_spill] sm:$0xff] %v10656_v12  ;;  %16919 = vst [vmem:[#allocation61_spill] sm:$0xff] %v10658_v11 }
 0x12e   :  { %v10660_v7 = vpop.f32.mrf.mxu0  ;;  %v10662_v6 = vpop.f32.mrf.mxu1  ;;  %8418 = vmatmul.mubr.msk.bf16.gmra.mxu0 %vm313_vm1, %v10396_v42  ;;  %8445 = vmatmul.mubr.msk.bf16.gmra.mxu1 %vm313_vm1, %v10396_v42 }
 0x12f   :  { %16920 = vst [vmem:[#allocation62_spill] sm:$0xff] %v10660_v7  ;;  %16921 = vst [vmem:[#allocation63_spill] sm:$0xff] %v10662_v6  ;;  %1138 = vmatprep.mubr.bf16.mxu0 %v16751_v0  ;;  %1423 = vmatprep.mubr.bf16.mxu1 %v16751_v0 }
 0x130   :  { %v10670_v41 = vpop.f32.mrf.mxu0  ;;  %v10672_v2 = vpop.f32.mrf.mxu1 }
 0x131   :  { %16922 = vst [vmem:[#allocation64_spill] sm:$0xff] %v10670_v41  ;;  %16923 = vst [vmem:[#allocation65_spill] sm:$0xff] %v10672_v2 }
 0x132   :  { %v10674_v12 = vpop.f32.mrf.mxu0  ;;  %v10676_v11 = vpop.f32.mrf.mxu1 }
 0x133   :  { %16924 = vst [vmem:[#allocation66_spill] sm:$0xff] %v10674_v12  ;;  %16925 = vst [vmem:[#allocation67_spill] sm:$0xff] %v10676_v11 }
 0x134   :  { %v10678_v7 = vpop.f32.mrf.mxu0  ;;  %v10680_v6 = vpop.f32.mrf.mxu1 }
 0x135   :  { %16926 = vst [vmem:[#allocation68_spill] sm:$0xff] %v10678_v7  ;;  %16927 = vst [vmem:[#allocation69_spill] sm:$0xff] %v10680_v6 }
 0x136   :  { %v10682_v5 = vpop.f32.mrf.mxu0  ;;  %v10684_v8 = vpop.f32.mrf.mxu1  ;;  %8419 = vmatmul.mubr.msk.bf16.gmra.mxu0 %vm313_vm1, %v10407_v43  ;;  %8446 = vmatmul.mubr.msk.bf16.gmra.mxu1 %vm313_vm1, %v10407_v43 }
 0x137   :  { %16928 = vst [vmem:[#allocation70_spill] sm:$0xff] %v10682_v5  ;;  %16929 = vst [vmem:[#allocation71_spill] sm:$0xff] %v10684_v8  ;;  %1148 = vmatprep.mubr.bf16.mxu0 %v16751_v0  ;;  %1433 = vmatprep.mubr.bf16.mxu1 %v16751_v0 }
 0x138   :  { %v10692_v42 = vpop.f32.mrf.mxu0  ;;  %v10694_v11 = vpop.f32.mrf.mxu1 }
 0x139   :  { %16930 = vst [vmem:[#allocation72_spill] sm:$0xff] %v10692_v42  ;;  %16931 = vst [vmem:[#allocation73_spill] sm:$0xff] %v10694_v11 }
 0x13a   :  { %v10696_v7 = vpop.f32.mrf.mxu0  ;;  %v10698_v6 = vpop.f32.mrf.mxu1 }
 0x13b   :  { %16932 = vst [vmem:[#allocation74_spill] sm:$0xff] %v10696_v7  ;;  %16933 = vst [vmem:[#allocation75_spill] sm:$0xff] %v10698_v6 }
 0x13c   :  { %v10700_v5 = vpop.f32.mrf.mxu0  ;;  %v10702_v8 = vpop.f32.mrf.mxu1 }
 0x13d   :  { %16934 = vst [vmem:[#allocation76_spill] sm:$0xff] %v10700_v5  ;;  %16935 = vst [vmem:[#allocation77_spill] sm:$0xff] %v10702_v8 }
 0x13e   :  { %v10704_v12 = vpop.f32.mrf.mxu0  ;;  %v10706_v2 = vpop.f32.mrf.mxu1  ;;  %8420 = vmatmul.mubr.msk.bf16.gmra.mxu0 %vm313_vm1, %v10418_v44  ;;  %8447 = vmatmul.mubr.msk.bf16.gmra.mxu1 %vm313_vm1, %v10418_v44 }
 0x13f   :  { %16936 = vst [vmem:[#allocation78_spill] sm:$0xff] %v10704_v12  ;;  %16937 = vst [vmem:[#allocation79_spill] sm:$0xff] %v10706_v2  ;;  %1158 = vmatprep.mubr.bf16.mxu0 %v16751_v0  ;;  %1443 = vmatprep.mubr.bf16.mxu1 %v16751_v0 }
 0x140   :  { %v10714_v7 = vpop.f32.mrf.mxu0  ;;  %v10716_v6 = vpop.f32.mrf.mxu1 }
 0x141   :  { %16938 = vst [vmem:[#allocation80_spill] sm:$0xff] %v10714_v7  ;;  %16939 = vst [vmem:[#allocation81_spill] sm:$0xff] %v10716_v6 }
 0x142   :  { %v10718_v5 = vpop.f32.mrf.mxu0  ;;  %v10720_v8 = vpop.f32.mrf.mxu1 }
 0x143   :  { %16940 = vst [vmem:[#allocation82_spill] sm:$0xff] %v10718_v5  ;;  %16941 = vst [vmem:[#allocation83_spill] sm:$0xff] %v10720_v8 }
 0x144   :  { %v10722_v12 = vpop.f32.mrf.mxu0  ;;  %v10724_v2 = vpop.f32.mrf.mxu1 }
 0x145   :  { %16942 = vst [vmem:[#allocation84_spill] sm:$0xff] %v10722_v12  ;;  %16943 = vst [vmem:[#allocation85_spill] sm:$0xff] %v10724_v2  ;;  %v10833_v2 = vld [vmem:[%s16741_s1 + $0x10] sm:$0xff]  }
 0x146   :  { %v559_v11 = vpop.f32.mrf.mxu0  ;;  %v844_v42 = vpop.f32.mrf.mxu1  ;;  %8421 = vmatmul.mubr.msk.bf16.gmra.mxu0 %vm313_vm1, %v10429_v45  ;;  %8448 = vmatmul.mubr.msk.bf16.gmra.mxu1 %vm313_vm1, %v10429_v45 }
 0x147   :  { %1168 = vmatprep.mubr.bf16.mxu0 %v16751_v0  ;;  %1453 = vmatprep.mubr.bf16.mxu1 %v16751_v0 }
 0x148   :  { %v560_v6 = vpop.f32.mrf.mxu0  ;;  %v845_v5 = vpop.f32.mrf.mxu1 }
 0x14a   :  { %v561_v7 = vpop.f32.mrf.mxu0  ;;  %v846_v8 = vpop.f32.mrf.mxu1 }
 0x14c   :  { %v562_v41 = vpop.f32.mrf.mxu0  ;;  %v847_v12 = vpop.f32.mrf.mxu1 }
 0x14e   :  { %v10732_v40 = vpop.f32.mrf.mxu0  ;;  %v10734_v11 = vpop.f32.mrf.mxu1  ;;  %8422 = vmatmul.mubr.msk.bf16.gmra.mxu0 %vm313_vm1, %v10440_v46  ;;  %8449 = vmatmul.mubr.msk.bf16.gmra.mxu1 %vm313_vm1, %v10440_v46 }
 0x14f   :  { %16944 = vst [vmem:[#allocation86_spill] sm:$0xff] %v10732_v40  ;;  %16945 = vst [vmem:[#allocation87_spill] sm:$0xff] %v10734_v11  ;;  %1178 = vmatprep.mubr.bf16.mxu0 %v16751_v0  ;;  %1463 = vmatprep.mubr.bf16.mxu1 %v16751_v0 }
 0x150   :  { %v10742_v6 = vpop.f32.mrf.mxu0  ;;  %v10744_v5 = vpop.f32.mrf.mxu1 }
 0x151   :  { %16946 = vst [vmem:[#allocation88_spill] sm:$0xff] %v10742_v6  ;;  %16947 = vst [vmem:[#allocation89_spill] sm:$0xff] %v10744_v5 }
 0x152   :  { %v10746_v7 = vpop.f32.mrf.mxu0  ;;  %v10748_v8 = vpop.f32.mrf.mxu1 }
 0x153   :  { %16948 = vst [vmem:[#allocation90_spill] sm:$0xff] %v10746_v7  ;;  %16949 = vst [vmem:[#allocation91_spill] sm:$0xff] %v10748_v8 }
 0x154   :  { %v10750_v12 = vpop.f32.mrf.mxu0  ;;  %v10752_v41 = vpop.f32.mrf.mxu1 }
 0x155   :  { %16950 = vst [vmem:[#allocation92_spill] sm:$0xff] %v10750_v12  ;;  %16951 = vst [vmem:[#allocation93_spill] sm:$0xff] %v10752_v41 }
 0x156   :  { %v10754_v42 = vpop.f32.mrf.mxu0  ;;  %v10756_v11 = vpop.f32.mrf.mxu1  ;;  %8423 = vmatmul.mubr.msk.bf16.gmra.mxu0 %vm313_vm1, %v10451_v47  ;;  %8450 = vmatmul.mubr.msk.bf16.gmra.mxu1 %vm313_vm1, %v10451_v47 }
 0x157   :  { %16952 = vst [vmem:[#allocation94_spill] sm:$0xff] %v10754_v42  ;;  %16953 = vst [vmem:[#allocation95_spill] sm:$0xff] %v10756_v11  ;;  %1184 = vmatprep.mubr.bf16.mxu0 %v16751_v0  ;;  %1469 = vmatprep.mubr.bf16.mxu1 %v16751_v0  ;;  %v10092_v0 = vld [vmem:[%s16741_s1] sm:$0xff]  }
 0x158   :  { %v10764_v7 = vpop.f32.mrf.mxu0  ;;  %v10766_v8 = vpop.f32.mrf.mxu1 }
 0x159   :  { %16954 = vst [vmem:[#allocation96_spill] sm:$0xff] %v10764_v7  ;;  %16955 = vst [vmem:[#allocation97_spill] sm:$0xff] %v10766_v8  ;;  %v16962_v8 = vmov 0  }
 0x15a   :  { %v10768_v12 = vpop.f32.mrf.mxu0  ;;  %v10770_v41 = vpop.f32.mrf.mxu1 }
 0x15b   :  { %16956 = vst [vmem:[#allocation98_spill] sm:$0xff] %v10768_v12  ;;  %16957 = vst [vmem:[#allocation99_spill] sm:$0xff] %v10770_v41 }
 0x15c   :  { %v10772_v42 = vpop.f32.mrf.mxu0  ;;  %v10774_v11 = vpop.f32.mrf.mxu1 }
 0x15d   :  { %16958 = vst [vmem:[#allocation100_spill] sm:$0xff] %v10772_v42  ;;  %16959 = vst [vmem:[#allocation101_spill] sm:$0xff] %v10774_v11 }
 0x15e   :  { %v10776_v5 = vpop.f32.mrf.mxu0  ;;  %v10778_v6 = vpop.f32.mrf.mxu1  ;;  %8424 = vmatmul.mubr.msk.bf16.gmra.mxu0 %vm313_vm1, %v10092_v0  ;;  %8451 = vmatmul.mubr.msk.bf16.gmra.mxu1 %vm313_vm1, %v10092_v0  ;;  %v10806_v0 = vld [vmem:[%s16741_s1 + $0x8] sm:$0xff]  }
 0x15f   :  { %16960 = vst [vmem:[#allocation102_spill] sm:$0xff] %v10776_v5  ;;  %16961 = vst [vmem:[#allocation103_spill] sm:$0xff] %v10778_v6  ;;  %1194 = vmatprep.mubr.bf16.mxu0 %v16962_v8  ;;  %1479 = vmatprep.mubr.bf16.mxu1 %v16962_v8 }
 0x160   :  { %v10787_v41 = vpop.f32.mrf.mxu0  ;;  %v10789_v42 = vpop.f32.mrf.mxu1 }
 0x161   :  { %16963 = vst [vmem:[#allocation104_spill] sm:$0xff] %v10787_v41  ;;  %16964 = vst [vmem:[#allocation105_spill] sm:$0xff] %v10789_v42 }
 0x162   :  { %v10791_v11 = vpop.f32.mrf.mxu0  ;;  %v10793_v5 = vpop.f32.mrf.mxu1 }
 0x163   :  { %16965 = vst [vmem:[#allocation106_spill] sm:$0xff] %v10791_v11  ;;  %16966 = vst [vmem:[#allocation107_spill] sm:$0xff] %v10793_v5 }
 0x164   :  { %v10795_v6 = vpop.f32.mrf.mxu0  ;;  %v10797_v12 = vpop.f32.mrf.mxu1 }
 0x165   :  { %16967 = vst [vmem:[#allocation108_spill] sm:$0xff] %v10795_v6  ;;  %16968 = vst [vmem:[#allocation109_spill] sm:$0xff] %v10797_v12 }
 0x166   :  { %v10799_v7 = vpop.f32.mrf.mxu0  ;;  %v10801_v40 = vpop.f32.mrf.mxu1  ;;  %8425 = vmatmul.mubr.msk.bf16.gmra.mxu0 %vm313_vm1, %v10806_v0  ;;  %8452 = vmatmul.mubr.msk.bf16.gmra.mxu1 %vm313_vm1, %v10806_v0 }
 0x167   :  { %16969 = vst [vmem:[#allocation110_spill] sm:$0xff] %v10799_v7  ;;  %16970 = vst [vmem:[#allocation111_spill] sm:$0xff] %v10801_v40  ;;  %1204 = vmatprep.mubr.bf16.mxu0 %v16962_v8  ;;  %1489 = vmatprep.mubr.bf16.mxu1 %v16962_v8 }
 0x168   :  { %v10814_v12 = vpop.f32.mrf.mxu0  ;;  %v10816_v7 = vpop.f32.mrf.mxu1 }
 0x169   :  { %16971 = vst [vmem:[#allocation112_spill] sm:$0xff] %v10814_v12  ;;  %16972 = vst [vmem:[#allocation113_spill] sm:$0xff] %v10816_v7 }
 0x16a   :  { %v10818_v40 = vpop.f32.mrf.mxu0  ;;  %v10820_v6 = vpop.f32.mrf.mxu1 }
 0x16b   :  { %16973 = vst [vmem:[#allocation114_spill] sm:$0xff] %v10818_v40  ;;  %16974 = vst [vmem:[#allocation115_spill] sm:$0xff] %v10820_v6 }
 0x16c   :  { %v10822_v5 = vpop.f32.mrf.mxu0  ;;  %v10824_v11 = vpop.f32.mrf.mxu1 }
 0x16d   :  { %16975 = vst [vmem:[#allocation116_spill] sm:$0xff] %v10822_v5  ;;  %16976 = vst [vmem:[#allocation117_spill] sm:$0xff] %v10824_v11 }
 0x16e   :  { %v10826_v42 = vpop.f32.mrf.mxu0  ;;  %v10828_v41 = vpop.f32.mrf.mxu1  ;;  %8426 = vmatmul.mubr.msk.bf16.gmra.mxu0 %vm313_vm1, %v10833_v2  ;;  %8453 = vmatmul.mubr.msk.bf16.gmra.mxu1 %vm313_vm1, %v10833_v2 }
 0x16f   :  { %16977 = vst [vmem:[#allocation118_spill] sm:$0xff] %v10826_v42  ;;  %16978 = vst [vmem:[#allocation119_spill] sm:$0xff] %v10828_v41  ;;  %1214 = vmatprep.mubr.bf16.mxu0 %v16962_v8  ;;  %1499 = vmatprep.mubr.bf16.mxu1 %v16962_v8 }
 0x170   :  { %v10841_v11 = vpop.f32.mrf.mxu0  ;;  %v10843_v42 = vpop.f32.mrf.mxu1 }
 0x171   :  { %16979 = vst [vmem:[#allocation120_spill] sm:$0xff] %v10841_v11  ;;  %16980 = vst [vmem:[#allocation121_spill] sm:$0xff] %v10843_v42 }
 0x172   :  { %v10845_v41 = vpop.f32.mrf.mxu0  ;;  %v10847_v5 = vpop.f32.mrf.mxu1 }
 0x173   :  { %16981 = vst [vmem:[#allocation122_spill] sm:$0xff] %v10845_v41  ;;  %16982 = vst [vmem:[#allocation123_spill] sm:$0xff] %v10847_v5 }
 0x174   :  { %v10849_v6 = vpop.f32.mrf.mxu0  ;;  %v10851_v40 = vpop.f32.mrf.mxu1 }
 0x175   :  { %16983 = vst [vmem:[#allocation124_spill] sm:$0xff] %v10849_v6  ;;  %16984 = vst [vmem:[#allocation125_spill] sm:$0xff] %v10851_v40 }
 0x176   :  { %v10853_v7 = vpop.f32.mrf.mxu0  ;;  %v10855_v12 = vpop.f32.mrf.mxu1  ;;  %8427 = vmatmul.mubr.msk.bf16.gmra.mxu0 %vm313_vm1, %v10860_v39  ;;  %8454 = vmatmul.mubr.msk.bf16.gmra.mxu1 %vm313_vm1, %v10860_v39 }
 0x177   :  { %16985 = vst [vmem:[#allocation126_spill] sm:$0xff] %v10853_v7  ;;  %16986 = vst [vmem:[#allocation127_spill] sm:$0xff] %v10855_v12  ;;  %1224 = vmatprep.mubr.bf16.mxu0 %v16962_v8  ;;  %1509 = vmatprep.mubr.bf16.mxu1 %v16962_v8 }
 0x178   :  { %v10868_v40 = vpop.f32.mrf.mxu0  ;;  %v10870_v7 = vpop.f32.mrf.mxu1 }
 0x179   :  { %16987 = vst [vmem:[#allocation128_spill] sm:$0xff] %v10868_v40  ;;  %16988 = vst [vmem:[#allocation129_spill] sm:$0xff] %v10870_v7 }
 0x17a   :  { %v10872_v12 = vpop.f32.mrf.mxu0  ;;  %v10874_v6 = vpop.f32.mrf.mxu1 }
 0x17b   :  { %16989 = vst [vmem:[#allocation130_spill] sm:$0xff] %v10872_v12  ;;  %16990 = vst [vmem:[#allocation131_spill] sm:$0xff] %v10874_v6 }
 0x17c   :  { %v10876_v5 = vpop.f32.mrf.mxu0  ;;  %v10878_v41 = vpop.f32.mrf.mxu1 }
 0x17d   :  { %16991 = vst [vmem:[#allocation132_spill] sm:$0xff] %v10876_v5  ;;  %16992 = vst [vmem:[#allocation133_spill] sm:$0xff] %v10878_v41 }
 0x17e   :  { %v10880_v42 = vpop.f32.mrf.mxu0  ;;  %v10882_v11 = vpop.f32.mrf.mxu1  ;;  %8428 = vmatmul.mubr.msk.bf16.gmra.mxu0 %vm313_vm1, %v10887_v38  ;;  %8455 = vmatmul.mubr.msk.bf16.gmra.mxu1 %vm313_vm1, %v10887_v38 }
 0x17f   :  { %16993 = vst [vmem:[#allocation134_spill] sm:$0xff] %v10880_v42  ;;  %16994 = vst [vmem:[#allocation135_spill] sm:$0xff] %v10882_v11  ;;  %1234 = vmatprep.mubr.bf16.mxu0 %v16962_v8  ;;  %1519 = vmatprep.mubr.bf16.mxu1 %v16962_v8 }
 0x180   :  { %v10895_v41 = vpop.f32.mrf.mxu0  ;;  %v10897_v42 = vpop.f32.mrf.mxu1 }
 0x181   :  { %16995 = vst [vmem:[#allocation136_spill] sm:$0xff] %v10895_v41  ;;  %16996 = vst [vmem:[#allocation137_spill] sm:$0xff] %v10897_v42 }
 0x182   :  { %v10899_v11 = vpop.f32.mrf.mxu0  ;;  %v10901_v5 = vpop.f32.mrf.mxu1 }
 0x183   :  { %16997 = vst [vmem:[#allocation138_spill] sm:$0xff] %v10899_v11  ;;  %16998 = vst [vmem:[#allocation139_spill] sm:$0xff] %v10901_v5 }
 0x184   :  { %v10903_v6 = vpop.f32.mrf.mxu0  ;;  %v10905_v12 = vpop.f32.mrf.mxu1 }
 0x185   :  { %16999 = vst [vmem:[#allocation140_spill] sm:$0xff] %v10903_v6  ;;  %17000 = vst [vmem:[#allocation141_spill] sm:$0xff] %v10905_v12 }
 0x186   :  { %v10907_v7 = vpop.f32.mrf.mxu0  ;;  %v10909_v40 = vpop.f32.mrf.mxu1  ;;  %8429 = vmatmul.mubr.msk.bf16.gmra.mxu0 %vm313_vm1, %v10914_v62  ;;  %8456 = vmatmul.mubr.msk.bf16.gmra.mxu1 %vm313_vm1, %v10914_v62 }
 0x187   :  { %17001 = vst [vmem:[#allocation142_spill] sm:$0xff] %v10907_v7  ;;  %17002 = vst [vmem:[#allocation143_spill] sm:$0xff] %v10909_v40  ;;  %1244 = vmatprep.mubr.bf16.mxu0 %v16962_v8  ;;  %1529 = vmatprep.mubr.bf16.mxu1 %v16962_v8 }
 0x188   :  { %v10922_v12 = vpop.f32.mrf.mxu0  ;;  %v10924_v7 = vpop.f32.mrf.mxu1 }
 0x189   :  { %17003 = vst [vmem:[#allocation144_spill] sm:$0xff] %v10922_v12  ;;  %17004 = vst [vmem:[#allocation145_spill] sm:$0xff] %v10924_v7 }
 0x18a   :  { %v10926_v40 = vpop.f32.mrf.mxu0  ;;  %v10928_v6 = vpop.f32.mrf.mxu1 }
 0x18b   :  { %17005 = vst [vmem:[#allocation146_spill] sm:$0xff] %v10926_v40  ;;  %17006 = vst [vmem:[#allocation147_spill] sm:$0xff] %v10928_v6 }
 0x18c   :  { %v10930_v5 = vpop.f32.mrf.mxu0  ;;  %v10932_v11 = vpop.f32.mrf.mxu1 }
 0x18d   :  { %17007 = vst [vmem:[#allocation148_spill] sm:$0xff] %v10930_v5  ;;  %17008 = vst [vmem:[#allocation149_spill] sm:$0xff] %v10932_v11 }
 0x18e   :  { %v10934_v42 = vpop.f32.mrf.mxu0  ;;  %v10936_v41 = vpop.f32.mrf.mxu1  ;;  %8430 = vmatmul.mubr.msk.bf16.gmra.mxu0 %vm313_vm1, %v10941_v61  ;;  %8457 = vmatmul.mubr.msk.bf16.gmra.mxu1 %vm313_vm1, %v10941_v61 }
 0x18f   :  { %17009 = vst [vmem:[#allocation150_spill] sm:$0xff] %v10934_v42  ;;  %17010 = vst [vmem:[#allocation151_spill] sm:$0xff] %v10936_v41  ;;  %1254 = vmatprep.mubr.bf16.mxu0 %v16962_v8  ;;  %1539 = vmatprep.mubr.bf16.mxu1 %v16962_v8 }
 0x190   :  { %v10949_v11 = vpop.f32.mrf.mxu0  ;;  %v10951_v42 = vpop.f32.mrf.mxu1 }
 0x191   :  { %17011 = vst [vmem:[#allocation152_spill] sm:$0xff] %v10949_v11  ;;  %17012 = vst [vmem:[#allocation153_spill] sm:$0xff] %v10951_v42 }
 0x192   :  { %v10953_v41 = vpop.f32.mrf.mxu0  ;;  %v10955_v5 = vpop.f32.mrf.mxu1 }
 0x193   :  { %17013 = vst [vmem:[#allocation154_spill] sm:$0xff] %v10953_v41  ;;  %17014 = vst [vmem:[#allocation155_spill] sm:$0xff] %v10955_v5 }
 0x194   :  { %v10957_v6 = vpop.f32.mrf.mxu0  ;;  %v10959_v40 = vpop.f32.mrf.mxu1 }
 0x195   :  { %17015 = vst [vmem:[#allocation156_spill] sm:$0xff] %v10957_v6  ;;  %17016 = vst [vmem:[#allocation157_spill] sm:$0xff] %v10959_v40 }
 0x196   :  { %v10961_v7 = vpop.f32.mrf.mxu0  ;;  %v10963_v12 = vpop.f32.mrf.mxu1  ;;  %8431 = vmatmul.mubr.msk.bf16.gmra.mxu0 %vm313_vm1, %v10968_v37  ;;  %8458 = vmatmul.mubr.msk.bf16.gmra.mxu1 %vm313_vm1, %v10968_v37 }
 0x197   :  { %17017 = vst [vmem:[#allocation158_spill] sm:$0xff] %v10961_v7  ;;  %17018 = vst [vmem:[#allocation159_spill] sm:$0xff] %v10963_v12  ;;  %1264 = vmatprep.mubr.bf16.mxu0 %v16962_v8  ;;  %1549 = vmatprep.mubr.bf16.mxu1 %v16962_v8 }
 0x198   :  { %v10976_v40 = vpop.f32.mrf.mxu0  ;;  %v10978_v7 = vpop.f32.mrf.mxu1 }
 0x199   :  { %17019 = vst [vmem:[#allocation160_spill] sm:$0xff] %v10976_v40  ;;  %17020 = vst [vmem:[#allocation161_spill] sm:$0xff] %v10978_v7 }
 0x19a   :  { %v10980_v12 = vpop.f32.mrf.mxu0  ;;  %v10982_v6 = vpop.f32.mrf.mxu1 }
 0x19b   :  { %17021 = vst [vmem:[#allocation162_spill] sm:$0xff] %v10980_v12  ;;  %17022 = vst [vmem:[#allocation163_spill] sm:$0xff] %v10982_v6 }
 0x19c   :  { %v10984_v5 = vpop.f32.mrf.mxu0  ;;  %v10986_v41 = vpop.f32.mrf.mxu1 }
 0x19d   :  { %17023 = vst [vmem:[#allocation164_spill] sm:$0xff] %v10984_v5  ;;  %17024 = vst [vmem:[#allocation165_spill] sm:$0xff] %v10986_v41 }
 0x19e   :  { %v10988_v42 = vpop.f32.mrf.mxu0  ;;  %v10990_v11 = vpop.f32.mrf.mxu1  ;;  %8432 = vmatmul.mubr.msk.bf16.gmra.mxu0 %vm313_vm1, %v10995_v36  ;;  %8459 = vmatmul.mubr.msk.bf16.gmra.mxu1 %vm313_vm1, %v10995_v36 }
 0x19f   :  { %17025 = vst [vmem:[#allocation166_spill] sm:$0xff] %v10988_v42  ;;  %17026 = vst [vmem:[#allocation167_spill] sm:$0xff] %v10990_v11  ;;  %1274 = vmatprep.mubr.bf16.mxu0 %v16962_v8  ;;  %1559 = vmatprep.mubr.bf16.mxu1 %v16962_v8 }
 0x1a0   :  { %v11003_v41 = vpop.f32.mrf.mxu0  ;;  %v11005_v42 = vpop.f32.mrf.mxu1 }
 0x1a1   :  { %17027 = vst [vmem:[#allocation168_spill] sm:$0xff] %v11003_v41  ;;  %17028 = vst [vmem:[#allocation169_spill] sm:$0xff] %v11005_v42 }
 0x1a2   :  { %v11007_v11 = vpop.f32.mrf.mxu0  ;;  %v11009_v5 = vpop.f32.mrf.mxu1 }
 0x1a3   :  { %17029 = vst [vmem:[#allocation170_spill] sm:$0xff] %v11007_v11  ;;  %17030 = vst [vmem:[#allocation171_spill] sm:$0xff] %v11009_v5 }
 0x1a4   :  { %v11011_v6 = vpop.f32.mrf.mxu0  ;;  %v11013_v12 = vpop.f32.mrf.mxu1 }
 0x1a5   :  { %17031 = vst [vmem:[#allocation172_spill] sm:$0xff] %v11011_v6  ;;  %17032 = vst [vmem:[#allocation173_spill] sm:$0xff] %v11013_v12 }
 0x1a6   :  { %v11015_v7 = vpop.f32.mrf.mxu0  ;;  %v11017_v40 = vpop.f32.mrf.mxu1  ;;  %8433 = vmatmul.mubr.msk.bf16.gmra.mxu0 %vm313_vm1, %v11022_v35  ;;  %8460 = vmatmul.mubr.msk.bf16.gmra.mxu1 %vm313_vm1, %v11022_v35 }
 0x1a7   :  { %17033 = vst [vmem:[#allocation174_spill] sm:$0xff] %v11015_v7  ;;  %17034 = vst [vmem:[#allocation175_spill] sm:$0xff] %v11017_v40  ;;  %1284 = vmatprep.mubr.bf16.mxu0 %v16962_v8  ;;  %1569 = vmatprep.mubr.bf16.mxu1 %v16962_v8 }
 0x1a8   :  { %v11030_v12 = vpop.f32.mrf.mxu0  ;;  %v11032_v7 = vpop.f32.mrf.mxu1 }
 0x1a9   :  { %17035 = vst [vmem:[#allocation176_spill] sm:$0xff] %v11030_v12  ;;  %17036 = vst [vmem:[#allocation177_spill] sm:$0xff] %v11032_v7  ;;  %v11058_v12 = vld [vmem:[%s16741_s1 + $0x58] sm:$0xff]  }
 0x1aa   :  { %v11034_v40 = vpop.f32.mrf.mxu0  ;;  %v11036_v6 = vpop.f32.mrf.mxu1 }
 0x1ab   :  { %17037 = vst [vmem:[#allocation178_spill] sm:$0xff] %v11034_v40  ;;  %17038 = vst [vmem:[#allocation179_spill] sm:$0xff] %v11036_v6 }
 0x1ac   :  { %v11038_v5 = vpop.f32.mrf.mxu0  ;;  %v11040_v11 = vpop.f32.mrf.mxu1 }
 0x1ad   :  { %17039 = vst [vmem:[#allocation180_spill] sm:$0xff] %v11038_v5  ;;  %17040 = vst [vmem:[#allocation181_spill] sm:$0xff] %v11040_v11 }
 0x1ae   :  { %v685_v42 = vpop.f32.mrf.mxu0  ;;  %v970_v41 = vpop.f32.mrf.mxu1  ;;  %8434 = vmatmul.mubr.msk.bf16.gmra.mxu0 %vm313_vm1, %v11045_v34  ;;  %8461 = vmatmul.mubr.msk.bf16.gmra.mxu1 %vm313_vm1, %v11045_v34 }
 0x1af   :  { %1294 = vmatprep.mubr.bf16.mxu0 %v16962_v8  ;;  %1579 = vmatprep.mubr.bf16.mxu1 %v16962_v8 }
 0x1b0   :  { %v686_v5 = vpop.f32.mrf.mxu0  ;;  %v971_v6 = vpop.f32.mrf.mxu1 }
 0x1b2   :  { %v687_v11 = vpop.f32.mrf.mxu0  ;;  %v972_v42 = vpop.f32.mrf.mxu1 }
 0x1b4   :  { %v688_v41 = vpop.f32.mrf.mxu0  ;;  %v973_v40 = vpop.f32.mrf.mxu1 }
 0x1b6   :  { %v11053_v7 = vpop.f32.mrf.mxu0  ;;  %8435 = vmatmul.mubr.msk.bf16.gmra.mxu0 %vm313_vm1, %v11058_v12  ;;  %v11062_v33 = vpop.f32.mrf.mxu1  ;;  %8462 = vmatmul.mubr.msk.bf16.gmra.mxu1 %vm313_vm1, %v11058_v12 }
 0x1b7   :  { %1304 = vmatprep.mubr.bf16.mxu0 %v16962_v8  ;;  %1589 = vmatprep.mubr.bf16.mxu1 %v16962_v8 }
 0x1b8   :  { %v11068_v40 = vpop.f32.mrf.mxu0  ;;  %v11070_v11 = vpop.f32.mrf.mxu1 }
 0x1ba   :  { %v11072_v6 = vpop.f32.mrf.mxu0  ;;  %v11074_v5 = vpop.f32.mrf.mxu1 }
 0x1bc   :  { %v11076_v42 = vpop.f32.mrf.mxu0  ;;  %v11078_v41 = vpop.f32.mrf.mxu1 }
 0x1be   :  { %v11080_v32 = vpop.f32.mrf.mxu0  ;;  %8436 = vmatmul.mubr.msk.bf16.gmra.mxu0 %vm313_vm1, %v11085_v31  ;;  %v11089_v30 = vpop.f32.mrf.mxu1  ;;  %8463 = vmatmul.mubr.msk.bf16.gmra.mxu1 %vm313_vm1, %v11085_v31 }
 0x1bf   :  { %1688 = vmatprep.mubr.bf16.mxu0 %v16962_v8  ;;  %1973 = vmatprep.mubr.bf16.mxu1 %v16962_v8 }
 0x1c0   :  { %v11095_v29 = vpop.f32.mrf.mxu0  ;;  %v11097_v28 = vpop.f32.mrf.mxu1 }
 0x1c2   :  { %v11099_v27 = vpop.f32.mrf.mxu0  ;;  %v11101_v26 = vpop.f32.mrf.mxu1 }
 0x1c4   :  { %v11103_v25 = vpop.f32.mrf.mxu0  ;;  %v11105_v24 = vpop.f32.mrf.mxu1 }
 0x1c6   :  { %v11107_v23 = vpop.f32.mrf.mxu0  ;;  %v11109_v22 = vpop.f32.mrf.mxu1  ;;  %8473 = vmatmul.mubr.msk.bf16.vlgmr.msra.gmra.mxu0 %vm313_vm1, %v10105_v21  ;;  %8500 = vmatmul.mubr.msk.bf16.vlgmr.msra.gmra.mxu1 %vm313_vm1, %v10105_v21  ;;  %v10106_v21 = vld [vmem:[%s16740_s0 + $0x10] sm:$0xff]  }
 0x1c7   :  { %1698 = vmatprep.mubr.bf16.mxu0 %v16962_v8  ;;  %1983 = vmatprep.mubr.bf16.mxu1 %v16962_v8 }
 0x1c8   :  { %v11118_v20 = vpop.f32.mrf.mxu0  ;;  %v11120_v19 = vpop.f32.mrf.mxu1 }
 0x1c9   :  { %17041 = vst [vmem:[#allocation182_spill] sm:$0xff] %v11118_v20  ;;  %17042 = vst [vmem:[#allocation183_spill] sm:$0xff] %v11120_v19 }
 0x1ca   :  { %v11122_v18 = vpop.f32.mrf.mxu0  ;;  %v11124_v17 = vpop.f32.mrf.mxu1 }
 0x1cb   :  { %17043 = vst [vmem:[#allocation184_spill] sm:$0xff] %v11122_v18  ;;  %17044 = vst [vmem:[#allocation185_spill] sm:$0xff] %v11124_v17 }
 0x1cc   :  { %v11126_v16 = vpop.f32.mrf.mxu0  ;;  %v11128_v15 = vpop.f32.mrf.mxu1 }
 0x1cd   :  { %17045 = vst [vmem:[#allocation186_spill] sm:$0xff] %v11126_v16  ;;  %17046 = vst [vmem:[#allocation187_spill] sm:$0xff] %v11128_v15 }
 0x1ce   :  { %v11130_v14 = vpop.f32.mrf.mxu0  ;;  %v11132_v13 = vpop.f32.mrf.mxu1  ;;  %8474 = vmatmul.mubr.msk.bf16.gmra.mxu0 %vm313_vm1, %v10106_v21  ;;  %8501 = vmatmul.mubr.msk.bf16.gmra.mxu1 %vm313_vm1, %v10106_v21  ;;  %v10107_v21 = vld [vmem:[%s16740_s0 + $0x18] sm:$0xff]  }
 0x1cf   :  { %17047 = vst [vmem:[#allocation188_spill] sm:$0xff] %v11130_v14  ;;  %17048 = vst [vmem:[#allocation189_spill] sm:$0xff] %v11132_v13  ;;  %1708 = vmatprep.mubr.bf16.mxu0 %v16962_v8  ;;  %1993 = vmatprep.mubr.bf16.mxu1 %v16962_v8 }
 0x1d0   :  { %v11141_v17 = vpop.f32.mrf.mxu0  ;;  %v11143_v16 = vpop.f32.mrf.mxu1 }
 0x1d1   :  { %17049 = vst [vmem:[#allocation190_spill] sm:$0xff] %v11141_v17  ;;  %17050 = vst [vmem:[#allocation191_spill] sm:$0xff] %v11143_v16 }
 0x1d2   :  { %v11145_v15 = vpop.f32.mrf.mxu0  ;;  %v11147_v14 = vpop.f32.mrf.mxu1 }
 0x1d3   :  { %17051 = vst [vmem:[#allocation192_spill] sm:$0xff] %v11145_v15  ;;  %17052 = vst [vmem:[#allocation193_spill] sm:$0xff] %v11147_v14 }
 0x1d4   :  { %v11149_v13 = vpop.f32.mrf.mxu0  ;;  %v11151_v18 = vpop.f32.mrf.mxu1 }
 0x1d5   :  { %17053 = vst [vmem:[#allocation194_spill] sm:$0xff] %v11149_v13  ;;  %17054 = vst [vmem:[#allocation195_spill] sm:$0xff] %v11151_v18 }
 0x1d6   :  { %v11153_v19 = vpop.f32.mrf.mxu0  ;;  %v11155_v20 = vpop.f32.mrf.mxu1  ;;  %8475 = vmatmul.mubr.msk.bf16.gmra.mxu0 %vm313_vm1, %v10107_v21  ;;  %8502 = vmatmul.mubr.msk.bf16.gmra.mxu1 %vm313_vm1, %v10107_v21  ;;  %v10108_v21 = vld [vmem:[%s16740_s0 + $0x20] sm:$0xff]  }
 0x1d7   :  { %17055 = vst [vmem:[#allocation196_spill] sm:$0xff] %v11153_v19  ;;  %17056 = vst [vmem:[#allocation197_spill] sm:$0xff] %v11155_v20  ;;  %1718 = vmatprep.mubr.bf16.mxu0 %v16962_v8  ;;  %2003 = vmatprep.mubr.bf16.mxu1 %v16962_v8 }
 0x1d8   :  { %v11164_v14 = vpop.f32.mrf.mxu0  ;;  %v11166_v13 = vpop.f32.mrf.mxu1 }
 0x1d9   :  { %17057 = vst [vmem:[#allocation198_spill] sm:$0xff] %v11164_v14  ;;  %17058 = vst [vmem:[#allocation199_spill] sm:$0xff] %v11166_v13 }
 0x1da   :  { %v11168_v18 = vpop.f32.mrf.mxu0  ;;  %v11170_v19 = vpop.f32.mrf.mxu1 }
 0x1db   :  { %17059 = vst [vmem:[#allocation200_spill] sm:$0xff] %v11168_v18  ;;  %17060 = vst [vmem:[#allocation201_spill] sm:$0xff] %v11170_v19 }
 0x1dc   :  { %v11172_v20 = vpop.f32.mrf.mxu0  ;;  %v11174_v15 = vpop.f32.mrf.mxu1 }
 0x1dd   :  { %17061 = vst [vmem:[#allocation202_spill] sm:$0xff] %v11172_v20  ;;  %17062 = vst [vmem:[#allocation203_spill] sm:$0xff] %v11174_v15 }
 0x1de   :  { %v11176_v16 = vpop.f32.mrf.mxu0  ;;  %v11178_v17 = vpop.f32.mrf.mxu1  ;;  %8476 = vmatmul.mubr.msk.bf16.gmra.mxu0 %vm313_vm1, %v10108_v21  ;;  %8503 = vmatmul.mubr.msk.bf16.gmra.mxu1 %vm313_vm1, %v10108_v21  ;;  %v10109_v21 = vld [vmem:[%s16740_s0 + $0x28] sm:$0xff]  }
 0x1df   :  { %17063 = vst [vmem:[#allocation204_spill] sm:$0xff] %v11176_v16  ;;  %17064 = vst [vmem:[#allocation205_spill] sm:$0xff] %v11178_v17  ;;  %1728 = vmatprep.mubr.bf16.mxu0 %v16962_v8  ;;  %2013 = vmatprep.mubr.bf16.mxu1 %v16962_v8 }
 0x1e0   :  { %v11187_v19 = vpop.f32.mrf.mxu0  ;;  %v11189_v20 = vpop.f32.mrf.mxu1 }
 0x1e1   :  { %17065 = vst [vmem:[#allocation206_spill] sm:$0xff] %v11187_v19  ;;  %17066 = vst [vmem:[#allocation207_spill] sm:$0xff] %v11189_v20 }
 0x1e2   :  { %v11191_v15 = vpop.f32.mrf.mxu0  ;;  %v11193_v16 = vpop.f32.mrf.mxu1 }
 0x1e3   :  { %17067 = vst [vmem:[#allocation208_spill] sm:$0xff] %v11191_v15  ;;  %17068 = vst [vmem:[#allocation209_spill] sm:$0xff] %v11193_v16 }
 0x1e4   :  { %v11195_v17 = vpop.f32.mrf.mxu0  ;;  %v11197_v18 = vpop.f32.mrf.mxu1 }
 0x1e5   :  { %17069 = vst [vmem:[#allocation210_spill] sm:$0xff] %v11195_v17  ;;  %17070 = vst [vmem:[#allocation211_spill] sm:$0xff] %v11197_v18 }
 0x1e6   :  { %v11199_v13 = vpop.f32.mrf.mxu0  ;;  %v11201_v14 = vpop.f32.mrf.mxu1  ;;  %8477 = vmatmul.mubr.msk.bf16.gmra.mxu0 %vm313_vm1, %v10109_v21  ;;  %8504 = vmatmul.mubr.msk.bf16.gmra.mxu1 %vm313_vm1, %v10109_v21  ;;  %v10110_v21 = vld [vmem:[%s16740_s0 + $0x30] sm:$0xff]  }
 0x1e7   :  { %17071 = vst [vmem:[#allocation212_spill] sm:$0xff] %v11199_v13  ;;  %17072 = vst [vmem:[#allocation213_spill] sm:$0xff] %v11201_v14  ;;  %1738 = vmatprep.mubr.bf16.mxu0 %v16962_v8  ;;  %2023 = vmatprep.mubr.bf16.mxu1 %v16962_v8 }
 0x1e8   :  { %v11210_v16 = vpop.f32.mrf.mxu0  ;;  %v11212_v17 = vpop.f32.mrf.mxu1 }
 0x1e9   :  { %17073 = vst [vmem:[#allocation214_spill] sm:$0xff] %v11210_v16  ;;  %17074 = vst [vmem:[#allocation215_spill] sm:$0xff] %v11212_v17 }
 0x1ea   :  { %v11214_v18 = vpop.f32.mrf.mxu0  ;;  %v11216_v13 = vpop.f32.mrf.mxu1 }
 0x1eb   :  { %17075 = vst [vmem:[#allocation216_spill] sm:$0xff] %v11214_v18  ;;  %17076 = vst [vmem:[#allocation217_spill] sm:$0xff] %v11216_v13 }
 0x1ec   :  { %v11218_v14 = vpop.f32.mrf.mxu0  ;;  %v11220_v15 = vpop.f32.mrf.mxu1 }
 0x1ed   :  { %17077 = vst [vmem:[#allocation218_spill] sm:$0xff] %v11218_v14  ;;  %17078 = vst [vmem:[#allocation219_spill] sm:$0xff] %v11220_v15 }
 0x1ee   :  { %v11222_v20 = vpop.f32.mrf.mxu0  ;;  %v11224_v19 = vpop.f32.mrf.mxu1  ;;  %8478 = vmatmul.mubr.msk.bf16.gmra.mxu0 %vm313_vm1, %v10110_v21  ;;  %8505 = vmatmul.mubr.msk.bf16.gmra.mxu1 %vm313_vm1, %v10110_v21  ;;  %v10111_v21 = vld [vmem:[%s16740_s0 + $0x38] sm:$0xff]  }
 0x1ef   :  { %17079 = vst [vmem:[#allocation220_spill] sm:$0xff] %v11222_v20  ;;  %17080 = vst [vmem:[#allocation221_spill] sm:$0xff] %v11224_v19  ;;  %1748 = vmatprep.mubr.bf16.mxu0 %v16962_v8  ;;  %2033 = vmatprep.mubr.bf16.mxu1 %v16962_v8 }
 0x1f0   :  { %v11233_v13 = vpop.f32.mrf.mxu0  ;;  %v11235_v14 = vpop.f32.mrf.mxu1 }
 0x1f1   :  { %17081 = vst [vmem:[#allocation222_spill] sm:$0xff] %v11233_v13  ;;  %17082 = vst [vmem:[#allocation223_spill] sm:$0xff] %v11235_v14 }
 0x1f2   :  { %v11237_v15 = vpop.f32.mrf.mxu0  ;;  %v11239_v20 = vpop.f32.mrf.mxu1 }
 0x1f3   :  { %17083 = vst [vmem:[#allocation224_spill] sm:$0xff] %v11237_v15  ;;  %17084 = vst [vmem:[#allocation225_spill] sm:$0xff] %v11239_v20 }
 0x1f4   :  { %v11241_v19 = vpop.f32.mrf.mxu0  ;;  %v11243_v18 = vpop.f32.mrf.mxu1 }
 0x1f5   :  { %17085 = vst [vmem:[#allocation226_spill] sm:$0xff] %v11241_v19  ;;  %17086 = vst [vmem:[#allocation227_spill] sm:$0xff] %v11243_v18 }
 0x1f6   :  { %v11245_v17 = vpop.f32.mrf.mxu0  ;;  %v11247_v16 = vpop.f32.mrf.mxu1  ;;  %8479 = vmatmul.mubr.msk.bf16.gmra.mxu0 %vm313_vm1, %v10111_v21  ;;  %8506 = vmatmul.mubr.msk.bf16.gmra.mxu1 %vm313_vm1, %v10111_v21 }
 0x1f7   :  { %17087 = vst [vmem:[#allocation228_spill] sm:$0xff] %v11245_v17  ;;  %17088 = vst [vmem:[#allocation229_spill] sm:$0xff] %v11247_v16  ;;  %1758 = vmatprep.mubr.bf16.mxu0 %v16962_v8  ;;  %2043 = vmatprep.mubr.bf16.mxu1 %v16962_v8 }
 0x1f8   :  { %v11256_v20 = vpop.f32.mrf.mxu0  ;;  %v11258_v19 = vpop.f32.mrf.mxu1 }
 0x1f9   :  { %17089 = vst [vmem:[#allocation230_spill] sm:$0xff] %v11258_v19 }
 0x1fa   :  { %v11260_v18 = vpop.f32.mrf.mxu0  ;;  %v11262_v17 = vpop.f32.mrf.mxu1 }
 0x1fb   :  { %17090 = vst [vmem:[#allocation231_spill] sm:$0xff] %v11260_v18  ;;  %17091 = vst [vmem:[#allocation232_spill] sm:$0xff] %v11262_v17 }
 0x1fc   :  { %v11264_v16 = vpop.f32.mrf.mxu0  ;;  %v11266_v15 = vpop.f32.mrf.mxu1 }
 0x1fd   :  { %17092 = vst [vmem:[#allocation233_spill] sm:$0xff] %v11264_v16  ;;  %17093 = vst [vmem:[#allocation234_spill] sm:$0xff] %v11266_v15 }
 0x1fe   :  { %v11268_v14 = vpop.f32.mrf.mxu0  ;;  %v11270_v13 = vpop.f32.mrf.mxu1  ;;  %8480 = vmatmul.mubr.msk.bf16.gmra.mxu0 %vm313_vm1, %v10407_v43  ;;  %8507 = vmatmul.mubr.msk.bf16.gmra.mxu1 %vm313_vm1, %v10407_v43 }
 0x1ff   :  { %17094 = vst [vmem:[#allocation235_spill] sm:$0xff] %v11268_v14  ;;  %17095 = vst [vmem:[#allocation236_spill] sm:$0xff] %v11270_v13  ;;  %1768 = vmatprep.mubr.bf16.mxu0 %v16962_v8  ;;  %2053 = vmatprep.mubr.bf16.mxu1 %v16962_v8 }
 0x200   :  { %v11278_v21 = vpop.f32.mrf.mxu0  ;;  %v11280_v17 = vpop.f32.mrf.mxu1 }
 0x201   :  { %17096 = vst [vmem:[#allocation237_spill] sm:$0xff] %v11280_v17 }
 0x202   :  { %v11282_v16 = vpop.f32.mrf.mxu0  ;;  %v11284_v15 = vpop.f32.mrf.mxu1 }
 0x203   :  { %17097 = vst [vmem:[#allocation238_spill] sm:$0xff] %v11282_v16  ;;  %17098 = vst [vmem:[#allocation239_spill] sm:$0xff] %v11284_v15 }
 0x204   :  { %v11286_v14 = vpop.f32.mrf.mxu0  ;;  %v11288_v13 = vpop.f32.mrf.mxu1 }
 0x205   :  { %17099 = vst [vmem:[#allocation240_spill] sm:$0xff] %v11286_v14  ;;  %17100 = vst [vmem:[#allocation241_spill] sm:$0xff] %v11288_v13 }
 0x206   :  { %v11290_v18 = vpop.f32.mrf.mxu0  ;;  %v11292_v19 = vpop.f32.mrf.mxu1  ;;  %8481 = vmatmul.mubr.msk.bf16.gmra.mxu0 %vm313_vm1, %v10418_v44  ;;  %8508 = vmatmul.mubr.msk.bf16.gmra.mxu1 %vm313_vm1, %v10418_v44 }
 0x207   :  { %17101 = vst [vmem:[#allocation242_spill] sm:$0xff] %v11290_v18  ;;  %17102 = vst [vmem:[#allocation243_spill] sm:$0xff] %v11292_v19  ;;  %1778 = vmatprep.mubr.bf16.mxu0 %v16962_v8  ;;  %2063 = vmatprep.mubr.bf16.mxu1 %v16962_v8 }
 0x208   :  { %v11300_v43 = vpop.f32.mrf.mxu0  ;;  %v11302_v15 = vpop.f32.mrf.mxu1 }
 0x209   :  { %17103 = vst [vmem:[#allocation244_spill] sm:$0xff] %v11300_v43  ;;  %17104 = vst [vmem:[#allocation245_spill] sm:$0xff] %v11302_v15 }
 0x20a   :  { %v11304_v14 = vpop.f32.mrf.mxu0  ;;  %v11306_v13 = vpop.f32.mrf.mxu1 }
 0x20b   :  { %17105 = vst [vmem:[#allocation246_spill] sm:$0xff] %v11304_v14  ;;  %17106 = vst [vmem:[#allocation247_spill] sm:$0xff] %v11306_v13 }
 0x20c   :  { %v11308_v18 = vpop.f32.mrf.mxu0  ;;  %v11310_v19 = vpop.f32.mrf.mxu1 }
 0x20d   :  { %17107 = vst [vmem:[#allocation248_spill] sm:$0xff] %v11308_v18  ;;  %17108 = vst [vmem:[#allocation249_spill] sm:$0xff] %v11310_v19 }
 0x20e   :  { %v11312_v16 = vpop.f32.mrf.mxu0  ;;  %v11314_v17 = vpop.f32.mrf.mxu1  ;;  %8482 = vmatmul.mubr.msk.bf16.gmra.mxu0 %vm313_vm1, %v10429_v45  ;;  %8509 = vmatmul.mubr.msk.bf16.gmra.mxu1 %vm313_vm1, %v10429_v45 }
 0x20f   :  { %17109 = vst [vmem:[#allocation250_spill] sm:$0xff] %v11312_v16  ;;  %17110 = vst [vmem:[#allocation251_spill] sm:$0xff] %v11314_v17  ;;  %1788 = vmatprep.mubr.bf16.mxu0 %v16962_v8  ;;  %2073 = vmatprep.mubr.bf16.mxu1 %v16962_v8 }
 0x210   :  { %v11322_v44 = vpop.f32.mrf.mxu0  ;;  %v11324_v13 = vpop.f32.mrf.mxu1 }
 0x211   :  { %17111 = vst [vmem:[#allocation252_spill] sm:$0xff] %v11322_v44  ;;  %17112 = vst [vmem:[#allocation253_spill] sm:$0xff] %v11324_v13 }
 0x212   :  { %v11326_v18 = vpop.f32.mrf.mxu0  ;;  %v11328_v19 = vpop.f32.mrf.mxu1 }
 0x213   :  { %17113 = vst [vmem:[#allocation254_spill] sm:$0xff] %v11326_v18  ;;  %17114 = vst [vmem:[#allocation255_spill] sm:$0xff] %v11328_v19 }
 0x214   :  { %v11330_v16 = vpop.f32.mrf.mxu0  ;;  %v11332_v17 = vpop.f32.mrf.mxu1 }
 0x215   :  { %17115 = vst [vmem:[#allocation256_spill] sm:$0xff] %v11330_v16 }
 0x216   :  { %v1180_v14 = vpop.f32.mrf.mxu0  ;;  %v1465_v15 = vpop.f32.mrf.mxu1  ;;  %8483 = vmatmul.mubr.msk.bf16.gmra.mxu0 %vm313_vm1, %v10440_v46  ;;  %8510 = vmatmul.mubr.msk.bf16.gmra.mxu1 %vm313_vm1, %v10440_v46 }
 0x217   :  { %1798 = vmatprep.mubr.bf16.mxu0 %v16962_v8  ;;  %2083 = vmatprep.mubr.bf16.mxu1 %v16962_v8 }
 0x218   :  { %v1181_v45 = vpop.f32.mrf.mxu0  ;;  %v1466_v18 = vpop.f32.mrf.mxu1 }
 0x21a   :  { %v1182_v13 = vpop.f32.mrf.mxu0  ;;  %v1467_v19 = vpop.f32.mrf.mxu1 }
 0x21c   :  { %v1183_v44 = vpop.f32.mrf.mxu0  ;;  %v1468_v16 = vpop.f32.mrf.mxu1 }
 0x21e   :  { %v11340_v43 = vpop.f32.mrf.mxu0  ;;  %v11342_v14 = vpop.f32.mrf.mxu1  ;;  %8484 = vmatmul.mubr.msk.bf16.gmra.mxu0 %vm313_vm1, %v10451_v47  ;;  %8511 = vmatmul.mubr.msk.bf16.gmra.mxu1 %vm313_vm1, %v10451_v47 }
 0x21f   :  { %17116 = vst [vmem:[#allocation257_spill] sm:$0xff] %v11342_v14  ;;  %1808 = vmatprep.mubr.bf16.mxu0 %v16962_v8  ;;  %2093 = vmatprep.mubr.bf16.mxu1 %v16962_v8 }
 0x220   :  { %v11350_v46 = vpop.f32.mrf.mxu0  ;;  %v11352_v13 = vpop.f32.mrf.mxu1 }
 0x221   :  { %17117 = vst [vmem:[#allocation258_spill] sm:$0xff] %v11350_v46  ;;  %17118 = vst [vmem:[#allocation259_spill] sm:$0xff] %v11352_v13 }
 0x222   :  { %v11354_v15 = vpop.f32.mrf.mxu0  ;;  %v11356_v16 = vpop.f32.mrf.mxu1 }
 0x223   :  { %17119 = vst [vmem:[#allocation260_spill] sm:$0xff] %v11354_v15  ;;  %17120 = vst [vmem:[#allocation261_spill] sm:$0xff] %v11356_v16 }
 0x224   :  { %v11358_v18 = vpop.f32.mrf.mxu0  ;;  %v11360_v19 = vpop.f32.mrf.mxu1 }
 0x225   :  { %17121 = vst [vmem:[#allocation262_spill] sm:$0xff] %v11358_v18  ;;  %17122 = vst [vmem:[#allocation263_spill] sm:$0xff] %v11360_v19 }
 0x226   :  { %v11362_v44 = vpop.f32.mrf.mxu0  ;;  %v11364_v45 = vpop.f32.mrf.mxu1  ;;  %8485 = vmatmul.mubr.msk.bf16.gmra.mxu0 %vm313_vm1, %v10474_v54  ;;  %8512 = vmatmul.mubr.msk.bf16.gmra.mxu1 %vm313_vm1, %v10474_v54 }
 0x227   :  { %17123 = vst [vmem:[#allocation264_spill] sm:$0xff] %v11362_v44  ;;  %17124 = vst [vmem:[#allocation265_spill] sm:$0xff] %v11364_v45  ;;  %1814 = vmatprep.mubr.bf16.mxu0 %v16962_v8  ;;  %2099 = vmatprep.mubr.bf16.mxu1 %v16962_v8 }
 0x228   :  { %v11372_v47 = vpop.f32.mrf.mxu0  ;;  %v11374_v16 = vpop.f32.mrf.mxu1 }
 0x229   :  { %17125 = vst [vmem:[#allocation266_spill] sm:$0xff] %v11372_v47  ;;  %17126 = vst [vmem:[#allocation267_spill] sm:$0xff] %v11374_v16 }
 0x22a   :  { %v11376_v18 = vpop.f32.mrf.mxu0  ;;  %v11378_v19 = vpop.f32.mrf.mxu1 }
 0x22b   :  { %17127 = vst [vmem:[#allocation268_spill] sm:$0xff] %v11376_v18  ;;  %17128 = vst [vmem:[#allocation269_spill] sm:$0xff] %v11378_v19 }
 0x22c   :  { %v11380_v44 = vpop.f32.mrf.mxu0  ;;  %v11382_v45 = vpop.f32.mrf.mxu1 }
 0x22d   :  { %17129 = vst [vmem:[#allocation270_spill] sm:$0xff] %v11380_v44  ;;  %17130 = vst [vmem:[#allocation271_spill] sm:$0xff] %v11382_v45 }
 0x22e   :  { %v11384_v15 = vpop.f32.mrf.mxu0  ;;  %v11386_v13 = vpop.f32.mrf.mxu1  ;;  %8486 = vmatmul.mubr.msk.bf16.gmra.mxu0 %vm313_vm1, %v10806_v0  ;;  %8513 = vmatmul.mubr.msk.bf16.gmra.mxu1 %vm313_vm1, %v10806_v0 }
 0x22f   :  { %17131 = vst [vmem:[#allocation272_spill] sm:$0xff] %v11384_v15  ;;  %17132 = vst [vmem:[#allocation273_spill] sm:$0xff] %v11386_v13  ;;  %1824 = vmatprep.mubr.bf16.mxu0 %v16962_v8  ;;  %2109 = vmatprep.mubr.bf16.mxu1 %v16962_v8 }
 0x230   :  { %v11394_v54 = vpop.f32.mrf.mxu0  ;;  %v11396_v19 = vpop.f32.mrf.mxu1 }
 0x231   :  { %17133 = vst [vmem:[#allocation274_spill] sm:$0xff] %v11394_v54  ;;  %17134 = vst [vmem:[#allocation275_spill] sm:$0xff] %v11396_v19 }
 0x232   :  { %v11398_v44 = vpop.f32.mrf.mxu0  ;;  %v11400_v45 = vpop.f32.mrf.mxu1 }
 0x233   :  { %17135 = vst [vmem:[#allocation276_spill] sm:$0xff] %v11398_v44  ;;  %17136 = vst [vmem:[#allocation277_spill] sm:$0xff] %v11400_v45 }
 0x234   :  { %v11402_v15 = vpop.f32.mrf.mxu0  ;;  %v11404_v13 = vpop.f32.mrf.mxu1 }
 0x235   :  { %17137 = vst [vmem:[#allocation278_spill] sm:$0xff] %v11402_v15  ;;  %17138 = vst [vmem:[#allocation279_spill] sm:$0xff] %v11404_v13 }
 0x236   :  { %v11406_v18 = vpop.f32.mrf.mxu0  ;;  %v11408_v16 = vpop.f32.mrf.mxu1  ;;  %8487 = vmatmul.mubr.msk.bf16.gmra.mxu0 %vm313_vm1, %v10833_v2  ;;  %8514 = vmatmul.mubr.msk.bf16.gmra.mxu1 %vm313_vm1, %v10833_v2 }
 0x237   :  { %17139 = vst [vmem:[#allocation280_spill] sm:$0xff] %v11406_v18  ;;  %17140 = vst [vmem:[#allocation281_spill] sm:$0xff] %v11408_v16  ;;  %1834 = vmatprep.mubr.bf16.mxu0 %v16962_v8  ;;  %2119 = vmatprep.mubr.bf16.mxu1 %v16962_v8 }
 0x238   :  { %v11416_v0 = vpop.f32.mrf.mxu0  ;;  %v11418_v45 = vpop.f32.mrf.mxu1 }
 0x239   :  { %17141 = vst [vmem:[#allocation282_spill] sm:$0xff] %v11416_v0  ;;  %17142 = vst [vmem:[#allocation283_spill] sm:$0xff] %v11418_v45 }
 0x23a   :  { %v11420_v15 = vpop.f32.mrf.mxu0  ;;  %v11422_v13 = vpop.f32.mrf.mxu1 }
 0x23b   :  { %17143 = vst [vmem:[#allocation284_spill] sm:$0xff] %v11420_v15  ;;  %17144 = vst [vmem:[#allocation285_spill] sm:$0xff] %v11422_v13 }
 0x23c   :  { %v11424_v18 = vpop.f32.mrf.mxu0  ;;  %v11426_v16 = vpop.f32.mrf.mxu1 }
 0x23d   :  { %17145 = vst [vmem:[#allocation286_spill] sm:$0xff] %v11424_v18  ;;  %17146 = vst [vmem:[#allocation287_spill] sm:$0xff] %v11426_v16 }
 0x23e   :  { %v11428_v44 = vpop.f32.mrf.mxu0  ;;  %v11430_v19 = vpop.f32.mrf.mxu1  ;;  %8488 = vmatmul.mubr.msk.bf16.gmra.mxu0 %vm313_vm1, %v10860_v39  ;;  %8515 = vmatmul.mubr.msk.bf16.gmra.mxu1 %vm313_vm1, %v10860_v39 }
 0x23f   :  { %17147 = vst [vmem:[#allocation288_spill] sm:$0xff] %v11428_v44  ;;  %17148 = vst [vmem:[#allocation289_spill] sm:$0xff] %v11430_v19  ;;  %1844 = vmatprep.mubr.bf16.mxu0 %v16962_v8  ;;  %2129 = vmatprep.mubr.bf16.mxu1 %v16962_v8 }
 0x240   :  { %v11438_v2 = vpop.f32.mrf.mxu0  ;;  %v11440_v13 = vpop.f32.mrf.mxu1 }
 0x241   :  { %17149 = vst [vmem:[#allocation290_spill] sm:$0xff] %v11438_v2  ;;  %17150 = vst [vmem:[#allocation291_spill] sm:$0xff] %v11440_v13  ;;  %v17287_v2 = vld [vmem:[#allocation210_spill] sm:$0xff] }
 0x242   :  { %v11442_v18 = vpop.f32.mrf.mxu0  ;;  %v11444_v16 = vpop.f32.mrf.mxu1 }
 0x243   :  { %17151 = vst [vmem:[#allocation292_spill] sm:$0xff] %v11442_v18  ;;  %17152 = vst [vmem:[#allocation293_spill] sm:$0xff] %v11444_v16 }
 0x244   :  { %v11446_v44 = vpop.f32.mrf.mxu0  ;;  %v11448_v19 = vpop.f32.mrf.mxu1 }
 0x245   :  { %17153 = vst [vmem:[#allocation294_spill] sm:$0xff] %v11446_v44  ;;  %17154 = vst [vmem:[#allocation295_spill] sm:$0xff] %v11448_v19 }
 0x246   :  { %v11450_v15 = vpop.f32.mrf.mxu0  ;;  %v11452_v45 = vpop.f32.mrf.mxu1  ;;  %8489 = vmatmul.mubr.msk.bf16.gmra.mxu0 %vm313_vm1, %v10887_v38  ;;  %8516 = vmatmul.mubr.msk.bf16.gmra.mxu1 %vm313_vm1, %v10887_v38 }
 0x247   :  { %17155 = vst [vmem:[#allocation296_spill] sm:$0xff] %v11450_v15  ;;  %17156 = vst [vmem:[#allocation297_spill] sm:$0xff] %v11452_v45  ;;  %1854 = vmatprep.mubr.bf16.mxu0 %v16962_v8  ;;  %2139 = vmatprep.mubr.bf16.mxu1 %v16962_v8 }
 0x248   :  { %v11460_v39 = vpop.f32.mrf.mxu0  ;;  %v11462_v16 = vpop.f32.mrf.mxu1 }
 0x249   :  { %17157 = vst [vmem:[#allocation298_spill] sm:$0xff] %v11460_v39  ;;  %17158 = vst [vmem:[#allocation299_spill] sm:$0xff] %v11462_v16  ;;  %v17284_v39 = vld [vmem:[#allocation209_spill] sm:$0xff] }
 0x24a   :  { %v11464_v44 = vpop.f32.mrf.mxu0  ;;  %v11466_v19 = vpop.f32.mrf.mxu1 }
 0x24b   :  { %17159 = vst [vmem:[#allocation300_spill] sm:$0xff] %v11464_v44  ;;  %17160 = vst [vmem:[#allocation301_spill] sm:$0xff] %v11466_v19 }
 0x24c   :  { %v11468_v15 = vpop.f32.mrf.mxu0  ;;  %v11470_v45 = vpop.f32.mrf.mxu1 }
 0x24d   :  { %17161 = vst [vmem:[#allocation302_spill] sm:$0xff] %v11468_v15  ;;  %17162 = vst [vmem:[#allocation303_spill] sm:$0xff] %v11470_v45 }
 0x24e   :  { %v11472_v18 = vpop.f32.mrf.mxu0  ;;  %v11474_v13 = vpop.f32.mrf.mxu1  ;;  %8490 = vmatmul.mubr.msk.bf16.gmra.mxu0 %vm313_vm1, %v10914_v62  ;;  %8517 = vmatmul.mubr.msk.bf16.gmra.mxu1 %vm313_vm1, %v10914_v62 }
 0x24f   :  { %17163 = vst [vmem:[#allocation304_spill] sm:$0xff] %v11472_v18  ;;  %17164 = vst [vmem:[#allocation305_spill] sm:$0xff] %v11474_v13  ;;  %1864 = vmatprep.mubr.bf16.mxu0 %v16962_v8  ;;  %2149 = vmatprep.mubr.bf16.mxu1 %v16962_v8 }
 0x250   :  { %v11482_v38 = vpop.f32.mrf.mxu0  ;;  %v11484_v19 = vpop.f32.mrf.mxu1 }
 0x251   :  { %17165 = vst [vmem:[#allocation306_spill] sm:$0xff] %v11482_v38  ;;  %17166 = vst [vmem:[#allocation307_spill] sm:$0xff] %v11484_v19  ;;  %v17283_v38 = vld [vmem:[#allocation35_spill] sm:$0xff] }
 0x252   :  { %v11486_v15 = vpop.f32.mrf.mxu0  ;;  %v11488_v45 = vpop.f32.mrf.mxu1 }
 0x253   :  { %17167 = vst [vmem:[#allocation308_spill] sm:$0xff] %v11486_v15  ;;  %17168 = vst [vmem:[#allocation309_spill] sm:$0xff] %v11488_v45 }
 0x254   :  { %v11490_v18 = vpop.f32.mrf.mxu0  ;;  %v11492_v13 = vpop.f32.mrf.mxu1 }
 0x255   :  { %17169 = vst [vmem:[#allocation310_spill] sm:$0xff] %v11490_v18  ;;  %17170 = vst [vmem:[#allocation311_spill] sm:$0xff] %v11492_v13 }
 0x256   :  { %v11494_v44 = vpop.f32.mrf.mxu0  ;;  %v11496_v16 = vpop.f32.mrf.mxu1  ;;  %8491 = vmatmul.mubr.msk.bf16.gmra.mxu0 %vm313_vm1, %v10941_v61  ;;  %8518 = vmatmul.mubr.msk.bf16.gmra.mxu1 %vm313_vm1, %v10941_v61 }
 0x257   :  { %17171 = vst [vmem:[#allocation312_spill] sm:$0xff] %v11494_v44  ;;  %17172 = vst [vmem:[#allocation313_spill] sm:$0xff] %v11496_v16  ;;  %1874 = vmatprep.mubr.bf16.mxu0 %v16962_v8  ;;  %2159 = vmatprep.mubr.bf16.mxu1 %v16962_v8 }
 0x258   :  { %v11504_v62 = vpop.f32.mrf.mxu0  ;;  %v11506_v45 = vpop.f32.mrf.mxu1 }
 0x259   :  { %17173 = vst [vmem:[#allocation314_spill] sm:$0xff] %v11504_v62  ;;  %17174 = vst [vmem:[#allocation315_spill] sm:$0xff] %v11506_v45 }
 0x25a   :  { %v11508_v18 = vpop.f32.mrf.mxu0  ;;  %v11510_v13 = vpop.f32.mrf.mxu1 }
 0x25b   :  { %17175 = vst [vmem:[#allocation316_spill] sm:$0xff] %v11508_v18  ;;  %17176 = vst [vmem:[#allocation317_spill] sm:$0xff] %v11510_v13 }
 0x25c   :  { %v11512_v44 = vpop.f32.mrf.mxu0  ;;  %v11514_v16 = vpop.f32.mrf.mxu1 }
 0x25d   :  { %17177 = vst [vmem:[#allocation318_spill] sm:$0xff] %v11512_v44  ;;  %17178 = vst [vmem:[#allocation319_spill] sm:$0xff] %v11514_v16 }
 0x25e   :  { %v11516_v15 = vpop.f32.mrf.mxu0  ;;  %v11518_v19 = vpop.f32.mrf.mxu1  ;;  %8492 = vmatmul.mubr.msk.bf16.gmra.mxu0 %vm313_vm1, %v10968_v37  ;;  %8519 = vmatmul.mubr.msk.bf16.gmra.mxu1 %vm313_vm1, %v10968_v37 }
 0x25f   :  { %17179 = vst [vmem:[#allocation320_spill] sm:$0xff] %v11516_v15  ;;  %17180 = vst [vmem:[#allocation321_spill] sm:$0xff] %v11518_v19  ;;  %1884 = vmatprep.mubr.bf16.mxu0 %v16962_v8  ;;  %2169 = vmatprep.mubr.bf16.mxu1 %v16962_v8 }
 0x260   :  { %v11526_v61 = vpop.f32.mrf.mxu0  ;;  %v11528_v13 = vpop.f32.mrf.mxu1 }
 0x261   :  { %17181 = vst [vmem:[#allocation322_spill] sm:$0xff] %v11526_v61  ;;  %17182 = vst [vmem:[#allocation323_spill] sm:$0xff] %v11528_v13 }
 0x262   :  { %v11530_v44 = vpop.f32.mrf.mxu0  ;;  %v11532_v16 = vpop.f32.mrf.mxu1 }
 0x263   :  { %17183 = vst [vmem:[#allocation324_spill] sm:$0xff] %v11530_v44  ;;  %17184 = vst [vmem:[#allocation325_spill] sm:$0xff] %v11532_v16 }
 0x264   :  { %v11534_v15 = vpop.f32.mrf.mxu0  ;;  %v11536_v19 = vpop.f32.mrf.mxu1 }
 0x265   :  { %17185 = vst [vmem:[#allocation326_spill] sm:$0xff] %v11534_v15  ;;  %17186 = vst [vmem:[#allocation327_spill] sm:$0xff] %v11536_v19 }
 0x266   :  { %v11538_v18 = vpop.f32.mrf.mxu0  ;;  %v11540_v45 = vpop.f32.mrf.mxu1  ;;  %8493 = vmatmul.mubr.msk.bf16.gmra.mxu0 %vm313_vm1, %v10995_v36  ;;  %8520 = vmatmul.mubr.msk.bf16.gmra.mxu1 %vm313_vm1, %v10995_v36  ;;  %v9602_v36 = vld [vmem:[%s16744_s4 + $0x1e0] ss:$12 sps:$4 sm:$0xff]  }
 0x267   :  { %17187 = vst [vmem:[#allocation328_spill] sm:$0xff] %v11538_v18  ;;  %17188 = vst [vmem:[#allocation329_spill] sm:$0xff] %v11540_v45  ;;  %1894 = vmatprep.mubr.bf16.mxu0 %v16962_v8  ;;  %2179 = vmatprep.mubr.bf16.mxu1 %v16962_v8 }
 0x268   :  { %v11548_v37 = vpop.f32.mrf.mxu0  ;;  %v11550_v16 = vpop.f32.mrf.mxu1 }
 0x269   :  { %17189 = vst [vmem:[#allocation330_spill] sm:$0xff] %v11548_v37  ;;  %17190 = vst [vmem:[#allocation331_spill] sm:$0xff] %v11550_v16  ;;  %v9605_v16 = vld [vmem:[%s16744_s4 + $0x1e8] ss:$12 sps:$4 sm:$0xff]  }
 0x26a   :  { %v11552_v15 = vpop.f32.mrf.mxu0  ;;  %v11554_v19 = vpop.f32.mrf.mxu1  ;;  %4525 = vmatpush1.bf16.msra.mxu1 %v9605_v16  ;;  %v9606_v16 = vld [vmem:[%s16744_s4 + $0x1c8] ss:$12 sps:$4 sm:$0xff]  }
 0x26b   :  { %17191 = vst [vmem:[#allocation332_spill] sm:$0xff] %v11552_v15  ;;  %17192 = vst [vmem:[#allocation333_spill] sm:$0xff] %v11554_v19  ;;  %4526 = vmatprep.subr.bf16.mxu1 %v16962_v8 }
 0x26c   :  { %v11556_v18 = vpop.f32.mrf.mxu0  ;;  %v11558_v45 = vpop.f32.mrf.mxu1 }
 0x26d   :  { %17193 = vst [vmem:[#allocation334_spill] sm:$0xff] %v11556_v18  ;;  %17194 = vst [vmem:[#allocation335_spill] sm:$0xff] %v11558_v45  ;;  %v9604_v18 = vld [vmem:[%s16744_s4 + $0x1e4] ss:$12 sps:$4 sm:$0xff]  }
 0x26e   :  { %v11560_v44 = vpop.f32.mrf.mxu0  ;;  %v11562_v13 = vpop.f32.mrf.mxu1  ;;  %8494 = vmatmul.mubr.msk.bf16.gmra.mxu0 %vm313_vm1, %v11022_v35  ;;  %8521 = vmatmul.mubr.msk.bf16.gmra.mxu1 %vm313_vm1, %v11022_v35 }
 0x26f   :  { %17195 = vst [vmem:[#allocation336_spill] sm:$0xff] %v11560_v44  ;;  %17196 = vst [vmem:[#allocation337_spill] sm:$0xff] %v11562_v13  ;;  %1904 = vmatprep.mubr.bf16.mxu0 %v16962_v8  ;;  %2189 = vmatprep.mubr.bf16.mxu1 %v16962_v8 }
 0x270   :  { %v11576_v44 = vpop.f32.mrf.mxu0  ;;  %v11578_v13 = vpop.f32.mrf.mxu1  ;;  %4391 = vmatprep.subr.bf16.mxu0 %v9604_v18 }
 0x271   :  { %17197 = vst [vmem:[#allocation338_spill] sm:$0xff] %v11576_v44  ;;  %17198 = vst [vmem:[#allocation339_spill] sm:$0xff] %v11578_v13  ;;  %4392 = vmatpush1.bf16.msra.mxu0 %v9602_v36  ;;  %v17280_v13 = vld [vmem:[#allocation34_spill] sm:$0xff]  ;;  %v17281_v44 = vld [vmem:[#allocation208_spill] sm:$0xff] }
 0x272   :  { %v11580_v45 = vpop.f32.mrf.mxu0  ;;  %v11582_v35 = vpop.f32.mrf.mxu1  ;;  %v11842_v62 = vadd.f32 %v17281_v44, %v17280_v13 }
 0x273   :  { %17199 = vst [vmem:[#allocation340_spill] sm:$0xff] %v11580_v45  ;;  %17200 = vst [vmem:[#allocation341_spill] sm:$0xff] %v11582_v35 }
 0x274   :  { %v11584_v19 = vpop.f32.mrf.mxu0  ;;  %v11586_v15 = vpop.f32.mrf.mxu1 }
 0x275   :  { %17201 = vst [vmem:[#allocation342_spill] sm:$0xff] %v11584_v19  ;;  %17202 = vst [vmem:[#allocation343_spill] sm:$0xff] %v11586_v15 }
 0x276   :  { %v11591_v37 = vpop.f32.mrf.mxu0  ;;  %v11593_v61 = vpop.f32.mrf.mxu1  ;;  %8495 = vmatmul.mubr.msk.bf16.gmra.mxu0 %vm313_vm1, %v11045_v34  ;;  %8522 = vmatmul.mubr.msk.bf16.gmra.mxu1 %vm313_vm1, %v11045_v34 }
 0x277   :  { %17203 = vst [vmem:[#allocation344_spill] sm:$0xff] %v11591_v37  ;;  %17204 = vst [vmem:[#allocation345_spill] sm:$0xff] %v11593_v61  ;;  %1914 = vmatprep.mubr.bf16.mxu0 %v16962_v8  ;;  %2199 = vmatprep.mubr.bf16.mxu1 %v16962_v8 }
 0x278   :  { %v11601_v18 = vpop.f32.mrf.mxu0  ;;  %v11603_v36 = vpop.f32.mrf.mxu1 }
 0x279   :  { %17205 = vst [vmem:[#allocation346_spill] sm:$0xff] %v11601_v18  ;;  %17206 = vst [vmem:[#allocation347_spill] sm:$0xff] %v11603_v36  ;;  %v1346_v36 = vadd.f32 %v11062_v33, %v10457_v49  ;;  %v1063_v18 = vadd.f32 %v11068_v40, %v10463_v50  ;;  %v11648_v49 = vadd.f32 %v11078_v41, %v10478_v56 }
 0x27a   :  { %v11606_v37 = vpop.f32.mrf.mxu0  ;;  %v11608_v61 = vpop.f32.mrf.mxu1  ;;  %v1071_v50 = vadd.f32 %v11080_v32, %v10480_v57  ;;  %v11670_v57 = vadd.f32 %v11099_v27, %v10494_v63  ;;  %v11688_v63 = vadd.f32 %v11105_v24, %v10503_v4  ;;  %v11692_v27 = vadd.f32 %v11107_v23, %v10507_v9  ;;  %v17219_v4 = vld [vmem:[#allocation9_spill] sm:$0xff]  ;;  %v17220_v24 = vld [vmem:[#allocation183_spill] sm:$0xff]  ;;  %v17221_v9 = vld [vmem:[#allocation10_spill] sm:$0xff] }
 0x27b   :  { %17207 = vst [vmem:[#allocation348_spill] sm:$0xff] %v11606_v37  ;;  %17208 = vst [vmem:[#allocation349_spill] sm:$0xff] %v11608_v61  ;;  %v1061_v37 = vadd.f32 %v11053_v7, %v10453_v48  ;;  %v11644_v48 = vadd.f32 %v11076_v42, %v10476_v55  ;;  %v11696_v32 = vadd.f32 %v11109_v22, %v10509_v10  ;;  %v17222_v23 = vld [vmem:[#allocation184_spill] sm:$0xff] }
 0x27c   :  { %v11610_v15 = vpop.f32.mrf.mxu0  ;;  %v11612_v19 = vpop.f32.mrf.mxu1  ;;  %17212 = vst [vmem:[#allocation353_spill] sm:$0xff] %v11648_v49  ;;  %v11708_v7 = vadd.f32 %v17220_v24, %v17219_v4  ;;  %v11712_v40 = vadd.f32 %v17222_v23, %v17221_v9  ;;  %v17225_v22 = vld [vmem:[#allocation12_spill] sm:$0xff]  ;;  %v17235_v4 = vld [vmem:[#allocation190_spill] sm:$0xff]  ;;  %v17236_v9 = vld [vmem:[#allocation17_spill] sm:$0xff] }
 0x27d   :  { %17209 = vst [vmem:[#allocation350_spill] sm:$0xff] %v11610_v15  ;;  %17210 = vst [vmem:[#allocation351_spill] sm:$0xff] %v11612_v19  ;;  %v9608_v19 = vld [vmem:[%s16744_s4 + $0x1cc] ss:$12 sps:$4 sm:$0xff]   ;;  %v17237_v23 = vld [vmem:[#allocation191_spill] sm:$0xff] }
 0x27e   :  { %v1306_v34 = vpop.f32.mrf.mxu0  ;;  %v1591_v35 = vpop.f32.mrf.mxu1  ;;  %8496 = vmatmul.mubr.msk.bf16.gmra.mxu0 %vm313_vm1, %v11058_v12  ;;  %8523 = vmatmul.mubr.msk.bf16.gmra.mxu1 %vm313_vm1, %v11058_v12  ;;  %17211 = vst [vmem:[#allocation352_spill] sm:$0xff] %v11644_v48  ;;  %v17272_v48 = vld [vmem:[#allocation204_spill] sm:$0xff] }
 0x27f   :  { %1924 = vmatprep.mubr.bf16.mxu0 %v16962_v8  ;;  %2209 = vmatprep.mubr.bf16.mxu1 %v16962_v8  ;;  %v9609_v35 = vld [vmem:[%s16744_s4 + $0x1d0] ss:$12 sps:$4 sm:$0xff]  }
 0x280   :  { %v1307_v34 = vpop.f32.mrf.mxu0  ;;  %v1592_v15 = vpop.f32.mrf.mxu1  ;;  %4393 = vmatprep.subr.bf16.mxu0 %v9608_v19  ;;  %4527 = vmatpush1.bf16.msra.mxu1 %v9609_v35  ;;  %v17228_v35 = vld [vmem:[#allocation13_spill] sm:$0xff] }
 0x281   :  { %4394 = vmatpush1.bf16.msra.mxu0 %v9606_v16  ;;  %4528 = vmatprep.subr.bf16.mxu1 %v16962_v8  ;;  %v1348_v34 = vadd.f32 %v11070_v11, %v10465_v51  ;;  %v1065_v15 = vadd.f32 %v11072_v6, %v10467_v52  ;;  %v1350_v16 = vadd.f32 %v11074_v5, %v10469_v53  ;;  %v17223_v11 = vld [vmem:[#allocation11_spill] sm:$0xff]  ;;  %v17224_v6 = vld [vmem:[#allocation185_spill] sm:$0xff]  ;;  %v17226_v5 = vld [vmem:[#allocation186_spill] sm:$0xff] }
 0x282   :  { %v1308_v12 = vpop.f32.mrf.mxu0  ;;  %v1593_v61 = vpop.f32.mrf.mxu1  ;;  %v11654_v51 = vadd.f32 %v11089_v30, %v10484_v58  ;;  %v11658_v52 = vadd.f32 %v11095_v29, %v10490_v59  ;;  %v11662_v53 = vadd.f32 %v11097_v28, %v10492_v60  ;;  %v2420_v59 = vlaneseq }
 0x283   :  { %v11680_v60 = vadd.f32 %v11101_v26, %v10496_v1  ;;  %v11684_v28 = vadd.f32 %v11103_v25, %v10501_v3  ;;  %v17215_v1 = vld [vmem:[#allocation8_spill] sm:$0xff]  ;;  %v17216_v26 = vld [vmem:[#allocation182_spill] sm:$0xff]  ;;  %v11716_v10 = vadd.f32 %v17224_v6, %v17223_v11  ;;  %v11720_v42 = vadd.f32 %v17226_v5, %v17225_v22  ;;  %v17229_v12 = vld [vmem:[#allocation187_spill] sm:$0xff] }
 0x284   :  { %v1309_v19 = vpop.f32.mrf.mxu0  ;;  %v1594_v61 = vpop.f32.mrf.mxu1  ;;  %v11700_v33 = vadd.f32 %v17216_v26, %v17215_v1  ;;  %v11740_v1 = vshrl.u32 %v2420_v59, 7  ;;  %v17234_v26 = vld [vmem:[#allocation16_spill] sm:$0xff]  ;;  %v11748_v11 = vadd.f32 %v17237_v23, %v17236_v9 }
 0x285   :  { %17227 = vst [vmem:[#allocation9_spill] sm:$0xff] %v11720_v42  ;;  %v17230_v19 = vld [vmem:[#allocation14_spill] sm:$0xff]  ;;  %v17231_v61 = vld [vmem:[#allocation188_spill] sm:$0xff]  ;;  %v11744_v24 = vadd.f32 %v17235_v4, %v17234_v26  ;;  %v17256_v42 = vld [vmem:[#allocation25_spill] sm:$0xff] }
 0x286   :  { %v1690_v55 = vpop.f32.mrf.mxu0  ;;  %8497 = vmatmul.mubr.msk.bf16.gmra.mxu0 %vm313_vm1, %v11085_v31  ;;  %v1975_v56 = vpop.f32.mrf.mxu1  ;;  %8524 = vmatmul.mubr.msk.bf16.gmra.mxu1 %vm313_vm1, %v11085_v31  ;;  %v17243_v59 = vld [vmem:[#allocation192_spill] sm:$0xff]  ;;  %v17247_v4 = vld [vmem:[#allocation194_spill] sm:$0xff]  ;;  %17282 = vst [vmem:[#allocation188_spill] sm:$0xff] %v11842_v62  ;;  %v17333_v62 = vld [vmem:[#allocation225_spill] sm:$0xff] }
 0x287   :  { %v11672_v58 = vadd.f32 %v1690_v55, %v1061_v37  ;;  %v11674_v29 = vadd.f32 %v1975_v56, %v1346_v36  ;;  %1934 = vmatprep.mubr.bf16.mxu0 %v16962_v8  ;;  %2219 = vmatprep.mubr.bf16.mxu1 %v16962_v8  ;;  %v9612_v36 = vld [vmem:[%s16744_s4 + $0x1b4] ss:$12 sps:$4 sm:$0xff]   ;;  %v11734_v55 = vadd.f32 %v17231_v61, %v17230_v19  ;;  %v17246_v26 = vld [vmem:[#allocation20_spill] sm:$0xff] }
 0x288   :  { %v1692_v30 = vpop.f32.mrf.mxu0  ;;  %v1977_v31 = vpop.f32.mrf.mxu1  ;;  %v17232_v56 = vld [vmem:[#allocation15_spill] sm:$0xff]  ;;  %4395 = vmatprep.subr.bf16.mxu0 %v9612_v36  ;;  %v11768_v9 = vadd.f32 %v17247_v4, %v17246_v26  ;;  %v17251_v23 = vld [vmem:[#allocation196_spill] sm:$0xff] }
 0x289   :  { %17213 = vst [vmem:[#allocation354_spill] sm:$0xff] %v11672_v58  ;;  %17214 = vst [vmem:[#allocation355_spill] sm:$0xff] %v11674_v29  ;;  %v11702_v3 = vadd.f32 %v1692_v30, %v1063_v18  ;;  %v11704_v25 = vadd.f32 %v1977_v31, %v1348_v34  ;;  %v9610_v18 = vld [vmem:[%s16744_s4 + $0x1b0] ss:$12 sps:$4 sm:$0xff]   ;;  %v11730_v34 = vadd.f32 %v17229_v12, %v17228_v35  ;;  %v17244_v61 = vld [vmem:[#allocation19_spill] sm:$0xff] }
 0x28a   :  { %v1694_v41 = vpop.f32.mrf.mxu0  ;;  %v1979_v37 = vpop.f32.mrf.mxu1  ;;  %v17233_v30 = vld [vmem:[#allocation189_spill] sm:$0xff]  ;;  %v17242_v12 = vld [vmem:[#allocation18_spill] sm:$0xff]  ;;  %4396 = vmatpush1.bf16.msra.mxu0 %v9610_v18  ;;  %v17254_v58 = vld [vmem:[#allocation24_spill] sm:$0xff] }
 0x28b   :  { %17217 = vst [vmem:[#allocation8_spill] sm:$0xff] %v11702_v3  ;;  %17218 = vst [vmem:[#allocation182_spill] sm:$0xff] %v11704_v25  ;;  %v11738_v31 = vadd.f32 %v17233_v30, %v17232_v56  ;;  %v11750_v6 = vadd.f32 %v1694_v41, %v1065_v15  ;;  %v11752_v22 = vadd.f32 %v1979_v37, %v1350_v16  ;;  %v17245_v56 = vld [vmem:[#allocation193_spill] sm:$0xff]  ;;  %v17249_v16 = vld [vmem:[#allocation195_spill] sm:$0xff] }
 0x28c   :  { %v11754_v5 = vpop.f32.mrf.mxu0  ;;  %v11756_v35 = vpop.f32.mrf.mxu1  ;;  %v11760_v19 = vadd.f32 %v17243_v59, %v17242_v12  ;;  %v11764_v30 = vadd.f32 %v17245_v56, %v17244_v61  ;;  %v17248_v15 = vld [vmem:[#allocation21_spill] sm:$0xff]  ;;  %v17250_v37 = vld [vmem:[#allocation22_spill] sm:$0xff]  ;;  %v17257_v26 = vld [vmem:[#allocation199_spill] sm:$0xff] }
 0x28d   :  { %17238 = vst [vmem:[#allocation183_spill] sm:$0xff] %v11750_v6  ;;  %17239 = vst [vmem:[#allocation10_spill] sm:$0xff] %v11752_v22  ;;  %v11772_v41 = vadd.f32 %v17249_v16, %v17248_v15  ;;  %v11776_v36 = vadd.f32 %v17251_v23, %v17250_v37  ;;  %v17252_v6 = vld [vmem:[#allocation23_spill] sm:$0xff]  ;;  %v17253_v12 = vld [vmem:[#allocation197_spill] sm:$0xff]  ;;  %v11788_v4 = vadd.f32 %v17257_v26, %v17256_v42  ;;  %v11795_v37 = vsub.s32 2, %v11740_v1 }
 0x28e   :  { %17240 = vst [vmem:[#allocation184_spill] sm:$0xff] %v11754_v5  ;;  %17241 = vst [vmem:[#allocation11_spill] sm:$0xff] %v11756_v35  ;;  %v11780_v59 = vadd.f32 %v17253_v12, %v17252_v6  ;;  %v17255_v61 = vld [vmem:[#allocation198_spill] sm:$0xff]  ;;  %v1700_v35 = vpop.f32.mrf.mxu0  ;;  %v1985_v15 = vpop.f32.mrf.mxu1  ;;  %v17259_v18 = vld [vmem:[#allocation200_spill] sm:$0xff]  ;;  %v11798_v6 = vsub.s32 3, %v11740_v1 }
 0x28f   :  { %v11784_v56 = vadd.f32 %v17255_v61, %v17254_v58  ;;  %v17258_v16 = vld [vmem:[#allocation26_spill] sm:$0xff]  ;;  %17260 = vst [vmem:[#allocation185_spill] sm:$0xff] %v11795_v37  ;;  %v11800_v23 = vadd.f32 %v1700_v35, %v1071_v50  ;;  %v17263_v58 = vld [vmem:[#allocation27_spill] sm:$0xff]  ;;  %v17264_v12 = vld [vmem:[#allocation201_spill] sm:$0xff] }
 0x290   :  { %v11792_v49 = vadd.f32 %v17259_v18, %v17258_v16  ;;  %17261 = vst [vmem:[#allocation12_spill] sm:$0xff] %v11798_v6  ;;  %v11804_v61 = vadd.f32 %v17264_v12, %v17263_v58  ;;  %v17265_v42 = vld [vmem:[#allocation28_spill] sm:$0xff]  ;;  %v17266_v26 = vld [vmem:[#allocation202_spill] sm:$0xff]  ;;  %v17268_v25 = vld [vmem:[#allocation29_spill] sm:$0xff]  ;;  %v1702_v35 = vpop.f32.mrf.mxu0  ;;  %v1987_v58 = vpop.f32.mrf.mxu1 }
 0x291   :  { %17262 = vst [vmem:[#allocation186_spill] sm:$0xff] %v11800_v23  ;;  %v11808_v22 = vadd.f32 %v17266_v26, %v17265_v42  ;;  %v17269_v5 = vld [vmem:[#allocation203_spill] sm:$0xff]  ;;  %v17271_v18 = vld [vmem:[#allocation30_spill] sm:$0xff]  ;;  %v17274_v26 = vld [vmem:[#allocation205_spill] sm:$0xff] }
 0x292   :  { %v11812_v16 = vadd.f32 %v17269_v5, %v17268_v25  ;;  %v11816_v3 = vadd.f32 %v17272_v48, %v17271_v18  ;;  %v11821_v50 = vld [vmem:[%s16743_s3] ss:$4 sm:$0xf]  ;;  %v17276_v5 = vld [vmem:[#allocation206_spill] sm:$0xff]  ;;  %v2236_v48 = vadd.f32 %v1985_v15, %v11654_v51  ;;  %v2237_v18 = vadd.f32 %v1987_v58, %v11662_v53  ;;  %v17278_v23 = vld [vmem:[#allocation33_spill] sm:$0xff]  ;;  %v1989_v51 = vpop.f32.mrf.mxu1 }
 0x293   :  { %17267 = vst [vmem:[#allocation13_spill] sm:$0xff] %v11808_v22  ;;  %v9613_v12 = vld [vmem:[%s16744_s4 + $0x1b8] ss:$12 sps:$4 sm:$0xff]   ;;  %v17275_v25 = vld [vmem:[#allocation32_spill] sm:$0xff]  ;;  %v17289_v53 = vld [vmem:[#allocation37_spill] sm:$0xff]  ;;  %v11862_v13 = vrot.slane %v11821_v50, %v11795_v37  ;;  %v11866_v44 = vrot.slane %v11821_v50, %v11798_v6 }
 0x294   :  { %17270 = vst [vmem:[#allocation187_spill] sm:$0xff] %v11812_v16  ;;  %v17273_v42 = vld [vmem:[#allocation31_spill] sm:$0xff]  ;;  %v11832_v16 = vadd.f32 %v17276_v5, %v17275_v25  ;;  %v1704_v5 = vpop.f32.mrf.mxu0  ;;  %4529 = vmatpush1.bf16.msra.mxu1 %v9613_v12  ;;  %v17298_v12 = vld [vmem:[#allocation40_spill] sm:$0xff] }
 0x295   :  { %v11828_v22 = vadd.f32 %v17274_v26, %v17273_v42  ;;  %v17279_v29 = vld [vmem:[#allocation207_spill] sm:$0xff]  ;;  %v11846_v42 = vadd.f32 %v17284_v39, %v17283_v38  ;;  %v17286_v26 = vld [vmem:[#allocation36_spill] sm:$0xff]  ;;  %4530 = vmatprep.subr.bf16.mxu1 %v16962_v8  ;;  %v17296_v39 = vld [vmem:[#allocation213_spill] sm:$0xff]  ;;  %v11882_v54 = vadd.f32 %v1704_v5, %v11670_v57 }
 0x296   :  { %17277 = vst [vmem:[#allocation14_spill] sm:$0xff] %v11832_v16  ;;  %v11838_v45 = vadd.f32 %v17279_v29, %v17278_v23  ;;  %v11850_v25 = vadd.f32 %v17287_v2, %v17286_v26  ;;  %v17290_v15 = vld [vmem:[#allocation211_spill] sm:$0xff]  ;;  %v17292_v29 = vld [vmem:[#allocation38_spill] sm:$0xff]  ;;  %v17293_v23 = vld [vmem:[#allocation212_spill] sm:$0xff]  ;;  %v1706_v47 = vpop.f32.mrf.mxu0 }
 0x297   :  { %17285 = vst [vmem:[#allocation15_spill] sm:$0xff] %v11846_v42  ;;  %v11854_v58 = vadd.f32 %v17290_v15, %v17289_v53  ;;  %v11858_v0 = vadd.f32 %v17293_v23, %v17292_v29  ;;  %v17295_v2 = vld [vmem:[#allocation39_spill] sm:$0xff]  ;;  %v17299_v26 = vld [vmem:[#allocation214_spill] sm:$0xff]  ;;  %v17301_v15 = vld [vmem:[#allocation41_spill] sm:$0xff] }
 0x298   :  { %17288 = vst [vmem:[#allocation189_spill] sm:$0xff] %v11850_v25  ;;  %v11871_v38 = vadd.f32 %v17296_v39, %v17295_v2  ;;  %v11875_v53 = vadd.f32 %v17299_v26, %v17298_v12  ;;  %v17302_v29 = vld [vmem:[#allocation215_spill] sm:$0xff]  ;;  %17304 = vst [vmem:[#allocation192_spill] sm:$0xff] %v11882_v54  ;;  %v17305_v25 = vld [vmem:[#allocation42_spill] sm:$0xff]  ;;  %v2450_v12 = vadd.f32 %v11862_v13, %v2236_v48 }
 0x299   :  { %17291 = vst [vmem:[#allocation16_spill] sm:$0xff] %v11854_v58  ;;  %17294 = vst [vmem:[#allocation190_spill] sm:$0xff] %v11858_v0  ;;  %v11879_v23 = vadd.f32 %v17302_v29, %v17301_v15  ;;  %v1991_v0 = vpop.f32.mrf.mxu1  ;;  %v17306_v58 = vld [vmem:[#allocation216_spill] sm:$0xff]  ;;  %v17308_v16 = vld [vmem:[#allocation43_spill] sm:$0xff]  ;;  %v2451_v26 = vadd.f32 %v11866_v44, %v2237_v18 }
 0x29a   :  { %17297 = vst [vmem:[#allocation17_spill] sm:$0xff] %v11871_v38  ;;  %17300 = vst [vmem:[#allocation191_spill] sm:$0xff] %v11875_v53  ;;  %v11886_v42 = vadd.f32 %v17306_v58, %v17305_v25  ;;  %v17309_v2 = vld [vmem:[#allocation217_spill] sm:$0xff]  ;;  %v17311_v53 = vld [vmem:[#allocation44_spill] sm:$0xff]  ;;  %v2241_v25 = vadd.f32 %v1991_v0, %v11688_v63  ;;  %v1710_v58 = vpop.f32.mrf.mxu0 }
 0x29b   :  { %17303 = vst [vmem:[#allocation18_spill] sm:$0xff] %v11879_v23  ;;  %v11890_v39 = vadd.f32 %v17309_v2, %v17308_v16  ;;  %v17312_v15 = vld [vmem:[#allocation218_spill] sm:$0xff]  ;;  %v17314_v57 = vld [vmem:[#allocation45_spill] sm:$0xff]  ;;  %v17315_v5 = vld [vmem:[#allocation219_spill] sm:$0xff]  ;;  %v2240_v23 = vadd.f32 %v1989_v51, %v11680_v60 }
 0x29c   :  { %17307 = vst [vmem:[#allocation19_spill] sm:$0xff] %v11886_v42  ;;  %v11896_v29 = vadd.f32 %v17312_v15, %v17311_v53  ;;  %v11900_v54 = vadd.f32 %v17315_v5, %v17314_v57  ;;  %v1995_v42 = vpop.f32.mrf.mxu1  ;;  %v17317_v16 = vld [vmem:[#allocation46_spill] sm:$0xff]  ;;  %v17318_v2 = vld [vmem:[#allocation220_spill] sm:$0xff]  ;;  %v17320_v48 = vld [vmem:[#allocation47_spill] sm:$0xff] }
 0x29d   :  { %17310 = vst [vmem:[#allocation193_spill] sm:$0xff] %v11890_v39  ;;  %v11906_v39 = vadd.f32 %v17318_v2, %v17317_v16  ;;  %v17321_v18 = vld [vmem:[#allocation221_spill] sm:$0xff]  ;;  %v17323_v53 = vld [vmem:[#allocation48_spill] sm:$0xff]  ;;  %v17324_v15 = vld [vmem:[#allocation222_spill] sm:$0xff] }
 0x29e   :  { %17313 = vst [vmem:[#allocation20_spill] sm:$0xff] %v11896_v29  ;;  %17316 = vst [vmem:[#allocation194_spill] sm:$0xff] %v11900_v54  ;;  %v11910_v38 = vadd.f32 %v17321_v18, %v17320_v48  ;;  %v11914_v29 = vadd.f32 %v17324_v15, %v17323_v53  ;;  %v17326_v57 = vld [vmem:[#allocation49_spill] sm:$0xff]  ;;  %v17327_v5 = vld [vmem:[#allocation223_spill] sm:$0xff]  ;;  %v11938_v53 = vsub.s32 1, %v11740_v1  ;;  %v1712_v15 = vpop.f32.mrf.mxu0 }
 0x29f   :  { %17319 = vst [vmem:[#allocation21_spill] sm:$0xff] %v11906_v39  ;;  %v11918_v54 = vadd.f32 %v17327_v5, %v17326_v57  ;;  %v17329_v60 = vld [vmem:[#allocation50_spill] sm:$0xff]  ;;  %v17330_v0 = vld [vmem:[#allocation224_spill] sm:$0xff]  ;;  %v17332_v51 = vld [vmem:[#allocation51_spill] sm:$0xff]  ;;  %v1997_v57 = vpop.f32.mrf.mxu1  ;;  %v2642_v5 = vmax.f32 %v2450_v12, 0.0 }
 0x2a0   :  { %17322 = vst [vmem:[#allocation195_spill] sm:$0xff] %v11910_v38  ;;  %17325 = vst [vmem:[#allocation22_spill] sm:$0xff] %v11914_v29  ;;  %v11922_v63 = vadd.f32 %v17330_v0, %v17329_v60  ;;  %v11926_v16 = vadd.f32 %v17333_v62, %v17332_v51  ;;  %v17335_v2 = vld [vmem:[#allocation52_spill] sm:$0xff]  ;;  %v17336_v39 = vld [vmem:[#allocation226_spill] sm:$0xff]  ;;  %v2643_v60 = vmax.f32 %v2451_v26, 0.0  ;;  %v11941_v0 = vadd.f32 %v1710_v58, %v11692_v27  ;;  %v1714_v12 = vpop.f32.mrf.mxu0 }
 0x2a1   :  { %17328 = vst [vmem:[#allocation196_spill] sm:$0xff] %v11918_v54  ;;  %v11930_v48 = vadd.f32 %v17336_v39, %v17335_v2  ;;  %v11935_v18 = vld [vmem:[%s16743_s3 + $0x1] ss:$4 sm:$0xf]  ;;  %17338 = vst [vmem:[#allocation198_spill] sm:$0xff] %v11938_v53  ;;  %v11944_v62 = vadd.f32 %v1712_v15, %v11700_v33  ;;  %v17341_v39 = vld [vmem:[#allocation53_spill] sm:$0xff]  ;;  %v2455_v54 = vadd.f32 %v11866_v44, %v2241_v25  ;;  %v1999_v26 = vpop.f32.mrf.mxu1 }
 0x2a2   :  { %17331 = vst [vmem:[#allocation23_spill] sm:$0xff] %v11922_v63  ;;  %17334 = vst [vmem:[#allocation197_spill] sm:$0xff] %v11926_v16  ;;  %v17342_v51 = vld [vmem:[#allocation227_spill] sm:$0xff]  ;;  %v17345_v29 = vld [vmem:[#allocation228_spill] sm:$0xff]  ;;  %v2454_v63 = vadd.f32 %v11862_v13, %v2240_v23  ;;  %v11963_v33 = vrot.slane %v11935_v18, %v11795_v37  ;;  %v11967_v58 = vrot.slane %v11935_v18, %v11798_v6  ;;  %v11987_v14 = vpop.f32.mrf.mxu0 }
 0x2a3   :  { %17337 = vst [vmem:[#allocation24_spill] sm:$0xff] %v11930_v48  ;;  %17339 = vst [vmem:[#allocation25_spill] sm:$0xff] %v11941_v0  ;;  %v11948_v2 = vadd.f32 %v17342_v51, %v17341_v39  ;;  %v17344_v48 = vld [vmem:[#allocation54_spill] sm:$0xff]  ;;  %v11959_v27 = vld [vmem:[%s16743_s3 + $0x2] ss:$4 sm:$0xf]  ;;  %v2239_v23 = vadd.f32 %v1706_v47, %v11684_v28 }
 0x2a4   :  { %17340 = vst [vmem:[#allocation199_spill] sm:$0xff] %v11944_v62  ;;  %v11952_v16 = vadd.f32 %v17345_v29, %v17344_v48  ;;  %v2235_v29 = vadd.f32 %v1702_v35, %v11658_v52  ;;  %v17347_v25 = vld [vmem:[#allocation55_spill] sm:$0xff]  ;;  %v17348_v48 = vld [vmem:[#allocation229_spill] sm:$0xff]  ;;  %v17350_v39 = vld [vmem:[#allocation56_spill] sm:$0xff]  ;;  %v2001_v52 = vpop.f32.mrf.mxu1 }
 0x2a5   :  { %17343 = vst [vmem:[#allocation26_spill] sm:$0xff] %v11948_v2  ;;  %v11973_v15 = vadd.f32 %v17348_v48, %v17347_v25  ;;  %v11977_v51 = vadd.f32 %v11256_v20, %v17350_v39  ;;  %v17352_v62 = vld [vmem:[#allocation57_spill] sm:$0xff]  ;;  %v17353_v0 = vld [vmem:[#allocation230_spill] sm:$0xff]  ;;  %v17356_v38 = vld [vmem:[#allocation231_spill] sm:$0xff]  ;;  %v11995_v25 = vrot.slane %v11821_v50, %v11938_v53  ;;  %v2857_v20 = vmul.f32 %v11963_v33, %v2642_v5  ;;  %v1720_v39 = vpop.f32.mrf.mxu0 }
 0x2a6   :  { %17346 = vst [vmem:[#allocation200_spill] sm:$0xff] %v11952_v16  ;;  %v11981_v16 = vadd.f32 %v17353_v0, %v17352_v62  ;;  %v17355_v2 = vld [vmem:[#allocation58_spill] sm:$0xff]  ;;  %17358 = vst [vmem:[#allocation29_spill] sm:$0xff] %v11987_v14  ;;  %v17359_v47 = vld [vmem:[#allocation59_spill] sm:$0xff]  ;;  %v2858_v0 = vmul.f32 %v11967_v58, %v2643_v60  ;;  %v2646_v62 = vmax.f32 %v2454_v63, 0.0  ;;  %v2647_v48 = vmax.f32 %v2455_v54, 0.0 }
 0x2a7   :  { %17349 = vst [vmem:[#allocation27_spill] sm:$0xff] %v11973_v15  ;;  %17351 = vst [vmem:[#allocation201_spill] sm:$0xff] %v11977_v51  ;;  %v11985_v46 = vadd.f32 %v17356_v38, %v17355_v2  ;;  %v17360_v28 = vld [vmem:[#allocation232_spill] sm:$0xff]  ;;  %v12000_v38 = vadd.f32 %v1714_v12, %v11712_v40  ;;  %v12004_v2 = vrot.slane %v11959_v27, %v11795_v37  ;;  %v17364_v37 = vld [vmem:[#allocation233_spill] sm:$0xff] }
 0x2a8   :  { %17354 = vst [vmem:[#allocation28_spill] sm:$0xff] %v11981_v16  ;;  %v11991_v35 = vadd.f32 %v17360_v28, %v17359_v47  ;;  %v2005_v47 = vpop.f32.mrf.mxu1  ;;  %v9614_v28 = vld [vmem:[%s16744_s4 + $0x198] ss:$12 sps:$4 sm:$0xff]   ;;  %v9616_v5 = vld [vmem:[%s16744_s4 + $0x19c] ss:$12 sps:$4 sm:$0xff]   ;;  %v2449_v63 = vadd.f32 %v11995_v25, %v2235_v29  ;;  %v2453_v54 = vadd.f32 %v11995_v25, %v2239_v23  ;;  %v2248_v40 = vadd.f32 %v1999_v26, %v11716_v10  ;;  %v1722_v23 = vpop.f32.mrf.mxu0 }
 0x2a9   :  { %17357 = vst [vmem:[#allocation202_spill] sm:$0xff] %v11985_v46  ;;  %17362 = vst [vmem:[#allocation30_spill] sm:$0xff] %v12000_v38  ;;  %v12017_v60 = vrot.slane %v11959_v27, %v11798_v6  ;;  %v17363_v12 = vld [vmem:[#allocation60_spill] sm:$0xff]  ;;  %v17366_v38 = vld [vmem:[#allocation61_spill] sm:$0xff]  ;;  %v2244_v29 = vadd.f32 %v1995_v42, %v11696_v32  ;;  %4397 = vmatprep.subr.bf16.mxu0 %v9616_v5  ;;  %v2245_v26 = vadd.f32 %v1997_v57, %v11708_v7 }
 0x2aa   :  { %17361 = vst [vmem:[#allocation203_spill] sm:$0xff] %v11991_v35  ;;  %v12021_v14 = vadd.f32 %v17364_v37, %v17363_v12  ;;  %v17367_v35 = vld [vmem:[#allocation234_spill] sm:$0xff]  ;;  %v17370_v51 = vld [vmem:[#allocation235_spill] sm:$0xff]  ;;  %v2007_v10 = vpop.f32.mrf.mxu1  ;;  %v3072_v6 = vadd.f32 %v12004_v2, %v2857_v20  ;;  %v12036_v12 = vadd.f32 %v1720_v39, %v11734_v55  ;;  %4398 = vmatpush1.bf16.msra.mxu0 %v9614_v28  ;;  %v2641_v57 = vmax.f32 %v2449_v63, 0.0  ;;  %v17374_v39 = vld [vmem:[#allocation64_spill] sm:$0xff] }
 0x2ab   :  { %v12025_v46 = vadd.f32 %v17367_v35, %v17366_v38  ;;  %v17369_v16 = vld [vmem:[#allocation62_spill] sm:$0xff]  ;;  %v3073_v37 = vadd.f32 %v12017_v60, %v2858_v0  ;;  %v17372_v35 = vld [vmem:[#allocation63_spill] sm:$0xff]  ;;  %v17373_v38 = vld [vmem:[#allocation236_spill] sm:$0xff]  ;;  %v2862_v32 = vmul.f32 %v11967_v58, %v2647_v48  ;;  %v2249_v42 = vadd.f32 %v2001_v52, %v11730_v34 }
 0x2ac   :  { %17365 = vst [vmem:[#allocation204_spill] sm:$0xff] %v12021_v14  ;;  %v12029_v15 = vadd.f32 %v17370_v51, %v17369_v16  ;;  %17371 = vst [vmem:[#allocation205_spill] sm:$0xff] %v12036_v12  ;;  %v2861_v16 = vmul.f32 %v11963_v33, %v2646_v62  ;;  %v1724_v51 = vpop.f32.mrf.mxu0  ;;  %v2009_v7 = vpop.f32.mrf.mxu1  ;;  %v2645_v20 = vmax.f32 %v2453_v54, 0.0  ;;  %v2462_v0 = vadd.f32 %v11862_v13, %v2248_v40  ;;  %v9617_v55 = vld [vmem:[%s16744_s4 + $0x1a0] ss:$12 sps:$4 sm:$0xff]   ;;  %v17376_v62 = vld [vmem:[#allocation65_spill] sm:$0xff] }
 0x2ad   :  { %17368 = vst [vmem:[#allocation31_spill] sm:$0xff] %v12025_v46  ;;  %v12040_v46 = vadd.f32 %v17373_v38, %v17372_v35  ;;  %v9079_v5 = vpack.i.bf16 %v3073_v37, %v3072_v6  ;;  %v12051_v28 = vadd.f32 %v11278_v21, %v17374_v39  ;;  %v17377_v35 = vld [vmem:[#allocation237_spill] sm:$0xff]  ;;  %v12059_v34 = vrot.slane %v11935_v18, %v11938_v53 }
 0x2ae   :  { %v12055_v48 = vadd.f32 %v17377_v35, %v17376_v62  ;;  %v2458_v52 = vadd.f32 %v11862_v13, %v2244_v29  ;;  %v1726_v63 = vpop.f32.mrf.mxu0  ;;  %v2011_v6 = vpop.f32.mrf.mxu1  ;;  %v2459_v54 = vadd.f32 %v11866_v44, %v2245_v26  ;;  %v2252_v21 = vadd.f32 %v2005_v47, %v11738_v31  ;;  %4531 = vmatpush1.bf16.msra.mxu1 %v9617_v55  ;;  %v17379_v26 = vld [vmem:[#allocation66_spill] sm:$0xff]  ;;  %v17385_v55 = vld [vmem:[#allocation69_spill] sm:$0xff] }
 0x2af   :  { %17375 = vst [vmem:[#allocation32_spill] sm:$0xff] %v12051_v28  ;;  %9080 = vrot.lane.b32.xlu0 %v9079_v5, %s10161_s14  ;;  %v2253_v40 = vadd.f32 %v2007_v10, %v11748_v11  ;;  %v2463_v37 = vadd.f32 %v11866_v44, %v2249_v42  ;;  %v3076_v38 = vadd.f32 %v12004_v2, %v2861_v16  ;;  %v17380_v5 = vld [vmem:[#allocation238_spill] sm:$0xff]  ;;  %v2654_v47 = vmax.f32 %v2462_v0, 0.0  ;;  %v17381_v10 = vld [vmem:[#allocation67_spill] sm:$0xff] }
 0x2b0   :  { %v3077_v39 = vadd.f32 %v12017_v60, %v2862_v32  ;;  %v12070_v29 = vadd.f32 %v1724_v51, %v11760_v19  ;;  %v1730_v62 = vpop.f32.mrf.mxu0  ;;  %v2015_v35 = vpop.f32.mrf.mxu1  ;;  %4532 = vmatprep.subr.bf16.mxu1 %v16962_v8  ;;  %v12075_v14 = vadd.f32 %v17380_v5, %v17379_v26  ;;  %v2856_v31 = vmul.f32 %v12059_v34, %v2641_v57  ;;  %v17382_v16 = vld [vmem:[#allocation239_spill] sm:$0xff]  ;;  %v17383_v32 = vld [vmem:[#allocation68_spill] sm:$0xff] }
 0x2b1   :  { %v2860_v11 = vmul.f32 %v12059_v34, %v2645_v20  ;;  %v12081_v42 = vadd.f32 %v17382_v16, %v17381_v10  ;;  %v17384_v19 = vld [vmem:[#allocation240_spill] sm:$0xff]  ;;  %v12092_v57 = vsub.s32 0, %v11740_v1  ;;  %v2466_v20 = vadd.f32 %v11862_v13, %v2252_v21 }
 0x2b2   :  { %17378 = vst [vmem:[#allocation206_spill] sm:$0xff] %v12070_v29  ;;  %v12085_v51 = vadd.f32 %v17384_v19, %v17383_v32  ;;  %v17386_v29 = vld [vmem:[#allocation241_spill] sm:$0xff]  ;;  %v9084_v28 = vpack.i.bf16 %v3077_v39, %v3076_v38  ;;  %v1732_v26 = vpop.f32.mrf.mxu0  ;;  %v2017_v5 = vpop.f32.mrf.mxu1  ;;  %v2467_v0 = vadd.f32 %v11866_v44, %v2253_v40  ;;  %v12098_v10 = vrot.slane %v11959_v27, %v11938_v53 }
 0x2b3   :  { %v12089_v12 = vadd.f32 %v17386_v29, %v17385_v55  ;;  %17387 = vst [vmem:[#allocation33_spill] sm:$0xff] %v12092_v57  ;;  %v2650_v16 = vmax.f32 %v2458_v52, 0.0  ;;  %v2651_v32 = vmax.f32 %v2459_v54, 0.0  ;;  %v2655_v19 = vmax.f32 %v2463_v37, 0.0 }
 0x2b4   :  { %v2251_v29 = vadd.f32 %v1722_v23, %v11744_v24  ;;  %9085 = vrot.lane.b32.xlu0 %v9084_v28, %s10161_s14  ;;  %v1734_v38 = vpop.f32.mrf.mxu0  ;;  %v2019_v39 = vpop.f32.mrf.mxu1  ;;  %v2869_v1 = vmul.f32 %v11963_v33, %v2654_v47  ;;  %v12104_v55 = vadd.f32 %v12098_v10, %v2856_v31  ;;  %v12107_v21 = vadd.f32 %v12098_v10, %v2860_v11 }
 0x2b5   :  { %v12110_v40 = vadd.f32 %v1730_v62, %v11776_v36  ;;  %v2256_v52 = vadd.f32 %v2009_v7, %v11764_v30  ;;  %v2255_v54 = vadd.f32 %v1726_v63, %v11768_v9  ;;  %v2257_v24 = vadd.f32 %v2011_v6, %v11772_v41  ;;  %v17395_v30 = vld [vmem:[#allocation70_spill] sm:$0xff]  ;;  %v17397_v41 = vld [vmem:[#allocation71_spill] sm:$0xff] }
 0x2b6   :  { %17388 = vst [vmem:[#allocation207_spill] sm:$0xff] %v12104_v55  ;;  %17389 = vst [vmem:[#allocation34_spill] sm:$0xff] %v12107_v21  ;;  %v12116_v23 = vadd.f32 %v2015_v35, %v11780_v59  ;;  %v12118_v28 = vpop.f32.mrf.mxu0  ;;  %v12120_v37 = vpop.f32.mrf.mxu1  ;;  %v2658_v31 = vmax.f32 %v2466_v20, 0.0  ;;  %v2659_v47 = vmax.f32 %v2467_v0, 0.0  ;;  %v9089_v11 = vpack.i.bf16 %v12107_v21, %v12104_v55  ;;  %v17396_v7 = vld [vmem:[#allocation242_spill] sm:$0xff]  ;;  %v17398_v63 = vld [vmem:[#allocation243_spill] sm:$0xff] }
 0x2b7   :  { %17390 = vst [vmem:[#allocation208_spill] sm:$0xff] %v12110_v40  ;;  %17392 = vst [vmem:[#allocation209_spill] sm:$0xff] %v12118_v28  ;;  %v12125_v36 = vadd.f32 %v1732_v26, %v11784_v56  ;;  %v12129_v9 = vadd.f32 %v17396_v7, %v17395_v30  ;;  %v12133_v59 = vadd.f32 %v17398_v63, %v17397_v41  ;;  %v17401_v7 = vld [vmem:[#allocation72_spill] sm:$0xff]  ;;  %v17406_v21 = vld [vmem:[#allocation245_spill] sm:$0xff] }
 0x2b8   :  { %17391 = vst [vmem:[#allocation35_spill] sm:$0xff] %v12116_v23  ;;  %17393 = vst [vmem:[#allocation36_spill] sm:$0xff] %v12120_v37  ;;  %v2865_v6 = vmul.f32 %v11963_v33, %v2650_v16  ;;  %v2866_v62 = vmul.f32 %v11967_v58, %v2651_v32  ;;  %v1740_v35 = vpop.f32.mrf.mxu0  ;;  %v2025_v20 = vpop.f32.mrf.mxu1  ;;  %v12139_v0 = vrot.slane %v11821_v50, %v12092_v57  ;;  %9090 = vrot.lane.b32.xlu0 %v9089_v11, %s10161_s14  ;;  %v17402_v41 = vld [vmem:[#allocation244_spill] sm:$0xff]  ;;  %v17408_v55 = vld [vmem:[#allocation246_spill] sm:$0xff] }
 0x2b9   :  { %17394 = vst [vmem:[#allocation210_spill] sm:$0xff] %v12125_v36  ;;  %v2465_v56 = vadd.f32 %v11995_v25, %v2251_v29  ;;  %v12144_v26 = vadd.f32 %v2017_v5, %v11788_v4  ;;  %v2870_v30 = vmul.f32 %v11967_v58, %v2655_v19  ;;  %v12149_v16 = vadd.f32 %v17402_v41, %v17401_v7  ;;  %v17427_v36 = vld [vmem:[#allocation253_spill] sm:$0xff]  ;;  %v17429_v23 = vld [vmem:[#allocation254_spill] sm:$0xff] }
 0x2ba   :  { %17399 = vst [vmem:[#allocation37_spill] sm:$0xff] %v12139_v0  ;;  %v2470_v32 = vadd.f32 %v11862_v13, %v2256_v52  ;;  %v2469_v63 = vadd.f32 %v11995_v25, %v2255_v54  ;;  %v2471_v50 = vadd.f32 %v11866_v44, %v2257_v24  ;;  %v12154_v53 = vpop.f32.mrf.mxu0  ;;  %v2027_v29 = vpop.f32.mrf.mxu1  ;;  %v2873_v11 = vmul.f32 %v11963_v33, %v2658_v31  ;;  %v17405_v31 = vld [vmem:[#allocation73_spill] sm:$0xff] }
 0x2bb   :  { %17400 = vst [vmem:[#allocation211_spill] sm:$0xff] %v12144_v26  ;;  %v2874_v4 = vmul.f32 %v11967_v58, %v2659_v47  ;;  %v3084_v5 = vadd.f32 %v12004_v2, %v2869_v1  ;;  %v3085_v19 = vadd.f32 %v12017_v60, %v2870_v30  ;;  %v3080_v7 = vadd.f32 %v12004_v2, %v2865_v6  ;;  %v17407_v1 = vld [vmem:[#allocation74_spill] sm:$0xff] }
 0x2bc   :  { %v3081_v41 = vadd.f32 %v12017_v60, %v2866_v62  ;;  %v12163_v52 = vadd.f32 %v1734_v38, %v11792_v49  ;;  %v12166_v54 = vadd.f32 %v2019_v39, %v11804_v61  ;;  %v1744_v24 = vpop.f32.mrf.mxu0  ;;  %v12168_v40 = vpop.f32.mrf.mxu1  ;;  %v12172_v47 = vadd.f32 %v17406_v21, %v17405_v31  ;;  %v17409_v39 = vld [vmem:[#allocation75_spill] sm:$0xff]  ;;  %v17420_v31 = vld [vmem:[#allocation78_spill] sm:$0xff] }
 0x2bd   :  { %v12176_v30 = vadd.f32 %v17408_v55, %v17407_v1  ;;  %v2657_v6 = vmax.f32 %v2465_v56, 0.0  ;;  %v9099_v26 = vpack.i.bf16 %v3085_v19, %v3084_v5  ;;  %v2662_v62 = vmax.f32 %v2470_v32, 0.0  ;;  %v17412_v32 = vld [vmem:[#allocation76_spill] sm:$0xff]  ;;  %v17415_v5 = vld [vmem:[#allocation77_spill] sm:$0xff]  ;;  %v17421_v1 = vld [vmem:[#allocation250_spill] sm:$0xff] }
 0x2be   :  { %17403 = vst [vmem:[#allocation38_spill] sm:$0xff] %v12163_v52  ;;  %17404 = vst [vmem:[#allocation212_spill] sm:$0xff] %v12166_v54  ;;  %v2661_v37 = vmax.f32 %v2469_v63, 0.0  ;;  %v2663_v49 = vmax.f32 %v2471_v50, 0.0  ;;  %v9094_v38 = vpack.i.bf16 %v3081_v41, %v3080_v7  ;;  %v12178_v52 = vpop.f32.mrf.mxu0  ;;  %v2031_v61 = vpop.f32.mrf.mxu1  ;;  %v17410_v54 = vld [vmem:[#allocation247_spill] sm:$0xff]  ;;  %v12186_v21 = vrot.slane %v11935_v18, %v12092_v57  ;;  %v17413_v63 = vld [vmem:[#allocation248_spill] sm:$0xff] }
 0x2bf   :  { %v12182_v28 = vadd.f32 %v17410_v54, %v17409_v39  ;;  %9100 = vrot.lane.b32.xlu1 %v9099_v26, %s10161_s14  ;;  %v3088_v55 = vadd.f32 %v12004_v2, %v2873_v11  ;;  %v3089_v56 = vadd.f32 %v12017_v60, %v2874_v4  ;;  %v12193_v50 = vadd.f32 %v17413_v63, %v17412_v32  ;;  %v17416_v19 = vld [vmem:[#allocation249_spill] sm:$0xff]  ;;  %v9618_v4 = vld [vmem:[%s16744_s4 + $0x180] ss:$12 sps:$4 sm:$0xff]  }
 0x2c0   :  { %17411 = vst [vmem:[#allocation39_spill] sm:$0xff] %v12186_v21  ;;  %v12197_v7 = vadd.f32 %v17416_v19, %v17415_v5  ;;  %v12201_v41 = vrot.slane %v11959_v27, %v12092_v57  ;;  %9095 = vrot.lane.b32.xlu0 %v9094_v38, %s10161_s14  ;;  %v12205_v18 = vadd.f32 %v1740_v35, %v11816_v3  ;;  %v1750_v26 = vpop.f32.mrf.mxu0  ;;  %v2035_v11 = vpop.f32.mrf.mxu1  ;;  %v9620_v54 = vld [vmem:[%s16744_s4 + $0x184] ss:$12 sps:$4 sm:$0xff]   ;;  %v17424_v3 = vld [vmem:[#allocation80_spill] sm:$0xff] }
 0x2c1   :  { %17414 = vst [vmem:[#allocation213_spill] sm:$0xff] %v12193_v50  ;;  %v12215_v39 = vadd.f32 %v17421_v1, %v17420_v31  ;;  %v17422_v27 = vld [vmem:[#allocation79_spill] sm:$0xff]  ;;  %v17425_v35 = vld [vmem:[#allocation252_spill] sm:$0xff]  ;;  %v9104_v5 = vpack.i.bf16 %v3089_v56, %v3088_v55  ;;  %v2872_v19 = vmul.f32 %v12059_v34, %v2657_v6  ;;  %v2877_v57 = vmul.f32 %v11963_v33, %v2662_v62  ;;  %v17426_v1 = vld [vmem:[#allocation81_spill] sm:$0xff] }
 0x2c2   :  { %17417 = vst [vmem:[#allocation40_spill] sm:$0xff] %v12197_v7  ;;  %17418 = vst [vmem:[#allocation214_spill] sm:$0xff] %v12201_v41  ;;  %v17423_v32 = vld [vmem:[#allocation251_spill] sm:$0xff]  ;;  %v12223_v63 = vadd.f32 %v17425_v35, %v17424_v3  ;;  %v2878_v7 = vmul.f32 %v11967_v58, %v2663_v49  ;;  %v1752_v50 = vpop.f32.mrf.mxu0  ;;  %v2037_v31 = vpop.f32.mrf.mxu1  ;;  %4399 = vmatprep.subr.bf16.mxu0 %v9620_v54  ;;  %v2268_v55 = vadd.f32 %v2025_v20, %v11828_v22  ;;  %v17434_v49 = vld [vmem:[#allocation84_spill] sm:$0xff] }
 0x2c3   :  { %17419 = vst [vmem:[#allocation41_spill] sm:$0xff] %v12205_v18  ;;  %v12219_v38 = vadd.f32 %v17423_v32, %v17422_v27  ;;  %v2876_v18 = vmul.f32 %v12059_v34, %v2661_v37  ;;  %v12231_v27 = vadd.f32 %v17427_v36, %v17426_v1  ;;  %v17428_v32 = vld [vmem:[#allocation82_spill] sm:$0xff]  ;;  %v2269_v6 = vadd.f32 %v2027_v29, %v11838_v45  ;;  %v17431_v62 = vld [vmem:[#allocation83_spill] sm:$0xff]  ;;  %v17435_v35 = vld [vmem:[#allocation256_spill] sm:$0xff] }
 0x2c4   :  { %v12235_v3 = vadd.f32 %v17429_v23, %v17428_v32  ;;  %4400 = vmatpush1.bf16.msra.mxu0 %v9618_v4  ;;  %v17432_v37 = vld [vmem:[#allocation255_spill] sm:$0xff]  ;;  %v12245_v54 = vadd.f32 %v17435_v35, %v17434_v49  ;;  %v17437_v41 = vld [vmem:[#allocation85_spill] sm:$0xff]  ;;  %v17439_v1 = vld [vmem:[#allocation86_spill] sm:$0xff]  ;;  %9105 = vrot.lane.b32.xlu0 %v9104_v5, %s10161_s14  ;;  %v12256_v45 = vpop.f32.mrf.mxu0  ;;  %v12258_v22 = vpop.f32.mrf.mxu1  ;;  %v3092_v5 = vadd.f32 %v12004_v2, %v2877_v57 }
 0x2c5   :  { %v12241_v56 = vadd.f32 %v17432_v37, %v17431_v62  ;;  %v12249_v36 = vadd.f32 %v11332_v17, %v17437_v41  ;;  %v12253_v23 = vadd.f32 %v11340_v43, %v17439_v1  ;;  %v17441_v20 = vld [vmem:[#allocation87_spill] sm:$0xff]  ;;  %v17442_v29 = vld [vmem:[#allocation257_spill] sm:$0xff]  ;;  %v17444_v32 = vld [vmem:[#allocation88_spill] sm:$0xff]  ;;  %v2483_v57 = vadd.f32 %v11866_v44, %v2269_v6 }
 0x2c6   :  { %17430 = vst [vmem:[#allocation215_spill] sm:$0xff] %v12235_v3  ;;  %17436 = vst [vmem:[#allocation216_spill] sm:$0xff] %v12245_v54  ;;  %v12262_v4 = vadd.f32 %v17442_v29, %v17441_v20  ;;  %v17445_v62 = vld [vmem:[#allocation258_spill] sm:$0xff]  ;;  %v17447_v17 = vld [vmem:[#allocation89_spill] sm:$0xff]  ;;  %v3093_v54 = vadd.f32 %v12017_v60, %v2878_v7  ;;  %v12282_v20 = vadd.f32 %v12098_v10, %v2876_v18  ;;  %v12284_v29 = vpop.f32.mrf.mxu0 }
 0x2c7   :  { %17433 = vst [vmem:[#allocation42_spill] sm:$0xff] %v12241_v56  ;;  %17438 = vst [vmem:[#allocation43_spill] sm:$0xff] %v12249_v36  ;;  %v12266_v37 = vadd.f32 %v17445_v62, %v17444_v32  ;;  %v17448_v41 = vld [vmem:[#allocation259_spill] sm:$0xff]  ;;  %v17450_v43 = vld [vmem:[#allocation90_spill] sm:$0xff]  ;;  %v12279_v36 = vadd.f32 %v12098_v10, %v2872_v19  ;;  %v12286_v32 = vpop.f32.mrf.mxu1 }
 0x2c8   :  { %17440 = vst [vmem:[#allocation217_spill] sm:$0xff] %v12253_v23  ;;  %17443 = vst [vmem:[#allocation44_spill] sm:$0xff] %v12262_v4  ;;  %v12270_v49 = vadd.f32 %v17448_v41, %v17447_v17  ;;  %v17451_v35 = vld [vmem:[#allocation260_spill] sm:$0xff]  ;;  %v17457_v62 = vld [vmem:[#allocation91_spill] sm:$0xff] }
 0x2c9   :  { %17446 = vst [vmem:[#allocation218_spill] sm:$0xff] %v12266_v37  ;;  %v12274_v1 = vadd.f32 %v17451_v35, %v17450_v43  ;;  %17453 = vst [vmem:[#allocation46_spill] sm:$0xff] %v12279_v36  ;;  %v17458_v17 = vld [vmem:[#allocation261_spill] sm:$0xff]  ;;  %v2482_v43 = vadd.f32 %v11862_v13, %v2268_v55  ;;  %v17460_v35 = vld [vmem:[#allocation188_spill] sm:$0xff]  ;;  %v12309_v55 = vpop.f32.mrf.mxu1 }
 0x2ca   :  { %17449 = vst [vmem:[#allocation45_spill] sm:$0xff] %v12270_v49  ;;  %17454 = vst [vmem:[#allocation220_spill] sm:$0xff] %v12282_v20  ;;  %v12290_v41 = vadd.f32 %v17458_v17, %v17457_v62  ;;  %v12295_v7 = vadd.f32 %v1744_v24, %v17460_v35  ;;  %v17462_v19 = vld [vmem:[#allocation92_spill] sm:$0xff]  ;;  %v17465_v18 = vld [vmem:[#allocation93_spill] sm:$0xff]  ;;  %v9114_v62 = vpack.i.bf16 %v12282_v20, %v12279_v36  ;;  %v12307_v17 = vpop.f32.mrf.mxu0 }
 0x2cb   :  { %17452 = vst [vmem:[#allocation219_spill] sm:$0xff] %v12274_v1  ;;  %17455 = vst [vmem:[#allocation47_spill] sm:$0xff] %v12284_v29  ;;  %v17463_v1 = vld [vmem:[#allocation262_spill] sm:$0xff]  ;;  %v17466_v37 = vld [vmem:[#allocation263_spill] sm:$0xff] }
 0x2cc   :  { %17456 = vst [vmem:[#allocation221_spill] sm:$0xff] %v12286_v32  ;;  %17459 = vst [vmem:[#allocation48_spill] sm:$0xff] %v12290_v41  ;;  %v12299_v49 = vadd.f32 %v17463_v1, %v17462_v19  ;;  %v12303_v29 = vadd.f32 %v17466_v37, %v17465_v18  ;;  %v9109_v32 = vpack.i.bf16 %v3093_v54, %v3092_v5  ;;  %v17468_v6 = vld [vmem:[#allocation94_spill] sm:$0xff]  ;;  %v17469_v41 = vld [vmem:[#allocation264_spill] sm:$0xff]  ;;  %9115 = vrot.lane.b32.xlu0 %v9114_v62, %s10161_s14 }
 0x2cd   :  { %17461 = vst [vmem:[#allocation222_spill] sm:$0xff] %v12295_v7  ;;  %v12313_v24 = vadd.f32 %v17469_v41, %v17468_v6  ;;  %v17471_v35 = vld [vmem:[#allocation14_spill] sm:$0xff]  ;;  %v17472_v19 = vld [vmem:[#allocation15_spill] sm:$0xff]  ;;  %v17473_v37 = vld [vmem:[#allocation16_spill] sm:$0xff] }
 0x2ce   :  { %17464 = vst [vmem:[#allocation49_spill] sm:$0xff] %v12299_v49  ;;  %17467 = vst [vmem:[#allocation223_spill] sm:$0xff] %v12303_v29  ;;  %v2267_v1 = vadd.f32 %v12154_v53, %v17471_v35  ;;  %v2272_v7 = vadd.f32 %v12168_v40, %v17472_v19  ;;  %v2273_v18 = vadd.f32 %v2031_v61, %v17473_v37  ;;  %v9621_v54 = vld [vmem:[%s16744_s4 + $0x188] ss:$12 sps:$4 sm:$0xff]   ;;  %9110 = vrot.lane.b32.xlu1 %v9109_v32, %s10161_s14  ;;  %v17475_v6 = vld [vmem:[#allocation190_spill] sm:$0xff]  ;;  %v12333_v40 = vpop.f32.mrf.mxu0  ;;  %v12335_v61 = vpop.f32.mrf.mxu1 }
 0x2cf   :  { %17470 = vst [vmem:[#allocation50_spill] sm:$0xff] %v12313_v24  ;;  %v17474_v5 = vld [vmem:[#allocation189_spill] sm:$0xff]  ;;  %v12328_v20 = vadd.f32 %v1750_v26, %v17475_v6  ;;  %v17479_v19 = vld [vmem:[#allocation95_spill] sm:$0xff]  ;;  %v2674_v32 = vmax.f32 %v2482_v43, 0.0  ;;  %v2675_v29 = vmax.f32 %v2483_v57, 0.0  ;;  %4533 = vmatpush1.bf16.msra.mxu1 %v9621_v54  ;;  %v17485_v26 = vld [vmem:[#allocation266_spill] sm:$0xff] }
 0x2d0   :  { %v2271_v41 = vadd.f32 %v12178_v52, %v17474_v5  ;;  %v17477_v53 = vld [vmem:[#allocation17_spill] sm:$0xff]  ;;  %v17482_v62 = vld [vmem:[#allocation191_spill] sm:$0xff]  ;;  %v17484_v52 = vld [vmem:[#allocation96_spill] sm:$0xff]  ;;  %v12359_v43 = vpop.f32.mrf.mxu0  ;;  %4534 = vmatprep.subr.bf16.mxu1 %v16962_v8 }
 0x2d1   :  { %17476 = vst [vmem:[#allocation224_spill] sm:$0xff] %v12328_v20  ;;  %v12331_v35 = vadd.f32 %v2035_v11, %v17477_v53  ;;  %v17480_v37 = vld [vmem:[#allocation265_spill] sm:$0xff]  ;;  %v12342_v49 = vadd.f32 %v1752_v50, %v17482_v62  ;;  %v12346_v5 = vadd.f32 %v17485_v26, %v17484_v52  ;;  %v17488_v6 = vld [vmem:[#allocation267_spill] sm:$0xff]  ;;  %v17490_v20 = vld [vmem:[#allocation98_spill] sm:$0xff]  ;;  %v12361_v50 = vpop.f32.mrf.mxu1 }
 0x2d2   :  { %v12339_v36 = vadd.f32 %v17480_v37, %v17479_v19  ;;  %v17487_v11 = vld [vmem:[#allocation97_spill] sm:$0xff]  ;;  %v17493_v19 = vld [vmem:[#allocation18_spill] sm:$0xff]  ;;  %v17495_v57 = vld [vmem:[#allocation99_spill] sm:$0xff] }
 0x2d3   :  { %17478 = vst [vmem:[#allocation51_spill] sm:$0xff] %v12331_v35  ;;  %17483 = vst [vmem:[#allocation52_spill] sm:$0xff] %v12342_v49  ;;  %v12350_v53 = vadd.f32 %v17488_v6, %v17487_v11  ;;  %v17491_v35 = vld [vmem:[#allocation268_spill] sm:$0xff]  ;;  %v12357_v37 = vadd.f32 %v2037_v31, %v17493_v19  ;;  %v17496_v54 = vld [vmem:[#allocation269_spill] sm:$0xff]  ;;  %v2481_v49 = vadd.f32 %v11995_v25, %v2267_v1 }
 0x2d4   :  { %17481 = vst [vmem:[#allocation225_spill] sm:$0xff] %v12339_v36  ;;  %17486 = vst [vmem:[#allocation226_spill] sm:$0xff] %v12346_v5  ;;  %v12354_v24 = vadd.f32 %v17491_v35, %v17490_v20  ;;  %v12366_v62 = vadd.f32 %v17496_v54, %v17495_v57  ;;  %v17498_v52 = vld [vmem:[#allocation100_spill] sm:$0xff]  ;;  %v17499_v26 = vld [vmem:[#allocation270_spill] sm:$0xff]  ;;  %v2486_v20 = vadd.f32 %v11862_v13, %v2272_v7  ;;  %v12384_v54 = vpop.f32.mrf.mxu0 }
 0x2d5   :  { %17489 = vst [vmem:[#allocation53_spill] sm:$0xff] %v12350_v53  ;;  %17494 = vst [vmem:[#allocation54_spill] sm:$0xff] %v12357_v37  ;;  %v12370_v11 = vadd.f32 %v17499_v26, %v17498_v52  ;;  %v2487_v35 = vadd.f32 %v11866_v44, %v2273_v18  ;;  %v17501_v31 = vld [vmem:[#allocation101_spill] sm:$0xff]  ;;  %v17502_v6 = vld [vmem:[#allocation271_spill] sm:$0xff]  ;;  %v2485_v57 = vadd.f32 %v11995_v25, %v2271_v41  ;;  %v12386_v52 = vpop.f32.mrf.mxu1 }
 0x2d6   :  { %17492 = vst [vmem:[#allocation227_spill] sm:$0xff] %v12354_v24  ;;  %17497 = vst [vmem:[#allocation228_spill] sm:$0xff] %v12366_v62  ;;  %v12376_v19 = vadd.f32 %v17502_v6, %v17501_v31  ;;  %v17504_v5 = vld [vmem:[#allocation102_spill] sm:$0xff]  ;;  %v17505_v24 = vld [vmem:[#allocation272_spill] sm:$0xff]  ;;  %v2889_v6 = vmul.f32 %v11963_v33, %v2674_v32 }
 0x2d7   :  { %17500 = vst [vmem:[#allocation55_spill] sm:$0xff] %v12370_v11  ;;  %v12380_v37 = vadd.f32 %v17505_v24, %v17504_v5  ;;  %v17507_v26 = vld [vmem:[#allocation103_spill] sm:$0xff]  ;;  %v17508_v7 = vld [vmem:[#allocation273_spill] sm:$0xff]  ;;  %v17510_v18 = vld [vmem:[#allocation104_spill] sm:$0xff]  ;;  %v2890_v24 = vmul.f32 %v11967_v58, %v2675_v29  ;;  %v12416_v32 = vpop.f32.mrf.mxu1 }
 0x2d8   :  { %17503 = vst [vmem:[#allocation229_spill] sm:$0xff] %v12376_v19  ;;  %v12390_v11 = vadd.f32 %v17508_v7, %v17507_v26  ;;  %v17511_v62 = vld [vmem:[#allocation274_spill] sm:$0xff]  ;;  %v17513_v5 = vld [vmem:[#allocation105_spill] sm:$0xff]  ;;  %v17514_v1 = vld [vmem:[#allocation275_spill] sm:$0xff] }
 0x2d9   :  { %17506 = vst [vmem:[#allocation56_spill] sm:$0xff] %v12380_v37  ;;  %v12394_v31 = vadd.f32 %v17511_v62, %v17510_v18  ;;  %v12400_v37 = vadd.f32 %v17514_v1, %v17513_v5  ;;  %v17516_v41 = vld [vmem:[#allocation106_spill] sm:$0xff]  ;;  %v17517_v19 = vld [vmem:[#allocation276_spill] sm:$0xff]  ;;  %v17519_v36 = vld [vmem:[#allocation107_spill] sm:$0xff]  ;;  %v12414_v18 = vpop.f32.mrf.mxu0  ;;  %v2678_v1 = vmax.f32 %v2486_v20, 0.0 }
 0x2da   :  { %17509 = vst [vmem:[#allocation57_spill] sm:$0xff] %v12390_v11  ;;  %v12404_v53 = vadd.f32 %v17517_v19, %v17516_v41  ;;  %v17520_v4 = vld [vmem:[#allocation277_spill] sm:$0xff]  ;;  %v17522_v7 = vld [vmem:[#allocation19_spill] sm:$0xff]  ;;  %v17524_v29 = vld [vmem:[#allocation108_spill] sm:$0xff]  ;;  %v2677_v11 = vmax.f32 %v2485_v57, 0.0 }
 0x2db   :  { %17512 = vst [vmem:[#allocation230_spill] sm:$0xff] %v12394_v31  ;;  %17515 = vst [vmem:[#allocation58_spill] sm:$0xff] %v12400_v37  ;;  %v12408_v26 = vadd.f32 %v17520_v4, %v17519_v36  ;;  %v12412_v62 = vadd.f32 %v12256_v45, %v17522_v7  ;;  %v17525_v31 = vld [vmem:[#allocation278_spill] sm:$0xff]  ;;  %v2679_v37 = vmax.f32 %v2487_v35, 0.0  ;;  %v17527_v19 = vld [vmem:[#allocation193_spill] sm:$0xff]  ;;  %v12434_v23 = vpop.f32.mrf.mxu0 }
 0x2dc   :  { %17518 = vst [vmem:[#allocation231_spill] sm:$0xff] %v12404_v53  ;;  %v12420_v5 = vadd.f32 %v17525_v31, %v17524_v29  ;;  %v12424_v41 = vadd.f32 %v12258_v22, %v17527_v19  ;;  %v17529_v36 = vld [vmem:[#allocation109_spill] sm:$0xff]  ;;  %v17530_v4 = vld [vmem:[#allocation279_spill] sm:$0xff]  ;;  %v17532_v45 = vld [vmem:[#allocation110_spill] sm:$0xff]  ;;  %v2673_v53 = vmax.f32 %v2481_v49, 0.0  ;;  %v12436_v31 = vpop.f32.mrf.mxu1 }
 0x2dd   :  { %17521 = vst [vmem:[#allocation59_spill] sm:$0xff] %v12408_v26  ;;  %17523 = vst [vmem:[#allocation232_spill] sm:$0xff] %v12412_v62  ;;  %v12428_v26 = vadd.f32 %v17530_v4, %v17529_v36  ;;  %v17533_v7 = vld [vmem:[#allocation280_spill] sm:$0xff]  ;;  %v17535_v20 = vld [vmem:[#allocation111_spill] sm:$0xff]  ;;  %v3104_v36 = vadd.f32 %v12004_v2, %v2889_v6  ;;  %v3105_v4 = vadd.f32 %v12017_v60, %v2890_v24 }
 0x2de   :  { %17526 = vst [vmem:[#allocation60_spill] sm:$0xff] %v12420_v5  ;;  %17528 = vst [vmem:[#allocation233_spill] sm:$0xff] %v12424_v41  ;;  %v12432_v62 = vadd.f32 %v17533_v7, %v17532_v45  ;;  %v17536_v35 = vld [vmem:[#allocation281_spill] sm:$0xff]  ;;  %v17538_v22 = vld [vmem:[#allocation112_spill] sm:$0xff]  ;;  %v12466_v6 = vpop.f32.mrf.mxu1 }
 0x2df   :  { %17531 = vst [vmem:[#allocation61_spill] sm:$0xff] %v12428_v26  ;;  %v12440_v29 = vadd.f32 %v17536_v35, %v17535_v20  ;;  %v17539_v19 = vld [vmem:[#allocation282_spill] sm:$0xff]  ;;  %v17541_v45 = vld [vmem:[#allocation113_spill] sm:$0xff]  ;;  %v17542_v7 = vld [vmem:[#allocation283_spill] sm:$0xff] }
 0x2e0   :  { %17534 = vst [vmem:[#allocation234_spill] sm:$0xff] %v12432_v62  ;;  %v12444_v5 = vadd.f32 %v17539_v19, %v17538_v22  ;;  %v12450_v49 = vadd.f32 %v17542_v7, %v17541_v45  ;;  %v17544_v57 = vld [vmem:[#allocation114_spill] sm:$0xff]  ;;  %v17545_v62 = vld [vmem:[#allocation284_spill] sm:$0xff]  ;;  %v17547_v41 = vld [vmem:[#allocation115_spill] sm:$0xff]  ;;  %v12464_v19 = vpop.f32.mrf.mxu0  ;;  %v2893_v7 = vmul.f32 %v11963_v33, %v2678_v1 }
 0x2e1   :  { %17537 = vst [vmem:[#allocation62_spill] sm:$0xff] %v12440_v29  ;;  %v12454_v26 = vadd.f32 %v17545_v62, %v17544_v57  ;;  %v17548_v21 = vld [vmem:[#allocation285_spill] sm:$0xff]  ;;  %v17552_v24 = vld [vmem:[#allocation116_spill] sm:$0xff]  ;;  %v2894_v62 = vmul.f32 %v11967_v58, %v2679_v37  ;;  %v9119_v57 = vpack.i.bf16 %v3105_v4, %v3104_v36  ;;  %v17564_v37 = vld [vmem:[#allocation119_spill] sm:$0xff] }
 0x2e2   :  { %17540 = vst [vmem:[#allocation235_spill] sm:$0xff] %v12444_v5  ;;  %17543 = vst [vmem:[#allocation63_spill] sm:$0xff] %v12450_v49  ;;  %v12458_v20 = vadd.f32 %v17548_v21, %v17547_v41  ;;  %v17550_v35 = vld [vmem:[#allocation21_spill] sm:$0xff]  ;;  %v17553_v5 = vld [vmem:[#allocation286_spill] sm:$0xff] }
 0x2e3   :  { %17546 = vst [vmem:[#allocation236_spill] sm:$0xff] %v12454_v26  ;;  %v12462_v22 = vadd.f32 %v12307_v17, %v17550_v35  ;;  %v12470_v45 = vadd.f32 %v17553_v5, %v17552_v24  ;;  %v17555_v49 = vld [vmem:[#allocation117_spill] sm:$0xff]  ;;  %v17556_v21 = vld [vmem:[#allocation287_spill] sm:$0xff]  ;;  %v2888_v17 = vmul.f32 %v12059_v34, %v2673_v53  ;;  %v2892_v35 = vmul.f32 %v12059_v34, %v2677_v11  ;;  %v12482_v26 = vpop.f32.mrf.mxu0  ;;  %v12484_v5 = vpop.f32.mrf.mxu1  ;;  %v17561_v24 = vld [vmem:[#allocation118_spill] sm:$0xff] }
 0x2e4   :  { %17549 = vst [vmem:[#allocation64_spill] sm:$0xff] %v12458_v20  ;;  %v12476_v41 = vadd.f32 %v17556_v21, %v17555_v49  ;;  %v17558_v20 = vld [vmem:[#allocation195_spill] sm:$0xff]  ;;  %17559 = vst [vmem:[#allocation238_spill] sm:$0xff] %v12482_v26  ;;  %v17562_v1 = vld [vmem:[#allocation288_spill] sm:$0xff]  ;;  %9120 = vrot.lane.b32.xlu0 %v9119_v57, %s10161_s14 }
 0x2e5   :  { %17551 = vst [vmem:[#allocation65_spill] sm:$0xff] %v12462_v22  ;;  %17554 = vst [vmem:[#allocation237_spill] sm:$0xff] %v12470_v45  ;;  %v2284_v29 = vadd.f32 %v12309_v55, %v17558_v20  ;;  %v12488_v45 = vadd.f32 %v17562_v1, %v17561_v24  ;;  %v17565_v36 = vld [vmem:[#allocation289_spill] sm:$0xff]  ;;  %v17567_v49 = vld [vmem:[#allocation120_spill] sm:$0xff]  ;;  %v12517_v57 = vpop.f32.mrf.mxu0 }
 0x2e6   :  { %17557 = vst [vmem:[#allocation66_spill] sm:$0xff] %v12476_v41  ;;  %17560 = vst [vmem:[#allocation67_spill] sm:$0xff] %v12484_v5  ;;  %v12492_v4 = vadd.f32 %v17565_v36, %v17564_v37  ;;  %v17568_v21 = vld [vmem:[#allocation290_spill] sm:$0xff]  ;;  %v17570_v11 = vld [vmem:[#allocation196_spill] sm:$0xff] }
 0x2e7   :  { %17563 = vst [vmem:[#allocation239_spill] sm:$0xff] %v12488_v45  ;;  %v12496_v53 = vadd.f32 %v17568_v21, %v17567_v49  ;;  %v2285_v55 = vadd.f32 %v12335_v61, %v17570_v11  ;;  %v17571_v20 = vld [vmem:[#allocation121_spill] sm:$0xff]  ;;  %v17572_v41 = vld [vmem:[#allocation291_spill] sm:$0xff]  ;;  %v17574_v26 = vld [vmem:[#allocation122_spill] sm:$0xff] }
 0x2e8   :  { %17566 = vst [vmem:[#allocation68_spill] sm:$0xff] %v12492_v4  ;;  %v12503_v5 = vadd.f32 %v17572_v41, %v17571_v20  ;;  %v17575_v24 = vld [vmem:[#allocation292_spill] sm:$0xff]  ;;  %v17577_v45 = vld [vmem:[#allocation123_spill] sm:$0xff]  ;;  %v17578_v37 = vld [vmem:[#allocation293_spill] sm:$0xff] }
 0x2e9   :  { %17569 = vst [vmem:[#allocation240_spill] sm:$0xff] %v12496_v53  ;;  %v12507_v1 = vadd.f32 %v17575_v24, %v17574_v26  ;;  %v12511_v36 = vadd.f32 %v17578_v37, %v17577_v45  ;;  %v17580_v4 = vld [vmem:[#allocation124_spill] sm:$0xff]  ;;  %v17581_v49 = vld [vmem:[#allocation294_spill] sm:$0xff]  ;;  %v12519_v53 = vpop.f32.mrf.mxu1  ;;  %v17583_v61 = vld [vmem:[#allocation125_spill] sm:$0xff]  ;;  %v3108_v24 = vadd.f32 %v12004_v2, %v2893_v7  ;;  %v3109_v45 = vadd.f32 %v12017_v60, %v2894_v62 }
 0x2ea   :  { %17573 = vst [vmem:[#allocation69_spill] sm:$0xff] %v12503_v5  ;;  %v12515_v21 = vadd.f32 %v17581_v49, %v17580_v4  ;;  %v17584_v11 = vld [vmem:[#allocation295_spill] sm:$0xff]  ;;  %v17586_v20 = vld [vmem:[#allocation126_spill] sm:$0xff]  ;;  %v17587_v5 = vld [vmem:[#allocation296_spill] sm:$0xff]  ;;  %v2498_v37 = vadd.f32 %v11862_v13, %v2284_v29  ;;  %v2499_v4 = vadd.f32 %v11866_v44, %v2285_v55  ;;  %v12534_v49 = vadd.f32 %v12098_v10, %v2888_v17 }
 0x2eb   :  { %17576 = vst [vmem:[#allocation241_spill] sm:$0xff] %v12507_v1  ;;  %17579 = vst [vmem:[#allocation70_spill] sm:$0xff] %v12511_v36  ;;  %v12523_v41 = vadd.f32 %v17584_v11, %v17583_v61  ;;  %v12527_v26 = vadd.f32 %v17587_v5, %v17586_v20  ;;  %v12539_v61 = vpop.f32.mrf.mxu0  ;;  %v12541_v11 = vpop.f32.mrf.mxu1  ;;  %v17591_v5 = vld [vmem:[#allocation127_spill] sm:$0xff]  ;;  %v17592_v20 = vld [vmem:[#allocation297_spill] sm:$0xff]  ;;  %v9124_v29 = vpack.i.bf16 %v3109_v45, %v3108_v24 }
 0x2ec   :  { %17582 = vst [vmem:[#allocation242_spill] sm:$0xff] %v12515_v21  ;;  %17589 = vst [vmem:[#allocation72_spill] sm:$0xff] %v12534_v49  ;;  %v12537_v21 = vadd.f32 %v12098_v10, %v2892_v35  ;;  %v17594_v7 = vld [vmem:[#allocation128_spill] sm:$0xff]  ;;  %v17595_v62 = vld [vmem:[#allocation298_spill] sm:$0xff] }
 0x2ed   :  { %17585 = vst [vmem:[#allocation71_spill] sm:$0xff] %v12523_v41  ;;  %17588 = vst [vmem:[#allocation243_spill] sm:$0xff] %v12527_v26  ;;  %v12545_v41 = vadd.f32 %v17592_v20, %v17591_v5  ;;  %v12549_v36 = vadd.f32 %v17595_v62, %v17594_v7  ;;  %v17597_v55 = vld [vmem:[#allocation23_spill] sm:$0xff]  ;;  %v9624_v35 = vld [vmem:[%s16744_s4 + $0x16c] ss:$12 sps:$4 sm:$0xff]   ;;  %v12568_v45 = vpop.f32.mrf.mxu0  ;;  %9125 = vrot.lane.b32.xlu1 %v9124_v29, %s10161_s14 }
 0x2ee   :  { %17590 = vst [vmem:[#allocation244_spill] sm:$0xff] %v12537_v21  ;;  %v12553_v17 = vadd.f32 %v12359_v43, %v17597_v55  ;;  %v17599_v26 = vld [vmem:[#allocation129_spill] sm:$0xff]  ;;  %v17600_v1 = vld [vmem:[#allocation299_spill] sm:$0xff]  ;;  %v9129_v5 = vpack.i.bf16 %v12537_v21, %v12534_v49  ;;  %v17603_v62 = vld [vmem:[#allocation26_spill] sm:$0xff]  ;;  %v12570_v43 = vpop.f32.mrf.mxu1  ;;  %v2690_v49 = vmax.f32 %v2498_v37, 0.0  ;;  %4401 = vmatprep.subr.bf16.mxu0 %v9624_v35 }
 0x2ef   :  { %17593 = vst [vmem:[#allocation73_spill] sm:$0xff] %v12545_v41  ;;  %17596 = vst [vmem:[#allocation245_spill] sm:$0xff] %v12549_v36  ;;  %v12560_v22 = vadd.f32 %v17600_v1, %v17599_v26  ;;  %v17602_v20 = vld [vmem:[#allocation197_spill] sm:$0xff]  ;;  %v2289_v24 = vadd.f32 %v12386_v52, %v17603_v62  ;;  %v17604_v36 = vld [vmem:[#allocation130_spill] sm:$0xff]  ;;  %v2691_v41 = vmax.f32 %v2499_v4, 0.0 }
 0x2f0   :  { %17598 = vst [vmem:[#allocation74_spill] sm:$0xff] %v12553_v17  ;;  %v2288_v7 = vadd.f32 %v12361_v50, %v17602_v20  ;;  %v9622_v55 = vld [vmem:[%s16744_s4 + $0x168] ss:$12 sps:$4 sm:$0xff]   ;;  %9130 = vrot.lane.b32.xlu0 %v9129_v5, %s10161_s14  ;;  %v17611_v17 = vld [vmem:[#allocation27_spill] sm:$0xff]  ;;  %v12599_v29 = vpop.f32.mrf.mxu1  ;;  %v17619_v4 = vld [vmem:[#allocation302_spill] sm:$0xff] }
 0x2f1   :  { %17601 = vst [vmem:[#allocation246_spill] sm:$0xff] %v12560_v22  ;;  %v17605_v1 = vld [vmem:[#allocation300_spill] sm:$0xff]  ;;  %v17607_v22 = vld [vmem:[#allocation22_spill] sm:$0xff]  ;;  %v17621_v5 = vld [vmem:[#allocation133_spill] sm:$0xff]  ;;  %4402 = vmatpush1.bf16.msra.mxu0 %v9622_v55 }
 0x2f2   :  { %v12577_v26 = vadd.f32 %v17605_v1, %v17604_v36  ;;  %v2283_v21 = vadd.f32 %v12333_v40, %v17607_v22  ;;  %v17608_v50 = vld [vmem:[#allocation24_spill] sm:$0xff]  ;;  %v12591_v36 = vadd.f32 %v12416_v32, %v17611_v17  ;;  %v17613_v1 = vld [vmem:[#allocation201_spill] sm:$0xff]  ;;  %v12597_v22 = vpop.f32.mrf.mxu0  ;;  %v17641_v55 = vld [vmem:[#allocation139_spill] sm:$0xff] }
 0x2f3   :  { %v2287_v52 = vadd.f32 %v12384_v54, %v17608_v50  ;;  %v17609_v20 = vld [vmem:[#allocation200_spill] sm:$0xff]  ;;  %v12595_v40 = vadd.f32 %v12434_v23, %v17613_v1  ;;  %v17615_v54 = vld [vmem:[#allocation131_spill] sm:$0xff]  ;;  %v17616_v50 = vld [vmem:[#allocation301_spill] sm:$0xff] }
 0x2f4   :  { %17606 = vst [vmem:[#allocation75_spill] sm:$0xff] %v12577_v26  ;;  %v12586_v62 = vadd.f32 %v12414_v18, %v17609_v20  ;;  %17612 = vst [vmem:[#allocation76_spill] sm:$0xff] %v12591_v36  ;;  %v12603_v18 = vadd.f32 %v17616_v50, %v17615_v54  ;;  %v17618_v37 = vld [vmem:[#allocation132_spill] sm:$0xff]  ;;  %v17626_v1 = vld [vmem:[#allocation134_spill] sm:$0xff] }
 0x2f5   :  { %17614 = vst [vmem:[#allocation248_spill] sm:$0xff] %v12595_v40  ;;  %v12607_v20 = vadd.f32 %v17619_v4, %v17618_v37  ;;  %v17624_v17 = vld [vmem:[#allocation28_spill] sm:$0xff]  ;;  %v17629_v36 = vld [vmem:[#allocation135_spill] sm:$0xff]  ;;  %v17630_v54 = vld [vmem:[#allocation305_spill] sm:$0xff]  ;;  %v2502_v37 = vadd.f32 %v11862_v13, %v2288_v7  ;;  %v2503_v4 = vadd.f32 %v11866_v44, %v2289_v24 }
 0x2f6   :  { %17610 = vst [vmem:[#allocation247_spill] sm:$0xff] %v12586_v62  ;;  %17617 = vst [vmem:[#allocation77_spill] sm:$0xff] %v12603_v18  ;;  %v17622_v62 = vld [vmem:[#allocation303_spill] sm:$0xff]  ;;  %v12615_v23 = vadd.f32 %v12436_v31, %v17624_v17  ;;  %v17627_v26 = vld [vmem:[#allocation304_spill] sm:$0xff]  ;;  %v12623_v50 = vadd.f32 %v17630_v54, %v17629_v36  ;;  %v2497_v36 = vadd.f32 %v11995_v25, %v2283_v21 }
 0x2f7   :  { %17620 = vst [vmem:[#allocation249_spill] sm:$0xff] %v12607_v20  ;;  %v12611_v32 = vadd.f32 %v17622_v62, %v17621_v5  ;;  %v12619_v40 = vadd.f32 %v17627_v26, %v17626_v1  ;;  %v12627_v20 = vpop.f32.mrf.mxu0  ;;  %v12629_v62 = vpop.f32.mrf.mxu1  ;;  %v17632_v31 = vld [vmem:[#allocation136_spill] sm:$0xff]  ;;  %v17633_v5 = vld [vmem:[#allocation306_spill] sm:$0xff]  ;;  %v17635_v17 = vld [vmem:[#allocation137_spill] sm:$0xff]  ;;  %v2501_v54 = vadd.f32 %v11995_v25, %v2287_v52  ;;  %v2694_v3 = vmax.f32 %v2502_v37, 0.0 }
 0x2f8   :  { %17625 = vst [vmem:[#allocation250_spill] sm:$0xff] %v12615_v23  ;;  %17631 = vst [vmem:[#allocation251_spill] sm:$0xff] %v12623_v50  ;;  %v12633_v35 = vadd.f32 %v17633_v5, %v17632_v31  ;;  %v17636_v26 = vld [vmem:[#allocation307_spill] sm:$0xff]  ;;  %v9625_v7 = vld [vmem:[%s16744_s4 + $0x170] ss:$12 sps:$4 sm:$0xff]   ;;  %v2905_v5 = vmul.f32 %v11963_v33, %v2690_v49  ;;  %v2689_v37 = vmax.f32 %v2497_v36, 0.0 }
 0x2f9   :  { %17623 = vst [vmem:[#allocation78_spill] sm:$0xff] %v12611_v32  ;;  %17628 = vst [vmem:[#allocation79_spill] sm:$0xff] %v12619_v40  ;;  %v12637_v1 = vadd.f32 %v17636_v26, %v17635_v17  ;;  %v17638_v24 = vld [vmem:[#allocation138_spill] sm:$0xff]  ;;  %v17639_v50 = vld [vmem:[#allocation308_spill] sm:$0xff]  ;;  %v2906_v17 = vmul.f32 %v11967_v58, %v2691_v41  ;;  %v12654_v26 = vpop.f32.mrf.mxu0  ;;  %v12656_v21 = vpop.f32.mrf.mxu1  ;;  %4535 = vmatpush1.bf16.msra.mxu1 %v9625_v7 }
 0x2fa   :  { %17634 = vst [vmem:[#allocation80_spill] sm:$0xff] %v12633_v35  ;;  %v12646_v32 = vadd.f32 %v17639_v50, %v17638_v24  ;;  %v17642_v18 = vld [vmem:[#allocation309_spill] sm:$0xff]  ;;  %v17644_v52 = vld [vmem:[#allocation140_spill] sm:$0xff]  ;;  %v17648_v23 = vld [vmem:[#allocation311_spill] sm:$0xff]  ;;  %4536 = vmatprep.subr.bf16.mxu1 %v16962_v8 }
 0x2fb   :  { %17637 = vst [vmem:[#allocation252_spill] sm:$0xff] %v12637_v1  ;;  %v12650_v31 = vadd.f32 %v17642_v18, %v17641_v55  ;;  %v17645_v1 = vld [vmem:[#allocation310_spill] sm:$0xff]  ;;  %v17647_v40 = vld [vmem:[#allocation141_spill] sm:$0xff]  ;;  %v17655_v41 = vld [vmem:[#allocation143_spill] sm:$0xff] }
 0x2fc   :  { %17640 = vst [vmem:[#allocation81_spill] sm:$0xff] %v12646_v32  ;;  %v12660_v35 = vadd.f32 %v17645_v1, %v17644_v52  ;;  %v12664_v50 = vadd.f32 %v17648_v23, %v17647_v40  ;;  %v17650_v24 = vld [vmem:[#allocation142_spill] sm:$0xff]  ;;  %v17651_v32 = vld [vmem:[#allocation312_spill] sm:$0xff]  ;;  %v2695_v1 = vmax.f32 %v2503_v4, 0.0  ;;  %v17658_v52 = vld [vmem:[#allocation203_spill] sm:$0xff]  ;;  %v12682_v40 = vpop.f32.mrf.mxu0  ;;  %v12684_v23 = vpop.f32.mrf.mxu1  ;;  %v2693_v4 = vmax.f32 %v2501_v54, 0.0 }
 0x2fd   :  { %17643 = vst [vmem:[#allocation253_spill] sm:$0xff] %v12650_v31  ;;  %v12668_v18 = vadd.f32 %v17651_v32, %v17650_v24  ;;  %v17653_v55 = vld [vmem:[#allocation202_spill] sm:$0xff]  ;;  %v17656_v31 = vld [vmem:[#allocation313_spill] sm:$0xff]  ;;  %v17660_v32 = vld [vmem:[#allocation144_spill] sm:$0xff] }
 0x2fe   :  { %17646 = vst [vmem:[#allocation82_spill] sm:$0xff] %v12660_v35  ;;  %17649 = vst [vmem:[#allocation254_spill] sm:$0xff] %v12664_v50  ;;  %v12672_v49 = vadd.f32 %v12464_v19, %v17653_v55  ;;  %v12676_v56 = vadd.f32 %v17656_v31, %v17655_v41  ;;  %v12680_v35 = vadd.f32 %v12466_v6, %v17658_v52  ;;  %v17661_v19 = vld [vmem:[#allocation314_spill] sm:$0xff]  ;;  %v17663_v7 = vld [vmem:[#allocation145_spill] sm:$0xff] }
 0x2ff   :  { %17652 = vst [vmem:[#allocation83_spill] sm:$0xff] %v12668_v18  ;;  %v12689_v24 = vadd.f32 %v17661_v19, %v17660_v32  ;;  %v17664_v55 = vld [vmem:[#allocation315_spill] sm:$0xff]  ;;  %v17666_v41 = vld [vmem:[#allocation146_spill] sm:$0xff]  ;;  %v17670_v50 = vld [vmem:[#allocation317_spill] sm:$0xff]  ;;  %v3120_v18 = vadd.f32 %v12004_v2, %v2905_v5  ;;  %v12705_v32 = vpop.f32.mrf.mxu0  ;;  %v12707_v19 = vpop.f32.mrf.mxu1  ;;  %v12723_v5 = vadd.f32 %v12517_v57, %v12029_v15  ;;  %v2908_v57 = vmul.f32 %v12059_v34, %v2693_v4 }
 0x300   :  { %17654 = vst [vmem:[#allocation255_spill] sm:$0xff] %v12672_v49  ;;  %17657 = vst [vmem:[#allocation84_spill] sm:$0xff] %v12676_v56  ;;  %v12693_v31 = vadd.f32 %v17664_v55, %v17663_v7  ;;  %v17667_v49 = vld [vmem:[#allocation316_spill] sm:$0xff]  ;;  %v17669_v52 = vld [vmem:[#allocation147_spill] sm:$0xff] }
 0x301   :  { %17659 = vst [vmem:[#allocation256_spill] sm:$0xff] %v12680_v35  ;;  %17662 = vst [vmem:[#allocation85_spill] sm:$0xff] %v12689_v24  ;;  %v12697_v6 = vadd.f32 %v17667_v49, %v17666_v41  ;;  %v12701_v56 = vadd.f32 %v17670_v50, %v17669_v52  ;;  %v3121_v35 = vadd.f32 %v12017_v60, %v2906_v17  ;;  %v17673_v7 = vld [vmem:[#allocation148_spill] sm:$0xff]  ;;  %v17674_v55 = vld [vmem:[#allocation318_spill] sm:$0xff] }
 0x302   :  { %17665 = vst [vmem:[#allocation86_spill] sm:$0xff] %v12693_v31  ;;  %17672 = vst [vmem:[#allocation88_spill] sm:$0xff] %v12707_v19  ;;  %v12711_v36 = vadd.f32 %v17674_v55, %v17673_v7  ;;  %v17676_v54 = vld [vmem:[#allocation149_spill] sm:$0xff]  ;;  %v17677_v24 = vld [vmem:[#allocation319_spill] sm:$0xff]  ;;  %v2909_v17 = vmul.f32 %v11963_v33, %v2694_v3  ;;  %v2910_v52 = vmul.f32 %v11967_v58, %v2695_v1  ;;  %v12729_v55 = vpop.f32.mrf.mxu0 }
 0x303   :  { %17668 = vst [vmem:[#allocation87_spill] sm:$0xff] %v12697_v6  ;;  %17671 = vst [vmem:[#allocation257_spill] sm:$0xff] %v12701_v56  ;;  %v12715_v49 = vadd.f32 %v17677_v24, %v17676_v54  ;;  %v17679_v41 = vld [vmem:[#allocation150_spill] sm:$0xff]  ;;  %v17680_v31 = vld [vmem:[#allocation320_spill] sm:$0xff]  ;;  %v9134_v56 = vpack.i.bf16 %v3121_v35, %v3120_v18  ;;  %v2300_v7 = vadd.f32 %v12519_v53, %v12040_v46  ;;  %v12731_v24 = vpop.f32.mrf.mxu1 }
 0x304   :  { %17675 = vst [vmem:[#allocation258_spill] sm:$0xff] %v12711_v36  ;;  %v12719_v50 = vadd.f32 %v17680_v31, %v17679_v41  ;;  %v17682_v54 = vld [vmem:[#allocation151_spill] sm:$0xff]  ;;  %v17683_v36 = vld [vmem:[#allocation321_spill] sm:$0xff]  ;;  %v17685_v41 = vld [vmem:[#allocation152_spill] sm:$0xff]  ;;  %v2904_v3 = vmul.f32 %v12059_v34, %v2689_v37  ;;  %v12758_v37 = vpop.f32.mrf.mxu0 }
 0x305   :  { %17678 = vst [vmem:[#allocation89_spill] sm:$0xff] %v12715_v49  ;;  %v12735_v31 = vadd.f32 %v17683_v36, %v17682_v54  ;;  %v17686_v49 = vld [vmem:[#allocation322_spill] sm:$0xff]  ;;  %v17688_v35 = vld [vmem:[#allocation153_spill] sm:$0xff]  ;;  %v17689_v18 = vld [vmem:[#allocation323_spill] sm:$0xff]  ;;  %9135 = vrot.lane.b32.xlu0 %v9134_v56, %s10161_s14  ;;  %v12760_v4 = vpop.f32.mrf.mxu1 }
 0x306   :  { %17681 = vst [vmem:[#allocation259_spill] sm:$0xff] %v12719_v50  ;;  %v12739_v15 = vadd.f32 %v17686_v49, %v17685_v41  ;;  %v12745_v1 = vadd.f32 %v17689_v18, %v17688_v35  ;;  %v17691_v46 = vld [vmem:[#allocation154_spill] sm:$0xff]  ;;  %v17692_v53 = vld [vmem:[#allocation324_spill] sm:$0xff]  ;;  %v17694_v6 = vld [vmem:[#allocation155_spill] sm:$0xff]  ;;  %v2301_v49 = vadd.f32 %v12541_v11, %v12055_v48 }
 0x307   :  { %17684 = vst [vmem:[#allocation90_spill] sm:$0xff] %v12735_v31  ;;  %v12749_v50 = vadd.f32 %v17692_v53, %v17691_v46  ;;  %v17695_v19 = vld [vmem:[#allocation325_spill] sm:$0xff]  ;;  %v17697_v54 = vld [vmem:[#allocation156_spill] sm:$0xff]  ;;  %v17698_v41 = vld [vmem:[#allocation326_spill] sm:$0xff] }
 0x308   :  { %17687 = vst [vmem:[#allocation260_spill] sm:$0xff] %v12739_v15  ;;  %17690 = vst [vmem:[#allocation91_spill] sm:$0xff] %v12745_v1  ;;  %v12753_v36 = vadd.f32 %v17695_v19, %v17694_v6  ;;  %v12764_v35 = vadd.f32 %v17698_v41, %v17697_v54  ;;  %v17700_v18 = vld [vmem:[#allocation157_spill] sm:$0xff]  ;;  %v17701_v46 = vld [vmem:[#allocation327_spill] sm:$0xff]  ;;  %v3124_v54 = vadd.f32 %v12004_v2, %v2909_v17 }
 0x309   :  { %17693 = vst [vmem:[#allocation261_spill] sm:$0xff] %v12749_v50  ;;  %v12768_v53 = vadd.f32 %v17701_v46, %v17700_v18  ;;  %v17703_v1 = vld [vmem:[#allocation158_spill] sm:$0xff]  ;;  %v17704_v6 = vld [vmem:[#allocation328_spill] sm:$0xff]  ;;  %v17706_v56 = vld [vmem:[#allocation159_spill] sm:$0xff]  ;;  %v2514_v50 = vadd.f32 %v11862_v13, %v2300_v7  ;;  %v3125_v41 = vadd.f32 %v12017_v60, %v2910_v52  ;;  %v12785_v18 = vpop.f32.mrf.mxu0  ;;  %v12787_v46 = vpop.f32.mrf.mxu1 }
 0x30a   :  { %17696 = vst [vmem:[#allocation188_spill] sm:$0xff] %v12753_v36  ;;  %17699 = vst [vmem:[#allocation92_spill] sm:$0xff] %v12764_v35  ;;  %v12772_v19 = vadd.f32 %v17704_v6, %v17703_v1  ;;  %v17707_v36 = vld [vmem:[#allocation329_spill] sm:$0xff]  ;;  %v17709_v48 = vld [vmem:[#allocation160_spill] sm:$0xff] }
 0x30b   :  { %17702 = vst [vmem:[#allocation262_spill] sm:$0xff] %v12768_v53  ;;  %v12776_v15 = vadd.f32 %v17707_v36, %v17706_v56  ;;  %v17710_v11 = vld [vmem:[#allocation330_spill] sm:$0xff]  ;;  %v17712_v1 = vld [vmem:[#allocation161_spill] sm:$0xff]  ;;  %v17713_v6 = vld [vmem:[#allocation331_spill] sm:$0xff]  ;;  %v2515_v36 = vadd.f32 %v11866_v44, %v2301_v49  ;;  %v12795_v56 = vadd.f32 %v12098_v10, %v2904_v3  ;;  %v12812_v49 = vpop.f32.mrf.mxu0  ;;  %v12814_v3 = vpop.f32.mrf.mxu1 }
 0x30c   :  { %17705 = vst [vmem:[#allocation93_spill] sm:$0xff] %v12772_v19  ;;  %v12780_v31 = vadd.f32 %v17710_v11, %v17709_v48  ;;  %v12791_v53 = vadd.f32 %v17713_v6, %v17712_v1  ;;  %v12798_v48 = vadd.f32 %v12098_v10, %v2908_v57  ;;  %v17717_v7 = vld [vmem:[#allocation162_spill] sm:$0xff]  ;;  %v17718_v17 = vld [vmem:[#allocation332_spill] sm:$0xff]  ;;  %v17720_v52 = vld [vmem:[#allocation163_spill] sm:$0xff]  ;;  %v12810_v1 = vadd.f32 %v12568_v45, %v12075_v14 }
 0x30d   :  { %17708 = vst [vmem:[#allocation263_spill] sm:$0xff] %v12776_v15  ;;  %17715 = vst [vmem:[#allocation14_spill] sm:$0xff] %v12795_v56  ;;  %v12802_v11 = vadd.f32 %v17718_v17, %v17717_v7  ;;  %v17721_v35 = vld [vmem:[#allocation333_spill] sm:$0xff]  ;;  %v9139_v15 = vpack.i.bf16 %v3125_v41, %v3124_v54  ;;  %v17724_v6 = vld [vmem:[#allocation164_spill] sm:$0xff]  ;;  %v2706_v14 = vmax.f32 %v2514_v50, 0.0  ;;  %v2304_v45 = vadd.f32 %v12570_v43, %v12081_v42 }
 0x30e   :  { %17711 = vst [vmem:[#allocation94_spill] sm:$0xff] %v12780_v31  ;;  %17714 = vst [vmem:[#allocation264_spill] sm:$0xff] %v12791_v53  ;;  %v12806_v31 = vadd.f32 %v17721_v35, %v17720_v52  ;;  %v17725_v57 = vld [vmem:[#allocation334_spill] sm:$0xff]  ;;  %v17727_v19 = vld [vmem:[#allocation165_spill] sm:$0xff]  ;;  %v9144_v54 = vpack.i.bf16 %v12798_v48, %v12795_v56  ;;  %v2305_v41 = vadd.f32 %v12599_v29, %v12089_v12 }
 0x30f   :  { %17716 = vst [vmem:[#allocation15_spill] sm:$0xff] %v12798_v48  ;;  %17719 = vst [vmem:[#allocation16_spill] sm:$0xff] %v12802_v11  ;;  %v12818_v53 = vadd.f32 %v17725_v57, %v17724_v6  ;;  %v17728_v7 = vld [vmem:[#allocation335_spill] sm:$0xff]  ;;  %v17730_v11 = vld [vmem:[#allocation32_spill] sm:$0xff]  ;;  %9140 = vrot.lane.b32.xlu1 %v9139_v15, %s10161_s14  ;;  %v12835_v52 = vadd.f32 %v12627_v20, %v12129_v9  ;;  %v2095_v6 = vpop.f32.mrf.mxu1  ;;  %v2707_v57 = vmax.f32 %v2515_v36, 0.0 }
 0x310   :  { %17722 = vst [vmem:[#allocation189_spill] sm:$0xff] %v12806_v31  ;;  %17723 = vst [vmem:[#allocation190_spill] sm:$0xff] %v12812_v49  ;;  %v12822_v17 = vadd.f32 %v17728_v7, %v17727_v19  ;;  %v2299_v35 = vadd.f32 %v12539_v61, %v17730_v11  ;;  %v1810_v19 = vpop.f32.mrf.mxu0  ;;  %9145 = vrot.lane.b32.xlu0 %v9144_v54, %s10161_s14  ;;  %v2303_v61 = vadd.f32 %v12597_v22, %v12085_v51  ;;  %v17732_v12 = vld [vmem:[#allocation166_spill] sm:$0xff]  ;;  %v17733_v43 = vld [vmem:[#allocation336_spill] sm:$0xff] }
 0x311   :  { %17726 = vst [vmem:[#allocation17_spill] sm:$0xff] %v12818_v53  ;;  %17731 = vst [vmem:[#allocation265_spill] sm:$0xff] %v12835_v52  ;;  %v12842_v50 = vadd.f32 %v12629_v62, %v12133_v59  ;;  %v12846_v42 = vadd.f32 %v12654_v26, %v12149_v16  ;;  %v12850_v9 = vadd.f32 %v17733_v43, %v17732_v12  ;;  %v17735_v29 = vld [vmem:[#allocation167_spill] sm:$0xff]  ;;  %v17736_v20 = vld [vmem:[#allocation337_spill] sm:$0xff]  ;;  %v2096_v22 = vpop.f32.mrf.mxu1 }
 0x312   :  { %17729 = vst [vmem:[#allocation95_spill] sm:$0xff] %v12822_v17  ;;  %v12854_v15 = vadd.f32 %v17736_v20, %v17735_v29  ;;  %v17738_v36 = vld [vmem:[#allocation168_spill] sm:$0xff]  ;;  %v17739_v11 = vld [vmem:[#allocation338_spill] sm:$0xff]  ;;  %v12862_v51 = vadd.f32 %v12656_v21, %v12172_v47  ;;  %v1811_v59 = vpop.f32.mrf.mxu0  ;;  %v17741_v16 = vld [vmem:[#allocation169_spill] sm:$0xff]  ;;  %v2513_v52 = vadd.f32 %v11995_v25, %v2299_v35  ;;  %v2922_v48 = vmul.f32 %v11967_v58, %v2707_v57 }
 0x313   :  { %17734 = vst [vmem:[#allocation191_spill] sm:$0xff] %v12850_v9  ;;  %v12858_v7 = vadd.f32 %v17739_v11, %v17738_v36  ;;  %v17742_v62 = vld [vmem:[#allocation339_spill] sm:$0xff]  ;;  %v17744_v54 = vld [vmem:[#allocation170_spill] sm:$0xff]  ;;  %v17745_v19 = vld [vmem:[#allocation340_spill] sm:$0xff]  ;;  %v2517_v56 = vadd.f32 %v11995_v25, %v2303_v61 }
 0x314   :  { %17737 = vst [vmem:[#allocation96_spill] sm:$0xff] %v12854_v15  ;;  %v12866_v26 = vadd.f32 %v17742_v62, %v17741_v16  ;;  %v12870_v6 = vadd.f32 %v17745_v19, %v17744_v54  ;;  %v17747_v12 = vld [vmem:[#allocation171_spill] sm:$0xff]  ;;  %v17748_v43 = vld [vmem:[#allocation341_spill] sm:$0xff]  ;;  %v17750_v20 = vld [vmem:[#allocation172_spill] sm:$0xff]  ;;  %v2518_v19 = vadd.f32 %v11862_v13, %v2304_v45 }
 0x315   :  { %17740 = vst [vmem:[#allocation266_spill] sm:$0xff] %v12858_v7  ;;  %v12874_v29 = vadd.f32 %v17748_v43, %v17747_v12  ;;  %v17751_v36 = vld [vmem:[#allocation342_spill] sm:$0xff]  ;;  %v9628_v21 = vld [vmem:[%s16744_s4 + $0x154] ss:$12 sps:$4 sm:$0xff]   ;;  %v2519_v12 = vadd.f32 %v11866_v44, %v2305_v41  ;;  %v1812_v43 = vpop.f32.mrf.mxu0  ;;  %v17763_v41 = vld [vmem:[#allocation176_spill] sm:$0xff] }
 0x316   :  { %17743 = vst [vmem:[#allocation97_spill] sm:$0xff] %v12866_v26  ;;  %17746 = vst [vmem:[#allocation267_spill] sm:$0xff] %v12870_v6  ;;  %v12878_v11 = vadd.f32 %v17751_v36, %v17750_v20  ;;  %v9626_v47 = vld [vmem:[%s16744_s4 + $0x150] ss:$12 sps:$4 sm:$0xff]   ;;  %v17754_v22 = vld [vmem:[#allocation343_spill] sm:$0xff]  ;;  %v2097_v20 = vpop.f32.mrf.mxu1  ;;  %v2921_v36 = vmul.f32 %v11963_v33, %v2706_v14  ;;  %4403 = vmatprep.subr.bf16.mxu0 %v9628_v21 }
 0x317   :  { %17749 = vst [vmem:[#allocation98_spill] sm:$0xff] %v12874_v29  ;;  %v17753_v59 = vld [vmem:[#allocation173_spill] sm:$0xff]  ;;  %v17756_v62 = vld [vmem:[#allocation355_spill] sm:$0xff]  ;;  %v17764_v43 = vld [vmem:[#allocation346_spill] sm:$0xff]  ;;  %v1813_v29 = vpop.f32.mrf.mxu0  ;;  %4404 = vmatpush1.bf16.msra.mxu0 %v9626_v47  ;;  %v2710_v47 = vmax.f32 %v2518_v19, 0.0  ;;  %v12945_v19 = vadd.f32 %v12729_v55, %v12215_v39 }
 0x318   :  { %17752 = vst [vmem:[#allocation268_spill] sm:$0xff] %v12878_v11  ;;  %v12888_v16 = vadd.f32 %v17754_v22, %v17753_v59  ;;  %v2442_v54 = vadd.f32 %v11862_v13, %v17756_v62  ;;  %v17757_v59 = vld [vmem:[#allocation174_spill] sm:$0xff]  ;;  %v17758_v22 = vld [vmem:[#allocation344_spill] sm:$0xff]  ;;  %v17760_v62 = vld [vmem:[#allocation175_spill] sm:$0xff]  ;;  %v12908_v20 = vadd.f32 %v17764_v43, %v17763_v41  ;;  %v2098_v57 = vpop.f32.mrf.mxu1 }
 0x319   :  { %v17761_v11 = vld [vmem:[#allocation345_spill] sm:$0xff]  ;;  %v17766_v14 = vld [vmem:[#allocation8_spill] sm:$0xff]  ;;  %v17768_v21 = vld [vmem:[#allocation347_spill] sm:$0xff]  ;;  %v12930_v57 = vpop.f32.mrf.mxu0  ;;  %17775 = vst [vmem:[#allocation271_spill] sm:$0xff] %v12945_v19 }
 0x31a   :  { %17755 = vst [vmem:[#allocation18_spill] sm:$0xff] %v12888_v16  ;;  %v12900_v16 = vadd.f32 %v17758_v22, %v17757_v59  ;;  %v12904_v45 = vadd.f32 %v17761_v11, %v17760_v62  ;;  %17765 = vst [vmem:[#allocation100_spill] sm:$0xff] %v12908_v20  ;;  %v2441_v35 = vadd.f32 %v11995_v25, %v17766_v14  ;;  %v17767_v61 = vld [vmem:[#allocation177_spill] sm:$0xff]  ;;  %v17770_v59 = vld [vmem:[#allocation352_spill] sm:$0xff]  ;;  %v2634_v41 = vmax.f32 %v2442_v54, 0.0 }
 0x31b   :  { %v12914_v26 = vadd.f32 %v17768_v21, %v17767_v61  ;;  %v17771_v22 = vld [vmem:[#allocation184_spill] sm:$0xff]  ;;  %v12920_v11 = vadd.f32 %v12682_v40, %v12176_v30  ;;  %v12924_v62 = vadd.f32 %v12684_v23, %v12182_v28  ;;  %v17773_v43 = vld [vmem:[#allocation182_spill] sm:$0xff]  ;;  %v2711_v14 = vmax.f32 %v2519_v12, 0.0  ;;  %v12932_v61 = vpop.f32.mrf.mxu1  ;;  %v17807_v53 = vld [vmem:[#allocation205_spill] sm:$0xff] }
 0x31c   :  { %17759 = vst [vmem:[#allocation99_spill] sm:$0xff] %v12900_v16  ;;  %17762 = vst [vmem:[#allocation269_spill] sm:$0xff] %v12904_v45  ;;  %v2231_v7 = vadd.f32 %v17771_v22, %v17770_v59  ;;  %v12928_v29 = vadd.f32 %v11866_v44, %v17773_v43  ;;  %v2705_v21 = vmax.f32 %v2513_v52, 0.0  ;;  %v2709_v59 = vmax.f32 %v2517_v56, 0.0  ;;  %v9629_v28 = vld [vmem:[%s16744_s4 + $0x158] ss:$12 sps:$4 sm:$0xff]   ;;  %v1818_v52 = vpop.f32.mrf.mxu0 }
 0x31d   :  { %17769 = vst [vmem:[#allocation270_spill] sm:$0xff] %v12914_v26  ;;  %17772 = vst [vmem:[#allocation101_spill] sm:$0xff] %v12920_v11  ;;  %v3136_v30 = vadd.f32 %v12004_v2, %v2921_v36  ;;  %v3137_v40 = vadd.f32 %v12017_v60, %v2922_v48  ;;  %v2633_v23 = vmax.f32 %v2441_v35, 0.0  ;;  %v17774_v54 = vld [vmem:[#allocation10_spill] sm:$0xff]  ;;  %v12949_v56 = vadd.f32 %v12731_v24, %v12219_v38  ;;  %v2103_v12 = vpop.f32.mrf.mxu1  ;;  %v17776_v36 = vld [vmem:[#allocation353_spill] sm:$0xff] }
 0x31e   :  { %v12941_v22 = vadd.f32 %v11862_v13, %v17774_v54  ;;  %v12952_v48 = vadd.f32 %v11995_v25, %v2231_v7  ;;  %v17777_v43 = vld [vmem:[#allocation11_spill] sm:$0xff]  ;;  %v12958_v54 = vadd.f32 %v12758_v37, %v12223_v63  ;;  %4537 = vmatpush1.bf16.msra.mxu1 %v9629_v28  ;;  %v17779_v39 = vld [vmem:[#allocation178_spill] sm:$0xff]  ;;  %v17780_v55 = vld [vmem:[#allocation348_spill] sm:$0xff]  ;;  %v2925_v20 = vmul.f32 %v11963_v33, %v2710_v47  ;;  %v12968_v26 = vpop.f32.mrf.mxu0 }
 0x31f   :  { %v2233_v35 = vadd.f32 %v17777_v43, %v17776_v36  ;;  %v9149_v11 = vpack.i.bf16 %v3137_v40, %v3136_v30  ;;  %v12962_v19 = vadd.f32 %v17780_v55, %v17779_v39  ;;  %v17782_v38 = vld [vmem:[#allocation186_spill] sm:$0xff]  ;;  %v2926_v7 = vmul.f32 %v11967_v58, %v2711_v14  ;;  %v12970_v36 = vpop.f32.mrf.mxu1  ;;  %4538 = vmatprep.subr.bf16.mxu1 %v16962_v8  ;;  %v17783_v63 = vld [vmem:[#allocation179_spill] sm:$0xff]  ;;  %v17784_v37 = vld [vmem:[#allocation349_spill] sm:$0xff] }
 0x320   :  { %17778 = vst [vmem:[#allocation102_spill] sm:$0xff] %v12958_v54  ;;  %v2448_v24 = vadd.f32 %v12139_v0, %v17782_v38  ;;  %v12975_v30 = vadd.f32 %v17784_v37, %v17783_v63  ;;  %v2920_v40 = vmul.f32 %v12059_v34, %v2705_v21  ;;  %v2924_v28 = vmul.f32 %v12059_v34, %v2709_v59  ;;  %v17786_v14 = vld [vmem:[#allocation180_spill] sm:$0xff]  ;;  %v17787_v43 = vld [vmem:[#allocation350_spill] sm:$0xff]  ;;  %v17789_v55 = vld [vmem:[#allocation181_spill] sm:$0xff]  ;;  %v12996_v59 = vpop.f32.mrf.mxu0 }
 0x321   :  { %17781 = vst [vmem:[#allocation272_spill] sm:$0xff] %v12962_v19  ;;  %9150 = vrot.lane.b32.xlu0 %v9149_v11, %s10161_s14  ;;  %v12982_v47 = vadd.f32 %v12760_v4, %v12231_v27  ;;  %v12986_v39 = vadd.f32 %v17787_v43, %v17786_v14  ;;  %v17790_v38 = vld [vmem:[#allocation351_spill] sm:$0xff]  ;;  %v12993_v63 = vmul.f32 %v11963_v33, %v2634_v41  ;;  %v2635_v21 = vmax.f32 %v12928_v29, 0.0  ;;  %v12998_v11 = vpop.f32.mrf.mxu1  ;;  %v17805_v15 = vld [vmem:[#allocation42_spill] sm:$0xff]  ;;  %v17865_v54 = vld [vmem:[#allocation229_spill] sm:$0xff] }
 0x322   :  { %17785 = vst [vmem:[#allocation103_spill] sm:$0xff] %v12975_v30  ;;  %v12990_v45 = vadd.f32 %v17790_v38, %v17789_v55  ;;  %17793 = vst [vmem:[#allocation105_spill] sm:$0xff] %v12996_v59  ;;  %v13001_v27 = vmul.f32 %v12059_v34, %v2633_v23  ;;  %v2638_v4 = vmax.f32 %v12941_v22, 0.0  ;;  %v2637_v37 = vmax.f32 %v12952_v48, 0.0  ;;  %v17796_v55 = vld [vmem:[#allocation192_spill] sm:$0xff]  ;;  %v17797_v23 = vld [vmem:[#allocation25_spill] sm:$0xff] }
 0x323   :  { %17788 = vst [vmem:[#allocation273_spill] sm:$0xff] %v12986_v39  ;;  %17792 = vst [vmem:[#allocation274_spill] sm:$0xff] %v12993_v63  ;;  %v2447_v14 = vadd.f32 %v11866_v44, %v2233_v35  ;;  %v2640_v43 = vmax.f32 %v2448_v24, 0.0  ;;  %v2452_v41 = vadd.f32 %v12139_v0, %v17796_v55  ;;  %v3140_v38 = vadd.f32 %v12004_v2, %v2925_v20  ;;  %v13012_v39 = vpop.f32.mrf.mxu1  ;;  %v17800_v35 = vld [vmem:[#allocation215_spill] sm:$0xff]  ;;  %v17802_v20 = vld [vmem:[#allocation30_spill] sm:$0xff] }
 0x324   :  { %17791 = vst [vmem:[#allocation104_spill] sm:$0xff] %v12990_v45  ;;  %17794 = vst [vmem:[#allocation275_spill] sm:$0xff] %v12998_v11  ;;  %v3141_v29 = vadd.f32 %v12017_v60, %v2926_v7  ;;  %v13010_v45 = vpop.f32.mrf.mxu0  ;;  %v13017_v22 = vadd.f32 %v12098_v10, %v2920_v40  ;;  %v13020_v48 = vadd.f32 %v12098_v10, %v2924_v28  ;;  %v17803_v55 = vld [vmem:[#allocation9_spill] sm:$0xff]  ;;  %v17814_v17 = vld [vmem:[#allocation199_spill] sm:$0xff] }
 0x325   :  { %17795 = vst [vmem:[#allocation106_spill] sm:$0xff] %v13001_v27  ;;  %v2456_v27 = vadd.f32 %v12139_v0, %v17797_v23  ;;  %v13024_v24 = vadd.f32 %v12785_v18, %v17800_v35  ;;  %v2460_v7 = vadd.f32 %v12139_v0, %v17802_v20  ;;  %v17804_v30 = vld [vmem:[#allocation29_spill] sm:$0xff]  ;;  %v13032_v23 = vadd.f32 %v12787_v46, %v17805_v15  ;;  %v13036_v16 = vpop.f32.mrf.mxu1  ;;  %v17808_v35 = vld [vmem:[#allocation206_spill] sm:$0xff]  ;;  %v17831_v11 = vld [vmem:[#allocation219_spill] sm:$0xff] }
 0x326   :  { %17798 = vst [vmem:[#allocation276_spill] sm:$0xff] %v13017_v22  ;;  %17799 = vst [vmem:[#allocation107_spill] sm:$0xff] %v13020_v48  ;;  %v2247_v63 = vadd.f32 %v17804_v30, %v17803_v55  ;;  %v9154_v19 = vpack.i.bf16 %v3141_v29, %v3140_v38  ;;  %v13034_v40 = vpop.f32.mrf.mxu0  ;;  %v2639_v28 = vmax.f32 %v2447_v14, 0.0  ;;  %v2464_v18 = vadd.f32 %v12139_v0, %v17807_v53  ;;  %v17809_v30 = vld [vmem:[#allocation39_spill] sm:$0xff]  ;;  %v17810_v46 = vld [vmem:[#allocation217_spill] sm:$0xff] }
 0x327   :  { %17801 = vst [vmem:[#allocation277_spill] sm:$0xff] %v13024_v24  ;;  %17806 = vst [vmem:[#allocation19_spill] sm:$0xff] %v13032_v23  ;;  %v2468_v24 = vadd.f32 %v12139_v0, %v17808_v35  ;;  %v9159_v20 = vpack.i.bf16 %v13020_v48, %v13017_v22  ;;  %v2855_v38 = vmul.f32 %v17809_v30, %v2640_v43  ;;  %v2644_v29 = vmax.f32 %v2452_v41, 0.0  ;;  %v17812_v55 = vld [vmem:[#allocation44_spill] sm:$0xff]  ;;  %v13056_v6 = vpop.f32.mrf.mxu1  ;;  %v17815_v43 = vld [vmem:[#allocation218_spill] sm:$0xff] }
 0x328   :  { %9155 = vrot.lane.b32.xlu1 %v9154_v19, %s10161_s14  ;;  %v13048_v15 = vadd.f32 %v12930_v57, %v17810_v46  ;;  %v13052_v14 = vadd.f32 %v12932_v61, %v17812_v55  ;;  %v13054_v53 = vpop.f32.mrf.mxu0  ;;  %v2648_v35 = vmax.f32 %v2456_v27, 0.0  ;;  %v2457_v48 = vadd.f32 %v11995_v25, %v17814_v17  ;;  %v17817_v41 = vld [vmem:[#allocation45_spill] sm:$0xff]  ;;  %v17826_v22 = vld [vmem:[#allocation210_spill] sm:$0xff] }
 0x329   :  { %9160 = vrot.lane.b32.xlu0 %v9159_v20, %s10161_s14  ;;  %v13062_v19 = vadd.f32 %v1818_v52, %v17815_v43  ;;  %v13065_v57 = vadd.f32 %v2103_v12, %v17817_v41  ;;  %v13068_v46 = vmul.f32 %v11967_v58, %v2635_v21  ;;  %v13071_v61 = vmul.f32 %v11963_v33, %v2638_v4  ;;  %v13076_v17 = vpop.f32.mrf.mxu1  ;;  %v17823_v21 = vld [vmem:[#allocation214_spill] sm:$0xff]  ;;  %v17825_v4 = vld [vmem:[#allocation35_spill] sm:$0xff] }
 0x32a   :  { %17811 = vst [vmem:[#allocation108_spill] sm:$0xff] %v13048_v15  ;;  %17813 = vst [vmem:[#allocation278_spill] sm:$0xff] %v13052_v14  ;;  %v2652_v55 = vmax.f32 %v2460_v7, 0.0  ;;  %v2461_v27 = vadd.f32 %v11995_v25, %v2247_v63  ;;  %v13074_v15 = vpop.f32.mrf.mxu0  ;;  %v13079_v20 = vmul.f32 %v12059_v34, %v2637_v37  ;;  %v13082_v52 = vmul.f32 %v11967_v58, %v2639_v28 }
 0x32b   :  { %17816 = vst [vmem:[#allocation193_spill] sm:$0xff] %v13062_v19  ;;  %17818 = vst [vmem:[#allocation109_spill] sm:$0xff] %v13065_v57  ;;  %v2656_v12 = vmax.f32 %v2464_v18, 0.0  ;;  %v2660_v43 = vmax.f32 %v2468_v24, 0.0  ;;  %v13085_v41 = vadd.f32 %v17823_v21, %v2855_v38  ;;  %v2474_v7 = vadd.f32 %v11862_v13, %v17825_v4  ;;  %v13095_v37 = vpop.f32.mrf.mxu1  ;;  %v17829_v38 = vld [vmem:[#allocation187_spill] sm:$0xff] }
 0x32c   :  { %17819 = vst [vmem:[#allocation279_spill] sm:$0xff] %v13068_v46  ;;  %17820 = vst [vmem:[#allocation110_spill] sm:$0xff] %v13071_v61  ;;  %v2473_v63 = vadd.f32 %v11995_v25, %v17826_v22  ;;  %v17827_v46 = vld [vmem:[#allocation13_spill] sm:$0xff]  ;;  %v13093_v9 = vpop.f32.mrf.mxu0  ;;  %v2859_v28 = vmul.f32 %v17809_v30, %v2644_v29  ;;  %v2863_v24 = vmul.f32 %v17809_v30, %v2648_v35  ;;  %v2649_v18 = vmax.f32 %v2457_v48, 0.0 }
 0x32d   :  { %17821 = vst [vmem:[#allocation280_spill] sm:$0xff] %v13079_v20  ;;  %17822 = vst [vmem:[#allocation111_spill] sm:$0xff] %v13082_v52  ;;  %v17828_v61 = vld [vmem:[#allocation209_spill] sm:$0xff]  ;;  %v17830_v20 = vld [vmem:[#allocation36_spill] sm:$0xff]  ;;  %v2867_v4 = vmul.f32 %v17809_v30, %v2652_v55  ;;  %v13104_v22 = vadd.f32 %v12968_v26, %v17831_v11  ;;  %v13112_v29 = vpop.f32.mrf.mxu1  ;;  %v2871_v48 = vmul.f32 %v17809_v30, %v2656_v12  ;;  %v2666_v11 = vmax.f32 %v2474_v7, 0.0 }
 0x32e   :  { %17824 = vst [vmem:[#allocation281_spill] sm:$0xff] %v13085_v41  ;;  %v2263_v31 = vadd.f32 %v17828_v61, %v17827_v46  ;;  %v2265_v52 = vadd.f32 %v17830_v20, %v17829_v38  ;;  %v2653_v41 = vmax.f32 %v2461_v27, 0.0  ;;  %v17833_v46 = vld [vmem:[#allocation48_spill] sm:$0xff]  ;;  %v13110_v59 = vpop.f32.mrf.mxu0  ;;  %v2875_v35 = vmul.f32 %v17809_v30, %v2660_v43  ;;  %v17835_v20 = vld [vmem:[#allocation211_spill] sm:$0xff] }
 0x32f   :  { %17832 = vst [vmem:[#allocation112_spill] sm:$0xff] %v13104_v22  ;;  %v13108_v61 = vadd.f32 %v12970_v36, %v17833_v46  ;;  %v2475_v55 = vadd.f32 %v11866_v44, %v17835_v20  ;;  %v17836_v27 = vld [vmem:[#allocation212_spill] sm:$0xff]  ;;  %v9630_v26 = vld [vmem:[%s16744_s4 + $0x138] ss:$12 sps:$4 sm:$0xff]   ;;  %v2665_v46 = vmax.f32 %v2473_v63, 0.0  ;;  %v13139_v57 = vadd.f32 %v17823_v21, %v2863_v24  ;;  %v17844_v63 = vld [vmem:[#allocation225_spill] sm:$0xff] }
 0x330   :  { %v2478_v38 = vadd.f32 %v11862_v13, %v17836_v27  ;;  %v9632_v36 = vld [vmem:[%s16744_s4 + $0x13c] ss:$12 sps:$4 sm:$0xff]   ;;  %v2477_v12 = vadd.f32 %v11995_v25, %v2263_v31  ;;  %v13131_v20 = vpop.f32.mrf.mxu0  ;;  %v13136_v27 = vadd.f32 %v17823_v21, %v2859_v28  ;;  %v13142_v49 = vmul.f32 %v12059_v34, %v2649_v18  ;;  %v17845_v28 = vld [vmem:[#allocation53_spill] sm:$0xff] }
 0x331   :  { %17834 = vst [vmem:[#allocation282_spill] sm:$0xff] %v13108_v61  ;;  %v17837_v22 = vld [vmem:[#allocation50_spill] sm:$0xff]  ;;  %v13133_v61 = vpop.f32.mrf.mxu1  ;;  %17840 = vst [vmem:[#allocation114_spill] sm:$0xff] %v13139_v57  ;;  %v2479_v7 = vadd.f32 %v11866_v44, %v2265_v52  ;;  %4405 = vmatprep.subr.bf16.mxu0 %v9632_v36  ;;  %v13146_v31 = vadd.f32 %v17823_v21, %v2867_v4  ;;  %v13160_v52 = vadd.f32 %v17823_v21, %v2871_v48  ;;  %v17847_v36 = vld [vmem:[#allocation51_spill] sm:$0xff] }
 0x332   :  { %v13129_v43 = vadd.f32 %v13010_v45, %v17837_v22  ;;  %17839 = vst [vmem:[#allocation283_spill] sm:$0xff] %v13136_v27  ;;  %17841 = vst [vmem:[#allocation284_spill] sm:$0xff] %v13142_v49  ;;  %v13149_v45 = vmul.f32 %v12059_v34, %v2653_v41  ;;  %v2332_v22 = vadd.f32 %v13012_v39, %v17844_v63  ;;  %v13155_v24 = vpop.f32.mrf.mxu0  ;;  %4406 = vmatpush1.bf16.msra.mxu0 %v9630_v26 }
 0x333   :  { %17842 = vst [vmem:[#allocation115_spill] sm:$0xff] %v13146_v31  ;;  %v2333_v27 = vadd.f32 %v13036_v16, %v17845_v28  ;;  %v13157_v57 = vpop.f32.mrf.mxu1  ;;  %17846 = vst [vmem:[#allocation21_spill] sm:$0xff] %v13160_v52  ;;  %v2667_v18 = vmax.f32 %v2475_v55, 0.0  ;;  %v2670_v4 = vmax.f32 %v2478_v38, 0.0  ;;  %v2490_v41 = vadd.f32 %v11862_v13, %v17847_v36  ;;  %v17851_v55 = vld [vmem:[#allocation52_spill] sm:$0xff]  ;;  %v17852_v52 = vld [vmem:[#allocation54_spill] sm:$0xff] }
 0x334   :  { %17838 = vst [vmem:[#allocation113_spill] sm:$0xff] %v13129_v43  ;;  %17843 = vst [vmem:[#allocation285_spill] sm:$0xff] %v13149_v45  ;;  %v13165_v31 = vadd.f32 %v17823_v21, %v2875_v35  ;;  %v13168_v39 = vmul.f32 %v11963_v33, %v2666_v11  ;;  %v13171_v16 = vmul.f32 %v12059_v34, %v2665_v46  ;;  %v2669_v63 = vmax.f32 %v2477_v12, 0.0  ;;  %v13173_v28 = vpop.f32.mrf.mxu0  ;;  %v17853_v35 = vld [vmem:[#allocation20_spill] sm:$0xff]  ;;  %v17855_v11 = vld [vmem:[#allocation194_spill] sm:$0xff] }
 0x335   :  { %v13175_v26 = vpop.f32.mrf.mxu1  ;;  %v2671_v48 = vmax.f32 %v2479_v7, 0.0  ;;  %v2489_v38 = vadd.f32 %v11995_v25, %v17851_v55  ;;  %v2491_v36 = vadd.f32 %v11866_v44, %v17852_v52  ;;  %v2546_v46 = vadd.f32 %v11862_v13, %v2332_v22  ;;  %v9633_v52 = vld [vmem:[%s16744_s4 + $0x140] ss:$12 sps:$4 sm:$0xff]  }
 0x336   :  { %17848 = vst [vmem:[#allocation116_spill] sm:$0xff] %v13165_v31  ;;  %17849 = vst [vmem:[#allocation286_spill] sm:$0xff] %v13168_v39  ;;  %v17854_v31 = vld [vmem:[#allocation47_spill] sm:$0xff]  ;;  %v17856_v39 = vld [vmem:[#allocation221_spill] sm:$0xff]  ;;  %v2547_v12 = vadd.f32 %v11866_v44, %v2333_v27  ;;  %v13191_v7 = vpop.f32.mrf.mxu0  ;;  %v2682_v22 = vmax.f32 %v2490_v41, 0.0  ;;  %4539 = vmatpush1.bf16.msra.mxu1 %v9633_v52 }
 0x337   :  { %17850 = vst [vmem:[#allocation117_spill] sm:$0xff] %v13171_v16  ;;  %v2279_v43 = vadd.f32 %v17854_v31, %v17853_v35  ;;  %v2281_v19 = vadd.f32 %v17856_v39, %v17855_v11  ;;  %v17857_v16 = vld [vmem:[#allocation227_spill] sm:$0xff]  ;;  %v13193_v55 = vpop.f32.mrf.mxu1  ;;  %v13199_v31 = vmul.f32 %v11967_v58, %v2667_v18  ;;  %v13202_v39 = vmul.f32 %v11963_v33, %v2670_v4  ;;  %v17861_v27 = vld [vmem:[#allocation233_spill] sm:$0xff] }
 0x338   :  { %v13189_v14 = vadd.f32 %v13054_v53, %v17857_v16  ;;  %v2494_v35 = vadd.f32 %v11862_v13, %v17861_v27  ;;  %v13207_v53 = vmul.f32 %v12059_v34, %v2669_v63  ;;  %v17863_v16 = vld [vmem:[#allocation65_spill] sm:$0xff]  ;;  %v2337_v18 = vadd.f32 %v13076_v17, %v17865_v54  ;;  %4546 = vmatprep.subr.bf16.mxu1 %v16962_v8 }
 0x339   :  { %17859 = vst [vmem:[#allocation195_spill] sm:$0xff] %v13199_v31  ;;  %17860 = vst [vmem:[#allocation118_spill] sm:$0xff] %v13202_v39  ;;  %v2496_v11 = vadd.f32 %v12139_v0, %v17863_v16  ;;  %v13215_v31 = vpop.f32.mrf.mxu0  ;;  %v13217_v4 = vpop.f32.mrf.mxu1  ;;  %v13220_v41 = vmul.f32 %v11967_v58, %v2671_v48  ;;  %v2681_v27 = vmax.f32 %v2489_v38, 0.0  ;;  %v2683_v63 = vmax.f32 %v2491_v36, 0.0  ;;  %v17870_v36 = vld [vmem:[#allocation226_spill] sm:$0xff] }
 0x33a   :  { %17858 = vst [vmem:[#allocation287_spill] sm:$0xff] %v13189_v14  ;;  %17862 = vst [vmem:[#allocation288_spill] sm:$0xff] %v13207_v53  ;;  %v17864_v14 = vld [vmem:[#allocation228_spill] sm:$0xff]  ;;  %v2495_v54 = vadd.f32 %v11866_v44, %v2281_v19  ;;  %v2739_v17 = vmax.f32 %v2547_v12, 0.0  ;;  %v13234_v48 = vmul.f32 %v11963_v33, %v2682_v22  ;;  %v2686_v38 = vmax.f32 %v2494_v35, 0.0  ;;  %v17876_v35 = vld [vmem:[#allocation57_spill] sm:$0xff] }
 0x33b   :  { %v2336_v23 = vadd.f32 %v13056_v6, %v17864_v14  ;;  %17866 = vst [vmem:[#allocation119_spill] sm:$0xff] %v13220_v41  ;;  %v17867_v53 = vld [vmem:[#allocation56_spill] sm:$0xff]  ;;  %v2493_v6 = vadd.f32 %v11995_v25, %v2279_v43  ;;  %v2738_v14 = vmax.f32 %v2546_v46, 0.0  ;;  %v13229_v16 = vpop.f32.mrf.mxu0  ;;  %v13231_v52 = vpop.f32.mrf.mxu1  ;;  %v2688_v41 = vmax.f32 %v2496_v11, 0.0  ;;  %v17872_v43 = vld [vmem:[#allocation74_spill] sm:$0xff] }
 0x33c   :  { %v13224_v39 = vadd.f32 %v13093_v9, %v17867_v53  ;;  %17869 = vst [vmem:[#allocation120_spill] sm:$0xff] %v13234_v48  ;;  %v2331_v9 = vadd.f32 %v13034_v40, %v17870_v36  ;;  %v17871_v53 = vld [vmem:[#allocation55_spill] sm:$0xff]  ;;  %v2500_v19 = vadd.f32 %v12139_v0, %v17872_v43  ;;  %v2551_v12 = vadd.f32 %v11866_v44, %v2337_v18  ;;  %v17877_v11 = vld [vmem:[#allocation58_spill] sm:$0xff] }
 0x33d   :  { %v2550_v46 = vadd.f32 %v11862_v13, %v2336_v23  ;;  %v13244_v45 = vpop.f32.mrf.mxu0  ;;  %v13246_v49 = vpop.f32.mrf.mxu1  ;;  %v13249_v22 = vmul.f32 %v12059_v34, %v2681_v27  ;;  %v13252_v40 = vmul.f32 %v11967_v58, %v2683_v63  ;;  %v2341_v36 = vadd.f32 %v13112_v29, %v17877_v11  ;;  %v9634_v27 = vld [vmem:[%s16744_s4 + $0x258] ss:$12 sps:$4 sm:$0xff]   ;;  %v9636_v63 = vld [vmem:[%s16744_s4 + $0x25c] ss:$12 sps:$4 sm:$0xff]  }
 0x33e   :  { %17868 = vst [vmem:[#allocation289_spill] sm:$0xff] %v13224_v39  ;;  %v2335_v39 = vadd.f32 %v13074_v15, %v17871_v53  ;;  %17873 = vst [vmem:[#allocation290_spill] sm:$0xff] %v13246_v49  ;;  %v2340_v15 = vadd.f32 %v13095_v37, %v17876_v35  ;;  %v2685_v53 = vmax.f32 %v2493_v6, 0.0  ;;  %v2687_v23 = vmax.f32 %v2495_v54, 0.0  ;;  %v17880_v54 = vld [vmem:[#allocation231_spill] sm:$0xff]  ;;  %4413 = vmatprep.subr.bf16.mxu0 %v9636_v63 }
 0x33f   :  { %17874 = vst [vmem:[#allocation196_spill] sm:$0xff] %v13249_v22  ;;  %17875 = vst [vmem:[#allocation121_spill] sm:$0xff] %v13252_v40  ;;  %v2953_v18 = vmul.f32 %v11963_v33, %v2738_v14  ;;  %v2954_v43 = vmul.f32 %v11967_v58, %v2739_v17  ;;  %v13260_v48 = vpop.f32.mrf.mxu0  ;;  %v13269_v37 = vmul.f32 %v11963_v33, %v2686_v38  ;;  %v2692_v35 = vmax.f32 %v2500_v19, 0.0  ;;  %v13278_v40 = vpop.f32.mrf.mxu1  ;;  %v17882_v38 = vld [vmem:[#allocation76_spill] sm:$0xff]  ;;  %v17883_v49 = vld [vmem:[#allocation59_spill] sm:$0xff] }
 0x340   :  { %17878 = vst [vmem:[#allocation291_spill] sm:$0xff] %v13260_v48  ;;  %v2545_v29 = vadd.f32 %v11995_v25, %v2331_v9  ;;  %v2549_v6 = vadd.f32 %v11995_v25, %v2335_v39  ;;  %v13275_v14 = vadd.f32 %v13131_v20, %v17880_v54  ;;  %v2903_v17 = vmul.f32 %v17809_v30, %v2688_v41  ;;  %v17884_v41 = vld [vmem:[#allocation61_spill] sm:$0xff]  ;;  %v17885_v54 = vld [vmem:[#allocation234_spill] sm:$0xff] }
 0x341   :  { %17879 = vst [vmem:[#allocation122_spill] sm:$0xff] %v13269_v37  ;;  %v2742_v11 = vmax.f32 %v2550_v46, 0.0  ;;  %v2743_v22 = vmax.f32 %v2551_v12, 0.0  ;;  %17881 = vst [vmem:[#allocation292_spill] sm:$0xff] %v13278_v40  ;;  %v13280_v48 = vpop.f32.mrf.mxu0  ;;  %v2506_v37 = vadd.f32 %v11862_v13, %v17882_v38  ;;  %v2554_v9 = vadd.f32 %v11862_v13, %v2340_v15  ;;  %4414 = vmatpush2.bf16.msra.mxu0 %v9634_v27  ;;  %v9637_v15 = vld [vmem:[%s16744_s4 + $0x260] ss:$12 sps:$4 sm:$0xff]  }
 0x342   :  { %v2555_v39 = vadd.f32 %v11866_v44, %v2341_v36  ;;  %v2344_v20 = vadd.f32 %v13133_v61, %v17883_v49  ;;  %v2345_v19 = vadd.f32 %v13157_v57, %v17884_v41  ;;  %v3168_v46 = vadd.f32 %v12004_v2, %v2953_v18  ;;  %v17889_v61 = vld [vmem:[#allocation248_spill] sm:$0xff]  ;;  %4547 = vmatpush2.bf16.msra.mxu1 %v9637_v15  ;;  %v17897_v40 = vld [vmem:[#allocation62_spill] sm:$0xff] }
 0x343   :  { %v3169_v12 = vadd.f32 %v12017_v60, %v2954_v43  ;;  %v13294_v63 = vadd.f32 %v13173_v28, %v17885_v54  ;;  %v13296_v38 = vpop.f32.mrf.mxu0  ;;  %v13302_v49 = vmul.f32 %v12059_v34, %v2685_v53  ;;  %v2505_v57 = vadd.f32 %v11995_v25, %v17889_v61  ;;  %v13311_v54 = vpop.f32.mrf.mxu1  ;;  %4548 = vmatprep.subr.bf16.mxu1 %v16962_v8 }
 0x344   :  { %17887 = vst [vmem:[#allocation293_spill] sm:$0xff] %v13296_v38  ;;  %v2737_v36 = vmax.f32 %v2545_v29, 0.0  ;;  %v2741_v18 = vmax.f32 %v2549_v6, 0.0  ;;  %v13307_v43 = vmul.f32 %v11967_v58, %v2687_v23  ;;  %v2957_v28 = vmul.f32 %v11963_v33, %v2742_v11  ;;  %v17892_v11 = vld [vmem:[#allocation250_spill] sm:$0xff] }
 0x345   :  { %17886 = vst [vmem:[#allocation123_spill] sm:$0xff] %v13294_v63  ;;  %17888 = vst [vmem:[#allocation124_spill] sm:$0xff] %v13302_v49  ;;  %v2958_v27 = vmul.f32 %v11967_v58, %v2743_v22  ;;  %v9164_v41 = vpack.i.bf16 %v3169_v12, %v3168_v46  ;;  %v13313_v38 = vpop.f32.mrf.mxu0  ;;  %v13316_v53 = vadd.f32 %v17823_v21, %v2903_v17  ;;  %v2746_v49 = vmax.f32 %v2554_v9, 0.0  ;;  %v17903_v63 = vld [vmem:[#allocation31_spill] sm:$0xff] }
 0x346   :  { %17890 = vst [vmem:[#allocation294_spill] sm:$0xff] %v13307_v43  ;;  %v2747_v61 = vmax.f32 %v2555_v39, 0.0  ;;  %v2558_v29 = vadd.f32 %v11862_v13, %v2344_v20  ;;  %v2907_v23 = vmul.f32 %v17809_v30, %v2692_v35  ;;  %v2698_v6 = vmax.f32 %v2506_v37, 0.0  ;;  %v17893_v20 = vld [vmem:[#allocation230_spill] sm:$0xff]  ;;  %v17894_v35 = vld [vmem:[#allocation60_spill] sm:$0xff] }
 0x347   :  { %17891 = vst [vmem:[#allocation125_spill] sm:$0xff] %v13316_v53  ;;  %v13323_v22 = vadd.f32 %v11866_v44, %v17892_v11  ;;  %v2559_v46 = vadd.f32 %v11866_v44, %v2345_v19  ;;  %9165 = vrot.lane.b32.xlu1 %v9164_v41, %s10161_s14  ;;  %v13327_v12 = vpop.f32.mrf.mxu0  ;;  %v2697_v17 = vmax.f32 %v2505_v57, 0.0  ;;  %v2952_v9 = vmul.f32 %v12059_v34, %v2737_v36  ;;  %v17895_v19 = vld [vmem:[#allocation236_spill] sm:$0xff]  ;;  %v13341_v53 = vpop.f32.mrf.mxu1 }
 0x348   :  { %v2956_v39 = vmul.f32 %v12059_v34, %v2741_v18  ;;  %v2339_v15 = vadd.f32 %v13110_v59, %v17893_v20  ;;  %v2343_v37 = vadd.f32 %v13155_v24, %v17894_v35  ;;  %v3172_v11 = vadd.f32 %v12004_v2, %v2957_v28  ;;  %v17899_v20 = vld [vmem:[#allocation63_spill] sm:$0xff] }
 0x349   :  { %v3173_v43 = vadd.f32 %v12017_v60, %v2958_v27  ;;  %v13339_v41 = vadd.f32 %v13215_v31, %v17895_v19  ;;  %v2961_v57 = vmul.f32 %v11963_v33, %v2746_v49  ;;  %v2962_v36 = vmul.f32 %v11967_v58, %v2747_v61  ;;  %v13352_v31 = vpop.f32.mrf.mxu0  ;;  %v17901_v61 = vld [vmem:[#allocation204_spill] sm:$0xff] }
 0x34a   :  { %v2750_v18 = vmax.f32 %v2558_v29, 0.0  ;;  %v2348_v59 = vadd.f32 %v13175_v26, %v17897_v40  ;;  %v13348_v24 = vadd.f32 %v17823_v21, %v2907_v23  ;;  %v2751_v28 = vmax.f32 %v2559_v46, 0.0  ;;  %v17902_v29 = vld [vmem:[#allocation238_spill] sm:$0xff]  ;;  %v17904_v26 = vld [vmem:[#allocation67_spill] sm:$0xff] }
 0x34b   :  { %17896 = vst [vmem:[#allocation295_spill] sm:$0xff] %v13339_v41  ;;  %v2349_v27 = vadd.f32 %v13193_v55, %v17899_v20  ;;  %v9169_v35 = vpack.i.bf16 %v3173_v43, %v3172_v11  ;;  %v13355_v19 = vmul.f32 %v11963_v33, %v2698_v6  ;;  %v2699_v49 = vmax.f32 %v13323_v22, 0.0  ;;  %v13371_v6 = vpop.f32.mrf.mxu1 }
 0x34c   :  { %17898 = vst [vmem:[#allocation126_spill] sm:$0xff] %v13348_v24  ;;  %v2295_v41 = vadd.f32 %v17902_v29, %v17901_v61  ;;  %v2297_v40 = vadd.f32 %v17904_v26, %v17903_v63  ;;  %v2553_v23 = vadd.f32 %v11995_v25, %v2339_v15  ;;  %v2557_v46 = vadd.f32 %v11995_v25, %v2343_v37  ;;  %v13385_v61 = vpop.f32.mrf.mxu0 }
 0x34d   :  { %17900 = vst [vmem:[#allocation296_spill] sm:$0xff] %v13355_v19  ;;  %9170 = vrot.lane.b32.xlu1 %v9169_v35, %s10161_s14  ;;  %v13366_v55 = vadd.f32 %v12098_v10, %v2952_v9  ;;  %v13369_v43 = vadd.f32 %v12098_v10, %v2956_v39  ;;  %v2965_v22 = vmul.f32 %v11963_v33, %v2750_v18  ;;  %v17907_v35 = vld [vmem:[#allocation239_spill] sm:$0xff] }
 0x34e   :  { %v2562_v11 = vadd.f32 %v11862_v13, %v2348_v59  ;;  %v3176_v63 = vadd.f32 %v12004_v2, %v2961_v57  ;;  %v3177_v15 = vadd.f32 %v12017_v60, %v2962_v36  ;;  %v2966_v37 = vmul.f32 %v11967_v58, %v2751_v28  ;;  %v9638_v18 = vld [vmem:[%s16744_s4 + $0x240] ss:$12 sps:$4 sm:$0xff]   ;;  %v9640_v57 = vld [vmem:[%s16744_s4 + $0x244] ss:$12 sps:$4 sm:$0xff]  }
 0x34f   :  { %17905 = vst [vmem:[#allocation127_spill] sm:$0xff] %v13366_v55  ;;  %17906 = vst [vmem:[#allocation297_spill] sm:$0xff] %v13369_v43  ;;  %v2563_v20 = vadd.f32 %v11866_v44, %v2349_v27  ;;  %v9174_v9 = vpack.i.bf16 %v13369_v43, %v13366_v55  ;;  %v13383_v39 = vadd.f32 %v13244_v45, %v17907_v35  ;;  %v17910_v27 = vld [vmem:[#allocation256_spill] sm:$0xff]  ;;  %4415 = vmatprep.subr.bf16.mxu0 %v9640_v57  ;;  %v17914_v57 = vld [vmem:[#allocation241_spill] sm:$0xff] }
 0x350   :  { %v13394_v36 = vmul.f32 %v12059_v34, %v2697_v17  ;;  %v2512_v59 = vadd.f32 %v12139_v0, %v12723_v5  ;;  %v2516_v45 = vadd.f32 %v12139_v0, %v12810_v1  ;;  %v9179_v28 = vpack.i.bf16 %v3177_v15, %v3176_v63  ;;  %v13411_v17 = vpop.permute.xlu0 %9080  ;;  %v17911_v63 = vld [vmem:[#allocation64_spill] sm:$0xff]  ;;  %4416 = vmatpush2.bf16.msra.mxu0 %v9638_v18 }
 0x351   :  { %17908 = vst [vmem:[#allocation128_spill] sm:$0xff] %v13383_v39  ;;  %v13402_v29 = vadd.f32 %v11862_v13, %v17910_v27  ;;  %v13405_v26 = vadd.f32 %v11995_v25, %v2295_v41  ;;  %v13408_v35 = vadd.f32 %v11866_v44, %v2297_v40  ;;  %9175 = vrot.lane.b32.xlu1 %v9174_v9, %s10161_s14  ;;  %v13413_v39 = vpop.f32.mrf.mxu1  ;;  %v2745_v5 = vmax.f32 %v2553_v23, 0.0  ;;  %v17912_v27 = vld [vmem:[#allocation66_spill] sm:$0xff]  ;;  %v9641_v23 = vld [vmem:[%s16744_s4 + $0x248] ss:$12 sps:$4 sm:$0xff]  }
 0x352   :  { %17909 = vst [vmem:[#allocation298_spill] sm:$0xff] %v13394_v36  ;;  %v2749_v1 = vmax.f32 %v2557_v46, 0.0  ;;  %v2352_v15 = vadd.f32 %v13217_v4, %v17911_v63  ;;  %v2353_v43 = vadd.f32 %v13231_v52, %v17912_v27  ;;  %9180 = vrot.lane.b32.xlu0 %v9179_v28, %s10161_s14  ;;  %v2754_v41 = vmax.f32 %v2562_v11, 0.0  ;;  %v13422_v36 = vpop.f32.mrf.mxu0  ;;  %4549 = vmatpush2.bf16.msra.mxu1 %v9641_v23  ;;  %v17917_v27 = vld [vmem:[#allocation237_spill] sm:$0xff] }
 0x353   :  { %v2755_v40 = vmax.f32 %v2563_v20, 0.0  ;;  %v3180_v9 = vadd.f32 %v12004_v2, %v2965_v22  ;;  %v3181_v55 = vadd.f32 %v12017_v60, %v2966_v37  ;;  %v13428_v4 = vmul.f32 %v11967_v58, %v2699_v49  ;;  %v13437_v28 = vpop.f32.mrf.mxu1  ;;  %4550 = vmatprep.subr.bf16.mxu1 %v16962_v8 }
 0x354   :  { %v2704_v46 = vmax.f32 %v2512_v59, 0.0  ;;  %v2708_v52 = vmax.f32 %v2516_v45, 0.0  ;;  %v13432_v18 = vadd.f32 %v13280_v48, %v17914_v57  ;;  %v2702_v11 = vmax.f32 %v13402_v29, 0.0  ;;  %v17919_v57 = vld [vmem:[#allocation40_spill] sm:$0xff] }
 0x355   :  { %17913 = vst [vmem:[#allocation23_spill] sm:$0xff] %v13428_v4  ;;  %v2701_v22 = vmax.f32 %v13405_v26, 0.0  ;;  %v2703_v37 = vmax.f32 %v13408_v35, 0.0  ;;  %v9184_v20 = vpack.i.bf16 %v3181_v55, %v3180_v9  ;;  %v2960_v63 = vmul.f32 %v12059_v34, %v2745_v5  ;;  %v13451_v35 = vpop.permute.xlu0 %9085  ;;  %v13453_v5 = vpop.f32.mrf.mxu0  ;;  %v17918_v9 = vld [vmem:[#allocation213_spill] sm:$0xff] }
 0x356   :  { %17915 = vst [vmem:[#allocation129_spill] sm:$0xff] %v13432_v18  ;;  %v2964_v49 = vmul.f32 %v12059_v34, %v2749_v1  ;;  %v2566_v59 = vadd.f32 %v11862_v13, %v2352_v15  ;;  %v2567_v45 = vadd.f32 %v11866_v44, %v2353_v43  ;;  %v2522_v48 = vadd.f32 %v11862_v13, %v12842_v50  ;;  %v17916_v15 = vld [vmem:[#allocation235_spill] sm:$0xff]  ;;  %v13469_v18 = vpop.f32.mrf.mxu1 }
 0x357   :  { %v2521_v29 = vadd.f32 %v11995_v25, %v12846_v42  ;;  %v2969_v55 = vmul.f32 %v11963_v33, %v2754_v41  ;;  %v2970_v26 = vmul.f32 %v11967_v58, %v2755_v40  ;;  %9185 = vrot.lane.b32.xlu1 %v9184_v20, %s10161_s14  ;;  %v2919_v43 = vmul.f32 %v17809_v30, %v2704_v46  ;;  %v17920_v20 = vld [vmem:[#allocation88_spill] sm:$0xff] }
 0x358   :  { %v2923_v1 = vmul.f32 %v17809_v30, %v2708_v52  ;;  %v2347_v50 = vadd.f32 %v13191_v7, %v17916_v15  ;;  %v2351_v42 = vadd.f32 %v13229_v16, %v17917_v27  ;;  %v2523_v41 = vadd.f32 %v11866_v44, %v12862_v51 }
 0x359   :  { %v2526_v40 = vadd.f32 %v11862_v13, %v12924_v62  ;;  %v2311_v23 = vadd.f32 %v12705_v32, %v17918_v9  ;;  %v2313_v46 = vadd.f32 %v17920_v20, %v17919_v57  ;;  %v2758_v52 = vmax.f32 %v2566_v59, 0.0  ;;  %v13479_v32 = vpop.f32.mrf.mxu0  ;;  %v13495_v20 = vpop.f32.mrf.mxu1 }
 0x35a   :  { %v2759_v4 = vmax.f32 %v2567_v45, 0.0  ;;  %v13472_v7 = vadd.f32 %v12098_v10, %v2960_v63  ;;  %v13475_v16 = vadd.f32 %v12098_v10, %v2964_v49  ;;  %v2714_v51 = vmax.f32 %v2522_v48, 0.0  ;;  %v17923_v63 = vld [vmem:[#allocation243_spill] sm:$0xff] }
 0x35b   :  { %v2713_v15 = vmax.f32 %v2521_v29, 0.0  ;;  %v3184_v62 = vadd.f32 %v12004_v2, %v2969_v55  ;;  %v3185_v27 = vadd.f32 %v12017_v60, %v2970_v26  ;;  %v2561_v9 = vadd.f32 %v11995_v25, %v2347_v50  ;;  %v13493_v26 = vpop.permute.xlu0 %9090 }
 0x35c   :  { %17921 = vst [vmem:[#allocation299_spill] sm:$0xff] %v13472_v7  ;;  %17922 = vst [vmem:[#allocation197_spill] sm:$0xff] %v13475_v16  ;;  %v2565_v57 = vadd.f32 %v11995_v25, %v2351_v42  ;;  %v9199_v59 = vpack.i.bf16 %v13475_v16, %v13472_v7  ;;  %v13487_v45 = vadd.f32 %v13313_v38, %v17923_v63  ;;  %v2715_v49 = vmax.f32 %v2523_v41, 0.0  ;;  %v17940_v7 = vld [vmem:[#allocation75_spill] sm:$0xff] }
 0x35d   :  { %v2525_v48 = vadd.f32 %v11995_v25, %v2311_v23  ;;  %v13491_v29 = vadd.f32 %v11866_v44, %v2313_v46  ;;  %v9189_v55 = vpack.i.bf16 %v3185_v27, %v3184_v62  ;;  %v13498_v50 = vmul.f32 %v11963_v33, %v2702_v11  ;;  %v13516_v11 = vpop.f32.mrf.mxu0 }
 0x35e   :  { %17924 = vst [vmem:[#allocation26_spill] sm:$0xff] %v13487_v45  ;;  %v2718_v42 = vmax.f32 %v2526_v40, 0.0  ;;  %v2973_v16 = vmul.f32 %v11963_v33, %v2758_v52  ;;  %v2974_v38 = vmul.f32 %v11967_v58, %v2759_v4  ;;  %9200 = vrot.lane.b32.xlu1 %v9199_v59, %s10161_s14  ;;  %v13504_v41 = vmul.f32 %v12059_v34, %v2701_v22  ;;  %v9642_v4 = vld [vmem:[%s16744_s4 + $0x228] ss:$12 sps:$4 sm:$0xff]   ;;  %v9644_v22 = vld [vmem:[%s16744_s4 + $0x22c] ss:$12 sps:$4 sm:$0xff]  }
 0x35f   :  { %17925 = vst [vmem:[#allocation130_spill] sm:$0xff] %v13498_v50  ;;  %v13507_v23 = vmul.f32 %v11967_v58, %v2703_v37  ;;  %v13510_v46 = vadd.f32 %v17823_v21, %v2919_v43  ;;  %v13513_v62 = vadd.f32 %v17823_v21, %v2923_v1  ;;  %9190 = vrot.lane.b32.xlu0 %v9189_v55, %s10161_s14  ;;  %v2753_v1 = vmax.f32 %v2561_v9, 0.0  ;;  %v13536_v55 = vpop.f32.mrf.mxu1  ;;  %v17976_v50 = vld [vmem:[#allocation113_spill] sm:$0xff] }
 0x360   :  { %17926 = vst [vmem:[#allocation300_spill] sm:$0xff] %v13504_v41  ;;  %v13525_v37 = vmul.f32 %v11963_v33, %v2714_v51  ;;  %v13528_v43 = vmul.f32 %v12059_v34, %v2713_v15  ;;  %v2757_v40 = vmax.f32 %v2565_v57, 0.0  ;;  %v13531_v52 = vmul.f32 %v11967_v58, %v2715_v49  ;;  %4417 = vmatprep.subr.bf16.mxu0 %v9644_v22  ;;  %v13545_v49 = vpop.permute.xlu1 %9100  ;;  %v17938_v22 = vld [vmem:[#allocation285_spill] sm:$0xff] }
 0x361   :  { %17927 = vst [vmem:[#allocation22_spill] sm:$0xff] %v13507_v23  ;;  %17928 = vst [vmem:[#allocation24_spill] sm:$0xff] %v13510_v46  ;;  %v2717_v27 = vmax.f32 %v2525_v48, 0.0  ;;  %v2719_v59 = vmax.f32 %v13491_v29, 0.0  ;;  %v2530_v63 = vadd.f32 %v11862_v13, %v12949_v56  ;;  %v13539_v51 = vmul.f32 %v11963_v33, %v2718_v42  ;;  %4418 = vmatpush2.bf16.msra.mxu0 %v9642_v4  ;;  %v17935_v48 = vld [vmem:[#allocation43_spill] sm:$0xff]  ;;  %v17936_v56 = vld [vmem:[#allocation284_spill] sm:$0xff] }
 0x362   :  { %17929 = vst [vmem:[#allocation200_spill] sm:$0xff] %v13513_v62  ;;  %17930 = vst [vmem:[#allocation27_spill] sm:$0xff] %v13525_v37  ;;  %v2531_v15 = vadd.f32 %v11866_v44, %v12982_v47  ;;  %v3188_v9 = vadd.f32 %v12004_v2, %v2973_v16  ;;  %v3189_v57 = vadd.f32 %v12017_v60, %v2974_v38  ;;  %v13561_v16 = vpop.permute.xlu0 %9095  ;;  %v13563_v38 = vpop.f32.mrf.mxu0  ;;  %v17943_v4 = vld [vmem:[#allocation102_spill] sm:$0xff]  ;;  %v17955_v37 = vld [vmem:[#allocation79_spill] sm:$0xff] }
 0x363   :  { %17931 = vst [vmem:[#allocation201_spill] sm:$0xff] %v13528_v43  ;;  %17932 = vst [vmem:[#allocation131_spill] sm:$0xff] %v13531_v52  ;;  %v2321_v29 = vadd.f32 %v12814_v3, %v17935_v48  ;;  %v13551_v45 = vadd.f32 %v12098_v10, %v17936_v56  ;;  %v13555_v42 = vadd.f32 %v12098_v10, %v17938_v22  ;;  %v9645_v3 = vld [vmem:[%s16744_s4 + $0x230] ss:$12 sps:$4 sm:$0xff]   ;;  %v13582_v52 = vpop.f32.mrf.mxu1 }
 0x364   :  { %17933 = vst [vmem:[#allocation301_spill] sm:$0xff] %v13539_v51  ;;  %17934 = vst [vmem:[#allocation132_spill] sm:$0xff] %v13545_v49  ;;  %v13559_v47 = vadd.f32 %v13352_v31, %v17940_v7  ;;  %v13570_v48 = vadd.f32 %v11995_v25, %v17943_v4  ;;  %v2968_v56 = vmul.f32 %v12059_v34, %v2753_v1  ;;  %v17946_v7 = vld [vmem:[#allocation73_spill] sm:$0xff]  ;;  %v9103_v51 = vunpack.i.h.bf16 %v13545_v49  ;;  %v17947_v4 = vld [vmem:[#allocation246_spill] sm:$0xff] }
 0x365   :  { %17937 = vst [vmem:[#allocation302_spill] sm:$0xff] %v13551_v45  ;;  %17939 = vst [vmem:[#allocation133_spill] sm:$0xff] %v13555_v42  ;;  %v2972_v22 = vmul.f32 %v12059_v34, %v2757_v40  ;;  %v9204_v43 = vpack.i.bf16 %v3189_v57, %v3188_v9  ;;  %v13575_v31 = vmul.f32 %v12059_v34, %v2717_v27  ;;  %4551 = vmatpush2.bf16.msra.mxu1 %v9645_v3 }
 0x366   :  { %17941 = vst [vmem:[#allocation303_spill] sm:$0xff] %v13559_v47  ;;  %17942 = vst [vmem:[#allocation28_spill] sm:$0xff] %v13561_v16  ;;  %v2364_v47 = vadd.f32 %v13371_v6, %v17946_v7  ;;  %v9194_v41 = vpack.i.bf16 %v13555_v42, %v13551_v45  ;;  %v2365_v1 = vadd.f32 %v13413_v39, %v17947_v4  ;;  %v16786_v40 = vunpack.i.l.bf16 %v13545_v49  ;;  %v17948_v7 = vld [vmem:[#allocation19_spill] sm:$0xff]  ;;  %v13599_v39 = vpop.f32.mrf.mxu0  ;;  %v17960_v42 = vld [vmem:[#allocation78_spill] sm:$0xff] }
 0x367   :  { %17944 = vst [vmem:[#allocation134_spill] sm:$0xff] %v13570_v48  ;;  %17945 = vst [vmem:[#allocation304_spill] sm:$0xff] %v13575_v31  ;;  %9205 = vrot.lane.b32.xlu1 %v9204_v43, %s10161_s14  ;;  %v9098_v27 = vunpack.i.h.bf16 %v13561_v16  ;;  %v16787_v9 = vunpack.i.l.bf16 %v13561_v16  ;;  %4552 = vmatprep.subr.bf16.mxu1 %v16962_v8  ;;  %v2722_v6 = vmax.f32 %v2530_v63, 0.0  ;;  %v2723_v57 = vmax.f32 %v2531_v15, 0.0  ;;  %v9646_v43 = vld [vmem:[%s16741_s1 + $0x68] sm:$0xff]   ;;  %v17953_v31 = vld [vmem:[#allocation278_spill] sm:$0xff] }
 0x368   :  { %v13593_v48 = vadd.f32 %v11862_v13, %v17948_v7  ;;  %v13596_v3 = vadd.f32 %v11866_v44, %v2321_v29  ;;  %9195 = vrot.lane.b32.xlu0 %v9194_v41, %s10161_s14  ;;  %v9649_v63 = vld [vmem:[%s16744_s4 + $0x214] ss:$12 sps:$4 sm:$0xff]   ;;  %v13610_v15 = vsel %vm3470_vm2, %v16786_v40, %v9103_v51  ;;  %v13618_v41 = vadd.f32 %v12098_v10, %v2968_v56  ;;  %v9647_v7 = vld [vmem:[%s16744_s4 + $0x210] ss:$12 sps:$4 sm:$0xff]  }
 0x369   :  { %17949 = vst [vmem:[#allocation135_spill] sm:$0xff] %v13610_v15  ;;  %v13615_v29 = vsel %vm3470_vm2, %v16787_v9, %v9098_v27  ;;  %v13621_v4 = vadd.f32 %v12098_v10, %v2972_v22  ;;  %v13628_v49 = vadd.f32 %v11862_v13, %v17953_v31  ;;  %v17954_v51 = vld [vmem:[#allocation193_spill] sm:$0xff]  ;;  %v13638_v22 = vpop.f32.mrf.mxu1  ;;  %8498 = vmatmul.mubr.msk.bf16.gmra.mxu0 %vm313_vm1, %v9646_v43  ;;  %v17969_v45 = vld [vmem:[#allocation282_spill] sm:$0xff] }
 0x36a   :  { %17950 = vst [vmem:[#allocation305_spill] sm:$0xff] %v13615_v29  ;;  %17951 = vst [vmem:[#allocation136_spill] sm:$0xff] %v13618_v41  ;;  %v13632_v40 = vadd.f32 %v11995_v25, %v17954_v51  ;;  %v2578_v9 = vadd.f32 %v11862_v13, %v2364_v47  ;;  %v2579_v16 = vadd.f32 %v11866_v44, %v2365_v1  ;;  %8525 = vmatmul.mubr.msk.bf16.gmra.mxu1 %vm313_vm1, %v9646_v43  ;;  %v17959_v15 = vld [vmem:[#allocation77_spill] sm:$0xff]  ;;  %v13660_v29 = vpop.f32.mrf.mxu0  ;;  %v17963_v43 = vld [vmem:[#allocation190_spill] sm:$0xff] }
 0x36b   :  { %17952 = vst [vmem:[#allocation306_spill] sm:$0xff] %v13621_v4  ;;  %v9209_v31 = vpack.i.bf16 %v13621_v4, %v13618_v41  ;;  %v13647_v51 = vadd.f32 %v13422_v36, %v17955_v37  ;;  %v13651_v27 = vmul.f32 %v11967_v58, %v2719_v59  ;;  %v13654_v56 = vmul.f32 %v11963_v33, %v2722_v6  ;;  %v9650_v36 = vld [vmem:[%s16744_s4 + $0x218] ss:$12 sps:$4 sm:$0xff]   ;;  %v17962_v6 = vld [vmem:[#allocation216_spill] sm:$0xff]  ;;  %v17964_v4 = vld [vmem:[#allocation109_spill] sm:$0xff] }
 0x36c   :  { %v2368_v47 = vadd.f32 %v13437_v28, %v17959_v15  ;;  %v2369_v1 = vadd.f32 %v13469_v18, %v17960_v42  ;;  %4419 = vmatprep.subr.bf16.mxu0 %v9649_v63  ;;  %v13666_v37 = vmul.f32 %v11967_v58, %v2723_v57  ;;  %v2726_v59 = vmax.f32 %v13593_v48, 0.0  ;;  %v9651_v18 = vld [vmem:[%s16744_s4 + $0x1f8] ss:$12 sps:$4 sm:$0xff]   ;;  %v9653_v42 = vld [vmem:[%s16744_s4 + $0x1fc] ss:$12 sps:$4 sm:$0xff]   ;;  %v17965_v63 = vld [vmem:[#allocation49_spill] sm:$0xff]  ;;  %4553 = vmatpush2.bf16.msra.mxu1 %v9650_v36 }
 0x36d   :  { %17956 = vst [vmem:[#allocation137_spill] sm:$0xff] %v13647_v51  ;;  %17957 = vst [vmem:[#allocation307_spill] sm:$0xff] %v13651_v27  ;;  %v2319_v51 = vadd.f32 %v17963_v43, %v17962_v6  ;;  %v2539_v28 = vadd.f32 %v11866_v44, %v17964_v4  ;;  %9210 = vrot.lane.b32.xlu1 %v9209_v31, %s10161_s14  ;;  %4420 = vmatpush2.bf16.msra.mxu0 %v9647_v7  ;;  %v2727_v57 = vmax.f32 %v13596_v3, 0.0  ;;  %v17966_v15 = vld [vmem:[#allocation105_spill] sm:$0xff]  ;;  %v17967_v43 = vld [vmem:[#allocation223_spill] sm:$0xff]  ;;  %v13686_v31 = vpop.f32.mrf.mxu1 }
 0x36e   :  { %17958 = vst [vmem:[#allocation138_spill] sm:$0xff] %v13654_v56  ;;  %17961 = vst [vmem:[#allocation308_spill] sm:$0xff] %v13666_v37  ;;  %v2730_v48 = vmax.f32 %v13628_v49, 0.0  ;;  %v2327_v6 = vadd.f32 %v17966_v15, %v17965_v63  ;;  %v17968_v4 = vld [vmem:[#allocation275_spill] sm:$0xff]  ;;  %v2729_v7 = vmax.f32 %v13632_v40, 0.0  ;;  %v2542_v37 = vadd.f32 %v11862_v13, %v17969_v45  ;;  %4421 = vmatprep.subr.bf16.mxu0 %v9653_v42  ;;  %v17970_v63 = vld [vmem:[#allocation118_spill] sm:$0xff] }
 0x36f   :  { %v2329_v41 = vadd.f32 %v17968_v4, %v17967_v43  ;;  %v2770_v56 = vmax.f32 %v2578_v9, 0.0  ;;  %v2771_v27 = vmax.f32 %v2579_v16, 0.0  ;;  %4554 = vmatprep.subr.bf16.mxu1 %v16962_v8  ;;  %v2582_v49 = vadd.f32 %v11862_v13, %v2368_v47  ;;  %v17971_v43 = vld [vmem:[#allocation119_spill] sm:$0xff]  ;;  %v13698_v4 = vpop.f32.mrf.mxu0  ;;  %v17972_v40 = vld [vmem:[#allocation245_spill] sm:$0xff] }
 0x370   :  { %v2583_v3 = vadd.f32 %v11866_v44, %v2369_v1  ;;  %v3100_v15 = vadd.f32 %v12004_v2, %v17970_v63  ;;  %v3101_v36 = vadd.f32 %v12017_v60, %v17971_v43  ;;  %v9654_v45 = vld [vmem:[%s16744_s4 + $0x200] ss:$12 sps:$4 sm:$0xff]   ;;  %v2731_v16 = vmax.f32 %v2539_v28, 0.0  ;;  %v17973_v42 = vld [vmem:[#allocation249_spill] sm:$0xff]  ;;  %v13715_v28 = vpop.f32.mrf.mxu1 }
 0x371   :  { %v2363_v9 = vadd.f32 %v13327_v12, %v17972_v40  ;;  %v2367_v47 = vadd.f32 %v13385_v61, %v17973_v42  ;;  %v17974_v1 = vld [vmem:[#allocation81_spill] sm:$0xff]  ;;  %4422 = vmatpush2.bf16.msra.mxu0 %v9651_v18  ;;  %v2541_v63 = vadd.f32 %v11995_v25, %v2327_v6  ;;  %v2543_v43 = vadd.f32 %v11866_v44, %v2329_v41 }
 0x372   :  { %v13709_v23 = vadd.f32 %v13479_v32, %v17974_v1  ;;  %v2544_v19 = vadd.f32 %v12139_v0, %v17976_v50  ;;  %v9224_v46 = vpack.i.bf16 %v3101_v36, %v3100_v15  ;;  %4555 = vmatpush2.bf16.msra.mxu1 %v9654_v45  ;;  %v13718_v12 = vmul.f32 %v11963_v33, %v2726_v59  ;;  %v13730_v36 = vpop.f32.mrf.mxu0  ;;  %v13743_v45 = vpop.f32.mrf.mxu1 }
 0x373   :  { %v13721_v61 = vadd.f32 %v11995_v25, %v2319_v51  ;;  %v13724_v32 = vmul.f32 %v11967_v58, %v2727_v57  ;;  %v2734_v18 = vmax.f32 %v2542_v37, 0.0  ;;  %4981 = vmatprep.subr.bf16.mxu1 %v16962_v8  ;;  %v2985_v41 = vmul.f32 %v11963_v33, %v2770_v56 }
 0x374   :  { %17975 = vst [vmem:[#allocation139_spill] sm:$0xff] %v13709_v23  ;;  %17977 = vst [vmem:[#allocation309_spill] sm:$0xff] %v13718_v12  ;;  %v2986_v50 = vmul.f32 %v11967_v58, %v2771_v27  ;;  %v2774_v6 = vmax.f32 %v2582_v49, 0.0  ;;  %v2775_v15 = vmax.f32 %v2583_v3, 0.0  ;;  %9225 = vrot.lane.b32.xlu1 %v9224_v46, %s10161_s14  ;;  %v13733_v59 = vmul.f32 %v11963_v33, %v2730_v48  ;;  %v17981_v48 = vld [vmem:[#allocation287_spill] sm:$0xff] }
 0x375   :  { %17978 = vst [vmem:[#allocation140_spill] sm:$0xff] %v13721_v61  ;;  %17979 = vst [vmem:[#allocation310_spill] sm:$0xff] %v13724_v32  ;;  %v13736_v51 = vmul.f32 %v12059_v34, %v2729_v7  ;;  %v2577_v37 = vadd.f32 %v11995_v25, %v2363_v9  ;;  %v2581_v57 = vadd.f32 %v11995_v25, %v2367_v47  ;;  %v2733_v27 = vmax.f32 %v2541_v63, 0.0  ;;  %v17982_v7 = vld [vmem:[#allocation289_spill] sm:$0xff]  ;;  %v17983_v9 = vld [vmem:[#allocation70_spill] sm:$0xff] }
 0x376   :  { %v13741_v56 = vmul.f32 %v11967_v58, %v2731_v16  ;;  %v2735_v49 = vmax.f32 %v2543_v43, 0.0  ;;  %v2736_v3 = vmax.f32 %v2544_v19, 0.0  ;;  %v13746_v46 = vmul.f32 %v11963_v33, %v2734_v18  ;;  %v13758_v43 = vpop.f32.mrf.mxu0  ;;  %v17984_v18 = vld [vmem:[#allocation71_spill] sm:$0xff] }
 0x377   :  { %17980 = vst [vmem:[#allocation141_spill] sm:$0xff] %v13736_v51  ;;  %v2548_v40 = vadd.f32 %v12139_v0, %v17981_v48  ;;  %v2552_v42 = vadd.f32 %v12139_v0, %v17982_v7  ;;  %v2360_v47 = vadd.f32 %v13311_v54, %v17983_v9  ;;  %v2989_v16 = vmul.f32 %v11963_v33, %v2774_v6  ;;  %v17985_v61 = vld [vmem:[#allocation83_spill] sm:$0xff] }
 0x378   :  { %v2990_v1 = vmul.f32 %v11967_v58, %v2775_v15  ;;  %v3200_v19 = vadd.f32 %v12004_v2, %v2985_v41  ;;  %v3201_v63 = vadd.f32 %v12017_v60, %v2986_v50  ;;  %v2361_v23 = vadd.f32 %v13341_v53, %v17984_v18  ;;  %v2177_v15 = vpop.f32.mrf.mxu1  ;;  %v17991_v18 = vld [vmem:[#allocation290_spill] sm:$0xff]  ;;  %v18000_v32 = vld [vmem:[#allocation291_spill] sm:$0xff] }
 0x379   :  { %v2769_v48 = vmax.f32 %v2577_v37, 0.0  ;;  %v2773_v51 = vmax.f32 %v2581_v57, 0.0  ;;  %v13764_v7 = vadd.f32 %v13563_v38, %v17985_v61  ;;  %v13767_v54 = vmul.f32 %v12059_v34, %v2733_v27  ;;  %v17988_v37 = vld [vmem:[#allocation123_spill] sm:$0xff]  ;;  %v17990_v27 = vld [vmem:[#allocation68_spill] sm:$0xff] }
 0x37a   :  { %v13770_v6 = vmul.f32 %v11967_v58, %v2735_v49  ;;  %v2951_v41 = vmul.f32 %v17809_v30, %v2736_v3  ;;  %v9214_v50 = vpack.i.bf16 %v3201_v63, %v3200_v19  ;;  %v2740_v9 = vmax.f32 %v2548_v40, 0.0  ;;  %v17989_v38 = vld [vmem:[#allocation295_spill] sm:$0xff]  ;;  %v1900_v40 = vpop.f32.mrf.mxu0 }
 0x37b   :  { %17986 = vst [vmem:[#allocation311_spill] sm:$0xff] %v13764_v7  ;;  %17987 = vst [vmem:[#allocation142_spill] sm:$0xff] %v13767_v54  ;;  %v2744_v8 = vmax.f32 %v2552_v42, 0.0  ;;  %v2556_v53 = vadd.f32 %v12139_v0, %v13275_v14  ;;  %v2560_v57 = vadd.f32 %v12139_v0, %v17988_v37  ;;  %v2564_v61 = vadd.f32 %v12139_v0, %v17989_v38  ;;  %v17992_v38 = vld [vmem:[#allocation286_spill] sm:$0xff] }
 0x37c   :  { %v2356_v7 = vadd.f32 %v17991_v18, %v17990_v27  ;;  %9215 = vrot.lane.b32.xlu0 %v9214_v50, %s10161_s14  ;;  %v3204_v49 = vadd.f32 %v12004_v2, %v2989_v16  ;;  %v3205_v3 = vadd.f32 %v12017_v60, %v2990_v1  ;;  %v2574_v42 = vadd.f32 %v11862_v13, %v2360_v47  ;;  %v17993_v27 = vld [vmem:[#allocation195_spill] sm:$0xff]  ;;  %v13796_v1 = vpop.f32.mrf.mxu1  ;;  %v17998_v54 = vld [vmem:[#allocation86_spill] sm:$0xff] }
 0x37d   :  { %v2575_v14 = vadd.f32 %v11866_v44, %v2361_v23  ;;  %v2984_v19 = vmul.f32 %v12059_v34, %v2769_v48  ;;  %v2988_v63 = vmul.f32 %v12059_v34, %v2773_v51  ;;  %v3096_v0 = vadd.f32 %v12004_v2, %v17992_v38  ;;  %v17994_v18 = vld [vmem:[#allocation87_spill] sm:$0xff]  ;;  %v17997_v48 = vld [vmem:[#allocation84_spill] sm:$0xff] }
 0x37e   :  { %v9229_v37 = vpack.i.bf16 %v3205_v3, %v3204_v49  ;;  %v3097_v50 = vadd.f32 %v12017_v60, %v17993_v27  ;;  %v13794_v16 = vadd.f32 %v13660_v29, %v17994_v18  ;;  %v13799_v47 = vadd.f32 %v17823_v21, %v2951_v41  ;;  %v13808_v18 = vpop.f32.mrf.mxu0  ;;  %v17999_v41 = vld [vmem:[#allocation240_spill] sm:$0xff] }
 0x37f   :  { %v2955_v23 = vmul.f32 %v17809_v30, %v2740_v9  ;;  %v2959_v51 = vmul.f32 %v17809_v30, %v2744_v8  ;;  %v2380_v49 = vadd.f32 %v13686_v31, %v17997_v48  ;;  %v2748_v3 = vmax.f32 %v2556_v53, 0.0  ;;  %v13824_v53 = vpop.f32.mrf.mxu1 }
 0x380   :  { %17995 = vst [vmem:[#allocation312_spill] sm:$0xff] %v13794_v16  ;;  %17996 = vst [vmem:[#allocation202_spill] sm:$0xff] %v13799_v47  ;;  %v2752_v38 = vmax.f32 %v2560_v57, 0.0  ;;  %v2381_v27 = vadd.f32 %v13715_v28, %v17998_v54  ;;  %9230 = vrot.lane.b32.xlu1 %v9229_v37, %s10161_s14  ;;  %v9219_v29 = vpack.i.bf16 %v3097_v50, %v3096_v0  ;;  %v2756_v16 = vmax.f32 %v2564_v61, 0.0  ;;  %v18003_v54 = vld [vmem:[#allocation259_spill] sm:$0xff]  ;;  %v18005_v61 = vld [vmem:[#allocation69_spill] sm:$0xff] }
 0x381   :  { %v2355_v47 = vadd.f32 %v18000_v32, %v17999_v41  ;;  %v2766_v9 = vmax.f32 %v2574_v42, 0.0  ;;  %v2767_v12 = vmax.f32 %v2575_v14, 0.0  ;;  %v2570_v8 = vadd.f32 %v11862_v13, %v2356_v7  ;;  %v18006_v7 = vld [vmem:[#allocation292_spill] sm:$0xff]  ;;  %v18007_v37 = vld [vmem:[#allocation257_spill] sm:$0xff] }
 0x382   :  { %9220 = vrot.lane.b32.xlu0 %v9219_v29, %s10161_s14  ;;  %v13815_v31 = vadd.f32 %v12098_v10, %v2984_v19  ;;  %v13818_v28 = vadd.f32 %v12098_v10, %v2988_v63  ;;  %v13822_v0 = vadd.f32 %v13730_v36, %v18003_v54  ;;  %v9083_v32 = vunpack.i.h.bf16 %v13411_v17  ;;  %v18008_v50 = vld [vmem:[#allocation89_spill] sm:$0xff]  ;;  %v13837_v29 = vpop.f32.mrf.mxu0 }
 0x383   :  { %v16801_v57 = vunpack.i.l.bf16 %v13411_v17  ;;  %v2357_v42 = vadd.f32 %v18006_v7, %v18005_v61  ;;  %v2594_v14 = vadd.f32 %v11862_v13, %v2380_v49  ;;  %v2595_v19 = vadd.f32 %v11866_v44, %v2381_v27 }
 0x384   :  { %18001 = vst [vmem:[#allocation143_spill] sm:$0xff] %v13815_v31  ;;  %18002 = vst [vmem:[#allocation313_spill] sm:$0xff] %v13818_v28  ;;  %v2384_v63 = vadd.f32 %v13743_v45, %v18007_v37  ;;  %v2385_v48 = vadd.f32 %v2177_v15, %v18008_v50  ;;  %v9234_v36 = vpack.i.bf16 %v13818_v28, %v13815_v31  ;;  %v13852_v37 = vpop.f32.mrf.mxu1  ;;  %v13866_v28 = vpop.f32.mrf.mxu0 }
 0x385   :  { %18004 = vst [vmem:[#allocation203_spill] sm:$0xff] %v13822_v0  ;;  %v13840_v41 = vadd.f32 %v17823_v21, %v2955_v23  ;;  %v2569_v54 = vadd.f32 %v11995_v25, %v2355_v47  ;;  %v2981_v61 = vmul.f32 %v11963_v33, %v2766_v9  ;;  %v2982_v49 = vmul.f32 %v11967_v58, %v2767_v12  ;;  %v18013_v9 = vld [vmem:[#allocation293_spill] sm:$0xff] }
 0x386   :  { %v13846_v27 = vadd.f32 %v17823_v21, %v2959_v51  ;;  %v2963_v45 = vmul.f32 %v17809_v30, %v2748_v3  ;;  %v2967_v15 = vmul.f32 %v17809_v30, %v2752_v38  ;;  %v2971_v7 = vmul.f32 %v17809_v30, %v2756_v16  ;;  %9235 = vrot.lane.b32.xlu1 %v9234_v36, %s10161_s14  ;;  %v18012_v51 = vld [vmem:[#allocation242_spill] sm:$0xff]  ;;  %v13862_v3 = vpop.permute.xlu0 %9105  ;;  %v13879_v30 = vpop.f32.mrf.mxu1 }
 0x387   :  { %18009 = vst [vmem:[#allocation144_spill] sm:$0xff] %v13840_v41  ;;  %v2762_v23 = vmax.f32 %v2570_v8, 0.0  ;;  %v13857_v47 = vsel %vm3470_vm2, %v16801_v57, %v9083_v32  ;;  %v2571_v12 = vadd.f32 %v11866_v44, %v2357_v42  ;;  %v2359_v50 = vadd.f32 %v18013_v9, %v18012_v51  ;;  %v18014_v57 = vld [vmem:[#allocation261_spill] sm:$0xff]  ;;  %v1910_v41 = vpop.f32.mrf.mxu0 }
 0x388   :  { %18010 = vst [vmem:[#allocation314_spill] sm:$0xff] %v13846_v27  ;;  %18011 = vst [vmem:[#allocation145_spill] sm:$0xff] %v13857_v47  ;;  %v2786_v38 = vmax.f32 %v2594_v14, 0.0  ;;  %v2787_v0 = vmax.f32 %v2595_v19, 0.0  ;;  %v2598_v16 = vadd.f32 %v11862_v13, %v2384_v63  ;;  %v2599_v36 = vadd.f32 %v11866_v44, %v2385_v48  ;;  %v18016_v14 = vld [vmem:[#allocation85_spill] sm:$0xff]  ;;  %v18017_v63 = vld [vmem:[#allocation258_spill] sm:$0xff] }
 0x389   :  { %v2761_v8 = vmax.f32 %v2569_v54, 0.0  ;;  %v3196_v31 = vadd.f32 %v12004_v2, %v2981_v61  ;;  %v3197_v32 = vadd.f32 %v12017_v60, %v2982_v49  ;;  %v13871_v42 = vadd.f32 %v1900_v40, %v18014_v57 }
 0x38a   :  { %v9088_v51 = vunpack.i.h.bf16 %v13451_v35  ;;  %v9087_v9 = vunpack.i.l.bf16 %v13451_v35  ;;  %v2379_v19 = vadd.f32 %v13599_v39, %v18016_v14  ;;  %v2383_v48 = vadd.f32 %v13698_v4, %v18017_v63  ;;  %v9657_v39 = vld [vmem:[%s16744_s4 + $0xac] ss:$12 sps:$4 sm:$0xff]   ;;  %v18022_v63 = vld [vmem:[#allocation251_spill] sm:$0xff] }
 0x38b   :  { %18015 = vst [vmem:[#allocation315_spill] sm:$0xff] %v13871_v42  ;;  %v13882_v54 = vadd.f32 %v17823_v21, %v2963_v45  ;;  %v2763_v61 = vmax.f32 %v2571_v12, 0.0  ;;  %v2573_v49 = vadd.f32 %v11995_v25, %v2359_v50  ;;  %v9249_v40 = vpack.i.bf16 %v3197_v32, %v3196_v31  ;;  %v18021_v31 = vld [vmem:[#allocation207_spill] sm:$0xff]  ;;  %4848 = vmatprep.subr.bf16.mxu0 %v9657_v39 }
 0x38c   :  { %v3001_v57 = vmul.f32 %v11963_v33, %v2786_v38  ;;  %v3002_v42 = vmul.f32 %v11967_v58, %v2787_v0  ;;  %v2790_v35 = vmax.f32 %v2598_v16, 0.0  ;;  %v2791_v27 = vmax.f32 %v2599_v36, 0.0  ;;  %v13899_v38 = vpop.permute.xlu0 %9115  ;;  %v2191_v36 = vpop.f32.mrf.mxu1 }
 0x38d   :  { %18018 = vst [vmem:[#allocation146_spill] sm:$0xff] %v13882_v54  ;;  %v13891_v4 = vadd.f32 %v17823_v21, %v2967_v15  ;;  %v13894_v45 = vadd.f32 %v17823_v21, %v2971_v7  ;;  %v2977_v12 = vmul.f32 %v11963_v33, %v2762_v23  ;;  %9250 = vrot.lane.b32.xlu1 %v9249_v40, %s10161_s14  ;;  %v2765_v32 = vmax.f32 %v2573_v49, 0.0  ;;  %v13918_v21 = vpop.f32.mrf.mxu0 }
 0x38e   :  { %v13903_v0 = vmul.f32 %v12059_v34, %v2761_v8  ;;  %v13906_v16 = vsel %vm3470_vm2, %v9087_v9, %v9088_v51  ;;  %v2593_v15 = vadd.f32 %v11995_v25, %v2379_v19  ;;  %v2597_v7 = vadd.f32 %v11995_v25, %v2383_v48  ;;  %v18023_v48 = vld [vmem:[#allocation34_spill] sm:$0xff]  ;;  %v2193_v47 = vpop.f32.mrf.mxu1 }
 0x38f   :  { %18019 = vst [vmem:[#allocation316_spill] sm:$0xff] %v13891_v4  ;;  %18020 = vst [vmem:[#allocation147_spill] sm:$0xff] %v13894_v45  ;;  %v2978_v23 = vmul.f32 %v11967_v58, %v2763_v61  ;;  %v9093_v14 = vunpack.i.h.bf16 %v13493_v26  ;;  %v2372_v40 = vadd.f32 %v13495_v20, %v18022_v63  ;;  %v3005_v8 = vmul.f32 %v11963_v33, %v2790_v35  ;;  %v18024_v61 = vld [vmem:[#allocation80_spill] sm:$0xff]  ;;  %v18027_v35 = vld [vmem:[#allocation93_spill] sm:$0xff] }
 0x390   :  { %v3006_v50 = vmul.f32 %v11967_v58, %v2791_v27  ;;  %v3216_v51 = vadd.f32 %v12004_v2, %v3001_v57  ;;  %v3217_v19 = vadd.f32 %v12017_v60, %v3002_v42  ;;  %v2371_v49 = vadd.f32 %v13453_v5, %v18024_v61  ;;  %v18025_v45 = vld [vmem:[#allocation252_spill] sm:$0xff]  ;;  %v13926_v20 = vpop.permute.xlu0 %9120 }
 0x391   :  { %v2373_v4 = vadd.f32 %v13536_v55, %v18025_v45  ;;  %18026 = vst [vmem:[#allocation317_spill] sm:$0xff] %v13926_v20  ;;  %v13930_v27 = vadd.f32 %v13837_v29, %v18027_v35  ;;  %v9092_v57 = vunpack.i.l.bf16 %v13493_v26  ;;  %v2785_v42 = vmax.f32 %v2593_v15, 0.0  ;;  %v18030_v45 = vld [vmem:[#allocation253_spill] sm:$0xff] }
 0x392   :  { %v2789_v63 = vmax.f32 %v2597_v7, 0.0  ;;  %v9239_v54 = vpack.i.bf16 %v3217_v19, %v3216_v51  ;;  %v13934_v39 = vmul.f32 %v12059_v34, %v2765_v32  ;;  %v13937_v5 = vsel %vm3470_vm2, %v9093_v14, %v9087_v9  ;;  %v1916_v7 = vpop.f32.mrf.mxu0  ;;  %v2195_v19 = vpop.f32.mrf.mxu1 }
 0x393   :  { %18028 = vst [vmem:[#allocation148_spill] sm:$0xff] %v13930_v27  ;;  %18029 = vst [vmem:[#allocation318_spill] sm:$0xff] %v13937_v5  ;;  %v9108_v55 = vunpack.i.h.bf16 %v13862_v3  ;;  %v2376_v61 = vadd.f32 %v13582_v52, %v18030_v45  ;;  %v2586_v29 = vadd.f32 %v11862_v13, %v2372_v40  ;;  %v9107_v35 = vunpack.i.l.bf16 %v13862_v3  ;;  %v9111_v3 = vpop.permute.xlu1 %9110  ;;  %v18034_v27 = vld [vmem:[#allocation16_spill] sm:$0xff] }
 0x394   :  { %9240 = vrot.lane.b32.xlu0 %v9239_v54, %s10161_s14  ;;  %v3220_v26 = vadd.f32 %v12004_v2, %v3005_v8  ;;  %v3221_v15 = vadd.f32 %v12017_v60, %v3006_v50  ;;  %v2585_v32 = vadd.f32 %v11995_v25, %v2371_v49  ;;  %v2587_v9 = vadd.f32 %v11866_v44, %v2373_v4  ;;  %v18032_v49 = vld [vmem:[#allocation283_spill] sm:$0xff] }
 0x395   :  { %v3192_v14 = vadd.f32 %v12004_v2, %v2977_v12  ;;  %v3193_v51 = vadd.f32 %v12017_v60, %v2978_v23  ;;  %v18031_v52 = vunpack.i.l.bf16 %v13411_v17  ;;  %v3000_v54 = vmul.f32 %v12059_v34, %v2785_v42  ;;  %v13961_v12 = vpop.permute.xlu0 %9130  ;;  %v18036_v42 = vld [vmem:[#allocation263_spill] sm:$0xff] }
 0x396   :  { %v3004_v8 = vmul.f32 %v12059_v34, %v2789_v63  ;;  %v9254_v50 = vpack.i.bf16 %v3221_v15, %v3220_v26  ;;  %v2590_v4 = vadd.f32 %v11862_v13, %v2376_v61  ;;  %18033 = vst [vmem:[#allocation149_spill] sm:$0xff] %v13961_v12  ;;  %v13964_v17 = vadd.f32 %v1910_v41, %v18034_v27  ;;  %v18037_v63 = vld [vmem:[#allocation264_spill] sm:$0xff]  ;;  %v13972_v15 = vpop.f32.mrf.mxu0  ;;  %v2197_v27 = vpop.f32.mrf.mxu1 }
 0x397   :  { %v13954_v40 = vsel %vm3470_vm2, %v9092_v57, %v18031_v52  ;;  %v9244_v23 = vpack.i.bf16 %v3193_v51, %v3192_v14  ;;  %v2778_v57 = vmax.f32 %v2586_v29, 0.0  ;;  %v13967_v52 = vsel %vm3470_vm2, %v9107_v35, %v9108_v55 }
 0x398   :  { %18035 = vst [vmem:[#allocation319_spill] sm:$0xff] %v13964_v17  ;;  %v2396_v20 = vadd.f32 %v2191_v36, %v18036_v42  ;;  %v2397_v26 = vadd.f32 %v2193_v47, %v18037_v63  ;;  %9255 = vrot.lane.b32.xlu1 %v9254_v50, %s10161_s14  ;;  %v2777_v45 = vmax.f32 %v2585_v32, 0.0  ;;  %v2779_v61 = vmax.f32 %v2587_v9, 0.0  ;;  %v18040_v47 = vld [vmem:[#allocation191_spill] sm:$0xff]  ;;  %v18042_v9 = vld [vmem:[#allocation82_spill] sm:$0xff]  ;;  %v13992_v42 = vpop.permute.xlu1 %9125  ;;  %v18046_v63 = vld [vmem:[#allocation189_spill] sm:$0xff] }
 0x399   :  { %v9113_v5 = vunpack.i.h.bf16 %v9111_v3  ;;  %v9112_v12 = vunpack.i.l.bf16 %v9111_v3  ;;  %9245 = vrot.lane.b32.xlu0 %v9244_v23, %s10161_s14  ;;  %v9118_v41 = vunpack.i.h.bf16 %v13899_v38  ;;  %v13977_v55 = vadd.f32 %v12098_v10, %v3000_v54  ;;  %v18043_v3 = vld [vmem:[#allocation254_spill] sm:$0xff]  ;;  %v13990_v23 = vpop.permute.xlu0 %9135  ;;  %18045 = vst [vmem:[#allocation152_spill] sm:$0xff] %v13992_v42  ;;  %v18062_v42 = vld [vmem:[#allocation17_spill] sm:$0xff] }
 0x39a   :  { %v13980_v36 = vadd.f32 %v12098_v10, %v3004_v8  ;;  %v13983_v29 = vadd.f32 %v1916_v7, %v18040_v47  ;;  %v2782_v14 = vmax.f32 %v2590_v4, 0.0  ;;  %v9117_v32 = vunpack.i.l.bf16 %v13899_v38  ;;  %18044 = vst [vmem:[#allocation321_spill] sm:$0xff] %v13990_v23  ;;  %v1920_v38 = vpop.f32.mrf.mxu0  ;;  %v18047_v47 = vld [vmem:[#allocation281_spill] sm:$0xff] }
 0x39b   :  { %18038 = vst [vmem:[#allocation150_spill] sm:$0xff] %v13977_v55  ;;  %v2375_v51 = vadd.f32 %v13516_v11, %v18042_v9  ;;  %v2377_v50 = vadd.f32 %v13638_v22, %v18043_v3  ;;  %v2610_v54 = vadd.f32 %v11862_v13, %v2396_v20  ;;  %v2611_v8 = vadd.f32 %v11866_v44, %v2397_v26  ;;  %v18048_v22 = vld [vmem:[#allocation46_spill] sm:$0xff] }
 0x39c   :  { %18039 = vst [vmem:[#allocation320_spill] sm:$0xff] %v13980_v36  ;;  %18041 = vst [vmem:[#allocation151_spill] sm:$0xff] %v13983_v29  ;;  %v2400_v7 = vadd.f32 %v2195_v19, %v18046_v63  ;;  %v9259_v4 = vpack.i.bf16 %v13980_v36, %v13977_v55  ;;  %v14002_v9 = vmul.f32 %v11963_v33, %v2778_v57  ;;  %v18049_v29 = vld [vmem:[#allocation95_spill] sm:$0xff] }
 0x39d   :  { %v2401_v17 = vadd.f32 %v2197_v27, %v18049_v29  ;;  %v14008_v20 = vmul.f32 %v12059_v34, %v2777_v45  ;;  %v14011_v19 = vmul.f32 %v11967_v58, %v2779_v61  ;;  %v14014_v26 = vsel %vm3470_vm2, %v9112_v12, %v9113_v5  ;;  %v18053_v61 = vld [vmem:[#allocation90_spill] sm:$0xff] }
 0x39e   :  { %18050 = vst [vmem:[#allocation322_spill] sm:$0xff] %v14014_v26  ;;  %v14017_v63 = vsel %vm3470_vm2, %v9118_v41, %v9112_v12  ;;  %9260 = vrot.lane.b32.xlu1 %v9259_v4, %s10161_s14  ;;  %v14021_v57 = vmul.f32 %v11963_v33, %v2782_v14  ;;  %v14024_v3 = vsel %vm3470_vm2, %v9117_v32, %v9107_v35  ;;  %v2802_v29 = vmax.f32 %v2610_v54, 0.0  ;;  %v14033_v41 = vpop.permute.xlu1 %9140  ;;  %v14035_v4 = vpop.f32.mrf.mxu0 }
 0x39f   :  { %18051 = vst [vmem:[#allocation153_spill] sm:$0xff] %v14017_v63  ;;  %18052 = vst [vmem:[#allocation323_spill] sm:$0xff] %v14024_v3  ;;  %v2589_v45 = vadd.f32 %v11995_v25, %v2375_v51  ;;  %v14028_v27 = vadd.f32 %v11866_v44, %v2377_v50  ;;  %v2388_v5 = vadd.f32 %v13796_v1, %v18053_v61  ;;  %v2803_v11 = vmax.f32 %v2611_v8, 0.0  ;;  %v2201_v35 = vpop.f32.mrf.mxu1  ;;  %v18057_v1 = vld [vmem:[#allocation267_spill] sm:$0xff]  ;;  %v9146_v54 = vpop.permute.xlu0 %9145  ;;  %v18059_v8 = vld [vmem:[#allocation220_spill] sm:$0xff] }
 0x3a0   :  { %v2614_v12 = vadd.f32 %v11862_v13, %v2400_v7  ;;  %18054 = vst [vmem:[#allocation154_spill] sm:$0xff] %v14033_v41  ;;  %v2615_v14 = vadd.f32 %v11866_v44, %v2401_v17  ;;  %v14040_v32 = vadd.f32 %v12098_v10, %v13903_v0  ;;  %v14044_v51 = vadd.f32 %v12098_v10, %v13934_v39  ;;  %v18060_v61 = vld [vmem:[#allocation116_spill] sm:$0xff]  ;;  %v18061_v17 = vld [vmem:[#allocation94_spill] sm:$0xff]  ;;  %v1926_v63 = vpop.f32.mrf.mxu0 }
 0x3a1   :  { %v14047_v50 = vadd.f32 %v1920_v38, %v18057_v1  ;;  %v2395_v55 = vadd.f32 %v13866_v28, %v18061_v17  ;;  %v2399_v0 = vadd.f32 %v13918_v21, %v18062_v42  ;;  %v2781_v3 = vmax.f32 %v2589_v45, 0.0  ;;  %v2203_v42 = vpop.f32.mrf.mxu1  ;;  %v18067_v21 = vld [vmem:[#allocation188_spill] sm:$0xff] }
 0x3a2   :  { %18055 = vst [vmem:[#allocation324_spill] sm:$0xff] %v14040_v32  ;;  %18056 = vst [vmem:[#allocation155_spill] sm:$0xff] %v14044_v51  ;;  %v2783_v39 = vmax.f32 %v14028_v27, 0.0  ;;  %v9274_v38 = vpack.i.bf16 %v14044_v51, %v14040_v32  ;;  %v3017_v7 = vmul.f32 %v11963_v33, %v2802_v29  ;;  %v2806_v26 = vmax.f32 %v2614_v12, 0.0  ;;  %v18063_v27 = vld [vmem:[#allocation260_spill] sm:$0xff] }
 0x3a3   :  { %18058 = vst [vmem:[#allocation325_spill] sm:$0xff] %v14047_v50  ;;  %v2602_v50 = vadd.f32 %v11862_v13, %v2388_v5  ;;  %v9148_v36 = vunpack.i.h.bf16 %v9146_v54  ;;  %v3018_v28 = vmul.f32 %v11967_v58, %v2803_v11  ;;  %v2807_v17 = vmax.f32 %v2615_v14, 0.0  ;;  %v18066_v11 = vld [vmem:[#allocation91_spill] sm:$0xff] }
 0x3a4   :  { %9275 = vrot.lane.b32.xlu1 %v9274_v38, %s10161_s14  ;;  %v9147_v45 = vunpack.i.l.bf16 %v9146_v54  ;;  %v2387_v51 = vadd.f32 %v13758_v43, %v18063_v27  ;;  %v2609_v1 = vadd.f32 %v11995_v25, %v2395_v55  ;;  %v2613_v5 = vadd.f32 %v11995_v25, %v2399_v0  ;;  %v18070_v0 = vld [vmem:[#allocation92_spill] sm:$0xff]  ;;  %v18071_v27 = vld [vmem:[#allocation262_spill] sm:$0xff]  ;;  %v2205_v54 = vpop.f32.mrf.mxu1 }
 0x3a5   :  { %v18064_v29 = vunpack.i.l.bf16 %v14033_v41  ;;  %v2389_v14 = vadd.f32 %v13824_v53, %v18066_v11  ;;  %v2392_v32 = vadd.f32 %v13852_v37, %v18067_v21  ;;  %v18068_v43 = vunpack.i.l.bf16 %v13990_v23  ;;  %v14093_v37 = vpop.f32.mrf.mxu0  ;;  %v18075_v53 = vld [vmem:[#allocation96_spill] sm:$0xff] }
 0x3a6   :  { %v2391_v38 = vadd.f32 %v13808_v18, %v18070_v0  ;;  %v3022_v21 = vmul.f32 %v11967_v58, %v2807_v17  ;;  %v14102_v18 = vmul.f32 %v12059_v34, %v2781_v3  ;;  %v2805_v0 = vmax.f32 %v2613_v5, 0.0  ;;  %v18077_v5 = vld [vmem:[#allocation117_spill] sm:$0xff] }
 0x3a7   :  { %v14073_v12 = vsel %vm3470_vm2, %v9148_v36, %v18064_v29  ;;  %v14084_v55 = vsel %vm3470_vm2, %v9147_v45, %v18068_v43  ;;  %v2393_v36 = vadd.f32 %v13879_v30, %v18071_v27  ;;  %v3021_v29 = vmul.f32 %v11963_v33, %v2806_v26  ;;  %v18073_v43 = vld [vmem:[#allocation99_spill] sm:$0xff] }
 0x3a8   :  { %18065 = vst [vmem:[#allocation156_spill] sm:$0xff] %v14073_v12  ;;  %18069 = vst [vmem:[#allocation326_spill] sm:$0xff] %v14084_v55  ;;  %v3232_v12 = vadd.f32 %v12004_v2, %v3017_v7  ;;  %v3233_v45 = vadd.f32 %v12017_v60, %v3018_v28  ;;  %v14099_v24 = vadd.f32 %v1926_v63, %v18073_v43  ;;  %v2794_v30 = vmax.f32 %v2602_v50, 0.0  ;;  %v18076_v43 = vld [vmem:[#allocation266_spill] sm:$0xff]  ;;  %v2207_v50 = vpop.f32.mrf.mxu1 }
 0x3a9   :  { %v2801_v26 = vmax.f32 %v2609_v1, 0.0  ;;  %v2601_v27 = vadd.f32 %v11995_v25, %v2387_v51  ;;  %v2603_v11 = vadd.f32 %v11866_v44, %v2389_v14  ;;  %v2606_v17 = vadd.f32 %v11862_v13, %v2392_v32 }
 0x3aa   :  { %18074 = vst [vmem:[#allocation157_spill] sm:$0xff] %v14099_v24  ;;  %v9264_v55 = vpack.i.bf16 %v3233_v45, %v3232_v12  ;;  %v2605_v7 = vadd.f32 %v11995_v25, %v2391_v38  ;;  %v2607_v28 = vadd.f32 %v11866_v44, %v2393_v36  ;;  %v2404_v63 = vadd.f32 %v2201_v35, %v18075_v53  ;;  %v1930_v24 = vpop.f32.mrf.mxu0  ;;  %v18079_v12 = vld [vmem:[#allocation288_spill] sm:$0xff]  ;;  %v18080_v38 = vld [vmem:[#allocation97_spill] sm:$0xff]  ;;  %v18081_v53 = vld [vmem:[#allocation98_spill] sm:$0xff] }
 0x3ab   :  { %v2403_v3 = vadd.f32 %v13972_v15, %v18076_v43  ;;  %v3236_v51 = vadd.f32 %v12004_v2, %v3021_v29  ;;  %v3237_v1 = vadd.f32 %v12017_v60, %v3022_v21  ;;  %v14117_v32 = vadd.f32 %v12098_v10, %v18077_v5  ;;  %v18082_v43 = vld [vmem:[#allocation272_spill] sm:$0xff] }
 0x3ac   :  { %9265 = vrot.lane.b32.xlu0 %v9264_v55, %s10161_s14  ;;  %v14121_v14 = vadd.f32 %v12098_v10, %v18079_v12  ;;  %v3016_v35 = vmul.f32 %v12059_v34, %v2801_v26  ;;  %v3020_v15 = vmul.f32 %v12059_v34, %v2805_v0  ;;  %v2405_v36 = vadd.f32 %v2203_v42, %v18080_v38  ;;  %v14136_v0 = vpop.permute.xlu0 %9150 }
 0x3ad   :  { %18078 = vst [vmem:[#allocation327_spill] sm:$0xff] %v14117_v32  ;;  %v2408_v55 = vadd.f32 %v2205_v54, %v18081_v53  ;;  %v2998_v29 = vmul.f32 %v11967_v58, %v2783_v39  ;;  %v9284_v45 = vpack.i.bf16 %v3237_v1, %v3236_v51  ;;  %v14131_v5 = vadd.f32 %v1930_v24, %v18082_v43  ;;  %v2211_v51 = vpop.f32.mrf.mxu1  ;;  %v18090_v53 = vld [vmem:[#allocation121_spill] sm:$0xff] }
 0x3ae   :  { %v9269_v21 = vpack.i.bf16 %v14121_v14, %v14117_v32  ;;  %v14134_v12 = vmul.f32 %v11963_v33, %v2794_v30  ;;  %v2793_v41 = vmax.f32 %v2601_v27, 0.0  ;;  %v2795_v26 = vmax.f32 %v2603_v11, 0.0  ;;  %18084 = vst [vmem:[#allocation328_spill] sm:$0xff] %v14136_v0 }
 0x3af   :  { %18083 = vst [vmem:[#allocation158_spill] sm:$0xff] %v14131_v5  ;;  %v2798_v23 = vmax.f32 %v2606_v17, 0.0  ;;  %v2797_v42 = vmax.f32 %v2605_v7, 0.0  ;;  %v2799_v38 = vmax.f32 %v2607_v28, 0.0  ;;  %v14139_v54 = vadd.f32 %v11862_v13, %v2404_v63  ;;  %9285 = vrot.lane.b32.xlu1 %v9284_v45, %s10161_s14  ;;  %v18087_v17 = vld [vmem:[#allocation268_spill] sm:$0xff]  ;;  %v18088_v28 = vld [vmem:[#allocation18_spill] sm:$0xff]  ;;  %v2213_v43 = vpop.f32.mrf.mxu1 }
 0x3b0   :  { %v14142_v39 = vadd.f32 %v11995_v25, %v2403_v3  ;;  %9270 = vrot.lane.b32.xlu0 %v9269_v21, %s10161_s14  ;;  %v14147_v24 = vadd.f32 %v11866_v44, %v2405_v36  ;;  %v14150_v11 = vadd.f32 %v11862_v13, %v2408_v55  ;;  %v14153_v30 = vadd.f32 %v12098_v10, %v3016_v35  ;;  %v18089_v3 = vld [vmem:[#allocation120_spill] sm:$0xff]  ;;  %v9161_v5 = vpop.permute.xlu0 %9160 }
 0x3b1   :  { %v14156_v27 = vadd.f32 %v12098_v10, %v3020_v15  ;;  %v2407_v7 = vadd.f32 %v14035_v4, %v18087_v17  ;;  %v2409_v63 = vadd.f32 %v2207_v50, %v18088_v28  ;;  %v3112_v1 = vadd.f32 %v12004_v2, %v18089_v3  ;;  %v18092_v3 = vld [vmem:[#allocation294_spill] sm:$0xff] }
 0x3b2   :  { %18085 = vst [vmem:[#allocation159_spill] sm:$0xff] %v14153_v30  ;;  %v3113_v36 = vadd.f32 %v12017_v60, %v18090_v53  ;;  %v14166_v55 = vmul.f32 %v12059_v34, %v2793_v41  ;;  %v3010_v35 = vmul.f32 %v11967_v58, %v2795_v26  ;;  %v3013_v45 = vmul.f32 %v11963_v33, %v2798_v23  ;;  %v18091_v26 = vld [vmem:[#allocation122_spill] sm:$0xff] }
 0x3b3   :  { %18086 = vst [vmem:[#allocation329_spill] sm:$0xff] %v14156_v27  ;;  %v9289_v15 = vpack.i.bf16 %v14156_v27, %v14153_v30  ;;  %v14173_v4 = vmul.f32 %v12059_v34, %v2797_v42  ;;  %v3014_v50 = vmul.f32 %v11967_v58, %v2799_v38  ;;  %v2810_v21 = vmax.f32 %v14139_v54, 0.0  ;;  %v14184_v42 = vpop.permute.xlu1 %9155 }
 0x3b4   :  { %v9279_v17 = vpack.i.bf16 %v3113_v36, %v3112_v1  ;;  %v2811_v41 = vmax.f32 %v14147_v24, 0.0  ;;  %v3116_v23 = vadd.f32 %v12004_v2, %v18091_v26  ;;  %v3117_v53 = vadd.f32 %v12017_v60, %v18092_v3  ;;  %18093 = vst [vmem:[#allocation160_spill] sm:$0xff] %v14184_v42  ;;  %v18094_v36 = vld [vmem:[#allocation269_spill] sm:$0xff] }
 0x3b5   :  { %9290 = vrot.lane.b32.xlu1 %v9289_v15, %s10161_s14  ;;  %v2814_v38 = vmax.f32 %v14150_v11, 0.0  ;;  %v14188_v54 = vadd.f32 %v11995_v25, %v2407_v7  ;;  %v2623_v1 = vadd.f32 %v11866_v44, %v2409_v63  ;;  %v2412_v24 = vadd.f32 %v2211_v51, %v18094_v36  ;;  %v18095_v15 = vld [vmem:[#allocation270_spill] sm:$0xff] }
 0x3b6   :  { %9280 = vrot.lane.b32.xlu0 %v9279_v17, %s10161_s14  ;;  %v2413_v28 = vadd.f32 %v2213_v43, %v18095_v15  ;;  %v9294_v26 = vpack.i.bf16 %v3117_v53, %v3116_v23  ;;  %v3208_v3 = vadd.f32 %v12004_v2, %v14002_v9  ;;  %v3209_v32 = vadd.f32 %v12017_v60, %v14011_v19  ;;  %v18096_v17 = vld [vmem:[#allocation124_spill] sm:$0xff] }
 0x3b7   :  { %v16826_v11 = vunpack.i.l.bf16 %v14136_v0  ;;  %v16825_v7 = vunpack.i.l.bf16 %v14184_v42  ;;  %v9163_v27 = vunpack.i.h.bf16 %v9161_v5  ;;  %v9162_v30 = vunpack.i.l.bf16 %v9161_v5  ;;  %v18100_v5 = vld [vmem:[#allocation196_spill] sm:$0xff]  ;;  %v2215_v0 = vpop.f32.mrf.mxu1 }
 0x3b8   :  { %v9299_v51 = vpack.i.bf16 %v3209_v32, %v3208_v3  ;;  %v3212_v63 = vadd.f32 %v12004_v2, %v14021_v57  ;;  %v3213_v43 = vadd.f32 %v12017_v60, %v2998_v29  ;;  %v14206_v9 = vadd.f32 %v12098_v10, %v18096_v17  ;;  %v18105_v3 = vld [vmem:[#allocation296_spill] sm:$0xff]  ;;  %v18106_v17 = vld [vmem:[#allocation23_spill] sm:$0xff] }
 0x3b9   :  { %9295 = vrot.lane.b32.xlu1 %v9294_v26, %s10161_s14  ;;  %v2626_v19 = vadd.f32 %v11862_v13, %v2412_v24  ;;  %v14212_v23 = vsel %vm3470_vm2, %v9163_v27, %v16825_v7  ;;  %v14217_v32 = vsel %vm3470_vm2, %v9162_v30, %v16826_v11  ;;  %v14221_v57 = vadd.f32 %v12098_v10, %v18100_v5  ;;  %v14223_v29 = vpop.permute.xlu1 %9165 }
 0x3ba   :  { %18097 = vst [vmem:[#allocation330_spill] sm:$0xff] %v14206_v9  ;;  %18098 = vst [vmem:[#allocation161_spill] sm:$0xff] %v14212_v23  ;;  %9300 = vrot.lane.b32.xlu0 %v9299_v51, %s10161_s14  ;;  %v9304_v24 = vpack.i.bf16 %v3213_v43, %v3212_v63  ;;  %v14232_v15 = vadd.f32 %v12098_v10, %v14008_v20  ;;  %v14238_v26 = vadd.f32 %v12098_v10, %v14102_v18  ;;  %v18107_v63 = vld [vmem:[#allocation130_spill] sm:$0xff] }
 0x3bb   :  { %18099 = vst [vmem:[#allocation331_spill] sm:$0xff] %v14217_v32  ;;  %18101 = vst [vmem:[#allocation162_spill] sm:$0xff] %v14221_v57  ;;  %v9309_v30 = vpack.i.bf16 %v14206_v9, %v14221_v57  ;;  %v3128_v51 = vadd.f32 %v12004_v2, %v18105_v3  ;;  %v3129_v5 = vadd.f32 %v12017_v60, %v18106_v17  ;;  %v18108_v20 = vld [vmem:[#allocation22_spill] sm:$0xff]  ;;  %v2815_v7 = vmax.f32 %v2623_v1, 0.0 }
 0x3bc   :  { %18103 = vst [vmem:[#allocation332_spill] sm:$0xff] %v14232_v15  ;;  %18104 = vst [vmem:[#allocation163_spill] sm:$0xff] %v14238_v26  ;;  %v3132_v43 = vadd.f32 %v12004_v2, %v18107_v63  ;;  %v3133_v27 = vadd.f32 %v12017_v60, %v18108_v20  ;;  %v3224_v53 = vadd.f32 %v12004_v2, %v14134_v12  ;;  %v2818_v12 = vmax.f32 %v2626_v19, 0.0 }
 0x3bd   :  { %9305 = vrot.lane.b32.xlu1 %v9304_v24, %s10161_s14  ;;  %v3225_v18 = vadd.f32 %v12017_v60, %v3010_v35  ;;  %v9319_v11 = vpack.i.bf16 %v3129_v5, %v3128_v51  ;;  %v3228_v3 = vadd.f32 %v12004_v2, %v3013_v45  ;;  %v3229_v57 = vadd.f32 %v12017_v60, %v3014_v50  ;;  %v18109_v45 = vld [vmem:[#allocation27_spill] sm:$0xff] }
 0x3be   :  { %v3025_v17 = vmul.f32 %v11963_v33, %v2810_v21  ;;  %9310 = vrot.lane.b32.xlu0 %v9309_v30, %s10161_s14  ;;  %v9314_v24 = vpack.i.bf16 %v14238_v26, %v14232_v15  ;;  %v9324_v63 = vpack.i.bf16 %v3133_v27, %v3132_v43  ;;  %v3026_v9 = vmul.f32 %v11967_v58, %v2811_v41  ;;  %v18110_v21 = vld [vmem:[#allocation131_spill] sm:$0xff]  ;;  %v18111_v27 = vld [vmem:[#allocation301_spill] sm:$0xff] }
 0x3bf   :  { %v9329_v20 = vpack.i.bf16 %v3225_v18, %v3224_v53  ;;  %v2627_v35 = vadd.f32 %v11866_v44, %v2413_v28  ;;  %v9334_v1 = vpack.i.bf16 %v3229_v57, %v3228_v3  ;;  %v14260_v51 = vpop.permute.xlu1 %9170  ;;  %v14265_v50 = vadd.f32 %v12004_v2, %v18109_v45  ;;  %v18112_v41 = vld [vmem:[#allocation307_spill] sm:$0xff]  ;;  %v18126_v15 = vld [vmem:[#allocation201_spill] sm:$0xff] }
 0x3c0   :  { %v14269_v30 = vadd.f32 %v12017_v60, %v18110_v21  ;;  %v14273_v53 = vadd.f32 %v12004_v2, %v18111_v27  ;;  %v14277_v28 = vadd.f32 %v12017_v60, %v18112_v41  ;;  %v18113_v19 = vmax.f32 %v14142_v39, 0.0  ;;  %v18114_v39 = vld [vmem:[#allocation110_spill] sm:$0xff]  ;;  %v18115_v21 = vld [vmem:[#allocation111_spill] sm:$0xff] }
 0x3c1   :  { %9315 = vrot.lane.b32.xlu1 %v9314_v24, %s10161_s14  ;;  %v14285_v5 = vmul.f32 %v11963_v33, %v2814_v38  ;;  %v14289_v18 = vmul.f32 %v11967_v58, %v2815_v7  ;;  %v14298_v45 = vadd.f32 %v12004_v2, %v18114_v39  ;;  %v14302_v38 = vadd.f32 %v12017_v60, %v18115_v21  ;;  %v18118_v39 = vld [vmem:[#allocation274_spill] sm:$0xff]  ;;  %v18128_v26 = vld [vmem:[#allocation127_spill] sm:$0xff] }
 0x3c2   :  { %v14282_v57 = vmul.f32 %v12059_v34, %v18113_v19  ;;  %9320 = vrot.lane.b32.xlu0 %v9319_v11, %s10161_s14  ;;  %v9349_v3 = vpack.i.bf16 %v14269_v30, %v14265_v50  ;;  %v3033_v27 = vmul.f32 %v11963_v33, %v2818_v12  ;;  %v2819_v7 = vmax.f32 %v2627_v35, 0.0  ;;  %v18116_v50 = vld [vmem:[#allocation300_spill] sm:$0xff]  ;;  %v18119_v12 = vld [vmem:[#allocation279_spill] sm:$0xff]  ;;  %v18120_v35 = vld [vmem:[#allocation298_spill] sm:$0xff] }
 0x3c3   :  { %v14306_v41 = vadd.f32 %v12004_v2, %v3025_v17  ;;  %v14309_v11 = vadd.f32 %v12017_v60, %v3026_v9  ;;  %v14314_v30 = vadd.f32 %v12098_v10, %v18116_v50  ;;  %v14320_v21 = vadd.f32 %v12004_v2, %v18118_v39  ;;  %v9176_v39 = vpop.permute.xlu1 %9175 }
 0x3c4   :  { %v14324_v17 = vadd.f32 %v12017_v60, %v18119_v12  ;;  %v14328_v9 = vadd.f32 %v12098_v10, %v18120_v35  ;;  %v14338_v19 = vadd.f32 %v12004_v2, %v13733_v59  ;;  %v14345_v35 = vadd.f32 %v12017_v60, %v13741_v56  ;;  %v18124_v59 = vld [vmem:[#allocation304_spill] sm:$0xff]  ;;  %v14380_v36 = vpop.permute.xlu0 %9180 }
 0x3c5   :  { %9325 = vrot.lane.b32.xlu1 %v9324_v63, %s10161_s14  ;;  %18117 = vst [vmem:[#allocation333_spill] sm:$0xff] %v14314_v30  ;;  %v14332_v63 = vadd.f32 %v12098_v10, %v14173_v4  ;;  %v9168_v4 = vunpack.i.h.bf16 %v14223_v29  ;;  %v9167_v43 = vunpack.i.l.bf16 %v14223_v29  ;;  %v14351_v50 = vadd.f32 %v12098_v10, %v14166_v55  ;;  %v18129_v55 = vld [vmem:[#allocation138_spill] sm:$0xff] }
 0x3c6   :  { %18121 = vst [vmem:[#allocation164_spill] sm:$0xff] %v14328_v9  ;;  %9330 = vrot.lane.b32.xlu0 %v9329_v20, %s10161_s14  ;;  %v14355_v24 = vadd.f32 %v12098_v10, %v18124_v59  ;;  %v14359_v20 = vadd.f32 %v12004_v2, %v13746_v46  ;;  %v14363_v56 = vadd.f32 %v12017_v60, %v13770_v6  ;;  %v9173_v59 = vunpack.i.h.bf16 %v14260_v51 }
 0x3c7   :  { %18122 = vst [vmem:[#allocation334_spill] sm:$0xff] %v14332_v63  ;;  %18123 = vst [vmem:[#allocation165_spill] sm:$0xff] %v14351_v50  ;;  %v9339_v29 = vpack.i.bf16 %v14314_v30, %v14328_v9  ;;  %v3836_v12 = vsel %vm3470_vm2, %v9167_v43, %v9168_v4  ;;  %v14374_v46 = vadd.f32 %v12098_v10, %v18126_v15  ;;  %v18130_v30 = vld [vmem:[#allocation308_spill] sm:$0xff]  ;;  %v9178_v6 = vunpack.i.h.bf16 %v9176_v39 }
 0x3c8   :  { %18125 = vst [vmem:[#allocation335_spill] sm:$0xff] %v14355_v24  ;;  %v3932_v32 = vmax.f32 %v18128_v26, %v3836_v12  ;;  %v3034_v9 = vmul.f32 %v11967_v58, %v2819_v7  ;;  %v9344_v4 = vpack.i.bf16 %v14332_v63, %v14351_v50  ;;  %v14388_v15 = vadd.f32 %v12004_v2, %v18129_v55  ;;  %v18133_v55 = vld [vmem:[#allocation297_spill] sm:$0xff] }
 0x3c9   :  { %9335 = vrot.lane.b32.xlu1 %v9334_v1, %s10161_s14  ;;  %18127 = vst [vmem:[#allocation32_spill] sm:$0xff] %v14374_v46  ;;  %v9172_v1 = vunpack.i.l.bf16 %v14260_v51  ;;  %v14392_v26 = vadd.f32 %v12017_v60, %v18130_v30  ;;  %v9359_v51 = vpack.i.bf16 %v14355_v24, %v14374_v46  ;;  %v9177_v7 = vunpack.i.l.bf16 %v9176_v39  ;;  %v9186_v23 = vpop.permute.xlu1 %9185  ;;  %v18134_v46 = vld [vmem:[#allocation309_spill] sm:$0xff] }
 0x3ca   :  { %9340 = vrot.lane.b32.xlu0 %v9339_v29, %s10161_s14  ;;  %v18131_v29 = vld [vmem:[#allocation145_spill] sm:$0xff]  ;;  %v9183_v42 = vunpack.i.h.bf16 %v14380_v36  ;;  %v9182_v39 = vunpack.i.l.bf16 %v14380_v36 }
 0x3cb   :  { %v3838_v12 = vsel %vm3470_vm2, %v9172_v1, %v9173_v59  ;;  %v18132_v63 = vmax.f32 %v18021_v31, %v18131_v29  ;;  %v9409_v30 = vpack.i.bf16 %v14392_v26, %v14388_v15  ;;  %v3837_v24 = vsel %vm3470_vm2, %v9178_v6, %v9172_v1  ;;  %v18137_v29 = vld [vmem:[#allocation202_spill] sm:$0xff] }
 0x3cc   :  { %v3934_v62 = vmax.f32 %v18133_v55, %v3838_v12  ;;  %v3835_v59 = vsel %vm3470_vm2, %v9177_v7, %v9167_v43  ;;  %v18135_v31 = vmax.f32 %v18023_v48, %v13906_v16  ;;  %v18138_v6 = vld [vmem:[#allocation310_spill] sm:$0xff]  ;;  %v3840_v36 = vsel %vm3470_vm2, %v9182_v39, %v9183_v42  ;;  %v1932_v7 = vpop.f32.mrf.mxu0 }
 0x3cd   :  { %9345 = vrot.lane.b32.xlu1 %v9344_v4, %s10161_s14  ;;  %v3980_v50 = vmax.f32 %v18132_v63, %v3932_v32  ;;  %v14410_v4 = vadd.f32 %v12004_v2, %v18134_v46  ;;  %v18136_v63 = vld [vmem:[#allocation144_spill] sm:$0xff]  ;;  %v3931_v55 = vmax.f32 %v18137_v29, %v3835_v59  ;;  %v14420_v43 = vadd.f32 %v12017_v60, %v18138_v6  ;;  %v18145_v6 = vld [vmem:[#allocation302_spill] sm:$0xff] }
 0x3ce   :  { %9350 = vrot.lane.b32.xlu0 %v9349_v3, %s10161_s14  ;;  %v3982_v32 = vmax.f32 %v18135_v31, %v3934_v62  ;;  %v3933_v12 = vmax.f32 %v18136_v63, %v3837_v24  ;;  %v14424_v46 = vadd.f32 %v12004_v2, %v3033_v27  ;;  %v14427_v1 = vadd.f32 %v12017_v60, %v3034_v9  ;;  %v18141_v24 = vld [vmem:[#allocation318_spill] sm:$0xff]  ;;  %v18143_v27 = vld [vmem:[#allocation299_spill] sm:$0xff] }
 0x3cf   :  { %v9188_v3 = vunpack.i.h.bf16 %v9186_v23  ;;  %v18139_v62 = vpack.i.bf16 %v14277_v28, %v14273_v53  ;;  %v18140_v16 = vmax.f32 %v18047_v47, %v13954_v40  ;;  %v18142_v42 = vmax.f32 %v18032_v49, %v18141_v24  ;;  %v2217_v49 = vpop.f32.mrf.mxu1  ;;  %v9675_v26 = vld [vmem:[%s16744_s4 + $0x30] ss:$12 sps:$4 sm:$0xff]  }
 0x3d0   :  { %v3936_v31 = vmax.f32 %v18143_v27, %v3840_v36  ;;  %v9414_v9 = vpack.i.bf16 %v14420_v43, %v14410_v4  ;;  %v18144_v63 = vmax.f32 %v14188_v54, 0.0  ;;  %v3245_v53 = vadd.f32 %v12017_v60, %v14289_v18  ;;  %v9201_v28 = vpop.permute.xlu1 %9200  ;;  %v18146_v36 = vld [vmem:[#allocation305_spill] sm:$0xff]  ;;  %v18148_v18 = vld [vmem:[#allocation103_spill] sm:$0xff]  ;;  %v9681_v4 = vld [vmem:[%s16744_s4 + $0x1c] ss:$12 sps:$4 sm:$0xff]  }
 0x3d1   :  { %9355 = vrot.lane.b32.xlu1 %v18139_v62, %s10161_s14  ;;  %v3979_v48 = vmax.f32 %v18140_v16, %v3931_v55  ;;  %v3981_v59 = vmax.f32 %v18142_v42, %v3933_v12  ;;  %v9187_v47 = vunpack.i.l.bf16 %v9186_v23  ;;  %v14449_v55 = vpop.permute.xlu0 %9190  ;;  %v18147_v54 = vmax.f32 %v18145_v6, %v18146_v36  ;;  %v18149_v42 = vld [vmem:[#allocation273_spill] sm:$0xff] }
 0x3d2   :  { %v3028_v29 = vmul.f32 %v12059_v34, %v18144_v63  ;;  %9360 = vrot.lane.b32.xlu0 %v9359_v51, %s10161_s14  ;;  %v14457_v16 = vpack.c.bf16 %v3982_v32, %v3980_v50  ;;  %v2416_v24 = vadd.f32 %v2215_v0, %v18148_v18  ;;  %v2415_v27 = vadd.f32 %v1932_v7, %v18149_v42  ;;  %v9655_v51 = vld [vmem:[%s16744_s4 + $0xa8] ss:$12 sps:$4 sm:$0xff]  }
 0x3d3   :  { %v14452_v12 = vpack.c.bf16 %v3981_v59, %v3979_v48  ;;  %v3984_v62 = vmax.f32 %v18147_v54, %v3936_v31  ;;  %v3244_v23 = vadd.f32 %v12004_v2, %v14285_v5  ;;  %v3842_v63 = vsel %vm3470_vm2, %v9187_v47, %v9188_v3  ;;  %v18151_v50 = vld [vmem:[#allocation197_spill] sm:$0xff]  ;;  %v18152_v59 = vld [vmem:[#allocation104_spill] sm:$0xff] }
 0x3d4   :  { %v18150_v48 = vpack.i.bf16 %v14302_v38, %v14298_v45  ;;  %v3938_v32 = vmax.f32 %v18151_v50, %v3842_v63  ;;  %8619 = vmatprep.mubr.msk.bf16.mxu0 %vm4360_vm3, %v14457_v16  ;;  %v9203_v0 = vunpack.i.h.bf16 %v9201_v28  ;;  %v9202_v7 = vunpack.i.l.bf16 %v9201_v28  ;;  %v9658_v3 = vld [vmem:[%s16744_s4 + $0xb0] ss:$12 sps:$4 sm:$0xff]   ;;  %8629 = vmatprep.mubr.msk.bf16.mxu1 %vm4360_vm3, %v14457_v16  ;;  %v9661_v38 = vld [vmem:[%s16744_s4 + $0x94] ss:$12 sps:$4 sm:$0xff]  }
 0x3d5   :  { %v9193_v5 = vunpack.i.h.bf16 %v14449_v55  ;;  %v2417_v31 = vadd.f32 %v2217_v49, %v18152_v59  ;;  %v9384_v6 = vpack.i.bf16 %v3245_v53, %v3244_v23  ;;  %v14480_v36 = vadd.f32 %v12098_v10, %v3028_v29  ;;  %4424 = vmatmul.mubr.bf16.vlgmr.msra.gmra.mxu0 %v14452_v12  ;;  %v18154_v53 = vld [vmem:[#allocation133_spill] sm:$0xff]  ;;  %v18155_v49 = vld [vmem:[#allocation135_spill] sm:$0xff]  ;;  %4557 = vmatmul.mubr.bf16.vlgmr.msra.gmra.mxu1 %v14452_v12  ;;  %v18157_v23 = vld [vmem:[#allocation100_spill] sm:$0xff] }
 0x3d6   :  { %9375 = vrot.lane.b32.xlu1 %v18150_v48, %s10161_s14  ;;  %v9192_v45 = vunpack.i.l.bf16 %v14449_v55  ;;  %v18153_v28 = vpack.i.bf16 %v14309_v11, %v14306_v41  ;;  %v18156_v29 = vmax.f32 %v18154_v53, %v18155_v49  ;;  %v3839_v18 = vsel %vm3470_vm2, %v9202_v7, %v9182_v39  ;;  %v18158_v48 = vld [vmem:[#allocation314_spill] sm:$0xff]  ;;  %4849 = vmatpush1.bf16.msra.mxu0 %v9655_v51 }
 0x3d7   :  { %v3841_v42 = vsel %vm3470_vm2, %v9203_v0, %v9187_v47  ;;  %v2411_v63 = vadd.f32 %v14093_v37, %v18157_v23  ;;  %v3935_v50 = vmax.f32 %v18158_v48, %v3839_v18  ;;  %v18159_v59 = vld [vmem:[#allocation146_spill] sm:$0xff]  ;;  %v14512_v47 = vadd.f32 %v12098_v10, %v14282_v57  ;;  %4982 = vmatpush1.bf16.msra.mxu1 %v9658_v3  ;;  %v18167_v48 = vld [vmem:[#allocation28_spill] sm:$0xff] }
 0x3d8   :  { %9365 = vrot.lane.b32.xlu0 %v18153_v28, %s10161_s14  ;;  %v3986_v54 = vmax.f32 %v18156_v29, %v3938_v32  ;;  %v3937_v40 = vmax.f32 %v18159_v59, %v3841_v42  ;;  %v3844_v41 = vsel %vm3470_vm2, %v9192_v45, %v9193_v5  ;;  %v9659_v39 = vld [vmem:[%s16744_s4 + $0x90] ss:$12 sps:$4 sm:$0xff]   ;;  %v9662_v51 = vld [vmem:[%s16744_s4 + $0x98] ss:$12 sps:$4 sm:$0xff]   ;;  %v2631_v5 = vadd.f32 %v11866_v44, %v2417_v31  ;;  %v18160_v28 = vld [vmem:[#allocation136_spill] sm:$0xff] }
 0x3d9   :  { %v9206_v11 = vpop.permute.xlu1 %9205  ;;  %v3940_v53 = vmax.f32 %v18160_v28, %v3844_v41  ;;  %4850 = vmatprep.subr.bf16.mxu0 %v9661_v38  ;;  %v18161_v29 = vmov 0   ;;  %v9665_v57 = vld [vmem:[%s16744_s4 + $0x7c] ss:$12 sps:$4 sm:$0xff]   ;;  %v14529_v3 = vadd.f32 %v11995_v25, %v2415_v27  ;;  %v18162_v44 = vpack.i.bf16 %v14324_v17, %v14320_v21  ;;  %v9663_v17 = vld [vmem:[%s16744_s4 + $0x78] ss:$12 sps:$4 sm:$0xff]  }
 0x3da   :  { %9385 = vrot.lane.b32.xlu1 %v9384_v6, %s10161_s14  ;;  %v14514_v37 = vpack.c.bf16 %v3986_v54, %v3984_v62  ;;  %v9208_v32 = vunpack.i.h.bf16 %v9206_v11  ;;  %v9207_v0 = vunpack.i.l.bf16 %v9206_v11  ;;  %v9196_v7 = vpop.permute.xlu0 %9195  ;;  %4983 = vmatprep.subr.bf16.mxu1 %v18161_v29  ;;  %v14526_v62 = vadd.f32 %v11862_v13, %v2416_v24  ;;  %v18163_v54 = vld [vmem:[#allocation280_spill] sm:$0xff]  ;;  %v18164_v42 = vld [vmem:[#allocation306_spill] sm:$0xff]  ;;  %v18171_v28 = vld [vmem:[#allocation115_spill] sm:$0xff] }
 0x3db   :  { %v9198_v49 = vunpack.i.h.bf16 %v9196_v7  ;;  %v9197_v6 = vunpack.i.l.bf16 %v9196_v7  ;;  %v9389_v31 = vpack.i.bf16 %v14480_v36, %v14512_v47  ;;  %v14540_v18 = vadd.f32 %v12098_v10, %v18163_v54  ;;  %v18165_v24 = vld [vmem:[#allocation132_spill] sm:$0xff]  ;;  %4851 = vmatpush1.bf16.msra.mxu0 %v9659_v39  ;;  %4984 = vmatpush1.bf16.msra.mxu1 %v9662_v51  ;;  %v18173_v54 = vld [vmem:[#allocation142_spill] sm:$0xff] }
 0x3dc   :  { %9370 = vrot.lane.b32.xlu0 %v18162_v44, %s10161_s14  ;;  %v3846_v38 = vsel %vm3470_vm2, %v9207_v0, %v9208_v32  ;;  %v18166_v23 = vunpack.i.l.bf16 %v18165_v24  ;;  %v18168_v59 = vunpack.i.l.bf16 %v18167_v48  ;;  %v18169_v41 = vld [vmem:[#allocation140_spill] sm:$0xff]  ;;  %v18170_v32 = vld [vmem:[#allocation106_spill] sm:$0xff]  ;;  %4852 = vmatprep.subr.bf16.mxu0 %v9665_v57  ;;  %v18177_v51 = vpack.i.bf16 %v14345_v35, %v14338_v19 }
 0x3dd   :  { %v3942_v13 = vmax.f32 %v18164_v42, %v3846_v38  ;;  %v2725_v11 = vmax.f32 %v18169_v41, 0.0  ;;  %v14556_v7 = vadd.f32 %v12098_v10, %v18170_v32  ;;  %v9666_v39 = vld [vmem:[%s16744_s4 + $0x80] ss:$12 sps:$4 sm:$0xff]   ;;  %v14565_v42 = vadd.f32 %v12098_v10, %v18173_v54  ;;  %4985 = vmatprep.subr.bf16.mxu1 %v18161_v29 }
 0x3de   :  { %v3481_v27 = vsel %vm3470_vm2, %v9198_v49, %v18166_v23  ;;  %v3479_v21 = vsel %vm3470_vm2, %v9197_v6, %v18168_v59  ;;  %9390 = vrot.lane.b32.xlu1 %v9389_v31, %s10161_s14  ;;  %v18172_v49 = vld [vmem:[#allocation114_spill] sm:$0xff]  ;;  %v2823_v6 = vmax.f32 %v2631_v5, 0.0  ;;  %v18174_v31 = vmax.f32 %v18048_v22, %v13967_v52  ;;  %v9669_v52 = vld [vmem:[%s16744_s4 + $0x64] ss:$12 sps:$4 sm:$0xff]   ;;  %v9667_v19 = vld [vmem:[%s16744_s4 + $0x60] ss:$12 sps:$4 sm:$0xff]  }
 0x3df   :  { %v3577_v44 = vmax.f32 %v18171_v28, %v3481_v27  ;;  %v3575_v38 = vmax.f32 %v18172_v49, %v3479_v21  ;;  %v18175_v23 = vld [vmem:[#allocation322_spill] sm:$0xff]  ;;  %v9211_v59 = vpop.permute.xlu1 %9210  ;;  %v2625_v22 = vadd.f32 %v11995_v25, %v2411_v63  ;;  %4853 = vmatpush1.bf16.msra.mxu0 %v9663_v17  ;;  %v2822_v35 = vmax.f32 %v14526_v62, 0.0  ;;  %4986 = vmatpush1.bf16.msra.mxu1 %v9666_v39  ;;  %v9670_v17 = vld [vmem:[%s16744_s4 + $0x68] ss:$12 sps:$4 sm:$0xff]   ;;  %v18180_v28 = vld [vmem:[#allocation323_spill] sm:$0xff] }
 0x3e0   :  { %v3988_v24 = vmax.f32 %v18174_v31, %v3940_v53  ;;  %v18176_v48 = vmax.f32 %v18059_v8, %v18175_v23  ;;  %9380 = vrot.lane.b32.xlu0 %v18177_v51, %s10161_s14  ;;  %v9213_v41 = vunpack.i.h.bf16 %v9211_v59  ;;  %v9212_v32 = vunpack.i.l.bf16 %v9211_v59  ;;  %v18178_v53 = vld [vmem:[#allocation141_spill] sm:$0xff]  ;;  %v18182_v49 = vld [vmem:[#allocation316_spill] sm:$0xff]  ;;  %4854 = vmatprep.subr.bf16.mxu0 %v9669_v52 }
 0x3e1   :  { %v3985_v5 = vmax.f32 %v3577_v44, %v3937_v40  ;;  %v3983_v21 = vmax.f32 %v3575_v38, %v3935_v50  ;;  %v9399_v8 = vpack.i.bf16 %v14540_v18, %v14556_v7  ;;  %v14586_v57 = vadd.f32 %v12098_v10, %v18178_v53  ;;  %v18181_v62 = vld [vmem:[#allocation21_spill] sm:$0xff]  ;;  %v9673_v55 = vld [vmem:[%s16744_s4 + $0x4c] ss:$12 sps:$4 sm:$0xff]   ;;  %4987 = vmatprep.subr.bf16.mxu1 %v18161_v29 }
 0x3e2   :  { %v3990_v27 = vmax.f32 %v18176_v48, %v3942_v13  ;;  %v18179_v25 = vpack.i.bf16 %v14363_v56, %v14359_v20  ;;  %v3843_v63 = vsel %vm3470_vm2, %v9212_v32, %v9192_v45  ;;  %v3845_v50 = vsel %vm3470_vm2, %v9213_v41, %v9207_v0  ;;  %v18183_v20 = vld [vmem:[#allocation147_spill] sm:$0xff]  ;;  %v18184_v45 = vld [vmem:[#allocation134_spill] sm:$0xff]  ;;  %v18185_v48 = vld [vmem:[#allocation153_spill] sm:$0xff] }
 0x3e3   :  { %v14598_v40 = vpack.c.bf16 %v3985_v5, %v3983_v21  ;;  %v3579_v44 = vmax.f32 %v18181_v62, %v18180_v28  ;;  %v3939_v38 = vmax.f32 %v18182_v49, %v3843_v63  ;;  %v3941_v56 = vmax.f32 %v18183_v20, %v3845_v50  ;;  %4855 = vmatpush1.bf16.msra.mxu0 %v9667_v19  ;;  %v18189_v53 = vld [vmem:[#allocation37_spill] sm:$0xff]  ;;  %v18193_v63 = vld [vmem:[#allocation222_spill] sm:$0xff]  ;;  %v18195_v62 = vld [vmem:[#allocation303_spill] sm:$0xff] }
 0x3e4   :  { %v14588_v13 = vpack.c.bf16 %v3990_v27, %v3988_v24  ;;  %9395 = vrot.lane.b32.xlu1 %v18179_v25, %s10161_s14  ;;  %v2721_v0 = vmax.f32 %v18184_v45, 0.0  ;;  %v2821_v39 = vmax.f32 %v14529_v3, 0.0  ;;  %v3038_v54 = vmul.f32 %v11967_v58, %v2823_v6  ;;  %9400 = vrot.lane.b32.xlu0 %v9399_v8, %s10161_s14  ;;  %v9671_v6 = vld [vmem:[%s16744_s4 + $0x48] ss:$12 sps:$4 sm:$0xff]  }
 0x3e5   :  { %v9404_v31 = vpack.i.bf16 %v14565_v42, %v14586_v57  ;;  %v2817_v24 = vmax.f32 %v2625_v22, 0.0  ;;  %v3987_v23 = vmax.f32 %v3579_v44, %v3939_v38  ;;  %v18186_v27 = vmax.f32 %v18060_v61, %v18185_v48  ;;  %4988 = vmatpush1.bf16.msra.mxu1 %v9670_v17  ;;  %4856 = vmatprep.subr.bf16.mxu0 %v9673_v55  ;;  %v18194_v17 = vld [vmem:[#allocation26_spill] sm:$0xff]  ;;  %v18198_v45 = vld [vmem:[#allocation152_spill] sm:$0xff] }
 0x3e6   :  { %8620 = vmatprep.mubr.msk.bf16.mxu0 %vm4360_vm3, %v14588_v13  ;;  %8630 = vmatprep.mubr.msk.bf16.mxu1 %vm4360_vm3, %v14588_v13  ;;  %v2940_v51 = vmul.f32 %v12059_v34, %v2725_v11  ;;  %v3037_v3 = vmul.f32 %v11963_v33, %v2822_v35  ;;  %v14631_v58 = vpop.permute.xlu1 %9225  ;;  %v9674_v33 = vld [vmem:[%s16744_s4 + $0x50] ss:$12 sps:$4 sm:$0xff]   ;;  %v9677_v11 = vld [vmem:[%s16744_s4 + $0x34] ss:$12 sps:$4 sm:$0xff]   ;;  %v2936_v41 = vmul.f32 %v12059_v34, %v2721_v0  ;;  %v9679_v55 = vld [vmem:[%s16744_s4 + $0x18] ss:$12 sps:$4 sm:$0xff]   ;;  %v9128_v0 = vunpack.i.h.bf16 %v18198_v45 }
 0x3e7   :  { %v3989_v59 = vmax.f32 %v18186_v27, %v3941_v56  ;;  %v9228_v61 = vunpack.i.h.bf16 %v14631_v58  ;;  %v16844_v21 = vunpack.i.l.bf16 %v14631_v58  ;;  %4989 = vmatprep.subr.bf16.mxu1 %v18161_v29  ;;  %v3036_v32 = vmul.f32 %v12059_v34, %v2821_v39  ;;  %4857 = vmatpush1.bf16.msra.mxu0 %v9671_v6 }
 0x3e8   :  { %9405 = vrot.lane.b32.xlu1 %v9404_v31, %s10161_s14  ;;  %9410 = vrot.lane.b32.xlu0 %v9409_v30, %s10161_s14  ;;  %v3253_v52 = vadd.f32 %v12017_v60, %v3038_v54  ;;  %v3032_v22 = vmul.f32 %v12059_v34, %v2817_v24  ;;  %v3252_v15 = vadd.f32 %v12004_v2, %v3037_v3  ;;  %v18188_v30 = vld [vmem:[#allocation41_spill] sm:$0xff]  ;;  %v9678_v2 = vld [vmem:[%s16744_s4 + $0x38] ss:$12 sps:$4 sm:$0xff]   ;;  %v9127_v39 = vunpack.i.l.bf16 %v18198_v45 }
 0x3e9   :  { %v14636_v5 = vpack.c.bf16 %v3989_v59, %v3987_v23  ;;  %v14658_v8 = vsel %vm3470_vm2, %v16844_v21, %v9228_v61  ;;  %v14668_v60 = vadd.f32 %v12098_v10, %v2940_v51  ;;  %v2480_v19 = vadd.f32 %v18189_v53, %v18188_v30  ;;  %4990 = vmatpush1.bf16.msra.mxu1 %v9674_v33  ;;  %v9685_v24 = vld [vmem:[%s16744_s4 + $0x4] ss:$12 sps:$4 sm:$0xff]   ;;  %v9683_v61 = vld [vmem:[%s16744_s4] ss:$12 sps:$4 sm:$0xff]  }
 0x3ea   :  { %4858 = vmatprep.subr.bf16.mxu0 %v9677_v11  ;;  %v18190_v43 = vpack.i.bf16 %v14427_v1, %v14424_v46  ;;  %v14688_v35 = vadd.f32 %v12098_v10, %v2936_v41  ;;  %v14691_v25 = vadd.f32 %v12098_v10, %v3036_v32  ;;  %4991 = vmatprep.subr.bf16.mxu1 %v18161_v29  ;;  %v18196_v46 = vld [vmem:[#allocation317_spill] sm:$0xff]  ;;  %v9693_v45 = vld [vmem:[%s16744_s4 + $0x10c] ss:$12 sps:$4 sm:$0xff]  }
 0x3eb   :  { %4434 = vmatmul.mubr.bf16.gmra.mxu0 %v14636_v5  ;;  %4565 = vmatmul.mubr.bf16.gmra.mxu1 %v14636_v5  ;;  %18187 = vst [vmem:[#allocation166_spill] sm:$0xff] %v14668_v60  ;;  %v2484_v50 = vadd.f32 %v18189_v53, %v18193_v63  ;;  %v2576_v28 = vadd.f32 %v18189_v53, %v18194_v17  ;;  %v9123_v1 = vunpack.i.h.bf16 %v18196_v46  ;;  %v9122_v49 = vunpack.i.l.bf16 %v18196_v46  ;;  %v18200_v30 = vld [vmem:[#allocation149_spill] sm:$0xff] }
 0x3ec   :  { %9415 = vrot.lane.b32.xlu1 %v9414_v9, %s10161_s14  ;;  %9420 = vrot.lane.b32.xlu0 %v18190_v43, %s10161_s14  ;;  %v9429_v9 = vpack.i.bf16 %v3253_v52, %v3252_v15  ;;  %18191 = vst [vmem:[#allocation336_spill] sm:$0xff] %v14688_v35  ;;  %18192 = vst [vmem:[#allocation167_spill] sm:$0xff] %v14691_v25  ;;  %v2580_v44 = vadd.f32 %v18189_v53, %v18195_v62  ;;  %v2672_v23 = vmax.f32 %v2480_v19, 0.0  ;;  %v9686_v52 = vld [vmem:[%s16744_s4 + $0x8] ss:$12 sps:$4 sm:$0xff]   ;;  %v18199_v15 = vld [vmem:[#allocation39_spill] sm:$0xff] }
 0x3ed   :  { %v9424_v38 = vpack.i.bf16 %v14668_v60, %v14688_v35  ;;  %v14706_v20 = vadd.f32 %v12098_v10, %v3032_v22  ;;  %4859 = vmatpush1.bf16.msra.mxu0 %v9675_v26  ;;  %4992 = vmatpush1.bf16.msra.mxu1 %v9678_v2  ;;  %v9682_v10 = vld [vmem:[%s16744_s4 + $0x20] ss:$12 sps:$4 sm:$0xff]   ;;  %v2676_v27 = vmax.f32 %v2484_v50, 0.0  ;;  %v2768_v59 = vmax.f32 %v2576_v28, 0.0  ;;  %v9689_v22 = vld [vmem:[%s16744_s4 + $0x124] ss:$12 sps:$4 sm:$0xff]  }
 0x3ee   :  { %v14708_v56 = vpop.permute.xlu0 %9215  ;;  %4860 = vmatprep.subr.bf16.mxu0 %v9681_v4  ;;  %4993 = vmatprep.subr.bf16.mxu1 %v18161_v29  ;;  %v2772_v3 = vmax.f32 %v2580_v44, 0.0  ;;  %v3492_v33 = vsel %vm3470_vm2, %v9122_v49, %v9123_v1  ;;  %v3494_v11 = vsel %vm3470_vm2, %v9127_v39, %v9128_v0  ;;  %v2887_v26 = vmul.f32 %v18199_v15, %v2672_v23  ;;  %v18201_v2 = vld [vmem:[#allocation143_spill] sm:$0xff]  ;;  %v18202_v28 = vld [vmem:[#allocation72_spill] sm:$0xff]  ;;  %v18204_v1 = vld [vmem:[#allocation313_spill] sm:$0xff] }
 0x3ef   :  { %18197 = vst [vmem:[#allocation337_spill] sm:$0xff] %v14706_v20  ;;  %v9218_v54 = vunpack.i.h.bf16 %v14708_v56  ;;  %v9217_v31 = vunpack.i.l.bf16 %v14708_v56  ;;  %v9434_v48 = vpack.i.bf16 %v14691_v25, %v14706_v20  ;;  %v9133_v19 = vunpack.i.h.bf16 %v18200_v30  ;;  %v18203_v44 = vld [vmem:[#allocation244_spill] sm:$0xff]  ;;  %v18205_v23 = vld [vmem:[#allocation214_spill] sm:$0xff]  ;;  %v18246_v25 = vld [vmem:[#allocation107_spill] sm:$0xff] }
 0x3f0   :  { %9430 = vrot.lane.b32.xlu1 %v9429_v9, %s10161_s14  ;;  %9425 = vrot.lane.b32.xlu0 %v9424_v38, %s10161_s14  ;;  %v2891_v43 = vmul.f32 %v18199_v15, %v2676_v27  ;;  %v2983_v9 = vmul.f32 %v18199_v15, %v2768_v59  ;;  %v9132_v63 = vunpack.i.l.bf16 %v18200_v30  ;;  %v2987_v17 = vmul.f32 %v18199_v15, %v2772_v3  ;;  %v9687_v56 = vld [vmem:[%s16744_s4 + $0x120] ss:$12 sps:$4 sm:$0xff]  }
 0x3f1   :  { %v3852_v51 = vsel %vm3470_vm2, %v9217_v31, %v9218_v54  ;;  %4861 = vmatpush1.bf16.msra.mxu0 %v9679_v55  ;;  %4994 = vmatpush1.bf16.msra.mxu1 %v9682_v10  ;;  %v3588_v62 = vmax.f32 %v18202_v28, %v3492_v33  ;;  %v3590_v46 = vmax.f32 %v18203_v44, %v3494_v11  ;;  %v9690_v55 = vld [vmem:[%s16744_s4 + $0x128] ss:$12 sps:$4 sm:$0xff]   ;;  %v9705_v28 = vld [vmem:[%s16744_s4 + $0xc4] ss:$12 sps:$4 sm:$0xff]  }
 0x3f2   :  { %v9231_v6 = vpop.permute.xlu1 %9230  ;;  %4862 = vmatprep.subr.bf16.mxu0 %v9685_v24  ;;  %v3948_v4 = vmax.f32 %v18201_v2, %v3852_v51  ;;  %4995 = vmatprep.subr.bf16.mxu1 %v18161_v29  ;;  %v3493_v0 = vsel %vm3470_vm2, %v9133_v19, %v9127_v39  ;;  %v3491_v27 = vsel %vm3470_vm2, %v9132_v63, %v9122_v49  ;;  %v9691_v39 = vld [vmem:[%s16744_s4 + $0x108] ss:$12 sps:$4 sm:$0xff]   ;;  %v9695_v2 = vld [vmem:[%s16744_s4 + $0xf0] ss:$12 sps:$4 sm:$0xff]  }
 0x3f3   :  { %v9233_v41 = vunpack.i.h.bf16 %v9231_v6  ;;  %v9232_v32 = vunpack.i.l.bf16 %v9231_v6  ;;  %v3102_v3 = vadd.f32 %v18205_v23, %v2887_v26  ;;  %v3198_v6 = vadd.f32 %v18205_v23, %v2983_v9  ;;  %v9701_v9 = vld [vmem:[%s16744_s4 + $0xdc] ss:$12 sps:$4 sm:$0xff]  }
 0x3f4   :  { %9435 = vrot.lane.b32.xlu1 %v9434_v48, %s10161_s14  ;;  %v3996_v54 = vmax.f32 %v3588_v62, %v3948_v4  ;;  %v3106_v48 = vadd.f32 %v18205_v23, %v2891_v43  ;;  %v9698_v4 = vld [vmem:[%s16744_s4 + $0xf8] ss:$12 sps:$4 sm:$0xff]   ;;  %v14798_v63 = vpop.permute.xlu0 %9220 }
 0x3f5   :  { %v3854_v50 = vsel %vm3470_vm2, %v9232_v32, %v9233_v41  ;;  %4863 = vmatpush1.bf16.msra.mxu0 %v9683_v61  ;;  %4996 = vmatpush1.bf16.msra.mxu1 %v9686_v52  ;;  %v3202_v61 = vadd.f32 %v18205_v23, %v2987_v17  ;;  %v9694_v52 = vld [vmem:[%s16744_s4 + $0x110] ss:$12 sps:$4 sm:$0xff]   ;;  %v3587_v26 = vmax.f32 %v3102_v3, %v3491_v27  ;;  %v9702_v17 = vld [vmem:[%s16744_s4 + $0xe0] ss:$12 sps:$4 sm:$0xff]   ;;  %v9706_v27 = vld [vmem:[%s16744_s4 + $0xc8] ss:$12 sps:$4 sm:$0xff]  }
 0x3f6   :  { %v3950_v38 = vmax.f32 %v18204_v1, %v3854_v50  ;;  %4870 = vmatprep.subr.bf16.mxu0 %v9689_v22  ;;  %5003 = vmatprep.subr.bf16.mxu1 %v18161_v29  ;;  %v3589_v11 = vmax.f32 %v3106_v48, %v3493_v0  ;;  %v9697_v22 = vld [vmem:[%s16744_s4 + $0xf4] ss:$12 sps:$4 sm:$0xff]   ;;  %v9699_v50 = vld [vmem:[%s16744_s4 + $0xd8] ss:$12 sps:$4 sm:$0xff]  }
 0x3f7   :  { %v18208_v62 = vld [vmem:[#allocation311_spill] sm:$0xff]  ;;  %v18211_v0 = vld [vmem:[#allocation154_spill] sm:$0xff] }
 0x3f8   :  { %v3998_v10 = vmax.f32 %v3590_v46, %v3950_v38  ;;  %v9236_v24 = vpop.permute.xlu1 %9235  ;;  %v2592_v44 = vadd.f32 %v18189_v53, %v18208_v62  ;;  %v18209_v46 = vld [vmem:[#allocation312_spill] sm:$0xff]  ;;  %v18218_v62 = vld [vmem:[#allocation354_spill] sm:$0xff] }
 0x3f9   :  { %v9238_v59 = vunpack.i.h.bf16 %v9236_v24  ;;  %v9237_v51 = vunpack.i.l.bf16 %v9236_v24  ;;  %4871 = vmatpush2.bf16.msra.mxu0 %v9687_v56  ;;  %5004 = vmatpush2.bf16.msra.mxu1 %v9690_v55  ;;  %v2596_v1 = vadd.f32 %v18189_v53, %v18209_v46  ;;  %v18210_v55 = vld [vmem:[#allocation321_spill] sm:$0xff]  ;;  %v9703_v48 = vld [vmem:[%s16744_s4 + $0xc0] ss:$12 sps:$4 sm:$0xff]  }
 0x3fa   :  { %v14768_v33 = vpack.c.bf16 %v3998_v10, %v3996_v54  ;;  %4872 = vmatprep.subr.bf16.mxu0 %v9693_v45  ;;  %5005 = vmatprep.subr.bf16.mxu1 %v18161_v29  ;;  %v9138_v45 = vunpack.i.h.bf16 %v18210_v55  ;;  %v9143_v54 = vunpack.i.h.bf16 %v18211_v0  ;;  %v18219_v46 = vld [vmem:[#allocation208_spill] sm:$0xff] }
 0x3fb   :  { %v3851_v41 = vsel %vm3470_vm2, %v9237_v51, %v9217_v31  ;;  %v3853_v49 = vsel %vm3470_vm2, %v9238_v59, %v9232_v32  ;;  %v9709_v59 = vld [vmem:[%s16744_s4 + $0x31c] ss:$12 sps:$4 sm:$0xff]   ;;  %v2784_v51 = vmax.f32 %v2592_v44, 0.0  ;;  %v2440_v44 = vadd.f32 %v18189_v53, %v18218_v62  ;;  %v18228_v62 = vld [vmem:[#allocation125_spill] sm:$0xff] }
 0x3fc   :  { %18206 = vst [vmem:[#allocation168_spill] sm:$0xff] %v14768_v33  ;;  %v3947_v30 = vmax.f32 %v3198_v6, %v3851_v41  ;;  %v3949_v19 = vmax.f32 %v3202_v61, %v3853_v49  ;;  %8621 = vmatprep.mubr.msk.bf16.mxu0 %vm4360_vm3, %v14768_v33  ;;  %8631 = vmatprep.mubr.msk.bf16.mxu1 %vm4360_vm3, %v14768_v33  ;;  %v2788_v6 = vmax.f32 %v2596_v1, 0.0  ;;  %v18213_v41 = vunpack.i.l.bf16 %v18211_v0  ;;  %v18220_v0 = vld [vmem:[#allocation38_spill] sm:$0xff]  ;;  %v18249_v33 = vld [vmem:[#allocation265_spill] sm:$0xff] }
 0x3fd   :  { %4873 = vmatpush2.bf16.msra.mxu0 %v9691_v39  ;;  %5006 = vmatpush2.bf16.msra.mxu1 %v9694_v52  ;;  %v18212_v39 = vunpack.i.l.bf16 %v18210_v55  ;;  %v2472_v1 = vadd.f32 %v18189_v53, %v18219_v46 }
 0x3fe   :  { %v3995_v31 = vmax.f32 %v3587_v26, %v3947_v30  ;;  %v3997_v32 = vmax.f32 %v3589_v11, %v3949_v19  ;;  %4874 = vmatprep.subr.bf16.mxu0 %v9697_v22  ;;  %5007 = vmatprep.subr.bf16.mxu1 %v18161_v29  ;;  %v3502_v49 = vsel %vm3470_vm2, %v18213_v41, %v9143_v54  ;;  %v18214_v26 = vld [vmem:[#allocation150_spill] sm:$0xff] }
 0x3ff   :  { %v14816_v38 = vpop.permute.xlu1 %9250  ;;  %v3500_v11 = vsel %vm3470_vm2, %v18212_v39, %v9138_v45  ;;  %v2999_v19 = vmul.f32 %v18199_v15, %v2784_v51  ;;  %v2476_v54 = vadd.f32 %v18189_v53, %v18220_v0  ;;  %v18222_v51 = vld [vmem:[#allocation232_spill] sm:$0xff] }
 0x400   :  { %v14792_v43 = vpack.c.bf16 %v3997_v32, %v3995_v31  ;;  %v3003_v32 = vmul.f32 %v18199_v15, %v2788_v6 }
 0x401   :  { %4875 = vmatpush2.bf16.msra.mxu0 %v9695_v2  ;;  %5008 = vmatpush2.bf16.msra.mxu1 %v9698_v4  ;;  %v18215_v2 = vld [vmem:[#allocation14_spill] sm:$0xff]  ;;  %v3214_v6 = vadd.f32 %v18205_v23, %v2999_v19 }
 0x402   :  { %18207 = vst [vmem:[#allocation338_spill] sm:$0xff] %v14792_v43  ;;  %4444 = vmatmul.mubr.bf16.gmra.mxu0 %v14792_v43  ;;  %4573 = vmatmul.mubr.bf16.gmra.mxu1 %v14792_v43  ;;  %v3596_v4 = vmax.f32 %v18215_v2, %v3500_v11  ;;  %v18224_v11 = vld [vmem:[#allocation183_spill] sm:$0xff]  ;;  %v18226_v2 = vld [vmem:[#allocation129_spill] sm:$0xff] }
 0x403   :  { %4876 = vmatprep.subr.bf16.mxu0 %v9701_v9  ;;  %5009 = vmatprep.subr.bf16.mxu1 %v18161_v29  ;;  %v18216_v9 = vld [vmem:[#allocation15_spill] sm:$0xff]  ;;  %v2444_v41 = vadd.f32 %v18189_v53, %v18224_v11 }
 0x405   :  { %4877 = vmatpush2.bf16.msra.mxu0 %v9699_v50  ;;  %5010 = vmatpush2.bf16.msra.mxu1 %v9702_v17  ;;  %v3598_v50 = vmax.f32 %v18216_v9, %v3502_v49  ;;  %v18217_v17 = vld [vmem:[#allocation320_spill] sm:$0xff] }
 0x406   :  { %v9241_v56 = vpop.permute.xlu0 %9240  ;;  %4878 = vmatprep.subr.bf16.mxu0 %v9705_v28  ;;  %5011 = vmatprep.subr.bf16.mxu1 %v18161_v29  ;;  %v18225_v49 = vld [vmem:[#allocation128_spill] sm:$0xff] }
 0x407   :  { %v9243_v10 = vunpack.i.h.bf16 %v9241_v56  ;;  %v9242_v24 = vunpack.i.l.bf16 %v9241_v56 }
 0x409   :  { %v3860_v3 = vsel %vm3470_vm2, %v9242_v24, %v9243_v10  ;;  %4879 = vmatpush2.bf16.msra.mxu0 %v9703_v48  ;;  %5012 = vmatpush2.bf16.msra.mxu1 %v9706_v27  ;;  %v18221_v10 = vld [vmem:[#allocation224_spill] sm:$0xff] }
 0x40a   :  { %v9256_v61 = vpop.permute.xlu1 %9255  ;;  %v3956_v30 = vmax.f32 %v18214_v26, %v3860_v3  ;;  %5358 = vmatprep.subr.bf16.mxu0 %v9709_v59  ;;  %5491 = vmatprep.subr.bf16.mxu1 %v18161_v29  ;;  %v2488_v48 = vadd.f32 %v18189_v53, %v18221_v10  ;;  %v2492_v3 = vadd.f32 %v18189_v53, %v18222_v51  ;;  %v2632_v10 = vmax.f32 %v2440_v44, 0.0 }
 0x40b   :  { %v9258_v52 = vunpack.i.h.bf16 %v9256_v61  ;;  %v9257_v22 = vunpack.i.l.bf16 %v9256_v61  ;;  %v3218_v61 = vadd.f32 %v18205_v23, %v3003_v32  ;;  %v2668_v32 = vmax.f32 %v2476_v54, 0.0 }
 0x40c   :  { %v4004_v56 = vmax.f32 %v3596_v4, %v3956_v30  ;;  %v2572_v4 = vadd.f32 %v18189_v53, %v18226_v2  ;;  %v14890_v44 = vmul.f32 %v18199_v15, %v2632_v10 }
 0x40d   :  { %v3862_v31 = vsel %vm3470_vm2, %v9257_v22, %v9258_v52  ;;  %v2568_v52 = vadd.f32 %v18189_v53, %v18225_v49 }
 0x40e   :  { %v3958_v28 = vmax.f32 %v18217_v17, %v3862_v31  ;;  %v2664_v31 = vmax.f32 %v2472_v1, 0.0  ;;  %v2684_v17 = vmax.f32 %v2492_v3, 0.0 }
 0x40f   :  { %v2760_v51 = vmax.f32 %v2568_v52, 0.0 }
 0x410   :  { %v4006_v55 = vmax.f32 %v3598_v50, %v3958_v28  ;;  %v9261_v45 = vpop.permute.xlu1 %9260  ;;  %v2680_v50 = vmax.f32 %v2488_v48, 0.0  ;;  %v18227_v28 = vld [vmem:[#allocation247_spill] sm:$0xff]  ;;  %v2879_v54 = vmul.f32 %v18199_v15, %v2664_v31  ;;  %v2764_v48 = vmax.f32 %v2572_v4, 0.0 }
 0x411   :  { %v9263_v27 = vunpack.i.h.bf16 %v9261_v45  ;;  %v9262_v59 = vunpack.i.l.bf16 %v9261_v45  ;;  %v2899_v49 = vmul.f32 %v18199_v15, %v2684_v17  ;;  %v2975_v52 = vmul.f32 %v18199_v15, %v2760_v51 }
 0x412   :  { %v14857_v39 = vpack.c.bf16 %v4006_v55, %v4004_v56  ;;  %v18231_v56 = vld [vmem:[#allocation126_spill] sm:$0xff]  ;;  %v18232_v55 = vld [vmem:[#allocation156_spill] sm:$0xff]  ;;  %v2895_v11 = vmul.f32 %v18199_v15, %v2680_v50  ;;  %v3094_v2 = vadd.f32 %v18205_v23, %v2879_v54  ;;  %v2979_v4 = vmul.f32 %v18199_v15, %v2764_v48 }
 0x413   :  { %v3859_v26 = vsel %vm3470_vm2, %v9262_v59, %v9242_v24  ;;  %v3861_v30 = vsel %vm3470_vm2, %v9263_v27, %v9257_v22  ;;  %v2504_v24 = vadd.f32 %v18189_v53, %v18227_v28  ;;  %v18229_v22 = vld [vmem:[#allocation326_spill] sm:$0xff]  ;;  %v18233_v45 = vmax.f32 %v18231_v56, %v18232_v55  ;;  %v18234_v27 = vld [vmem:[#allocation255_spill] sm:$0xff]  ;;  %v18237_v28 = vld [vmem:[#allocation148_spill] sm:$0xff] }
 0x414   :  { %18223 = vst [vmem:[#allocation169_spill] sm:$0xff] %v14857_v39  ;;  %v3955_v9 = vmax.f32 %v3214_v6, %v3859_v26  ;;  %v3957_v19 = vmax.f32 %v3218_v61, %v3861_v30  ;;  %8622 = vmatprep.mubr.msk.bf16.mxu0 %vm4360_vm3, %v14857_v39  ;;  %8632 = vmatprep.mubr.msk.bf16.mxu1 %vm4360_vm3, %v14857_v39  ;;  %v2636_v6 = vmax.f32 %v2444_v41, 0.0  ;;  %v14893_v30 = vpop.permute.xlu0 %9245  ;;  %v18239_v56 = vld [vmem:[#allocation328_spill] sm:$0xff] }
 0x415   :  { %v18230_v46 = vmax.f32 %v18228_v62, %v18229_v22  ;;  %v2508_v59 = vadd.f32 %v18189_v53, %v18234_v27  ;;  %v2883_v61 = vmul.f32 %v18199_v15, %v2668_v32  ;;  %v2696_v26 = vmax.f32 %v2504_v24, 0.0  ;;  %v18238_v62 = vld [vmem:[#allocation319_spill] sm:$0xff] }
 0x416   :  { %v4005_v0 = vmax.f32 %v18233_v45, %v3957_v19  ;;  %v14896_v31 = vmul.f32 %v18199_v15, %v2636_v6  ;;  %v9276_v32 = vpop.permute.xlu1 %9275  ;;  %v14904_v17 = vadd.f32 %v18205_v23, %v2895_v11  ;;  %v2608_v24 = vadd.f32 %v18189_v53, %v18237_v28  ;;  %v18240_v45 = vld [vmem:[#allocation160_spill] sm:$0xff] }
 0x417   :  { %v4003_v1 = vmax.f32 %v18230_v46, %v3955_v9  ;;  %v2700_v41 = vmax.f32 %v2508_v59, 0.0  ;;  %v18236_v9 = vld [vmem:[#allocation137_spill] sm:$0xff]  ;;  %v3098_v50 = vadd.f32 %v18205_v23, %v2883_v61  ;;  %v2612_v22 = vadd.f32 %v18189_v53, %v18238_v62  ;;  %v18241_v62 = vld [vmem:[#allocation139_spill] sm:$0xff] }
 0x418   :  { %v2584_v19 = vadd.f32 %v18189_v53, %v18236_v9  ;;  %v14911_v46 = vadd.f32 %v18205_v23, %v2899_v49  ;;  %v9153_v55 = vunpack.i.h.bf16 %v18239_v56  ;;  %v3190_v27 = vadd.f32 %v18205_v23, %v2975_v52 }
 0x419   :  { %v14882_v3 = vpack.c.bf16 %v4005_v0, %v4003_v1  ;;  %v14914_v1 = vmul.f32 %v18199_v15, %v2696_v26  ;;  %v9158_v0 = vunpack.i.h.bf16 %v18240_v45  ;;  %v14919_v10 = vmul.f32 %v18199_v15, %v2700_v41 }
 0x41a   :  { %v9278_v59 = vunpack.i.h.bf16 %v9276_v32  ;;  %v9277_v51 = vunpack.i.l.bf16 %v9276_v32  ;;  %v3194_v54 = vadd.f32 %v18205_v23, %v2979_v4  ;;  %v2776_v48 = vmax.f32 %v2584_v19, 0.0 }
 0x41b   :  { %18235 = vst [vmem:[#allocation339_spill] sm:$0xff] %v14882_v3  ;;  %4454 = vmatmul.mubr.bf16.gmra.mxu0 %v14882_v3  ;;  %4581 = vmatmul.mubr.bf16.gmra.mxu1 %v14882_v3  ;;  %v2800_v49 = vmax.f32 %v2608_v24, 0.0  ;;  %v2804_v26 = vmax.f32 %v2612_v22, 0.0  ;;  %v16853_v9 = vunpack.i.l.bf16 %v14816_v38  ;;  %v9247_v28 = vunpack.i.l.bf16 %v14893_v30 }
 0x41c   :  { %v14927_v41 = vadd.f32 %v18189_v53, %v18241_v62  ;;  %v18242_v52 = vunpack.i.l.bf16 %v18239_v56  ;;  %v18243_v34 = vunpack.i.l.bf16 %v18240_v45  ;;  %v9222_v24 = vunpack.i.l.bf16 %v14798_v63  ;;  %v18244_v62 = vld [vmem:[#allocation159_spill] sm:$0xff] }
 0x41d   :  { %v3847_v22 = vsel %vm3470_vm2, %v9277_v51, %v9247_v28 }
 0x41e   :  { %v9266_v6 = vpop.permute.xlu0 %9265  ;;  %v3508_v32 = vsel %vm3470_vm2, %v18242_v52, %v9153_v55  ;;  %v3510_v4 = vsel %vm3470_vm2, %v18243_v34, %v9158_v0  ;;  %v3015_v34 = vmul.f32 %v18199_v15, %v2800_v49  ;;  %v3019_v0 = vmul.f32 %v18199_v15, %v2804_v26 }
 0x41f   :  { %v9268_v61 = vunpack.i.h.bf16 %v9266_v6  ;;  %v9267_v11 = vunpack.i.l.bf16 %v9266_v6  ;;  %v3849_v6 = vsel %vm3470_vm2, %v9278_v59, %v16853_v9  ;;  %v3606_v51 = vmax.f32 %v18246_v25, %v3510_v4  ;;  %v18248_v9 = vld [vmem:[#allocation329_spill] sm:$0xff] }
 0x420   :  { %v3943_v3 = vmax.f32 %v3190_v27, %v3847_v22  ;;  %v18247_v59 = vunpack.i.l.bf16 %v14631_v58  ;;  %v14954_v26 = vadd.f32 %v18189_v53, %v18249_v33  ;;  %v2991_v25 = vmul.f32 %v18199_v15, %v2776_v48 }
 0x421   :  { %v3868_v19 = vsel %vm3470_vm2, %v9267_v11, %v9268_v61  ;;  %v9286_v35 = vpop.permute.xlu1 %9285  ;;  %v18245_v61 = vld [vmem:[#allocation276_spill] sm:$0xff]  ;;  %v9248_v27 = vunpack.i.h.bf16 %v14893_v30  ;;  %v3230_v48 = vadd.f32 %v18205_v23, %v3015_v34  ;;  %v14975_v34 = vadd.f32 %v18205_v23, %v14914_v1 }
 0x422   :  { %v3964_v21 = vmax.f32 %v18244_v62, %v3868_v19  ;;  %v9271_v56 = vpop.permute.xlu0 %9270  ;;  %v9288_v20 = vunpack.i.h.bf16 %v9286_v35  ;;  %v9287_v55 = vunpack.i.l.bf16 %v9286_v35  ;;  %v3604_v60 = vmax.f32 %v18245_v61, %v3508_v32  ;;  %v18251_v1 = vld [vmem:[#allocation200_spill] sm:$0xff] }
 0x423   :  { %v9273_v52 = vunpack.i.h.bf16 %v9271_v56  ;;  %v9272_v45 = vunpack.i.l.bf16 %v9271_v56  ;;  %v3945_v35 = vmax.f32 %v3194_v54, %v3849_v6 }
 0x424   :  { %v3870_v39 = vsel %vm3470_vm2, %v9287_v55, %v9288_v20  ;;  %v4012_v20 = vmax.f32 %v3604_v60, %v3964_v21 }
 0x425   :  { %v3489_v19 = vsel %vm3470_vm2, %v9273_v52, %v18247_v59  ;;  %v3487_v62 = vsel %vm3470_vm2, %v9272_v45, %v9222_v24  ;;  %v3966_v56 = vmax.f32 %v18248_v9, %v3870_v39  ;;  %v2780_v39 = vmax.f32 %v14927_v41, 0.0 }
 0x426   :  { %v3585_v43 = vmax.f32 %v3098_v50, %v3489_v19  ;;  %v3583_v49 = vmax.f32 %v3094_v2, %v3487_v62  ;;  %v3234_v2 = vadd.f32 %v18205_v23, %v3019_v0  ;;  %v9223_v50 = vunpack.i.h.bf16 %v14798_v63 }
 0x427   :  { %v9291_v32 = vpop.permute.xlu1 %9290  ;;  %v4014_v58 = vmax.f32 %v3606_v51, %v3966_v56  ;;  %v9253_v41 = vunpack.i.h.bf16 %v14816_v38  ;;  %v3848_v51 = vsel %vm3470_vm2, %v9247_v28, %v9248_v27  ;;  %v2712_v19 = vmax.f32 %v14954_v26, 0.0 }
 0x428   :  { %v3993_v4 = vmax.f32 %v3585_v43, %v3945_v35  ;;  %v3991_v22 = vmax.f32 %v3583_v49, %v3943_v3  ;;  %v9293_v52 = vunpack.i.h.bf16 %v9291_v32  ;;  %v14958_v45 = vpop.permute.xlu0 %9280  ;;  %v9292_v33 = vunpack.i.l.bf16 %v9291_v32  ;;  %v18250_v3 = vld [vmem:[#allocation203_spill] sm:$0xff]  ;;  %v18252_v35 = vld [vmem:[#allocation161_spill] sm:$0xff] }
 0x429   :  { %v1936_v54 = vpop.f32.mrf.mxu0  ;;  %v14964_v9 = vpack.c.bf16 %v4014_v58, %v4012_v20  ;;  %v2600_v30 = vadd.f32 %v18189_v53, %v18250_v3  ;;  %v3488_v62 = vsel %vm3470_vm2, %v9222_v24, %v9223_v50  ;;  %v18253_v56 = vmax.f32 %v18251_v1, %v18252_v35  ;;  %v18254_v20 = vld [vmem:[#allocation101_spill] sm:$0xff]  ;;  %v18258_v50 = vld [vmem:[#allocation315_spill] sm:$0xff] }
 0x42a   :  { %v14966_v21 = vpack.c.bf16 %v3993_v4, %v3991_v22  ;;  %v3869_v60 = vsel %vm3470_vm2, %v9293_v52, %v9287_v55  ;;  %v2221_v43 = vpop.f32.mrf.mxu1  ;;  %v3867_v6 = vsel %vm3470_vm2, %v9292_v33, %v9267_v11  ;;  %v14984_v11 = vadd.f32 %v18205_v23, %v14919_v10  ;;  %v18255_v10 = vld [vmem:[#allocation24_spill] sm:$0xff]  ;;  %v18256_v22 = vld [vmem:[#allocation331_spill] sm:$0xff] }
 0x42b   :  { %v3965_v0 = vmax.f32 %v3234_v2, %v3869_v60  ;;  %v9296_v63 = vpop.permute.xlu1 %9295  ;;  %v1937_v61 = vpop.f32.mrf.mxu0  ;;  %v3963_v59 = vmax.f32 %v3230_v48, %v3867_v6  ;;  %8623 = vmatprep.mubr.msk.bf16.mxu0 %vm4360_vm3, %v14964_v9  ;;  %8633 = vmatprep.mubr.msk.bf16.mxu1 %vm4360_vm3, %v14964_v9  ;;  %v14993_v32 = vadd.f32 %v18189_v53, %v18254_v20  ;;  %v2792_v24 = vmax.f32 %v2600_v30, 0.0  ;;  %v18260_v43 = vld [vmem:[#allocation324_spill] sm:$0xff] }
 0x42c   :  { %v2222_v55 = vpop.f32.mrf.mxu1  ;;  %v9301_v49 = vpop.permute.xlu0 %9300  ;;  %v3206_v58 = vadd.f32 %v18205_v23, %v2991_v25  ;;  %v2995_v4 = vmul.f32 %v18199_v15, %v2780_v39  ;;  %v18257_v52 = vmax.f32 %v18255_v10, %v18256_v22  ;;  %v2604_v54 = vadd.f32 %v18189_v53, %v18258_v50  ;;  %v18261_v25 = vld [vmem:[#allocation327_spill] sm:$0xff] }
 0x42d   :  { %v4013_v28 = vmax.f32 %v18253_v56, %v3965_v0  ;;  %v1938_v27 = vpop.f32.mrf.mxu0  ;;  %v18259_v48 = vunpack.i.l.bf16 %v14816_v38  ;;  %v3944_v3 = vmax.f32 %v18260_v43, %v3848_v51  ;;  %v3584_v61 = vmax.f32 %v18261_v25, %v3488_v62  ;;  %v18262_v10 = vld [vmem:[#allocation155_spill] sm:$0xff] }
 0x42e   :  { %v4011_v2 = vmax.f32 %v18257_v52, %v3963_v59  ;;  %v2223_v33 = vpop.f32.mrf.mxu1  ;;  %v9298_v35 = vunpack.i.h.bf16 %v9296_v63  ;;  %v9297_v30 = vunpack.i.l.bf16 %v9296_v63  ;;  %v9303_v56 = vunpack.i.h.bf16 %v9301_v49  ;;  %v18264_v25 = vld [vmem:[#allocation163_spill] sm:$0xff] }
 0x42f   :  { %v3850_v60 = vsel %vm3470_vm2, %v18259_v48, %v9253_v41  ;;  %v9306_v6 = vpop.permute.xlu1 %9305  ;;  %v1939_v0 = vpop.f32.mrf.mxu0  ;;  %v9302_v27 = vunpack.i.l.bf16 %v9301_v49  ;;  %v9282_v41 = vunpack.i.l.bf16 %v14958_v45  ;;  %v3210_v62 = vadd.f32 %v18205_v23, %v2995_v4 }
 0x430   :  { %v15007_v39 = vpack.c.bf16 %v4013_v28, %v4011_v2  ;;  %v9308_v55 = vunpack.i.h.bf16 %v9306_v6  ;;  %v9307_v1 = vunpack.i.l.bf16 %v9306_v6  ;;  %v2224_v59 = vpop.f32.mrf.mxu1  ;;  %v9311_v20 = vpop.permute.xlu0 %9310  ;;  %v3946_v38 = vmax.f32 %v18262_v10, %v3850_v60 }
 0x431   :  { %v9313_v22 = vunpack.i.h.bf16 %v9311_v20  ;;  %v9312_v51 = vunpack.i.l.bf16 %v9311_v20  ;;  %v3992_v28 = vmax.f32 %v3584_v61, %v3944_v3  ;;  %v9283_v52 = vunpack.i.h.bf16 %v14958_v45 }
 0x432   :  { %4464 = vmatmul.mubr.bf16.gmra.mxu0 %v15007_v39  ;;  %4589 = vmatmul.mubr.bf16.gmra.mxu1 %v15007_v39  ;;  %v3858_v63 = vsel %vm3470_vm2, %v9307_v1, %v9308_v55  ;;  %v3007_v4 = vmul.f32 %v18199_v15, %v2792_v24  ;;  %v2796_v60 = vmax.f32 %v2604_v54, 0.0  ;;  %v3498_v45 = vsel %vm3470_vm2, %v9297_v30, %v9298_v35 }
 0x433   :  { %8624 = vmatprep.mubr.msk.bf16.mxu0 %vm4360_vm3, %v14514_v37  ;;  %8634 = vmatprep.mubr.msk.bf16.mxu1 %vm4360_vm3, %v14514_v37  ;;  %v9316_v49 = vpop.permute.xlu1 %9315  ;;  %v3497_v2 = vsel %vm3470_vm2, %v9313_v22, %v9297_v30  ;;  %v3495_v33 = vsel %vm3470_vm2, %v9312_v51, %v9282_v41  ;;  %v3856_v43 = vsel %vm3470_vm2, %v9302_v27, %v9303_v56  ;;  %v18265_v22 = vld [vmem:[#allocation330_spill] sm:$0xff] }
 0x434   :  { %v9318_v50 = vunpack.i.h.bf16 %v9316_v49  ;;  %v9317_v48 = vunpack.i.l.bf16 %v9316_v49  ;;  %v9321_v3 = vpop.permute.xlu0 %9320  ;;  %v18263_v6 = vmax.f32 %v14121_v14, %v14658_v8  ;;  %v3954_v61 = vmax.f32 %v18264_v25, %v3858_v63  ;;  %v18266_v8 = vld [vmem:[#allocation332_spill] sm:$0xff] }
 0x435   :  { %v3593_v20 = vmax.f32 %v14911_v46, %v3497_v2  ;;  %v3591_v24 = vmax.f32 %v14904_v17, %v3495_v33  ;;  %v3496_v56 = vsel %vm3470_vm2, %v9282_v41, %v9283_v52  ;;  %v3594_v14 = vmax.f32 %v18265_v22, %v3498_v45 }
 0x436   :  { %v3994_v0 = vmax.f32 %v18263_v6, %v3946_v38  ;;  %v3855_v55 = vsel %vm3470_vm2, %v9317_v48, %v9302_v27  ;;  %v3857_v59 = vsel %vm3470_vm2, %v9318_v50, %v9307_v1  ;;  %v3952_v38 = vmax.f32 %v18266_v8, %v3856_v43 }
 0x437   :  { %v3951_v54 = vmax.f32 %v3206_v58, %v3855_v55  ;;  %v3953_v10 = vmax.f32 %v3210_v62, %v3857_v59  ;;  %v9326_v35 = vpop.permute.xlu1 %9325  ;;  %v15041_v17 = vmul.f32 %v18199_v15, %v2712_v19  ;;  %v3011_v46 = vmul.f32 %v18199_v15, %v2796_v60  ;;  %v18268_v19 = vld [vmem:[#allocation108_spill] sm:$0xff] }
 0x438   :  { %v15033_v30 = vpack.c.bf16 %v3994_v0, %v3992_v28  ;;  %v9328_v27 = vunpack.i.h.bf16 %v9326_v35  ;;  %v9327_v49 = vunpack.i.l.bf16 %v9326_v35  ;;  %v9331_v1 = vpop.permute.xlu0 %9330  ;;  %v2716_v41 = vmax.f32 %v14993_v32, 0.0  ;;  %v18267_v28 = vld [vmem:[#allocation162_spill] sm:$0xff] }
 0x439   :  { %v3999_v51 = vmax.f32 %v3591_v24, %v3951_v54  ;;  %v4001_v63 = vmax.f32 %v3593_v20, %v3953_v10  ;;  %v9333_v58 = vunpack.i.h.bf16 %v9331_v1  ;;  %v9332_v62 = vunpack.i.l.bf16 %v9331_v1  ;;  %v18269_v54 = vld [vmem:[#allocation151_spill] sm:$0xff]  ;;  %v18272_v1 = vld [vmem:[#allocation165_spill] sm:$0xff] }
 0x43a   :  { %4474 = vmatmul.mubr.bf16.gmra.mxu0 %v14598_v40  ;;  %4597 = vmatmul.mubr.bf16.gmra.mxu1 %v14598_v40  ;;  %v3592_v52 = vmax.f32 %v18267_v28, %v3496_v56  ;;  %v4002_v2 = vmax.f32 %v3594_v14, %v3954_v61  ;;  %v2536_v50 = vadd.f32 %v18189_v53, %v18268_v19  ;;  %v9323_v43 = vunpack.i.h.bf16 %v9321_v3 }
 0x43b   :  { %v15048_v33 = vpack.c.bf16 %v4001_v63, %v3999_v51  ;;  %8625 = vmatprep.mubr.msk.bf16.mxu0 %vm4360_vm3, %v15033_v30  ;;  %8635 = vmatprep.mubr.msk.bf16.mxu1 %vm4360_vm3, %v15033_v30  ;;  %v9336_v26 = vpop.permute.xlu1 %9335  ;;  %v3222_v48 = vadd.f32 %v18205_v23, %v3007_v4  ;;  %v9322_v6 = vunpack.i.l.bf16 %v9321_v3  ;;  %v3506_v0 = vsel %vm3470_vm2, %v9327_v49, %v9328_v27  ;;  %v18270_v4 = vld [vmem:[#allocation325_spill] sm:$0xff] }
 0x43c   :  { %v9338_v60 = vunpack.i.h.bf16 %v9336_v26  ;;  %v9337_v45 = vunpack.i.l.bf16 %v9336_v26  ;;  %v4000_v32 = vmax.f32 %v3592_v52, %v3952_v38  ;;  %v9341_v25 = vpop.permute.xlu0 %9340  ;;  %v3864_v61 = vsel %vm3470_vm2, %v9332_v62, %v9333_v58  ;;  %v18271_v63 = vld [vmem:[#allocation333_spill] sm:$0xff]  ;;  %v18273_v58 = vld [vmem:[#allocation334_spill] sm:$0xff] }
 0x43d   :  { %v9343_v59 = vunpack.i.h.bf16 %v9341_v25  ;;  %v9342_v20 = vunpack.i.l.bf16 %v9341_v25  ;;  %v3226_v24 = vadd.f32 %v18205_v23, %v3011_v46  ;;  %v2616_v10 = vadd.f32 %v18189_v53, %v18269_v54  ;;  %v18275_v25 = vld [vmem:[#allocation164_spill] sm:$0xff] }
 0x43e   :  { %v3866_v55 = vsel %vm3470_vm2, %v9337_v45, %v9338_v60  ;;  %v2620_v35 = vadd.f32 %v18189_v53, %v18270_v4  ;;  %v15065_v56 = vpack.c.bf16 %v4002_v2, %v4000_v32  ;;  %v3504_v51 = vsel %vm3470_vm2, %v9322_v6, %v9323_v43 }
 0x43f   :  { %v9346_v3 = vpop.permute.xlu1 %9345  ;;  %v3505_v22 = vsel %vm3470_vm2, %v9343_v59, %v9327_v49  ;;  %v3503_v14 = vsel %vm3470_vm2, %v9342_v20, %v9322_v6  ;;  %v3602_v27 = vmax.f32 %v18271_v63, %v3506_v0  ;;  %v3960_v46 = vmax.f32 %v18272_v1, %v3864_v61 }
 0x440   :  { %v9348_v8 = vunpack.i.h.bf16 %v9346_v3  ;;  %v9347_v38 = vunpack.i.l.bf16 %v9346_v3  ;;  %v3962_v28 = vmax.f32 %v18273_v58, %v3866_v55  ;;  %v15073_v52 = vpop.permute.xlu0 %9350  ;;  %v2728_v26 = vmax.f32 %v2536_v50, 0.0 }
 0x441   :  { %v3601_v2 = vmax.f32 %v14984_v11, %v3505_v22  ;;  %v3599_v60 = vmax.f32 %v14975_v34, %v3503_v14  ;;  %v2931_v11 = vmul.f32 %v18199_v15, %v2716_v41  ;;  %v2808_v6 = vmax.f32 %v2616_v10, 0.0 }
 0x442   :  { %v3863_v19 = vsel %vm3470_vm2, %v9347_v38, %v9332_v62  ;;  %v3865_v49 = vsel %vm3470_vm2, %v9348_v8, %v9337_v45  ;;  %4484 = vmatmul.mubr.bf16.gmra.mxu0 %v14966_v21  ;;  %4605 = vmatmul.mubr.bf16.gmra.mxu1 %v14966_v21  ;;  %v18274_v62 = vld [vmem:[#allocation112_spill] sm:$0xff]  ;;  %v2812_v0 = vmax.f32 %v2620_v35, 0.0  ;;  %v3600_v61 = vmax.f32 %v18275_v25, %v3504_v51 }
 0x443   :  { %v3959_v32 = vmax.f32 %v3222_v48, %v3863_v19  ;;  %v3961_v43 = vmax.f32 %v3226_v24, %v3865_v49  ;;  %8626 = vmatprep.mubr.msk.bf16.mxu0 %vm4360_vm3, %v15065_v56  ;;  %8636 = vmatprep.mubr.msk.bf16.mxu1 %vm4360_vm3, %v15065_v56  ;;  %v9356_v50 = vpop.permute.xlu1 %9355  ;;  %v2540_v45 = vadd.f32 %v18189_v53, %v18274_v62  ;;  %v9353_v35 = vunpack.i.h.bf16 %v15073_v52 }
 0x444   :  { %v4010_v55 = vmax.f32 %v3602_v27, %v3962_v28  ;;  %v9361_v59 = vpop.permute.xlu0 %9360  ;;  %v15091_v20 = vadd.f32 %v18205_v23, %v14890_v44  ;;  %v15095_v24 = vadd.f32 %v18205_v23, %v14896_v31  ;;  %v15099_v41 = vadd.f32 %v18205_v23, %v15041_v17  ;;  %v18276_v31 = vld [vmem:[#allocation271_spill] sm:$0xff] }
 0x445   :  { %v4007_v34 = vmax.f32 %v3599_v60, %v3959_v32  ;;  %v4009_v48 = vmax.f32 %v3601_v2, %v3961_v43  ;;  %v2943_v54 = vmul.f32 %v18199_v15, %v2728_v26  ;;  %v4008_v10 = vmax.f32 %v3600_v61, %v3960_v46  ;;  %v18277_v26 = vld [vmem:[#allocation277_spill] sm:$0xff]  ;;  %v18278_v61 = vld [vmem:[#allocation32_spill] sm:$0xff] }
 0x446   :  { %v9352_v3 = vunpack.i.l.bf16 %v15073_v52  ;;  %v15109_v44 = vadd.f32 %v18205_v23, %v2931_v11  ;;  %v15113_v14 = vadd.f32 %v18189_v53, %v18276_v31  ;;  %v9358_v17 = vunpack.i.h.bf16 %v9356_v50 }
 0x447   :  { %v15102_v4 = vpack.c.bf16 %v4009_v48, %v4007_v34  ;;  %v9357_v8 = vunpack.i.l.bf16 %v9356_v50  ;;  %v2732_v38 = vmax.f32 %v2540_v45, 0.0  ;;  %v3023_v51 = vmul.f32 %v18199_v15, %v2808_v6 }
 0x448   :  { %v15106_v22 = vpop.permute.xlu1 %9375  ;;  %v3027_v63 = vmul.f32 %v18199_v15, %v2812_v0  ;;  %v15117_v27 = vpack.c.bf16 %v4010_v55, %v4008_v10  ;;  %v9363_v46 = vunpack.i.h.bf16 %v9361_v59  ;;  %v9362_v58 = vunpack.i.l.bf16 %v9361_v59 }
 0x449   :  { %v15123_v2 = vadd.f32 %v18189_v53, %v18277_v26  ;;  %v15126_v19 = vadd.f32 %v18205_v23, %v2943_v54  ;;  %v3512_v49 = vsel %vm3470_vm2, %v9352_v3, %v9353_v35  ;;  %v3514_v32 = vsel %vm3470_vm2, %v9357_v8, %v9358_v17  ;;  %v18279_v54 = vld [vmem:[#allocation335_spill] sm:$0xff] }
 0x44a   :  { %v9366_v1 = vpop.permute.xlu0 %9365  ;;  %4494 = vmatmul.mubr.bf16.gmra.mxu0 %v15048_v33  ;;  %4613 = vmatmul.mubr.bf16.gmra.mxu1 %v15048_v33  ;;  %v2947_v62 = vmul.f32 %v18199_v15, %v2732_v38  ;;  %v3238_v45 = vadd.f32 %v18205_v23, %v3023_v51  ;;  %v3242_v6 = vadd.f32 %v18205_v23, %v3027_v63  ;;  %v9378_v35 = vunpack.i.h.bf16 %v15106_v22 }
 0x44b   :  { %v9368_v28 = vunpack.i.h.bf16 %v9366_v1  ;;  %v9367_v52 = vunpack.i.l.bf16 %v9366_v1  ;;  %8627 = vmatprep.mubr.msk.bf16.mxu0 %vm4360_vm3, %v15117_v27  ;;  %8637 = vmatprep.mubr.msk.bf16.mxu1 %vm4360_vm3, %v15117_v27  ;;  %v3608_v55 = vmax.f32 %v18278_v61, %v3512_v49  ;;  %v3513_v34 = vsel %vm3470_vm2, %v9363_v46, %v9357_v8 }
 0x44c   :  { %v9386_v60 = vpop.permute.xlu1 %9385  ;;  %v3511_v48 = vsel %vm3470_vm2, %v9362_v58, %v9352_v3  ;;  %v3610_v10 = vmax.f32 %v18279_v54, %v3514_v32  ;;  %v9377_v31 = vunpack.i.l.bf16 %v15106_v22 }
 0x44d   :  { %v3872_v43 = vsel %vm3470_vm2, %v9367_v52, %v9368_v28  ;;  %v9388_v50 = vunpack.i.h.bf16 %v9386_v60  ;;  %v9387_v11 = vunpack.i.l.bf16 %v9386_v60  ;;  %v3609_v28 = vmax.f32 %v15109_v44, %v3513_v34 }
 0x44e   :  { %v3968_v0 = vmax.f32 %v14512_v47, %v3872_v43  ;;  %v9371_v25 = vpop.permute.xlu0 %9370  ;;  %v3607_v8 = vmax.f32 %v15099_v41, %v3511_v48 }
 0x44f   :  { %v3874_v59 = vsel %vm3470_vm2, %v9387_v11, %v9388_v50  ;;  %v9373_v51 = vunpack.i.h.bf16 %v9371_v25  ;;  %v9372_v47 = vunpack.i.l.bf16 %v9371_v25 }
 0x450   :  { %v3970_v17 = vmax.f32 %v14480_v36, %v3874_v59  ;;  %v9391_v38 = vpop.permute.xlu1 %9390  ;;  %v4016_v3 = vmax.f32 %v3608_v55, %v3968_v0  ;;  %v3474_v36 = vsel %vm3470_vm2, %v9377_v31, %v9378_v35 }
 0x451   :  { %v9393_v63 = vunpack.i.h.bf16 %v9391_v38  ;;  %v9392_v1 = vunpack.i.l.bf16 %v9391_v38  ;;  %v3472_v41 = vsel %vm3470_vm2, %v9372_v47, %v9373_v51  ;;  %v3570_v54 = vmax.f32 %v14540_v18, %v3474_v36 }
 0x452   :  { %v4018_v46 = vmax.f32 %v3610_v10, %v3970_v17  ;;  %v9381_v58 = vpop.permute.xlu0 %9380  ;;  %4504 = vmatmul.mubr.bf16.gmra.mxu0 %v15102_v4  ;;  %4621 = vmatmul.mubr.bf16.gmra.mxu1 %v15102_v4  ;;  %v3568_v10 = vmax.f32 %v14556_v7, %v3472_v41 }
 0x453   :  { %v3871_v26 = vsel %vm3470_vm2, %v9392_v1, %v9367_v52  ;;  %v3873_v49 = vsel %vm3470_vm2, %v9393_v63, %v9387_v11  ;;  %v9383_v60 = vunpack.i.h.bf16 %v9381_v58  ;;  %v9382_v22 = vunpack.i.l.bf16 %v9381_v58 }
 0x454   :  { %v3967_v32 = vmax.f32 %v3238_v45, %v3871_v26  ;;  %v3969_v43 = vmax.f32 %v3242_v6, %v3873_v49  ;;  %v15154_v50 = vpack.c.bf16 %v4018_v46, %v4016_v3  ;;  %v3162_v45 = vadd.f32 %v18205_v23, %v2947_v62  ;;  %v18280_v62 = vld [vmem:[#allocation157_spill] sm:$0xff] }
 0x455   :  { %v3832_v0 = vsel %vm3470_vm2, %v9382_v22, %v9383_v60 }
 0x456   :  { %v9396_v44 = vpop.permute.xlu1 %9395  ;;  %v4015_v11 = vmax.f32 %v3607_v8, %v3967_v32  ;;  %v4017_v61 = vmax.f32 %v3609_v28, %v3969_v43  ;;  %v3928_v55 = vmax.f32 %v14586_v57, %v3832_v0  ;;  %v9401_v34 = vpop.permute.xlu0 %9400  ;;  %8628 = vmatprep.mubr.msk.bf16.mxu0 %vm4360_vm3, %v15154_v50  ;;  %8638 = vmatprep.mubr.msk.bf16.mxu1 %vm4360_vm3, %v15154_v50  ;;  %v18281_v8 = vld [vmem:[#allocation158_spill] sm:$0xff] }
 0x457   :  { %v9398_v52 = vunpack.i.h.bf16 %v9396_v44  ;;  %v9397_v25 = vunpack.i.l.bf16 %v9396_v44  ;;  %v9403_v48 = vunpack.i.h.bf16 %v9401_v34  ;;  %v9402_v59 = vunpack.i.l.bf16 %v9401_v34 }
 0x458   :  { %v15168_v17 = vpack.c.bf16 %v4017_v61, %v4015_v11  ;;  %v2624_v28 = vadd.f32 %v18189_v53, %v18280_v62  ;;  %v2628_v3 = vadd.f32 %v18189_v53, %v18281_v8  ;;  %v3976_v18 = vmax.f32 %v3568_v10, %v3928_v55  ;;  %v9713_v55 = vld [vmem:[%s16744_s4 + $0x304] ss:$12 sps:$4 sm:$0xff]  }
 0x459   :  { %v3834_v6 = vsel %vm3470_vm2, %v9397_v25, %v9398_v52  ;;  %v3473_v38 = vsel %vm3470_vm2, %v9403_v48, %v9377_v31  ;;  %v3471_v51 = vsel %vm3470_vm2, %v9402_v59, %v9372_v47 }
 0x45a   :  { %v3930_v35 = vmax.f32 %v14565_v42, %v3834_v6  ;;  %v9406_v57 = vpop.permute.xlu1 %9405  ;;  %v15176_v7 = vpop.permute.xlu0 %9410  ;;  %v2720_v42 = vmax.f32 %v15113_v14, 0.0  ;;  %v3569_v58 = vmax.f32 %v15095_v24, %v3473_v38  ;;  %4514 = vmatmul.mubr.bf16.gmra.mxu0 %v15168_v17  ;;  %4629 = vmatmul.mubr.bf16.gmra.mxu1 %v15168_v17  ;;  %v3567_v26 = vmax.f32 %v15091_v20, %v3471_v51 }
 0x45b   :  { %v9408_v63 = vunpack.i.h.bf16 %v9406_v57  ;;  %v9407_v1 = vunpack.i.l.bf16 %v9406_v57  ;;  %v2724_v14 = vmax.f32 %v15123_v2, 0.0  ;;  %v2816_v32 = vmax.f32 %v2624_v28, 0.0  ;;  %v9710_v2 = vld [vmem:[%s16744_s4 + $0x320] ss:$12 sps:$4 sm:$0xff]  }
 0x45c   :  { %v3978_v46 = vmax.f32 %v3570_v54, %v3930_v35  ;;  %v2820_v24 = vmax.f32 %v2628_v3, 0.0  ;;  %v2935_v20 = vmul.f32 %v18199_v15, %v2720_v42  ;;  %v9412_v34 = vunpack.i.l.bf16 %v15176_v7  ;;  %v9717_v3 = vld [vmem:[%s16744_s4 + $0x2ec] ss:$12 sps:$4 sm:$0xff]  }
 0x45d   :  { %v3833_v31 = vsel %vm3470_vm2, %v9408_v63, %v9397_v25  ;;  %v3831_v47 = vsel %vm3470_vm2, %v9407_v1, %v9382_v22  ;;  %v2939_v52 = vmul.f32 %v18199_v15, %v2724_v14  ;;  %v3031_v25 = vmul.f32 %v18199_v15, %v2816_v32  ;;  %v9711_v63 = vld [vmem:[%s16744_s4 + $0x300] ss:$12 sps:$4 sm:$0xff]   ;;  %v9714_v1 = vld [vmem:[%s16744_s4 + $0x308] ss:$12 sps:$4 sm:$0xff]   ;;  %v9719_v14 = vld [vmem:[%s16744_s4 + $0x2d0] ss:$12 sps:$4 sm:$0xff]  }
 0x45e   :  { %v3929_v49 = vmax.f32 %v3162_v45, %v3833_v31  ;;  %v3927_v53 = vmax.f32 %v15126_v19, %v3831_v47  ;;  %v15186_v60 = vpop.permute.xlu1 %9415  ;;  %v4024_v36 = vpack.c.bf16 %v3978_v46, %v3976_v18  ;;  %v15189_v41 = vpop.permute.xlu0 %9420  ;;  %v9707_v19 = vld [vmem:[%s16744_s4 + $0x318] ss:$12 sps:$4 sm:$0xff]   ;;  %v3035_v11 = vmul.f32 %v18199_v15, %v2820_v24  ;;  %v9725_v24 = vld [vmem:[%s16744_s4 + $0x2bc] ss:$12 sps:$4 sm:$0xff]  }
 0x45f   :  { %v9417_v45 = vunpack.i.l.bf16 %v15186_v60  ;;  %v3150_v59 = vadd.f32 %v18205_v23, %v2935_v20  ;;  %v9422_v54 = vunpack.i.l.bf16 %v15189_v41  ;;  %v3154_v62 = vadd.f32 %v18205_v23, %v2939_v52  ;;  %v9722_v32 = vld [vmem:[%s16744_s4 + $0x2d8] ss:$12 sps:$4 sm:$0xff]   ;;  %v9731_v52 = vld [vmem:[%s16744_s4 + $0x288] ss:$12 sps:$4 sm:$0xff]  }
 0x460   :  { %v3975_v43 = vmax.f32 %v3567_v26, %v3927_v53  ;;  %v3977_v44 = vmax.f32 %v3569_v58, %v3929_v49  ;;  %8678 = vmatprep.mubr.msk.bf16.mxu0 %vm4360_vm3, %v4024_v36  ;;  %8688 = vmatprep.mubr.msk.bf16.mxu1 %vm4360_vm3, %v4024_v36  ;;  %v3246_v28 = vadd.f32 %v18205_v23, %v3031_v25  ;;  %v9718_v26 = vld [vmem:[%s16744_s4 + $0x2f0] ss:$12 sps:$4 sm:$0xff]   ;;  %v9721_v36 = vld [vmem:[%s16744_s4 + $0x2d4] ss:$12 sps:$4 sm:$0xff]  }
 0x461   :  { %v3250_v8 = vadd.f32 %v18205_v23, %v3035_v11  ;;  %v9715_v23 = vld [vmem:[%s16744_s4 + $0x2e8] ss:$12 sps:$4 sm:$0xff]   ;;  %v9729_v20 = vld [vmem:[%s16744_s4 + $0x2a4] ss:$12 sps:$4 sm:$0xff]  }
 0x462   :  { %v4023_v22 = vpack.c.bf16 %v3977_v44, %v3975_v43  ;;  %v15194_v0 = vpop.permute.xlu1 %9430  ;;  %v9426_v61 = vpop.permute.xlu0 %9425  ;;  %v9723_v43 = vld [vmem:[%s16744_s4 + $0x2b8] ss:$12 sps:$4 sm:$0xff]   ;;  %v9726_v44 = vld [vmem:[%s16744_s4 + $0x2c0] ss:$12 sps:$4 sm:$0xff]   ;;  %v9734_v25 = vld [vmem:[%s16744_s4 + $0x290] ss:$12 sps:$4 sm:$0xff]  }
 0x463   :  { %v9428_v6 = vunpack.i.h.bf16 %v9426_v61  ;;  %v9427_v48 = vunpack.i.l.bf16 %v9426_v61  ;;  %v9432_v10 = vunpack.i.l.bf16 %v15194_v0  ;;  %v9737_v11 = vld [vmem:[%s16744_s4 + $0x274] ss:$12 sps:$4 sm:$0xff]  }
 0x464   :  { %4881 = vmatmul.mubr.bf16.vlgmr.msra.gmra.mxu0 %v4023_v22  ;;  %5014 = vmatmul.mubr.bf16.vlgmr.msra.gmra.mxu1 %v4023_v22  ;;  %v9727_v22 = vld [vmem:[%s16744_s4 + $0x2a0] ss:$12 sps:$4 sm:$0xff]  }
 0x465   :  { %8679 = vmatprep.mubr.msk.bf16.mxu0 %vm4360_vm3, %v14514_v37  ;;  %8689 = vmatprep.mubr.msk.bf16.mxu1 %vm4360_vm3, %v14514_v37  ;;  %v3517_v35 = vsel %vm3470_vm2, %v9428_v6, %v9417_v45  ;;  %v3515_v57 = vsel %vm3470_vm2, %v9427_v48, %v9412_v34  ;;  %v9738_v6 = vld [vmem:[%s16744_s4 + $0x278] ss:$12 sps:$4 sm:$0xff]   ;;  %v9741_v48 = vld [vmem:[%s16744_s4 + $0x394] ss:$12 sps:$4 sm:$0xff]  }
 0x466   :  { %v9436_v15 = vpop.permute.xlu1 %9435  ;;  %5359 = vmatpush1.bf16.msra.mxu0 %v9707_v19  ;;  %5492 = vmatpush1.bf16.msra.mxu1 %v9710_v2  ;;  %v3613_v42 = vmax.f32 %v3154_v62, %v3517_v35  ;;  %v3611_v58 = vmax.f32 %v3150_v59, %v3515_v57  ;;  %v9730_v19 = vld [vmem:[%s16744_s4 + $0x2a8] ss:$12 sps:$4 sm:$0xff]   ;;  %v9733_v2 = vld [vmem:[%s16744_s4 + $0x28c] ss:$12 sps:$4 sm:$0xff]   ;;  %v9739_v59 = vld [vmem:[%s16744_s4 + $0x390] ss:$12 sps:$4 sm:$0xff]  }
 0x467   :  { %v9438_v38 = vunpack.i.h.bf16 %v9436_v15  ;;  %v9437_v51 = vunpack.i.l.bf16 %v9436_v15  ;;  %5360 = vmatprep.subr.bf16.mxu0 %v9713_v55  ;;  %5493 = vmatprep.subr.bf16.mxu1 %v18161_v29  ;;  %v9735_v55 = vld [vmem:[%s16744_s4 + $0x270] ss:$12 sps:$4 sm:$0xff]   ;;  %v9742_v15 = vld [vmem:[%s16744_s4 + $0x398] ss:$12 sps:$4 sm:$0xff]   ;;  %v9751_v62 = vld [vmem:[%s16744_s4 + $0x348] ss:$12 sps:$4 sm:$0xff]  }
 0x468   :  { %v9745_v35 = vld [vmem:[%s16744_s4 + $0x37c] ss:$12 sps:$4 sm:$0xff]   ;;  %v9743_v57 = vld [vmem:[%s16744_s4 + $0x378] ss:$12 sps:$4 sm:$0xff]  }
 0x469   :  { %v3875_v18 = vsel %vm3470_vm2, %v9437_v51, %v9422_v54  ;;  %v3877_v46 = vsel %vm3470_vm2, %v9438_v38, %v9432_v10  ;;  %v9746_v38 = vld [vmem:[%s16744_s4 + $0x380] ss:$12 sps:$4 sm:$0xff]   ;;  %v9749_v51 = vld [vmem:[%s16744_s4 + $0x364] ss:$12 sps:$4 sm:$0xff]  }
 0x46a   :  { %v3971_v31 = vmax.f32 %v3246_v28, %v3875_v18  ;;  %v3973_v47 = vmax.f32 %v3250_v8, %v3877_v46  ;;  %5361 = vmatpush1.bf16.msra.mxu0 %v9711_v63  ;;  %5494 = vmatpush1.bf16.msra.mxu1 %v9714_v1  ;;  %v9750_v63 = vld [vmem:[%s16744_s4 + $0x368] ss:$12 sps:$4 sm:$0xff]   ;;  %v9753_v1 = vld [vmem:[%s16744_s4 + $0x34c] ss:$12 sps:$4 sm:$0xff]   ;;  %v9754_v28 = vld [vmem:[%s16744_s4 + $0x350] ss:$12 sps:$4 sm:$0xff]  }
 0x46b   :  { %5362 = vmatprep.subr.bf16.mxu0 %v9717_v3  ;;  %5495 = vmatprep.subr.bf16.mxu1 %v18161_v29  ;;  %v9755_v8 = vld [vmem:[%s16744_s4 + $0x330] ss:$12 sps:$4 sm:$0xff]   ;;  %v9758_v3 = vld [vmem:[%s16744_s4 + $0x338] ss:$12 sps:$4 sm:$0xff]   ;;  %v18282_v18 = vld [vmem:[#allocation168_spill] sm:$0xff] }
 0x46c   :  { %v4019_v49 = vmax.f32 %v3611_v58, %v3971_v31  ;;  %v4021_v53 = vmax.f32 %v3613_v42, %v3973_v47  ;;  %4891 = vmatmul.mubr.bf16.gmra.mxu0 %v14598_v40  ;;  %5022 = vmatmul.mubr.bf16.gmra.mxu1 %v14598_v40  ;;  %v18283_v58 = vld [vmem:[#allocation338_spill] sm:$0xff]  ;;  %v18284_v31 = vld [vmem:[#allocation169_spill] sm:$0xff] }
 0x46d   :  { %8680 = vmatprep.mubr.msk.bf16.mxu0 %vm4360_vm3, %v15033_v30  ;;  %8690 = vmatprep.mubr.msk.bf16.mxu1 %vm4360_vm3, %v15033_v30 }
 0x46e   :  { %5363 = vmatpush1.bf16.msra.mxu0 %v9715_v23  ;;  %5496 = vmatpush1.bf16.msra.mxu1 %v9718_v26  ;;  %v15306_v61 = vpack.c.bf16 %v4021_v53, %v4019_v49  ;;  %v18285_v26 = vld [vmem:[#allocation339_spill] sm:$0xff] }
 0x46f   :  { %5364 = vmatprep.subr.bf16.mxu0 %v9721_v36  ;;  %5497 = vmatprep.subr.bf16.mxu1 %v18161_v29 }
 0x472   :  { %5365 = vmatpush1.bf16.msra.mxu0 %v9719_v14  ;;  %5498 = vmatpush1.bf16.msra.mxu1 %v9722_v32 }
 0x473   :  { %5366 = vmatprep.subr.bf16.mxu0 %v9725_v24  ;;  %5499 = vmatprep.subr.bf16.mxu1 %v18161_v29 }
 0x474   :  { %4901 = vmatmul.mubr.bf16.gmra.mxu0 %v14966_v21  ;;  %5030 = vmatmul.mubr.bf16.gmra.mxu1 %v14966_v21 }
 0x475   :  { %8681 = vmatprep.mubr.msk.bf16.mxu0 %vm4360_vm3, %v15065_v56  ;;  %8691 = vmatprep.mubr.msk.bf16.mxu1 %vm4360_vm3, %v15065_v56 }
 0x476   :  { %5367 = vmatpush1.bf16.msra.mxu0 %v9723_v43  ;;  %5500 = vmatpush1.bf16.msra.mxu1 %v9726_v44 }
 0x477   :  { %5368 = vmatprep.subr.bf16.mxu0 %v9729_v20  ;;  %5501 = vmatprep.subr.bf16.mxu1 %v18161_v29 }
 0x47a   :  { %5369 = vmatpush1.bf16.msra.mxu0 %v9727_v22  ;;  %5502 = vmatpush1.bf16.msra.mxu1 %v9730_v19 }
 0x47b   :  { %5370 = vmatprep.subr.bf16.mxu0 %v9733_v2  ;;  %5503 = vmatprep.subr.bf16.mxu1 %v18161_v29 }
 0x47c   :  { %4911 = vmatmul.mubr.bf16.gmra.mxu0 %v15048_v33  ;;  %5038 = vmatmul.mubr.bf16.gmra.mxu1 %v15048_v33 }
 0x47d   :  { %8682 = vmatprep.mubr.msk.bf16.mxu0 %vm4360_vm3, %v15117_v27  ;;  %8692 = vmatprep.mubr.msk.bf16.mxu1 %vm4360_vm3, %v15117_v27 }
 0x47e   :  { %5371 = vmatpush1.bf16.msra.mxu0 %v9731_v52  ;;  %5504 = vmatpush1.bf16.msra.mxu1 %v9734_v25  ;;  %v9433_v52 = vunpack.i.h.bf16 %v15194_v0  ;;  %v18287_v0 = vld [vmem:[#allocation166_spill] sm:$0xff] }
 0x47f   :  { %5372 = vmatprep.subr.bf16.mxu0 %v9737_v11  ;;  %5505 = vmatprep.subr.bf16.mxu1 %v18161_v29  ;;  %v9423_v11 = vunpack.i.h.bf16 %v15189_v41 }
 0x482   :  { %5373 = vmatpush1.bf16.msra.mxu0 %v9735_v55  ;;  %5506 = vmatpush1.bf16.msra.mxu1 %v9738_v6  ;;  %v9413_v6 = vunpack.i.h.bf16 %v15176_v7 }
 0x483   :  { %5380 = vmatprep.subr.bf16.mxu0 %v9741_v48  ;;  %5513 = vmatprep.subr.bf16.mxu1 %v18161_v29  ;;  %v3878_v48 = vsel %vm3470_vm2, %v9432_v10, %v9433_v52  ;;  %v18288_v10 = vld [vmem:[#allocation337_spill] sm:$0xff] }
 0x484   :  { %4921 = vmatmul.mubr.bf16.gmra.mxu0 %v15102_v4  ;;  %5046 = vmatmul.mubr.bf16.gmra.mxu1 %v15102_v4 }
 0x485   :  { %8683 = vmatprep.mubr.msk.bf16.mxu0 %vm4360_vm3, %v14457_v16  ;;  %8693 = vmatprep.mubr.msk.bf16.mxu1 %vm4360_vm3, %v14457_v16  ;;  %v9747_v16 = vld [vmem:[%s16744_s4 + $0x360] ss:$12 sps:$4 sm:$0xff]  }
 0x486   :  { %5381 = vmatpush2.bf16.msra.mxu0 %v9739_v59  ;;  %5514 = vmatpush2.bf16.msra.mxu1 %v9742_v15  ;;  %v3876_v15 = vsel %vm3470_vm2, %v9422_v54, %v9423_v11  ;;  %v18289_v54 = vld [vmem:[#allocation336_spill] sm:$0xff] }
 0x487   :  { %5382 = vmatprep.subr.bf16.mxu0 %v9745_v35  ;;  %5515 = vmatprep.subr.bf16.mxu1 %v18161_v29 }
 0x48a   :  { %5383 = vmatpush2.bf16.msra.mxu0 %v9743_v57  ;;  %5516 = vmatpush2.bf16.msra.mxu1 %v9746_v38  ;;  %v18286_v57 = vld [vmem:[#allocation167_spill] sm:$0xff] }
 0x48b   :  { %5384 = vmatprep.subr.bf16.mxu0 %v9749_v51  ;;  %5517 = vmatprep.subr.bf16.mxu1 %v18161_v29  ;;  %v3974_v38 = vmax.f32 %v18286_v57, %v3878_v48  ;;  %v3516_v51 = vsel %vm3470_vm2, %v9412_v34, %v9413_v6 }
 0x48c   :  { %4931 = vmatmul.mubr.bf16.gmra.mxu0 %v14452_v12  ;;  %5054 = vmatmul.mubr.bf16.gmra.mxu1 %v14452_v12  ;;  %v9757_v12 = vld [vmem:[%s16744_s4 + $0x334] ss:$12 sps:$4 sm:$0xff]   ;;  %v3612_v7 = vmax.f32 %v18289_v54, %v3516_v51 }
 0x48d   :  { %8684 = vmatprep.mubr.msk.bf16.mxu0 %vm4360_vm3, %v14588_v13  ;;  %8694 = vmatprep.mubr.msk.bf16.mxu1 %vm4360_vm3, %v14588_v13 }
 0x48e   :  { %5385 = vmatpush2.bf16.msra.mxu0 %v9747_v16  ;;  %5518 = vmatpush2.bf16.msra.mxu1 %v9750_v63 }
 0x48f   :  { %5386 = vmatprep.subr.bf16.mxu0 %v9753_v1  ;;  %5519 = vmatprep.subr.bf16.mxu1 %v18161_v29 }
 0x492   :  { %5387 = vmatpush2.bf16.msra.mxu0 %v9751_v62  ;;  %5520 = vmatpush2.bf16.msra.mxu1 %v9754_v28 }
 0x493   :  { %5388 = vmatprep.subr.bf16.mxu0 %v9757_v12  ;;  %5521 = vmatprep.subr.bf16.mxu1 %v18161_v29 }
 0x494   :  { %4941 = vmatmul.mubr.bf16.gmra.mxu0 %v14636_v5  ;;  %5062 = vmatmul.mubr.bf16.gmra.mxu1 %v14636_v5 }
 0x495   :  { %8685 = vmatprep.mubr.msk.bf16.mxu0 %vm4360_vm3, %v18282_v18  ;;  %8695 = vmatprep.mubr.msk.bf16.mxu1 %vm4360_vm3, %v18282_v18  ;;  %v15387_v46 = vpop.f32.mrf.mxu1  ;;  %v15419_v32 = vpop.f32.mrf.mxu0 }
 0x496   :  { %5389 = vmatpush2.bf16.msra.mxu0 %v9755_v8  ;;  %5522 = vmatpush2.bf16.msra.mxu1 %v9758_v3 }
 0x497   :  { %v4560_v42 = vpop.f32.mrf.mxu1 }
 0x499   :  { %v15395_v47 = vpop.f32.mrf.mxu1 }
 0x49b   :  { %v4563_v23 = vpop.f32.mrf.mxu1 }
 0x49c   :  { %4951 = vmatmul.mubr.bf16.gmra.mxu0 %v18283_v58  ;;  %5070 = vmatmul.mubr.bf16.gmra.mxu1 %v18283_v58 }
 0x49d   :  { %8686 = vmatprep.mubr.msk.bf16.mxu0 %vm4360_vm3, %v18284_v31  ;;  %8696 = vmatprep.mubr.msk.bf16.mxu1 %vm4360_vm3, %v18284_v31 }
 0x4a4   :  { %4961 = vmatmul.mubr.bf16.gmra.mxu0 %v18285_v26  ;;  %5078 = vmatmul.mubr.bf16.gmra.mxu1 %v18285_v26 }
 0x4a5   :  { %8687 = vmatprep.mubr.msk.bf16.mxu0 %vm4360_vm3, %v14964_v9  ;;  %8697 = vmatprep.mubr.msk.bf16.mxu1 %vm4360_vm3, %v14964_v9 }
 0x4ab   :  { %v15403_v49 = vpop.f32.mrf.mxu1 }
 0x4ac   :  { %4971 = vmatmul.mubr.bf16.gmra.mxu0 %v15007_v39  ;;  %5086 = vmatmul.mubr.bf16.gmra.mxu1 %v15007_v39 }
 0x4ad   :  { %v4568_v53 = vpop.f32.mrf.mxu1  ;;  %8789 = vmatprep.mubr.msk.bf16.mxu0 %vm4360_vm3, %v14514_v37  ;;  %8799 = vmatprep.mubr.msk.bf16.mxu1 %vm4360_vm3, %v14514_v37  ;;  %v15427_v37 = vpop.f32.mrf.mxu0 }
 0x4af   :  { %v15411_v36 = vpop.f32.mrf.mxu1  ;;  %v15431_v24 = vpop.f32.mrf.mxu0 }
 0x4b1   :  { %v4571_v14 = vpop.f32.mrf.mxu1 }
 0x4b4   :  { %5391 = vmatmul.mubr.bf16.vlgmr.msra.gmra.mxu0 %v14598_v40  ;;  %5524 = vmatmul.mubr.bf16.vlgmr.msra.gmra.mxu1 %v14598_v40 }
 0x4b5   :  { %8790 = vmatprep.mubr.msk.bf16.mxu0 %vm4360_vm3, %v15033_v30  ;;  %8800 = vmatprep.mubr.msk.bf16.mxu1 %vm4360_vm3, %v15033_v30 }
 0x4bc   :  { %5401 = vmatmul.mubr.bf16.gmra.mxu0 %v14966_v21  ;;  %5532 = vmatmul.mubr.bf16.gmra.mxu1 %v14966_v21 }
 0x4bd   :  { %8791 = vmatprep.mubr.msk.bf16.mxu0 %vm4360_vm3, %v15065_v56  ;;  %8801 = vmatprep.mubr.msk.bf16.mxu1 %vm4360_vm3, %v15065_v56  ;;  %v15441_v56 = vpop.f32.mrf.mxu0 }
 0x4bf   :  { %v15443_v44 = vpop.f32.mrf.mxu0 }
 0x4c2   :  { %v15429_v40 = vpop.f32.mrf.mxu1 }
 0x4c4   :  { %5411 = vmatmul.mubr.bf16.gmra.mxu0 %v15048_v33  ;;  %5540 = vmatmul.mubr.bf16.gmra.mxu1 %v15048_v33  ;;  %v4576_v21 = vpop.f32.mrf.mxu1  ;;  %v15451_v33 = vpop.f32.mrf.mxu0 }
 0x4c5   :  { %8792 = vmatprep.mubr.msk.bf16.mxu0 %vm4360_vm3, %v15117_v27  ;;  %8802 = vmatprep.mubr.msk.bf16.mxu1 %vm4360_vm3, %v15117_v27 }
 0x4c6   :  { %v15439_v30 = vpop.f32.mrf.mxu1  ;;  %v15453_v27 = vpop.f32.mrf.mxu0 }
 0x4c8   :  { %v4579_v43 = vpop.f32.mrf.mxu1 }
 0x4cc   :  { %5421 = vmatmul.mubr.bf16.gmra.mxu0 %v15102_v4  ;;  %5548 = vmatmul.mubr.bf16.gmra.mxu1 %v15102_v4  ;;  %v15461_v4 = vpop.f32.mrf.mxu0 }
 0x4cd   :  { %8793 = vmatprep.mubr.msk.bf16.mxu0 %vm4360_vm3, %v15154_v50  ;;  %8803 = vmatprep.mubr.msk.bf16.mxu1 %vm4360_vm3, %v15154_v50 }
 0x4ce   :  { %v15463_v20 = vpop.f32.mrf.mxu0 }
 0x4d0   :  { %v15467_v50 = vpop.f32.mrf.mxu0 }
 0x4d2   :  { %v15477_v19 = vpop.f32.mrf.mxu0 }
 0x4d4   :  { %5431 = vmatmul.mubr.bf16.gmra.mxu0 %v15168_v17  ;;  %5556 = vmatmul.mubr.bf16.gmra.mxu1 %v15168_v17  ;;  %v15480_v25 = vpop.f32.mrf.mxu0 }
 0x4d5   :  { %8794 = vmatprep.mubr.msk.bf16.mxu0 %vm4360_vm3, %v14588_v13  ;;  %8804 = vmatprep.mubr.msk.bf16.mxu1 %vm4360_vm3, %v14588_v13 }
 0x4db   :  { %v15465_v22 = vpop.f32.mrf.mxu1  ;;  %v15490_v55 = vpop.f32.mrf.mxu0 }
 0x4dc   :  { %5441 = vmatmul.mubr.bf16.gmra.mxu0 %v14636_v5  ;;  %5564 = vmatmul.mubr.bf16.gmra.mxu1 %v14636_v5  ;;  %v9418_v5 = vunpack.i.h.bf16 %v15186_v60 }
 0x4dd   :  { %8795 = vmatprep.mubr.msk.bf16.mxu0 %vm4360_vm3, %v18282_v18  ;;  %8805 = vmatprep.mubr.msk.bf16.mxu1 %vm4360_vm3, %v18282_v18  ;;  %v4584_v17 = vpop.f32.mrf.mxu1  ;;  %v15502_v35 = vpop.f32.mrf.mxu0 }
 0x4de   :  { %v3518_v59 = vsel %vm3470_vm2, %v9417_v45, %v9418_v5  ;;  %v3972_v45 = vmax.f32 %v18288_v10, %v3876_v15 }
 0x4df   :  { %v15475_v13 = vpop.f32.mrf.mxu1  ;;  %v3614_v60 = vmax.f32 %v18287_v0, %v3518_v59  ;;  %v15516_v41 = vpop.f32.mrf.mxu0 }
 0x4e0   :  { %v4020_v34 = vmax.f32 %v3612_v7, %v3972_v45 }
 0x4e1   :  { %v4587_v2 = vpop.f32.mrf.mxu1  ;;  %v4022_v16 = vmax.f32 %v3614_v60, %v3974_v38  ;;  %v15519_v63 = vpop.f32.mrf.mxu0 }
 0x4e3   :  { %v4046_v1 = vpack.c.bf16 %v4022_v16, %v4020_v34 }
 0x4e4   :  { %5451 = vmatmul.mubr.bf16.gmra.mxu0 %v18283_v58  ;;  %5572 = vmatmul.mubr.bf16.gmra.mxu1 %v18283_v58 }
 0x4e5   :  { %8796 = vmatprep.mubr.msk.bf16.mxu0 %vm4360_vm3, %v18284_v31  ;;  %8806 = vmatprep.mubr.msk.bf16.mxu1 %vm4360_vm3, %v18284_v31 }
 0x4ec   :  { %5461 = vmatmul.mubr.bf16.gmra.mxu0 %v18285_v26  ;;  %5580 = vmatmul.mubr.bf16.gmra.mxu1 %v18285_v26 }
 0x4ed   :  { %8797 = vmatprep.mubr.msk.bf16.mxu0 %vm4360_vm3, %v14964_v9  ;;  %8807 = vmatprep.mubr.msk.bf16.mxu1 %vm4360_vm3, %v14964_v9 }
 0x4f2   :  { %v15521_v62 = vpop.f32.mrf.mxu0  ;;  %v15523_v28 = vpop.f32.mrf.mxu1 }
 0x4f3   :  { %18290 = vst [vmem:[#allocation170_spill] sm:$0xff] %v15521_v62  ;;  %18291 = vst [vmem:[#allocation340_spill] sm:$0xff] %v15523_v28  ;;  %v9767_v28 = vld [vmem:[#allocation4 + $0x204] ss:$16 sps:$4 sm:$0xff]  }
 0x4f4   :  { %5471 = vmatmul.mubr.bf16.gmra.mxu0 %v15007_v39  ;;  %5588 = vmatmul.mubr.bf16.gmra.mxu1 %v15007_v39  ;;  %v15529_v9 = vpop.f32.mrf.mxu0  ;;  %v4592_v12 = vpop.f32.mrf.mxu1 }
 0x4f5   :  { %8798 = vmatprep.mubr.msk.bf16.mxu0 %vm4360_vm3, %v4046_v1  ;;  %8808 = vmatprep.mubr.msk.bf16.mxu1 %vm4360_vm3, %v4046_v1  ;;  %18292 = vst [vmem:[#allocation171_spill] sm:$0xff] %v15529_v9 }
 0x4f6   :  { %v15531_v8 = vpop.f32.mrf.mxu0  ;;  %v15533_v3 = vpop.f32.mrf.mxu1 }
 0x4f7   :  { %18293 = vst [vmem:[#allocation341_spill] sm:$0xff] %v15531_v8  ;;  %18294 = vst [vmem:[#allocation172_spill] sm:$0xff] %v15533_v3 }
 0x4f8   :  { %v15535_v18 = vpop.f32.mrf.mxu0  ;;  %v4595_v42 = vpop.f32.mrf.mxu1 }
 0x4f9   :  { %18295 = vst [vmem:[#allocation342_spill] sm:$0xff] %v15535_v18 }
 0x4fa   :  { %v15537_v58 = vpop.f32.mrf.mxu0  ;;  %v15539_v31 = vpop.f32.mrf.mxu1 }
 0x4fb   :  { %18296 = vst [vmem:[#allocation173_spill] sm:$0xff] %v15537_v58  ;;  %18297 = vst [vmem:[#allocation343_spill] sm:$0xff] %v15539_v31 }
 0x4fc   :  { %5481 = vmatmul.mubr.bf16.gmra.mxu0 %v15306_v61  ;;  %5596 = vmatmul.mubr.bf16.gmra.mxu1 %v15306_v61  ;;  %v15543_v39 = vpop.f32.mrf.mxu0  ;;  %v4600_v23 = vpop.f32.mrf.mxu1 }
 0x4fd   :  { %18298 = vst [vmem:[#allocation355_spill] sm:$0xff] %v15543_v39 }
 0x4fe   :  { %v15545_v26 = vpop.f32.mrf.mxu0  ;;  %v15547_v53 = vpop.f32.mrf.mxu1 }
 0x4ff   :  { %18299 = vst [vmem:[#allocation174_spill] sm:$0xff] %v15545_v26  ;;  %18300 = vst [vmem:[#allocation344_spill] sm:$0xff] %v15547_v53 }
 0x500   :  { %v15549_v14 = vpop.f32.mrf.mxu0  ;;  %v4603_v21 = vpop.f32.mrf.mxu1 }
 0x501   :  { %18301 = vst [vmem:[#allocation175_spill] sm:$0xff] %v15549_v14 }
 0x502   :  { %v15551_v43 = vpop.f32.mrf.mxu0  ;;  %v15553_v17 = vpop.f32.mrf.mxu1 }
 0x503   :  { %18302 = vst [vmem:[#allocation345_spill] sm:$0xff] %v15551_v43  ;;  %18303 = vst [vmem:[#allocation176_spill] sm:$0xff] %v15553_v17 }
 0x504   :  { %v15555_v2 = vpop.f32.mrf.mxu0  ;;  %v4608_v52 = vpop.f32.mrf.mxu1 }
 0x505   :  { %18304 = vst [vmem:[#allocation346_spill] sm:$0xff] %v15555_v2 }
 0x506   :  { %v15557_v5 = vpop.f32.mrf.mxu0  ;;  %v15559_v61 = vpop.f32.mrf.mxu1 }
 0x507   :  { %18305 = vst [vmem:[#allocation8_spill] sm:$0xff] %v15557_v5  ;;  %18306 = vst [vmem:[#allocation177_spill] sm:$0xff] %v15559_v61 }
 0x508   :  { %v15561_v11 = vpop.f32.mrf.mxu0  ;;  %v4611_v6 = vpop.f32.mrf.mxu1 }
 0x509   :  { %18307 = vst [vmem:[#allocation347_spill] sm:$0xff] %v15561_v11 }
 0x50a   :  { %v15563_v48 = vpop.f32.mrf.mxu0  ;;  %v15565_v59 = vpop.f32.mrf.mxu1 }
 0x50b   :  { %18308 = vst [vmem:[#allocation352_spill] sm:$0xff] %v15563_v48  ;;  %18309 = vst [vmem:[#allocation184_spill] sm:$0xff] %v15565_v59 }
 0x50c   :  { %v15567_v15 = vpop.f32.mrf.mxu0  ;;  %v4616_v57 = vpop.f32.mrf.mxu1 }
 0x50d   :  { %18310 = vst [vmem:[#allocation182_spill] sm:$0xff] %v15567_v15 }
 0x50e   :  { %v15569_v38 = vpop.f32.mrf.mxu0  ;;  %v15571_v51 = vpop.f32.mrf.mxu1 }
 0x50f   :  { %18311 = vst [vmem:[#allocation10_spill] sm:$0xff] %v15569_v38  ;;  %18312 = vst [vmem:[#allocation353_spill] sm:$0xff] %v15571_v51 }
 0x510   :  { %v15573_v0 = vpop.f32.mrf.mxu0  ;;  %v4619_v60 = vpop.f32.mrf.mxu1 }
 0x511   :  { %18313 = vst [vmem:[#allocation11_spill] sm:$0xff] %v15573_v0 }
 0x512   :  { %v15575_v10 = vpop.f32.mrf.mxu0  ;;  %v15577_v45 = vpop.f32.mrf.mxu1 }
 0x513   :  { %18314 = vst [vmem:[#allocation178_spill] sm:$0xff] %v15575_v10  ;;  %18315 = vst [vmem:[#allocation348_spill] sm:$0xff] %v15577_v45 }
 0x514   :  { %v15579_v54 = vpop.f32.mrf.mxu0  ;;  %v4624_v7 = vpop.f32.mrf.mxu1 }
 0x515   :  { %18316 = vst [vmem:[#allocation186_spill] sm:$0xff] %v15579_v54 }
 0x516   :  { %v15581_v16 = vpop.f32.mrf.mxu0  ;;  %v15583_v34 = vpop.f32.mrf.mxu1 }
 0x517   :  { %18317 = vst [vmem:[#allocation179_spill] sm:$0xff] %v15581_v16  ;;  %18318 = vst [vmem:[#allocation349_spill] sm:$0xff] %v15583_v34 }
 0x518   :  { %v15585_v1 = vpop.f32.mrf.mxu0  ;;  %v4627_v12 = vpop.f32.mrf.mxu1 }
 0x519   :  { %18319 = vst [vmem:[#allocation180_spill] sm:$0xff] %v15585_v1 }
 0x51a   :  { %v15587_v42 = vpop.f32.mrf.mxu0  ;;  %v15589_v23 = vpop.f32.mrf.mxu1 }
 0x51b   :  { %18320 = vst [vmem:[#allocation350_spill] sm:$0xff] %v15587_v42  ;;  %18321 = vst [vmem:[#allocation181_spill] sm:$0xff] %v15589_v23 }
 0x51c   :  { %v15591_v21 = vpop.f32.mrf.mxu0  ;;  %v4632_v52 = vpop.f32.mrf.mxu1 }
 0x51d   :  { %18322 = vst [vmem:[#allocation351_spill] sm:$0xff] %v15591_v21 }
 0x51e   :  { %v15593_v6 = vpop.f32.mrf.mxu0  ;;  %v15595_v57 = vpop.f32.mrf.mxu1 }
 0x51f   :  { %18323 = vst [vmem:[#allocation192_spill] sm:$0xff] %v15593_v6  ;;  %18324 = vst [vmem:[#allocation25_spill] sm:$0xff] %v15595_v57 }
 0x520   :  { %v15597_v60 = vpop.f32.mrf.mxu0  ;;  %v4635_v7 = vpop.f32.mrf.mxu1 }
 0x521   :  { %18325 = vst [vmem:[#allocation215_spill] sm:$0xff] %v15597_v60 }
 0x524   :  { %v15599_v29 = vpop.f32.mrf.mxu0  ;;  %v15601_v34 = vpop.f32.mrf.mxu1 }
 0x526   :  { %v15603_v1 = vpop.f32.mrf.mxu0  ;;  %v5017_v12 = vpop.f32.mrf.mxu1 }
 0x528   :  { %v15605_v42 = vpop.f32.mrf.mxu0  ;;  %v15607_v23 = vpop.f32.mrf.mxu1 }
 0x52a   :  { %v15609_v21 = vpop.f32.mrf.mxu0  ;;  %v5020_v52 = vpop.f32.mrf.mxu1 }
 0x52c   :  { %v15611_v6 = vpop.f32.mrf.mxu0  ;;  %v15613_v57 = vpop.f32.mrf.mxu1 }
 0x52e   :  { %v15615_v60 = vpop.f32.mrf.mxu0  ;;  %v5025_v7 = vpop.f32.mrf.mxu1 }
 0x530   :  { %v15617_v16 = vpop.f32.mrf.mxu0  ;;  %v15619_v54 = vpop.f32.mrf.mxu1 }
 0x532   :  { %v15621_v45 = vpop.f32.mrf.mxu0  ;;  %v5028_v12 = vpop.f32.mrf.mxu1 }
 0x534   :  { %v15623_v10 = vpop.f32.mrf.mxu0  ;;  %v15625_v0 = vpop.f32.mrf.mxu1 }
 0x536   :  { %v15627_v51 = vpop.f32.mrf.mxu0  ;;  %v5033_v52 = vpop.f32.mrf.mxu1 }
 0x538   :  { %v15629_v38 = vpop.f32.mrf.mxu0  ;;  %v15631_v15 = vpop.f32.mrf.mxu1 }
 0x53a   :  { %v15633_v59 = vpop.f32.mrf.mxu0  ;;  %v5036_v7 = vpop.f32.mrf.mxu1 }
 0x53c   :  { %v15635_v48 = vpop.f32.mrf.mxu0  ;;  %v15637_v11 = vpop.f32.mrf.mxu1 }
 0x53e   :  { %v15639_v61 = vpop.f32.mrf.mxu0  ;;  %v5041_v12 = vpop.f32.mrf.mxu1 }
 0x540   :  { %v15641_v5 = vpop.f32.mrf.mxu0  ;;  %v15643_v2 = vpop.f32.mrf.mxu1 }
 0x542   :  { %v15645_v17 = vpop.f32.mrf.mxu0  ;;  %v5044_v52 = vpop.f32.mrf.mxu1 }
 0x544   :  { %v15647_v43 = vpop.f32.mrf.mxu0  ;;  %v15649_v14 = vpop.f32.mrf.mxu1 }
 0x545   :  { %18326 = vst [vmem:[#allocation30_spill] sm:$0xff] %v15647_v43  ;;  %18327 = vst [vmem:[#allocation9_spill] sm:$0xff] %v15649_v14  ;;  %v9762_v14 = vld [vmem:[#allocation4 + $0x228] ss:$16 sps:$4 sm:$0xff]  }
 0x546   :  { %v15651_v53 = vpop.f32.mrf.mxu0  ;;  %v5049_v7 = vpop.f32.mrf.mxu1 }
 0x547   :  { %18328 = vst [vmem:[#allocation29_spill] sm:$0xff] %v15651_v53 }
 0x548   :  { %v15653_v26 = vpop.f32.mrf.mxu0  ;;  %v15655_v39 = vpop.f32.mrf.mxu1 }
 0x549   :  { %18329 = vst [vmem:[#allocation42_spill] sm:$0xff] %v15653_v26  ;;  %18330 = vst [vmem:[#allocation205_spill] sm:$0xff] %v15655_v39 }
 0x54a   :  { %v15657_v31 = vpop.f32.mrf.mxu0  ;;  %v5052_v12 = vpop.f32.mrf.mxu1 }
 0x54b   :  { %18331 = vst [vmem:[#allocation206_spill] sm:$0xff] %v15657_v31 }
 0x54c   :  { %v15659_v58 = vpop.f32.mrf.mxu0  ;;  %v15661_v18 = vpop.f32.mrf.mxu1 }
 0x54d   :  { %18332 = vst [vmem:[#allocation217_spill] sm:$0xff] %v15659_v58  ;;  %18333 = vst [vmem:[#allocation44_spill] sm:$0xff] %v15661_v18 }
 0x54e   :  { %v15663_v3 = vpop.f32.mrf.mxu0  ;;  %v5057_v52 = vpop.f32.mrf.mxu1 }
 0x54f   :  { %18334 = vst [vmem:[#allocation199_spill] sm:$0xff] %v15663_v3  ;;  %v9759_v3 = vld [vmem:[#allocation4 + $0x220] ss:$16 sps:$4 sm:$0xff]   ;;  %v9761_v52 = vld [vmem:[#allocation4 + $0x224] ss:$16 sps:$4 sm:$0xff]  }
 0x550   :  { %v15665_v8 = vpop.f32.mrf.mxu0  ;;  %v15667_v9 = vpop.f32.mrf.mxu1  ;;  %6493 = vmatprep.subr.bf16.mxu0 %v9761_v52 }
 0x551   :  { %18335 = vst [vmem:[#allocation218_spill] sm:$0xff] %v15665_v8  ;;  %18336 = vst [vmem:[#allocation45_spill] sm:$0xff] %v15667_v9  ;;  %v9764_v8 = vld [vmem:[#allocation4 + $0x22c] ss:$16 sps:$4 sm:$0xff]   ;;  %6494 = vmatpush1.bf16.msra.mxu0 %v9759_v3 }
 0x552   :  { %v15669_v53 = vpop.f32.mrf.mxu0  ;;  %v5060_v7 = vpop.f32.mrf.mxu1  ;;  %6536 = vmatprep.subr.bf16.mxu1 %v9764_v8  ;;  %6495 = vmatprep.subr.bf16.mxu0 %v9767_v28  ;;  %v9774_v8 = vld [vmem:[#allocation4 + $0x1e8] ss:$16 sps:$4 sm:$0xff]  }
 0x553   :  { %18337 = vst [vmem:[#allocation35_spill] sm:$0xff] %v15669_v53  ;;  %v9770_v7 = vld [vmem:[#allocation4 + $0x20c] ss:$16 sps:$4 sm:$0xff]   ;;  %6537 = vmatpush1.bf16.msra.mxu1 %v9762_v14 }
 0x554   :  { %v15671_v26 = vpop.f32.mrf.mxu0  ;;  %v15673_v39 = vpop.f32.mrf.mxu1  ;;  %6538 = vmatprep.subr.bf16.mxu1 %v9770_v7  ;;  %v9777_v7 = vld [vmem:[#allocation4 + $0x1c0] ss:$16 sps:$4 sm:$0xff]  }
 0x555   :  { %18338 = vst [vmem:[#allocation210_spill] sm:$0xff] %v15671_v26  ;;  %18339 = vst [vmem:[#allocation13_spill] sm:$0xff] %v15673_v39  ;;  %v9765_v39 = vld [vmem:[#allocation4 + $0x200] ss:$16 sps:$4 sm:$0xff]  }
 0x556   :  { %v15675_v31 = vpop.f32.mrf.mxu0  ;;  %v5065_v12 = vpop.f32.mrf.mxu1  ;;  %6496 = vmatpush1.bf16.msra.mxu0 %v9765_v39 }
 0x557   :  { %18340 = vst [vmem:[#allocation209_spill] sm:$0xff] %v15675_v31  ;;  %v9776_v31 = vld [vmem:[#allocation4 + $0x1ec] ss:$16 sps:$4 sm:$0xff]  }
 0x558   :  { %v15677_v58 = vpop.f32.mrf.mxu0  ;;  %v15679_v18 = vpop.f32.mrf.mxu1 }
 0x559   :  { %18341 = vst [vmem:[#allocation187_spill] sm:$0xff] %v15677_v58  ;;  %18342 = vst [vmem:[#allocation36_spill] sm:$0xff] %v15679_v18  ;;  %v9768_v18 = vld [vmem:[#allocation4 + $0x208] ss:$16 sps:$4 sm:$0xff]   ;;  %v9773_v58 = vld [vmem:[#allocation4 + $0x1e4] ss:$16 sps:$4 sm:$0xff]  }
 0x55a   :  { %v15681_v9 = vpop.f32.mrf.mxu0  ;;  %v5068_v53 = vpop.f32.mrf.mxu1  ;;  %6539 = vmatpush1.bf16.msra.mxu1 %v9768_v18  ;;  %6497 = vmatprep.subr.bf16.mxu0 %v9773_v58 }
 0x55b   :  { %v9771_v53 = vld [vmem:[#allocation4 + $0x1e0] ss:$16 sps:$4 sm:$0xff]   ;;  %6540 = vmatprep.subr.bf16.mxu1 %v9776_v31 }
 0x55c   :  { %v15683_v26 = vpop.f32.mrf.mxu0  ;;  %v15685_v12 = vpop.f32.mrf.mxu1  ;;  %6498 = vmatpush1.bf16.msra.mxu0 %v9771_v53 }
 0x55d   :  { %18343 = vst [vmem:[#allocation219_spill] sm:$0xff] %v15683_v26  ;;  %18344 = vst [vmem:[#allocation48_spill] sm:$0xff] %v15685_v12  ;;  %v9779_v26 = vld [vmem:[#allocation4 + $0x1c4] ss:$16 sps:$4 sm:$0xff]  }
 0x55e   :  { %v15687_v43 = vpop.f32.mrf.mxu0  ;;  %v5073_v62 = vpop.f32.mrf.mxu1  ;;  %6541 = vmatpush1.bf16.msra.mxu1 %v9774_v8  ;;  %6499 = vmatprep.subr.bf16.mxu0 %v9779_v26 }
 0x55f   :  { %18345 = vst [vmem:[#allocation211_spill] sm:$0xff] %v15687_v43 }
 0x560   :  { %v15689_v52 = vpop.f32.mrf.mxu0  ;;  %v15691_v3 = vpop.f32.mrf.mxu1  ;;  %6500 = vmatpush1.bf16.msra.mxu0 %v9777_v7 }
 0x562   :  { %v15693_v14 = vpop.f32.mrf.mxu0  ;;  %v5076_v28 = vpop.f32.mrf.mxu1 }
 0x563   :  { %18346 = vst [vmem:[#allocation212_spill] sm:$0xff] %v15693_v14 }
 0x564   :  { %v15695_v12 = vpop.f32.mrf.mxu0  ;;  %v15697_v43 = vpop.f32.mrf.mxu1 }
 0x565   :  { %18347 = vst [vmem:[#allocation50_spill] sm:$0xff] %v15695_v12  ;;  %18348 = vst [vmem:[#allocation225_spill] sm:$0xff] %v15697_v43 }
 0x566   :  { %v15699_v62 = vpop.f32.mrf.mxu0  ;;  %v5081_v39 = vpop.f32.mrf.mxu1 }
 0x567   :  { %18349 = vst [vmem:[#allocation53_spill] sm:$0xff] %v15699_v62 }
 0x568   :  { %v15701_v18 = vpop.f32.mrf.mxu0  ;;  %v15703_v58 = vpop.f32.mrf.mxu1 }
 0x569   :  { %18350 = vst [vmem:[#allocation51_spill] sm:$0xff] %v15701_v18  ;;  %18351 = vst [vmem:[#allocation52_spill] sm:$0xff] %v15703_v58  ;;  %v4883_v58 = vadd.f32 %v15599_v29, %v15419_v32  ;;  %v4893_v29 = vadd.f32 %v15611_v6, %v15443_v44  ;;  %v15740_v32 = vld [vmem:[%s16745_s5] ss:$4 sm:$0x7] }
 0x56a   :  { %v15705_v31 = vpop.f32.mrf.mxu0  ;;  %v5084_v14 = vpop.f32.mrf.mxu1  ;;  %18361 = vst [vmem:[#allocation229_spill] sm:$0xff] %v15740_v32 }
 0x56b   :  { %18352 = vst [vmem:[#allocation54_spill] sm:$0xff] %v15705_v31 }
 0x56c   :  { %v15707_v28 = vpop.f32.mrf.mxu0  ;;  %v15709_v53 = vpop.f32.mrf.mxu1 }
 0x56d   :  { %18353 = vst [vmem:[#allocation20_spill] sm:$0xff] %v15707_v28  ;;  %18354 = vst [vmem:[#allocation47_spill] sm:$0xff] %v15709_v53 }
 0x56e   :  { %v15711_v12 = vpop.f32.mrf.mxu0  ;;  %v5089_v43 = vpop.f32.mrf.mxu1 }
 0x56f   :  { %18355 = vst [vmem:[#allocation194_spill] sm:$0xff] %v15711_v12  ;;  %v4887_v43 = vadd.f32 %v15605_v42, %v15431_v24 }
 0x570   :  { %v15713_v8 = vpop.f32.mrf.mxu0  ;;  %v15715_v26 = vpop.f32.mrf.mxu1 }
 0x571   :  { %18356 = vst [vmem:[#allocation221_spill] sm:$0xff] %v15713_v8  ;;  %18357 = vst [vmem:[#allocation227_spill] sm:$0xff] %v15715_v26 }
 0x572   :  { %v15717_v39 = vpop.f32.mrf.mxu0  ;;  %v5092_v7 = vpop.f32.mrf.mxu1 }
 0x573   :  { %18358 = vst [vmem:[#allocation233_spill] sm:$0xff] %v15717_v39 }
 0x574   :  { %v5392_v18 = vpop.f32.mrf.mxu0  ;;  %v15721_v31 = vpop.f32.mrf.mxu1 }
 0x575   :  { %v15723_v14 = vadd.f32 %v5392_v18, %v4883_v58  ;;  %v5024_v18 = vadd.f32 %v15613_v57, %v15403_v49  ;;  %v4895_v58 = vadd.f32 %v15615_v60, %v15451_v33  ;;  %v15757_v49 = vld [vmem:[%s16745_s5 + $0x1] ss:$4 sm:$0x7]  ;;  %v18365_v57 = vld [vmem:[#allocation198_spill] sm:$0xff] }
 0x576   :  { %v15725_v28 = vpop.f32.mrf.mxu0  ;;  %v5527_v53 = vpop.f32.mrf.mxu1  ;;  %18364 = vst [vmem:[#allocation226_spill] sm:$0xff] %v15757_v49  ;;  %v15761_v33 = vrot.slane %v15740_v32, %v18365_v57 }
 0x577   :  { %18359 = vst [vmem:[#allocation65_spill] sm:$0xff] %v15723_v14 }
 0x578   :  { %v5396_v8 = vpop.f32.mrf.mxu0  ;;  %v15729_v12 = vpop.f32.mrf.mxu1 }
 0x579   :  { %v15731_v26 = vadd.f32 %v5396_v8, %v4887_v43  ;;  %v18363_v8 = vld [vmem:[#allocation185_spill] sm:$0xff] }
 0x57a   :  { %v15733_v7 = vpop.f32.mrf.mxu0  ;;  %v5530_v39 = vpop.f32.mrf.mxu1 }
 0x57b   :  { %18360 = vst [vmem:[#allocation228_spill] sm:$0xff] %v15731_v26  ;;  %v15750_v39 = vrot.slane %v15740_v32, %v18363_v8  ;;  %v4897_v26 = vadd.f32 %v15617_v16, %v15453_v27  ;;  %v4899_v27 = vadd.f32 %v15621_v45, %v15461_v4  ;;  %v15782_v4 = vrot.slane %v15757_v49, %v18365_v57 }
 0x57c   :  { %v5402_v24 = vpop.f32.mrf.mxu0  ;;  %v5533_v42 = vpop.f32.mrf.mxu1 }
 0x57d   :  { %v15746_v53 = vadd.f32 %v5402_v24, %v4893_v29  ;;  %v5612_v44 = vadd.f32 %v5533_v42, %v5024_v18  ;;  %v5027_v29 = vadd.f32 %v15619_v54, %v15411_v36  ;;  %v9780_v36 = vld [vmem:[#allocation4 + $0x1c8] ss:$16 sps:$4 sm:$0xff]   ;;  %v9782_v54 = vld [vmem:[#allocation4 + $0x1cc] ss:$16 sps:$4 sm:$0xff]  }
 0x57e   :  { %v5404_v6 = vpop.f32.mrf.mxu0  ;;  %v5535_v43 = vpop.f32.mrf.mxu1  ;;  %6542 = vmatprep.subr.bf16.mxu1 %v9782_v54  ;;  %v4907_v54 = vadd.f32 %v15629_v38, %v15477_v19  ;;  %v9789_v19 = vld [vmem:[#allocation4 + $0x180] ss:$16 sps:$4 sm:$0xff]   ;;  %v9794_v38 = vld [vmem:[#allocation4 + $0x18c] ss:$16 sps:$4 sm:$0xff]  }
 0x57f   :  { %18362 = vst [vmem:[#allocation56_spill] sm:$0xff] %v15746_v53  ;;  %v5611_v60 = vadd.f32 %v5404_v6, %v4895_v58  ;;  %v5689_v18 = vadd.f32 %v15750_v39, %v5612_v44  ;;  %v15773_v53 = vrot.slane %v15757_v49, %v18363_v8  ;;  %v15778_v44 = vld [vmem:[%s16745_s5 + $0x2] ss:$4 sm:$0x7]  ;;  %6543 = vmatpush1.bf16.msra.mxu1 %v9780_v36  ;;  %s10162_s5 = smov 96  }
 0x580   :  { %v5406_v24 = vpop.f32.mrf.mxu0  ;;  %v5536_v42 = vpop.f32.mrf.mxu1  ;;  %18367 = vst [vmem:[#allocation74_spill] sm:$0xff] %v15778_v44  ;;  %v15794_v49 = vrot.slane %v15778_v44, %v18365_v57  ;;  %v9786_v36 = vld [vmem:[#allocation4 + $0x1a8] ss:$16 sps:$4 sm:$0xff]  }
 0x581   :  { %v5688_v16 = vadd.f32 %v15761_v33, %v5611_v60  ;;  %v15769_v43 = vadd.f32 %v5406_v24, %v4897_v26  ;;  %v5749_v14 = vmax.f32 %v5689_v18, 0.0  ;;  %v5615_v58 = vadd.f32 %v5536_v42, %v5027_v29 }
 0x582   :  { %v5408_v6 = vpop.f32.mrf.mxu0  ;;  %v5538_v32 = vpop.f32.mrf.mxu1  ;;  %v4903_v60 = vadd.f32 %v15623_v10, %v15463_v20 }
 0x583   :  { %18366 = vst [vmem:[#allocation55_spill] sm:$0xff] %v15769_v43  ;;  %v5748_v45 = vmax.f32 %v5688_v16, 0.0  ;;  %v5614_v26 = vadd.f32 %v5408_v6, %v4899_v27  ;;  %v5827_v29 = vmul.f32 %v15773_v53, %v5749_v14  ;;  %v5692_v32 = vadd.f32 %v15750_v39, %v5615_v58  ;;  %v9783_v58 = vld [vmem:[#allocation4 + $0x1a0] ss:$16 sps:$4 sm:$0xff]   ;;  %v9785_v6 = vld [vmem:[#allocation4 + $0x1a4] ss:$16 sps:$4 sm:$0xff]  }
 0x584   :  { %v5412_v18 = vpop.f32.mrf.mxu0  ;;  %v15788_v24 = vpop.f32.mrf.mxu1  ;;  %v15802_v14 = vrot.slane %v15778_v44, %v18363_v8  ;;  %6501 = vmatprep.subr.bf16.mxu0 %v9785_v6  ;;  %v9791_v8 = vld [vmem:[#allocation4 + $0x184] ss:$16 sps:$4 sm:$0xff]  }
 0x585   :  { %v5826_v42 = vmul.f32 %v15782_v4, %v5748_v45  ;;  %v5691_v43 = vadd.f32 %v15761_v33, %v5614_v26  ;;  %v5752_v27 = vmax.f32 %v5692_v32, 0.0  ;;  %v15796_v16 = vadd.f32 %v5412_v18, %v4903_v60  ;;  %v9788_v32 = vld [vmem:[#allocation4 + $0x1ac] ss:$16 sps:$4 sm:$0xff]   ;;  %6502 = vmatpush1.bf16.msra.mxu0 %v9783_v58 }
 0x586   :  { %v15798_v20 = vpop.f32.mrf.mxu0  ;;  %v5543_v10 = vpop.f32.mrf.mxu1  ;;  %6544 = vmatprep.subr.bf16.mxu1 %v9788_v32  ;;  %6503 = vmatprep.subr.bf16.mxu0 %v9791_v8  ;;  %v5016_v58 = vadd.f32 %v15601_v34, %v15387_v46  ;;  %v9795_v46 = vld [vmem:[#allocation4 + $0x160] ss:$16 sps:$4 sm:$0xff]   ;;  %v5032_v34 = vadd.f32 %v15625_v0, %v15429_v40  ;;  %v15853_v40 = vadd.f32 %v15637_v11, %v15465_v22 }
 0x587   :  { %18368 = vst [vmem:[#allocation57_spill] sm:$0xff] %v15796_v16  ;;  %v5751_v45 = vmax.f32 %v5691_v43, 0.0  ;;  %v15807_v26 = vadd.f32 %v15794_v49, %v5826_v42  ;;  %v5830_v60 = vmul.f32 %v15773_v53, %v5752_v27  ;;  %v5905_v10 = vadd.f32 %v15802_v14, %v5827_v29  ;;  %v9797_v27 = vld [vmem:[#allocation4 + $0x164] ss:$16 sps:$4 sm:$0xff]   ;;  %6545 = vmatpush1.bf16.msra.mxu1 %v9786_v36 }
 0x588   :  { %v5416_v18 = vpop.f32.mrf.mxu0  ;;  %v15810_v57 = vpop.f32.mrf.mxu1  ;;  %v4913_v29 = vadd.f32 %v15635_v48, %v15490_v55  ;;  %v5019_v55 = vadd.f32 %v15607_v23, %v15395_v47  ;;  %v4889_v48 = vadd.f32 %v15609_v21, %v15441_v56  ;;  %6546 = vmatprep.subr.bf16.mxu1 %v9794_v38  ;;  %v9803_v21 = vld [vmem:[#allocation4 + $0x144] ss:$16 sps:$4 sm:$0xff]   ;;  %v4909_v36 = vadd.f32 %v15633_v59, %v15480_v25 }
 0x589   :  { %18369 = vst [vmem:[#allocation58_spill] sm:$0xff] %v15807_v26  ;;  %v5829_v44 = vmul.f32 %v15782_v4, %v5751_v45  ;;  %v15814_v16 = vadd.f32 %v5416_v18, %v4907_v54  ;;  %v9439_v62 = vpack.i.bf16 %v5905_v10, %v15807_v26  ;;  %v9792_v54 = vld [vmem:[#allocation4 + $0x188] ss:$16 sps:$4 sm:$0xff]   ;;  %v4885_v45 = vadd.f32 %v15603_v1, %v15427_v37  ;;  %v9800_v37 = vld [vmem:[#allocation4 + $0x16c] ss:$16 sps:$4 sm:$0xff]   ;;  %v18373_v59 = vld [vmem:[#allocation170_spill] sm:$0xff] }
 0x58a   :  { %v15816_v43 = vpop.f32.mrf.mxu0  ;;  %v5546_v42 = vpop.f32.mrf.mxu1  ;;  %v5908_v18 = vadd.f32 %v15802_v14, %v5830_v60  ;;  %6504 = vmatpush1.bf16.msra.mxu0 %v9789_v19  ;;  %v4905_v1 = vadd.f32 %v15627_v51, %v15467_v50  ;;  %v15857_v50 = vadd.f32 %v15639_v61, %v15502_v35  ;;  %v15863_v51 = vadd.f32 %v15643_v2, %v15475_v13  ;;  %v18374_v22 = vld [vmem:[#allocation30_spill] sm:$0xff]  ;;  %v18375_v0 = vld [vmem:[#allocation340_spill] sm:$0xff]  ;;  %v18376_v60 = vld [vmem:[#allocation9_spill] sm:$0xff] }
 0x58b   :  { %18370 = vst [vmem:[#allocation231_spill] sm:$0xff] %v15814_v16  ;;  %v15822_v6 = vadd.f32 %v15794_v49, %v5829_v44  ;;  %9440 = vrot.lane.b32.xlu0 %v9439_v62, %s10162_s5  ;;  %v15844_v62 = vadd.f32 %v15631_v15, %v15439_v30  ;;  %6505 = vmatprep.subr.bf16.mxu0 %v9797_v27  ;;  %v9798_v15 = vld [vmem:[#allocation4 + $0x168] ss:$16 sps:$4 sm:$0xff]   ;;  %v9806_v61 = vld [vmem:[#allocation4 + $0x14c] ss:$16 sps:$4 sm:$0xff]   ;;  %v18381_v38 = vld [vmem:[#allocation172_spill] sm:$0xff] }
 0x58c   :  { %v5422_v32 = vpop.f32.mrf.mxu0  ;;  %v15829_v8 = vpop.f32.mrf.mxu1  ;;  %v4917_v30 = vadd.f32 %v15641_v5, %v15516_v41  ;;  %6547 = vmatpush1.bf16.msra.mxu1 %v9792_v54  ;;  %v15867_v25 = vadd.f32 %v15645_v17, %v15519_v63  ;;  %v4923_v11 = vadd.f32 %v18374_v22, %v18373_v59  ;;  %v15873_v35 = vadd.f32 %v18376_v60, %v18375_v0  ;;  %v18377_v10 = vld [vmem:[#allocation171_spill] sm:$0xff]  ;;  %v18378_v13 = vld [vmem:[#allocation29_spill] sm:$0xff]  ;;  %v18380_v63 = vld [vmem:[#allocation42_spill] sm:$0xff] }
 0x58d   :  { %18371 = vst [vmem:[#allocation76_spill] sm:$0xff] %v15822_v6  ;;  %v15836_v44 = vadd.f32 %v5422_v32, %v4913_v29  ;;  %v9444_v56 = vpack.i.bf16 %v5908_v18, %v15822_v6  ;;  %v15880_v2 = vadd.f32 %v18378_v13, %v18377_v10  ;;  %v18379_v19 = vld [vmem:[#allocation341_spill] sm:$0xff]  ;;  %6548 = vmatprep.subr.bf16.mxu1 %v9800_v37  ;;  %v9801_v29 = vld [vmem:[#allocation4 + $0x140] ss:$16 sps:$4 sm:$0xff]   ;;  %v9809_v60 = vld [vmem:[#allocation4 + $0x264] ss:$16 sps:$4 sm:$0xff]  }
 0x58e   :  { %v15846_v47 = vpop.f32.mrf.mxu0  ;;  %v5551_v23 = vpop.f32.mrf.mxu1  ;;  %v4927_v17 = vadd.f32 %v18380_v63, %v18379_v19  ;;  %v18382_v42 = vld [vmem:[#allocation205_spill] sm:$0xff]  ;;  %6506 = vmatpush1.bf16.msra.mxu0 %v9795_v46  ;;  %v18384_v54 = vld [vmem:[#allocation342_spill] sm:$0xff]  ;;  %v18390_v37 = vld [vmem:[#allocation343_spill] sm:$0xff] }
 0x58f   :  { %18372 = vst [vmem:[#allocation59_spill] sm:$0xff] %v15836_v44  ;;  %9445 = vrot.lane.b32.xlu1 %v9444_v56, %s10162_s5  ;;  %v15886_v27 = vadd.f32 %v18382_v42, %v18381_v38  ;;  %v18385_v32 = vld [vmem:[#allocation206_spill] sm:$0xff]  ;;  %v5605_v23 = vadd.f32 %v15725_v28, %v4885_v45  ;;  %v5608_v56 = vadd.f32 %v15733_v7, %v4889_v48  ;;  %v18388_v10 = vld [vmem:[#allocation173_spill] sm:$0xff]  ;;  %v18391_v19 = vld [vmem:[#allocation44_spill] sm:$0xff] }
 0x590   :  { %v5426_v41 = vpop.f32.mrf.mxu0  ;;  %v15876_v5 = vpop.f32.mrf.mxu1  ;;  %v15890_v18 = vadd.f32 %v18385_v32, %v18384_v54  ;;  %6507 = vmatprep.subr.bf16.mxu0 %v9803_v21  ;;  %v18389_v13 = vld [vmem:[#allocation217_spill] sm:$0xff]  ;;  %v15904_v63 = vadd.f32 %v18391_v19, %v18390_v37  ;;  %v5606_v38 = vadd.f32 %v15721_v31, %v5016_v58  ;;  %v5617_v28 = vadd.f32 %v15798_v20, %v4905_v1  ;;  %v18392_v45 = vld [vmem:[#allocation355_spill] sm:$0xff]  ;;  %v18394_v21 = vld [vmem:[#allocation174_spill] sm:$0xff] }
 0x591   :  { %18383 = vst [vmem:[#allocation61_spill] sm:$0xff] %v15886_v27  ;;  %v15894_v59 = vadd.f32 %v5426_v41, %v4917_v30  ;;  %v15900_v46 = vadd.f32 %v18389_v13, %v18388_v10  ;;  %6549 = vmatpush1.bf16.msra.mxu1 %v9798_v15  ;;  %v9804_v7 = vld [vmem:[#allocation4 + $0x148] ss:$16 sps:$4 sm:$0xff]   ;;  %v18395_v41 = vld [vmem:[#allocation218_spill] sm:$0xff]  ;;  %v5609_v54 = vadd.f32 %v15729_v12, %v5019_v55  ;;  %v18396_v31 = vld [vmem:[#allocation344_spill] sm:$0xff] }
 0x592   :  { %18386 = vst [vmem:[#allocation234_spill] sm:$0xff] %v15890_v18  ;;  %v15896_v22 = vpop.f32.mrf.mxu0  ;;  %v5554_v0 = vpop.f32.mrf.mxu1  ;;  %v18393_v48 = vld [vmem:[#allocation199_spill] sm:$0xff]  ;;  %v15914_v42 = vadd.f32 %v18395_v41, %v18394_v21  ;;  %v5618_v32 = vadd.f32 %v15788_v24, %v5032_v34  ;;  %6550 = vmatprep.subr.bf16.mxu1 %v9806_v61  ;;  %v18397_v20 = vld [vmem:[#allocation45_spill] sm:$0xff]  ;;  %v18401_v19 = vld [vmem:[#allocation210_spill] sm:$0xff]  ;;  %6508 = vmatpush1.bf16.msra.mxu0 %v9801_v29 }
 0x593   :  { %18387 = vst [vmem:[#allocation248_spill] sm:$0xff] %v15894_v59  ;;  %v15910_v30 = vadd.f32 %v18393_v48, %v18392_v45  ;;  %v15922_v58 = vadd.f32 %v18397_v20, %v18396_v31  ;;  %v18398_v1 = vld [vmem:[#allocation175_spill] sm:$0xff]  ;;  %v18400_v37 = vld [vmem:[#allocation345_spill] sm:$0xff]  ;;  %v9807_v12 = vld [vmem:[#allocation4 + $0x260] ss:$16 sps:$4 sm:$0xff]   ;;  %v5682_v31 = vadd.f32 %v15761_v33, %v5605_v23  ;;  %v5685_v20 = vadd.f32 %v15761_v33, %v5608_v56 }
 0x594   :  { %v5432_v0 = vpop.f32.mrf.mxu0  ;;  %v15918_v10 = vpop.f32.mrf.mxu1  ;;  %v18399_v15 = vld [vmem:[#allocation35_spill] sm:$0xff]  ;;  %v15930_v45 = vadd.f32 %v18401_v19, %v18400_v37  ;;  %v18403_v24 = vld [vmem:[#allocation176_spill] sm:$0xff]  ;;  %v18404_v55 = vld [vmem:[#allocation13_spill] sm:$0xff]  ;;  %6521 = vmatprep.subr.bf16.mxu0 %v9809_v60  ;;  %v5695_v60 = vadd.f32 %v15750_v39, %v5618_v32 }
 0x595   :  { %v15926_v13 = vadd.f32 %v18399_v15, %v18398_v1  ;;  %v15932_v48 = vadd.f32 %v5432_v0, %v4923_v11  ;;  %v15936_v34 = vadd.f32 %v18404_v55, %v18403_v24  ;;  %v18405_v61 = vld [vmem:[#allocation346_spill] sm:$0xff]  ;;  %v18406_v21 = vld [vmem:[#allocation209_spill] sm:$0xff]  ;;  %v18407_v11 = vld [vmem:[#allocation8_spill] sm:$0xff]  ;;  %v5683_v55 = vadd.f32 %v15750_v39, %v5606_v38  ;;  %6551 = vmatpush1.bf16.msra.mxu1 %v9804_v7 }
 0x596   :  { %v15940_v41 = vadd.f32 %v18406_v21, %v18405_v61  ;;  %v15944_v1 = vpop.f32.mrf.mxu0  ;;  %v5559_v15 = vpop.f32.mrf.mxu1  ;;  %v18408_v0 = vld [vmem:[#allocation187_spill] sm:$0xff]  ;;  %v18409_v37 = vld [vmem:[#allocation177_spill] sm:$0xff]  ;;  %v18410_v19 = vld [vmem:[#allocation36_spill] sm:$0xff]  ;;  %v5694_v61 = vadd.f32 %v15761_v33, %v5617_v28  ;;  %v5686_v21 = vadd.f32 %v15750_v39, %v5609_v54  ;;  %6522 = vmatpush2.bf16.msra.mxu0 %v9807_v12  ;;  %v5621_v12 = vadd.f32 %v15810_v57, %v15844_v62 }
 0x597   :  { %18402 = vst [vmem:[#allocation250_spill] sm:$0xff] %v15932_v48  ;;  %v15948_v29 = vadd.f32 %v18408_v0, %v18407_v11  ;;  %v15952_v24 = vadd.f32 %v18410_v19, %v18409_v37  ;;  %v18411_v23 = vld [vmem:[#allocation347_spill] sm:$0xff]  ;;  %v5620_v15 = vadd.f32 %v15816_v43, %v4909_v36  ;;  %v18413_v37 = vld [vmem:[#allocation352_spill] sm:$0xff]  ;;  %v18417_v26 = vld [vmem:[#allocation182_spill] sm:$0xff] }
 0x598   :  { %v15958_v56 = vadd.f32 %v15681_v9, %v18411_v23  ;;  %v5436_v11 = vpop.f32.mrf.mxu0  ;;  %v15963_v0 = vpop.f32.mrf.mxu1  ;;  %v18414_v19 = vld [vmem:[#allocation219_spill] sm:$0xff]  ;;  %v18415_v38 = vld [vmem:[#allocation184_spill] sm:$0xff]  ;;  %v18420_v32 = vld [vmem:[#allocation10_spill] sm:$0xff] }
 0x599   :  { %18412 = vst [vmem:[#allocation230_spill] sm:$0xff] %v15963_v0  ;;  %v15967_v6 = vadd.f32 %v18414_v19, %v18413_v37  ;;  %v18416_v28 = vld [vmem:[#allocation48_spill] sm:$0xff]  ;;  %v18418_v9 = vld [vmem:[#allocation211_spill] sm:$0xff]  ;;  %v15977_v54 = vadd.f32 %v5436_v11, %v4927_v17  ;;  %v15981_v43 = vadd.f32 %v15689_v52, %v18420_v32  ;;  %v18421_v36 = vld [vmem:[#allocation353_spill] sm:$0xff]  ;;  %v5742_v37 = vmax.f32 %v5682_v31, 0.0 }
 0x59a   :  { %v15971_v7 = vadd.f32 %v18416_v28, %v18415_v38  ;;  %v15975_v23 = vadd.f32 %v18418_v9, %v18417_v26  ;;  %v15985_v48 = vadd.f32 %v15691_v3, %v18421_v36  ;;  %v5745_v19 = vmax.f32 %v5685_v20, 0.0  ;;  %v15987_v59 = vpop.f32.mrf.mxu0  ;;  %v5562_v38 = vpop.f32.mrf.mxu1  ;;  %v18423_v28 = vld [vmem:[#allocation11_spill] sm:$0xff]  ;;  %v18424_v44 = vld [vmem:[#allocation212_spill] sm:$0xff]  ;;  %v18425_v52 = vld [vmem:[#allocation178_spill] sm:$0xff] }
 0x59b   :  { %18419 = vst [vmem:[#allocation60_spill] sm:$0xff] %v15977_v54  ;;  %18422 = vst [vmem:[#allocation236_spill] sm:$0xff] %v15987_v59  ;;  %v15991_v26 = vadd.f32 %v18424_v44, %v18423_v28  ;;  %v5743_v17 = vmax.f32 %v5683_v55, 0.0  ;;  %v5754_v11 = vmax.f32 %v5694_v61, 0.0  ;;  %v18426_v9 = vld [vmem:[#allocation50_spill] sm:$0xff]  ;;  %v5746_v3 = vmax.f32 %v5686_v21, 0.0 }
 0x59c   :  { %v15997_v32 = vadd.f32 %v18426_v9, %v18425_v52  ;;  %v5755_v36 = vmax.f32 %v5695_v60, 0.0  ;;  %v5697_v31 = vadd.f32 %v15761_v33, %v5620_v15  ;;  %v5442_v20 = vpop.f32.mrf.mxu0  ;;  %v5565_v54 = vpop.f32.mrf.mxu1  ;;  %v18427_v38 = vld [vmem:[#allocation348_spill] sm:$0xff]  ;;  %v18428_v16 = vld [vmem:[#allocation225_spill] sm:$0xff]  ;;  %v18429_v44 = vld [vmem:[#allocation186_spill] sm:$0xff]  ;;  %v5624_v21 = vadd.f32 %v15829_v8, %v15853_v40 }
 0x59d   :  { %v16002_v0 = vadd.f32 %v18428_v16, %v18427_v38  ;;  %v18430_v55 = vld [vmem:[#allocation53_spill] sm:$0xff]  ;;  %v18431_v28 = vld [vmem:[#allocation179_spill] sm:$0xff]  ;;  %v18434_v52 = vld [vmem:[#allocation52_spill] sm:$0xff]  ;;  %v5820_v9 = vmul.f32 %v15782_v4, %v5742_v37  ;;  %v5823_v16 = vmul.f32 %v15782_v4, %v5745_v19  ;;  %v16021_v38 = vadd.f32 %v5442_v20, %v15900_v46 }
 0x59e   :  { %v16006_v61 = vadd.f32 %v18430_v55, %v18429_v44  ;;  %v18432_v57 = vld [vmem:[#allocation51_spill] sm:$0xff]  ;;  %v18433_v60 = vld [vmem:[#allocation349_spill] sm:$0xff]  ;;  %v5444_v44 = vpop.f32.mrf.mxu0  ;;  %v5567_v55 = vpop.f32.mrf.mxu1  ;;  %v18437_v27 = vld [vmem:[#allocation180_spill] sm:$0xff]  ;;  %v5832_v8 = vmul.f32 %v15782_v4, %v5754_v11  ;;  %v5698_v40 = vadd.f32 %v15750_v39, %v5621_v12  ;;  %v5833_v37 = vmul.f32 %v15773_v53, %v5755_v36 }
 0x59f   :  { %v16010_v62 = vadd.f32 %v18432_v57, %v18431_v28  ;;  %v16016_v15 = vadd.f32 %v18434_v52, %v18433_v60  ;;  %18436 = vst [vmem:[#allocation63_spill] sm:$0xff] %v16021_v38  ;;  %v18438_v59 = vld [vmem:[#allocation54_spill] sm:$0xff]  ;;  %v5821_v57 = vmul.f32 %v15773_v53, %v5743_v17  ;;  %v5824_v60 = vmul.f32 %v15773_v53, %v5746_v3  ;;  %v18441_v38 = vld [vmem:[#allocation20_spill] sm:$0xff]  ;;  %v18443_v17 = vld [vmem:[#allocation47_spill] sm:$0xff] }
 0x5a0   :  { %v16025_v28 = vadd.f32 %v18438_v59, %v18437_v27  ;;  %v5757_v19 = vmax.f32 %v5697_v31, 0.0  ;;  %v5623_v46 = vadd.f32 %v15846_v47, %v15857_v50  ;;  %v5446_v20 = vpop.f32.mrf.mxu0  ;;  %v5568_v52 = vpop.f32.mrf.mxu1  ;;  %v18440_v55 = vld [vmem:[#allocation350_spill] sm:$0xff]  ;;  %v18442_v59 = vld [vmem:[#allocation181_spill] sm:$0xff]  ;;  %v5701_v11 = vadd.f32 %v15750_v39, %v5624_v21  ;;  %v18445_v3 = vld [vmem:[#allocation351_spill] sm:$0xff] }
 0x5a1   :  { %18435 = vst [vmem:[#allocation62_spill] sm:$0xff] %v16016_v15  ;;  %v16036_v27 = vadd.f32 %v18441_v38, %v18440_v55  ;;  %v16040_v15 = vadd.f32 %v18443_v17, %v18442_v59  ;;  %v16044_v12 = vadd.f32 %v5446_v20, %v15914_v42  ;;  %v18446_v36 = vld [vmem:[#allocation194_spill] sm:$0xff]  ;;  %v18447_v47 = vld [vmem:[#allocation192_spill] sm:$0xff]  ;;  %v18448_v50 = vld [vmem:[#allocation221_spill] sm:$0xff]  ;;  %v16055_v55 = vadd.f32 %v15794_v49, %v5820_v9 }
 0x5a2   :  { %18439 = vst [vmem:[#allocation204_spill] sm:$0xff] %v16025_v28  ;;  %v16048_v31 = vadd.f32 %v18446_v36, %v18445_v3  ;;  %v16052_v28 = vadd.f32 %v18448_v50, %v18447_v47  ;;  %v5448_v18 = vpop.f32.mrf.mxu0  ;;  %v5570_v38 = vpop.f32.mrf.mxu1  ;;  %v16058_v59 = vadd.f32 %v15794_v49, %v5823_v16  ;;  %v18450_v21 = vld [vmem:[#allocation25_spill] sm:$0xff]  ;;  %v18451_v17 = vld [vmem:[#allocation227_spill] sm:$0xff]  ;;  %v5758_v20 = vmax.f32 %v5698_v40, 0.0 }
 0x5a3   :  { %18444 = vst [vmem:[#allocation238_spill] sm:$0xff] %v16044_v12  ;;  %v16062_v42 = vadd.f32 %v18451_v17, %v18450_v21  ;;  %v16065_v3 = vadd.f32 %v15802_v14, %v5821_v57  ;;  %v16068_v36 = vadd.f32 %v15794_v49, %v5832_v8  ;;  %v5835_v47 = vmul.f32 %v15782_v4, %v5757_v19  ;;  %v18453_v19 = vld [vmem:[#allocation215_spill] sm:$0xff]  ;;  %v18454_v17 = vld [vmem:[#allocation233_spill] sm:$0xff] }
 0x5a4   :  { %18449 = vst [vmem:[#allocation31_spill] sm:$0xff] %v16052_v28  ;;  %v5700_v50 = vadd.f32 %v15761_v33, %v5623_v46  ;;  %v5452_v9 = vpop.f32.mrf.mxu0  ;;  %v5573_v38 = vpop.f32.mrf.mxu1  ;;  %v16073_v16 = vadd.f32 %v15802_v14, %v5824_v60  ;;  %v16076_v12 = vadd.f32 %v15802_v14, %v5833_v37  ;;  %v5761_v21 = vmax.f32 %v5701_v11, 0.0 }
 0x5a5   :  { %18452 = vst [vmem:[#allocation67_spill] sm:$0xff] %v16062_v42  ;;  %v5627_v57 = vadd.f32 %v15876_v5, %v15863_v51  ;;  %v5635_v40 = vadd.f32 %v5444_v44, %v15910_v30  ;;  %v16082_v8 = vadd.f32 %v5452_v9, %v15930_v45  ;;  %v16086_v46 = vadd.f32 %v18454_v17, %v18453_v19 }
 0x5a6   :  { %v5642_v42 = vadd.f32 %v5573_v38, %v15936_v34  ;;  %v5454_v60 = vpop.f32.mrf.mxu0  ;;  %v5575_v28 = vpop.f32.mrf.mxu1  ;;  %v9459_v37 = vpack.i.bf16 %v16065_v3, %v16055_v55  ;;  %v9464_v11 = vpack.i.bf16 %v16073_v16, %v16058_v59  ;;  %v5836_v51 = vmul.f32 %v15773_v53, %v5758_v20 }
 0x5a7   :  { %v5636_v5 = vadd.f32 %v5565_v54, %v15904_v63  ;;  %v5641_v30 = vadd.f32 %v5454_v60, %v15940_v41  ;;  %v5760_v44 = vmax.f32 %v5700_v50, 0.0  ;;  %v5626_v34 = vadd.f32 %v15896_v22, %v15867_v25 }
 0x5a8   :  { %v5719_v28 = vadd.f32 %v15750_v39, %v5642_v42  ;;  %v5456_v9 = vpop.f32.mrf.mxu0  ;;  %v5576_v38 = vpop.f32.mrf.mxu1  ;;  %v16102_v19 = vadd.f32 %v15794_v49, %v5835_v47  ;;  %v16105_v20 = vmul.f32 %v15773_v53, %v5761_v21  ;;  %v16108_v63 = vadd.f32 %v15750_v39, %v5627_v57 }
 0x5a9   :  { %v5712_v41 = vadd.f32 %v15761_v33, %v5635_v40  ;;  %v5718_v54 = vadd.f32 %v15761_v33, %v5641_v30  ;;  %v5638_v50 = vadd.f32 %v5448_v18, %v15926_v13  ;;  %v16114_v22 = vadd.f32 %v5456_v9, %v15948_v29  ;;  %v9812_v9 = vld [vmem:[#allocation4 + $0x26c] ss:$16 sps:$4 sm:$0xff]  }
 0x5aa   :  { %v5779_v25 = vmax.f32 %v5719_v28, 0.0  ;;  %v5645_v42 = vadd.f32 %v5576_v38, %v15952_v24  ;;  %v5458_v47 = vpop.f32.mrf.mxu0  ;;  %v5578_v17 = vpop.f32.mrf.mxu1  ;;  %v5713_v21 = vadd.f32 %v15750_v39, %v5636_v5  ;;  %v16120_v45 = vadd.f32 %v15802_v14, %v5836_v51  ;;  %v9810_v28 = vld [vmem:[#allocation4 + $0x268] ss:$16 sps:$4 sm:$0xff]   ;;  %6564 = vmatprep.subr.bf16.mxu1 %v9812_v9 }
 0x5ab   :  { %v5778_v60 = vmax.f32 %v5718_v54, 0.0  ;;  %v5644_v57 = vadd.f32 %v5458_v47, %v15958_v56  ;;  %v5838_v40 = vmul.f32 %v15782_v4, %v5760_v44  ;;  %v5639_v18 = vadd.f32 %v5568_v52, %v15922_v58  ;;  %6565 = vmatpush2.bf16.msra.mxu1 %v9810_v28 }
 0x5ac   :  { %v5857_v13 = vmul.f32 %v15773_v53, %v5779_v25  ;;  %v5722_v29 = vadd.f32 %v15750_v39, %v5645_v42  ;;  %v5462_v30 = vpop.f32.mrf.mxu0  ;;  %v5581_v24 = vpop.f32.mrf.mxu1  ;;  %v5772_v38 = vmax.f32 %v5712_v41, 0.0  ;;  %v5764_v44 = vmax.f32 %v16108_v63, 0.0 }
 0x5ad   :  { %v5856_v5 = vmul.f32 %v15782_v4, %v5778_v60  ;;  %v5721_v56 = vadd.f32 %v15761_v33, %v5644_v57  ;;  %v16129_v51 = vadd.f32 %v5462_v30, %v15967_v6  ;;  %v16133_v58 = vadd.f32 %v15761_v33, %v5626_v34 }
 0x5ae   :  { %v5715_v52 = vadd.f32 %v15761_v33, %v5638_v50  ;;  %v5782_v54 = vmax.f32 %v5722_v29, 0.0  ;;  %v5464_v25 = vpop.f32.mrf.mxu0  ;;  %v5583_v42 = vpop.f32.mrf.mxu1  ;;  %v5773_v47 = vmax.f32 %v5713_v21, 0.0  ;;  %v5716_v6 = vadd.f32 %v15750_v39, %v5639_v18 }
 0x5af   :  { %v5781_v41 = vmax.f32 %v5721_v56, 0.0  ;;  %v5647_v17 = vadd.f32 %v5464_v25, %v15975_v23  ;;  %v16138_v60 = vadd.f32 %v15794_v49, %v5856_v5  ;;  %v5648_v34 = vadd.f32 %v5581_v24, %v15971_v7  ;;  %v9813_v24 = vld [vmem:[#allocation4 + $0x240] ss:$16 sps:$4 sm:$0xff]  }
 0x5b0   :  { %v5860_v63 = vmul.f32 %v15773_v53, %v5782_v54  ;;  %v5466_v57 = vpop.f32.mrf.mxu0  ;;  %v5584_v50 = vpop.f32.mrf.mxu1  ;;  %v5935_v29 = vadd.f32 %v15802_v14, %v5857_v13  ;;  %v5630_v21 = vadd.f32 %v15918_v10, %v15873_v35  ;;  %v5850_v30 = vmul.f32 %v15782_v4, %v5772_v38  ;;  %v9815_v54 = vld [vmem:[#allocation4 + $0x244] ss:$16 sps:$4 sm:$0xff]  }
 0x5b1   :  { %v5859_v23 = vmul.f32 %v15782_v4, %v5781_v41  ;;  %v16149_v9 = vadd.f32 %v5466_v57, %v15981_v43  ;;  %v5775_v28 = vmax.f32 %v5715_v52, 0.0  ;;  %v5724_v18 = vadd.f32 %v15761_v33, %v5647_v17  ;;  %6523 = vmatprep.subr.bf16.mxu0 %v9815_v54 }
 0x5b2   :  { %v5468_v5 = vpop.f32.mrf.mxu0  ;;  %v5586_v56 = vpop.f32.mrf.mxu1  ;;  %v9449_v7 = vpack.i.bf16 %v5935_v29, %v16138_v60  ;;  %v9484_v13 = vpack.i.bf16 %v16120_v45, %v16102_v19  ;;  %v5763_v35 = vmax.f32 %v16133_v58, 0.0  ;;  %v5851_v10 = vmul.f32 %v15773_v53, %v5773_v47  ;;  %6524 = vmatpush2.bf16.msra.mxu0 %v9813_v24 }
 0x5b3   :  { %v5651_v38 = vadd.f32 %v5584_v50, %v15985_v48  ;;  %v5650_v43 = vadd.f32 %v5468_v5, %v15991_v26  ;;  %v5776_v52 = vmax.f32 %v5716_v6, 0.0  ;;  %v5725_v25 = vadd.f32 %v15750_v39, %v5648_v34  ;;  %v9816_v6 = vld [vmem:[#allocation4 + $0x248] ss:$16 sps:$4 sm:$0xff]   ;;  %v9818_v34 = vld [vmem:[#allocation4 + $0x24c] ss:$16 sps:$4 sm:$0xff]  }
 0x5b4   :  { %9450 = vrot.lane.b32.xlu0 %v9449_v7, %s10162_s5  ;;  %v5472_v42 = vpop.f32.mrf.mxu0  ;;  %v5589_v41 = vpop.f32.mrf.mxu1  ;;  %v16162_v17 = vadd.f32 %v15794_v49, %v5859_v23  ;;  %v5938_v57 = vadd.f32 %v15802_v14, %v5860_v63  ;;  %v5629_v29 = vadd.f32 %v15944_v1, %v15880_v2  ;;  %v16169_v48 = vadd.f32 %v15794_v49, %v5850_v30 }
 0x5b5   :  { %v5727_v47 = vadd.f32 %v15761_v33, %v5650_v43  ;;  %v16172_v26 = vadd.f32 %v15794_v49, %v5838_v40  ;;  %v5853_v50 = vmul.f32 %v15782_v4, %v5775_v28  ;;  %v5784_v23 = vmax.f32 %v5724_v18, 0.0  ;;  %6566 = vmatprep.subr.bf16.mxu1 %v9818_v34  ;;  %v9824_v34 = vld [vmem:[#allocation4 + $0xec] ss:$16 sps:$4 sm:$0xff]  }
 0x5b6   :  { %v16176_v5 = vadd.f32 %v5472_v42, %v15997_v32  ;;  %v5474_v63 = vpop.f32.mrf.mxu0  ;;  %v5591_v56 = vpop.f32.mrf.mxu1  ;;  %v9454_v2 = vpack.i.bf16 %v5938_v57, %v16162_v17  ;;  %v16180_v1 = vmul.f32 %v15773_v53, %v5764_v44  ;;  %v5728_v40 = vadd.f32 %v15750_v39, %v5651_v38  ;;  %6567 = vmatpush2.bf16.msra.mxu1 %v9816_v6  ;;  %v9821_v42 = vld [vmem:[#allocation4 + $0xe4] ss:$16 sps:$4 sm:$0xff]  }
 0x5b7   :  { %v5654_v30 = vadd.f32 %v5589_v41, %v16002_v0  ;;  %v5653_v7 = vadd.f32 %v5474_v63, %v16006_v61  ;;  %v16186_v28 = vadd.f32 %v15750_v39, %v5630_v21  ;;  %v5854_v32 = vmul.f32 %v15773_v53, %v5776_v52  ;;  %v18455_v41 = vld [vmem:[#allocation234_spill] sm:$0xff]  ;;  %6782 = vmatprep.subr.bf16.mxu0 %v9821_v42 }
 0x5b8   :  { %v5785_v18 = vmax.f32 %v5725_v25, 0.0  ;;  %9455 = vrot.lane.b32.xlu1 %v9454_v2, %s10162_s5  ;;  %9460 = vrot.lane.b32.xlu0 %v9459_v37, %s10162_s5  ;;  %v5476_v44 = vpop.f32.mrf.mxu0  ;;  %v5592_v24 = vpop.f32.mrf.mxu1  ;;  %v5929_v0 = vadd.f32 %v15802_v14, %v5851_v10  ;;  %v16196_v61 = vadd.f32 %v15761_v33, %v5629_v29  ;;  %v5787_v54 = vmax.f32 %v5727_v47, 0.0  ;;  %v18457_v47 = vld [vmem:[#allocation204_spill] sm:$0xff]  ;;  %v18458_v63 = vld [vmem:[#allocation62_spill] sm:$0xff] }
 0x5b9   :  { %v16199_v21 = vadd.f32 %v5476_v44, %v16010_v62  ;;  %v16203_v38 = vadd.f32 %v15802_v14, %v16105_v20  ;;  %v5862_v43 = vmul.f32 %v15782_v4, %v5784_v23  ;;  %v5730_v3 = vadd.f32 %v15761_v33, %v5653_v7  ;;  %v18456_v62 = vld [vmem:[#allocation236_spill] sm:$0xff]  ;;  %6825 = vmatprep.subr.bf16.mxu1 %v9824_v34  ;;  %v18462_v34 = vld [vmem:[#allocation31_spill] sm:$0xff] }
 0x5ba   :  { %v5478_v37 = vpop.f32.mrf.mxu0  ;;  %v5594_v52 = vpop.f32.mrf.mxu1  ;;  %v9469_v10 = vpack.i.bf16 %v5929_v0, %v16169_v48  ;;  %v16209_v25 = vadd.f32 %v15794_v49, %v5853_v50  ;;  %v5632_v57 = vadd.f32 %v18456_v62, %v18455_v41  ;;  %v5788_v29 = vmax.f32 %v5728_v40, 0.0 }
 0x5bb   :  { %v5731_v20 = vadd.f32 %v15750_v39, %v5654_v30  ;;  %v5656_v6 = vadd.f32 %v5478_v37, %v18457_v47  ;;  %v5863_v23 = vmul.f32 %v15773_v53, %v5785_v18  ;;  %v5657_v56 = vadd.f32 %v5592_v24, %v18458_v63  ;;  %v18460_v37 = vld [vmem:[#allocation230_spill] sm:$0xff] }
 0x5bc   :  { %9465 = vrot.lane.b32.xlu1 %v9464_v11, %s10162_s5  ;;  %9470 = vrot.lane.b32.xlu0 %v9469_v10, %s10162_s5  ;;  %v5482_v50 = vpop.f32.mrf.mxu0  ;;  %v5597_v2 = vpop.f32.mrf.mxu1  ;;  %v5932_v40 = vadd.f32 %v15802_v14, %v5854_v32  ;;  %v5865_v30 = vmul.f32 %v15782_v4, %v5787_v54  ;;  %v5841_v16 = vmul.f32 %v15782_v4, %v5763_v35  ;;  %v5790_v11 = vmax.f32 %v5730_v3, 0.0  ;;  %v18459_v54 = vld [vmem:[#allocation61_spill] sm:$0xff] }
 0x5bd   :  { %v5733_v7 = vadd.f32 %v15761_v33, %v5656_v6  ;;  %v16226_v44 = vadd.f32 %v5482_v50, %v16036_v27  ;;  %v16233_v32 = vadd.f32 %v15794_v49, %v5862_v43  ;;  %v5633_v52 = vadd.f32 %v18460_v37, %v18459_v54 }
 0x5be   :  { %v5484_v18 = vpop.f32.mrf.mxu0  ;;  %v5599_v24 = vpop.f32.mrf.mxu1  ;;  %v9474_v0 = vpack.i.bf16 %v5932_v40, %v16209_v25  ;;  %v5866_v27 = vmul.f32 %v15773_v53, %v5788_v29  ;;  %v5791_v10 = vmax.f32 %v5731_v20, 0.0  ;;  %v5767_v58 = vmax.f32 %v16186_v28, 0.0 }
 0x5bf   :  { %v5659_v42 = vadd.f32 %v5484_v18, %v16048_v31  ;;  %v5734_v35 = vadd.f32 %v15750_v39, %v5657_v56  ;;  %v5660_v3 = vadd.f32 %v5597_v2, %v16040_v15  ;;  %v18461_v43 = vpack.i.bf16 %v16076_v12, %v16068_v36 }
 0x5c0   :  { %9475 = vrot.lane.b32.xlu1 %v9474_v0, %s10162_s5  ;;  %v5486_v41 = vpop.f32.mrf.mxu0  ;;  %v5600_v62 = vpop.f32.mrf.mxu1  ;;  %v5941_v29 = vadd.f32 %v15802_v14, %v5863_v23  ;;  %v5766_v20 = vmax.f32 %v16196_v61, 0.0  ;;  %v5709_v31 = vadd.f32 %v15761_v33, %v5632_v57  ;;  %v5793_v28 = vmax.f32 %v5733_v7, 0.0  ;;  %v18463_v7 = vld [vmem:[#allocation67_spill] sm:$0xff] }
 0x5c1   :  { %9480 = vrot.lane.b32.xlu0 %v18461_v43, %s10162_s5  ;;  %v16251_v47 = vadd.f32 %v15794_v49, %v5865_v30  ;;  %v5868_v15 = vmul.f32 %v15782_v4, %v5790_v11  ;;  %v5736_v6 = vadd.f32 %v15761_v33, %v5659_v42  ;;  %v16256_v63 = vadd.f32 %v5486_v41, %v18462_v34 }
 0x5c2   :  { %v5488_v12 = vpop.f32.mrf.mxu0  ;;  %v5602_v56 = vpop.f32.mrf.mxu1  ;;  %v9489_v50 = vpack.i.bf16 %v5941_v29, %v16233_v32  ;;  %v5710_v23 = vadd.f32 %v15750_v39, %v5633_v52  ;;  %v5869_v61 = vmul.f32 %v15773_v53, %v5791_v10  ;;  %v9499_v2 = vpack.i.bf16 %v16203_v38, %v16172_v26 }
 0x5c3   :  { %v5662_v57 = vadd.f32 %v5488_v12, %v16086_v46  ;;  %v5794_v40 = vmax.f32 %v5734_v35, 0.0  ;;  %v5737_v30 = vadd.f32 %v15750_v39, %v5660_v3  ;;  %v5663_v11 = vadd.f32 %v5600_v62, %v18463_v7  ;;  %v18464_v7 = vld [vmem:[#allocation33_spill] sm:$0xff] }
 0x5c4   :  { %9485 = vrot.lane.b32.xlu1 %v9484_v13, %s10162_s5  ;;  %v5944_v18 = vadd.f32 %v15802_v14, %v5866_v27  ;;  %v5844_v24 = vmul.f32 %v15782_v4, %v5766_v20  ;;  %v5769_v46 = vmax.f32 %v5709_v31, 0.0  ;;  %v5871_v0 = vmul.f32 %v15782_v4, %v5793_v28 }
 0x5c5   :  { %9490 = vrot.lane.b32.xlu0 %v9489_v50, %s10162_s5  ;;  %v16275_v38 = vadd.f32 %v15794_v49, %v5841_v16  ;;  %v5796_v54 = vmax.f32 %v5736_v6, 0.0  ;;  %v5739_v37 = vadd.f32 %v15761_v33, %v5662_v57  ;;  %v16280_v45 = vadd.f32 %v15794_v49, %v5868_v15 }
 0x5c6   :  { %v9494_v52 = vpack.i.bf16 %v5944_v18, %v16251_v47  ;;  %v5845_v13 = vmul.f32 %v15773_v53, %v5767_v58  ;;  %v5770_v10 = vmax.f32 %v5710_v23, 0.0  ;;  %v5920_v27 = vadd.f32 %v15802_v14, %v16180_v1 }
 0x5c7   :  { %v5872_v42 = vmul.f32 %v15773_v53, %v5794_v40  ;;  %v5797_v35 = vmax.f32 %v5737_v30, 0.0  ;;  %v5740_v16 = vadd.f32 %v15750_v39, %v5663_v11  ;;  %v5947_v33 = vadd.f32 %v15802_v14, %v5869_v61  ;;  %v18465_v11 = vld [vmem:[#allocation229_spill] sm:$0xff] }
 0x5c8   :  { %9495 = vrot.lane.b32.xlu1 %v9494_v52, %s10162_s5  ;;  %v5847_v3 = vmul.f32 %v15782_v4, %v5769_v46  ;;  %v9504_v43 = vpack.i.bf16 %v5920_v27, %v16275_v38  ;;  %v16293_v58 = vadd.f32 %v15794_v49, %v5844_v24  ;;  %v5874_v1 = vmul.f32 %v15782_v4, %v5796_v54  ;;  %v18466_v24 = vld [vmem:[#allocation65_spill] sm:$0xff]  ;;  %v18468_v54 = vld [vmem:[#allocation56_spill] sm:$0xff]  ;;  %v18469_v52 = vld [vmem:[#allocation55_spill] sm:$0xff] }
 0x5c9   :  { %9500 = vrot.lane.b32.xlu0 %v9499_v2, %s10162_s5  ;;  %v5799_v41 = vmax.f32 %v5739_v37, 0.0  ;;  %v9509_v62 = vpack.i.bf16 %v5947_v33, %v16280_v45  ;;  %v16298_v39 = vadd.f32 %v15794_v49, %v5871_v0  ;;  %v5923_v29 = vadd.f32 %v15802_v14, %v5845_v13  ;;  %v18467_v0 = vld [vmem:[#allocation228_spill] sm:$0xff]  ;;  %v18470_v13 = vld [vmem:[#allocation57_spill] sm:$0xff] }
 0x5ca   :  { %v5848_v20 = vmul.f32 %v15773_v53, %v5770_v10  ;;  %v5875_v31 = vmul.f32 %v15773_v53, %v5797_v35  ;;  %v5800_v28 = vmax.f32 %v5740_v16, 0.0  ;;  %v5950_v15 = vadd.f32 %v15802_v14, %v5872_v42  ;;  %v18471_v42 = vld [vmem:[#allocation226_spill] sm:$0xff]  ;;  %v18472_v16 = vld [vmem:[#allocation231_spill] sm:$0xff] }
 0x5cb   :  { %v9519_v6 = vpack.i.bf16 %v5923_v29, %v16293_v58  ;;  %v5877_v34 = vmul.f32 %v15782_v4, %v5799_v41  ;;  %v16310_v56 = vadd.f32 %v15794_v49, %v5847_v3  ;;  %v16313_v50 = vadd.f32 %v15794_v49, %v5874_v1 }
 0x5cc   :  { %9505 = vrot.lane.b32.xlu1 %v9504_v43, %s10162_s5  ;;  %v9514_v12 = vpack.i.bf16 %v5950_v15, %v16298_v39  ;;  %v5878_v23 = vmul.f32 %v15773_v53, %v5800_v28  ;;  %v5926_v61 = vadd.f32 %v15802_v14, %v5848_v20  ;;  %v5953_v57 = vadd.f32 %v15802_v14, %v5875_v31  ;;  %v18473_v43 = vld [vmem:[#allocation59_spill] sm:$0xff] }
 0x5cd   :  { %9510 = vrot.lane.b32.xlu0 %v9509_v62, %s10162_s5  ;;  %v16323_v40 = vadd.f32 %v15794_v49, %v5877_v34  ;;  %v16332_v18 = vrot.slane %v18465_v11, %v18464_v7  ;;  %v16346_v35 = vrot.slane %v18471_v42, %v18464_v7  ;;  %v18474_v20 = vld [vmem:[#allocation63_spill] sm:$0xff]  ;;  %v18476_v11 = vld [vmem:[#allocation238_spill] sm:$0xff] }
 0x5ce   :  { %v9524_v4 = vpack.i.bf16 %v5926_v61, %v16310_v56  ;;  %v9529_v2 = vpack.i.bf16 %v5953_v57, %v16313_v50  ;;  %v5956_v53 = vadd.f32 %v15802_v14, %v5878_v23 }
 0x5cf   :  { %v5681_v46 = vadd.f32 %v16332_v18, %v18466_v24  ;;  %v5684_v49 = vadd.f32 %v16332_v18, %v18467_v0  ;;  %v5687_v37 = vadd.f32 %v16332_v18, %v18468_v54  ;;  %v5690_v14 = vadd.f32 %v16332_v18, %v18469_v52 }
 0x5d0   :  { %9515 = vrot.lane.b32.xlu1 %v9514_v12, %s10162_s5  ;;  %v9534_v30 = vpack.i.bf16 %v5956_v53, %v16323_v40  ;;  %v5693_v10 = vadd.f32 %v16332_v18, %v18470_v13  ;;  %v5696_v33 = vadd.f32 %v16332_v18, %v18472_v16  ;;  %v5699_v1 = vadd.f32 %v16332_v18, %v18473_v43 }
 0x5d1   :  { %9520 = vrot.lane.b32.xlu0 %v9519_v6, %s10162_s5  ;;  %v5741_v27 = vmax.f32 %v5681_v46, 0.0  ;;  %v5744_v3 = vmax.f32 %v5684_v49, 0.0  ;;  %v5717_v41 = vadd.f32 %v16332_v18, %v16082_v8  ;;  %v5747_v62 = vmax.f32 %v5687_v37, 0.0  ;;  %v18475_v6 = vld [vmem:[#allocation74_spill] sm:$0xff] }
 0x5d2   :  { %v5750_v29 = vmax.f32 %v5690_v14, 0.0  ;;  %v5711_v31 = vadd.f32 %v16332_v18, %v18474_v20  ;;  %v5753_v28 = vmax.f32 %v5693_v10, 0.0  ;;  %v16359_v34 = vrot.slane %v18475_v6, %v18464_v7  ;;  %v18477_v6 = vld [vmem:[#allocation248_spill] sm:$0xff] }
 0x5d3   :  { %v5819_v15 = vmul.f32 %v16346_v35, %v5741_v27  ;;  %v5756_v12 = vmax.f32 %v5696_v33, 0.0  ;;  %v5822_v23 = vmul.f32 %v16346_v35, %v5744_v3  ;;  %v5759_v61 = vmax.f32 %v5699_v1, 0.0 }
 0x5d4   :  { %9525 = vrot.lane.b32.xlu1 %v9524_v4, %s10162_s5  ;;  %v5777_v57 = vmax.f32 %v5717_v41, 0.0  ;;  %v5720_v8 = vadd.f32 %v16332_v18, %v16114_v22  ;;  %v5828_v53 = vmul.f32 %v16346_v35, %v5750_v29  ;;  %v5714_v24 = vadd.f32 %v16332_v18, %v18476_v11 }
 0x5d5   :  { %9530 = vrot.lane.b32.xlu0 %v9529_v2, %s10162_s5  ;;  %v5825_v2 = vmul.f32 %v16346_v35, %v5747_v62  ;;  %v5831_v46 = vmul.f32 %v16346_v35, %v5753_v28  ;;  %v16370_v0 = vadd.f32 %v16359_v34, %v5819_v15  ;;  %v5834_v49 = vmul.f32 %v16346_v35, %v5756_v12 }
 0x5d6   :  { %v16374_v52 = vadd.f32 %v16359_v34, %v5822_v23  ;;  %v5837_v14 = vmul.f32 %v16346_v35, %v5759_v61  ;;  %v5855_v13 = vmul.f32 %v16346_v35, %v5777_v57  ;;  %v5780_v10 = vmax.f32 %v5720_v8, 0.0  ;;  %v18478_v61 = vld [vmem:[#allocation250_spill] sm:$0xff] }
 0x5d7   :  { %v5903_v27 = vadd.f32 %v16359_v34, %v5825_v2  ;;  %v5906_v42 = vadd.f32 %v16359_v34, %v5828_v53  ;;  %v5774_v33 = vmax.f32 %v5714_v24, 0.0  ;;  %v16382_v3 = vadd.f32 %v16359_v34, %v5831_v46 }
 0x5d8   :  { %9535 = vrot.lane.b32.xlu1 %v9534_v30, %s10162_s5  ;;  %v5771_v30 = vmax.f32 %v5711_v31, 0.0  ;;  %v5723_v43 = vadd.f32 %v16332_v18, %v16129_v51  ;;  %v16387_v29 = vadd.f32 %v16359_v34, %v5834_v49  ;;  %v16391_v15 = vadd.f32 %v16359_v34, %v5837_v14 }
 0x5d9   :  { %v16395_v12 = vadd.f32 %v16332_v18, %v18477_v6  ;;  %v5933_v23 = vadd.f32 %v16359_v34, %v5855_v13  ;;  %v5858_v51 = vmul.f32 %v16346_v35, %v5780_v10  ;;  %v16401_v57 = vadd.f32 %v16332_v18, %v18478_v61 }
 0x5da   :  { %v5849_v16 = vmul.f32 %v16346_v35, %v5771_v30  ;;  %v5783_v53 = vmax.f32 %v5723_v43, 0.0  ;;  %v18479_v43 = vld [vmem:[#allocation58_spill] sm:$0xff] }
 0x5db   :  { %v5936_v10 = vadd.f32 %v16359_v34, %v5858_v51 }
 0x5dc   :  { %v16404_v8 = vadd.f32 %v16359_v34, %v5849_v16  ;;  %v16413_v16 = vadd.f32 %v16332_v18, %v16149_v9 }
 0x5fd   :  { %v9441_v4 = vpop.permute.xlu0 %9440 }
 0x5fe   :  { %v9443_v54 = vunpack.i.h.bf16 %v9441_v4  ;;  %v9442_v37 = vunpack.i.l.bf16 %v9441_v4  ;;  %v5852_v4 = vmul.f32 %v16346_v35, %v5774_v33 }
 0x600   :  { %v6020_v20 = vsel %vm6017_vm4, %v9442_v37, %v9443_v54 }
 0x601   :  { %v9446_v22 = vpop.permute.xlu1 %9445  ;;  %v6052_v30 = vmax.f32 %v5903_v27, %v6020_v20  ;;  %v6053_v27 = vmax.f32 %v18479_v43, %v9443_v54  ;;  %v18480_v20 = vld [vmem:[#allocation76_spill] sm:$0xff] }
 0x602   :  { %v9448_v1 = vunpack.i.h.bf16 %v9446_v22  ;;  %v9447_v41 = vunpack.i.l.bf16 %v9446_v22 }
 0x604   :  { %v6021_v11 = vsel %vm6017_vm4, %v9447_v41, %v9448_v1  ;;  %v6055_v41 = vmax.f32 %v18480_v20, %v9448_v1  ;;  %v9822_v20 = vld [vmem:[#allocation4 + $0xe8] ss:$16 sps:$4 sm:$0xff]  }
 0x626   :  { %v9451_v62 = vpop.permute.xlu0 %9450 }
 0x627   :  { %v9453_v31 = vunpack.i.h.bf16 %v9451_v62  ;;  %v9452_v28 = vunpack.i.l.bf16 %v9451_v62 }
 0x629   :  { %v6130_v2 = vsel %vm6017_vm4, %v9452_v28, %v9453_v31  ;;  %v6163_v37 = vmax.f32 %v16138_v60, %v9453_v31  ;;  %v16420_v60 = vadd.f32 %v16359_v34, %v5852_v4  ;;  %v6054_v31 = vmax.f32 %v5906_v42, %v6021_v11  ;;  %v9819_v11 = vld [vmem:[#allocation4 + $0xe0] ss:$16 sps:$4 sm:$0xff]  }
 0x62a   :  { %v6162_v24 = vmax.f32 %v5933_v23, %v6130_v2  ;;  %v9456_v46 = vpop.permute.xlu1 %9455  ;;  %v9461_v49 = vpop.permute.xlu0 %9460 }
 0x62b   :  { %v9458_v22 = vunpack.i.h.bf16 %v9456_v46  ;;  %v9457_v14 = vunpack.i.l.bf16 %v9456_v46  ;;  %v9463_v13 = vunpack.i.h.bf16 %v9461_v49  ;;  %v9462_v62 = vunpack.i.l.bf16 %v9461_v49 }
 0x62c   :  { %v6182_v33 = vmax.f32 %v6052_v30, %v6162_v24  ;;  %v6183_v2 = vmax.f32 %v6053_v27, %v6163_v37 }
 0x62d   :  { %v6165_v28 = vmax.f32 %v16162_v17, %v9458_v22  ;;  %v6131_v6 = vsel %vm6017_vm4, %v9457_v14, %v9458_v22  ;;  %v6018_v51 = vsel %vm6017_vm4, %v9462_v62, %v9463_v13  ;;  %v5861_v17 = vmul.f32 %v16346_v35, %v5783_v53 }
 0x62e   :  { %v6164_v23 = vmax.f32 %v5936_v10, %v6131_v6  ;;  %v9466_v61 = vpop.permute.xlu1 %9465  ;;  %v9471_v9 = vpop.permute.xlu0 %9470  ;;  %v5786_v22 = vmax.f32 %v16413_v16, 0.0  ;;  %v6048_v4 = vmax.f32 %v16370_v0, %v6018_v51  ;;  %v16439_v6 = vadd.f32 %v16332_v18, %v16199_v21 }
 0x62f   :  { %v6185_v30 = vmax.f32 %v6055_v41, %v6165_v28  ;;  %v9468_v24 = vunpack.i.h.bf16 %v9466_v61  ;;  %v9467_v46 = vunpack.i.l.bf16 %v9466_v61  ;;  %v9473_v49 = vunpack.i.h.bf16 %v9471_v9  ;;  %v9827_v41 = vld [vmem:[#allocation4 + $0xc4] ss:$16 sps:$4 sm:$0xff]  }
 0x630   :  { %v6184_v54 = vmax.f32 %v6054_v31, %v6164_v23  ;;  %v9472_v1 = vunpack.i.l.bf16 %v9471_v9  ;;  %v6049_v31 = vmax.f32 %v16055_v55, %v9463_v13 }
 0x631   :  { %v6201_v42 = vpack.c.bf16 %v6185_v30, %v6183_v2  ;;  %v6019_v10 = vsel %vm6017_vm4, %v9467_v46, %v9468_v24  ;;  %v6159_v37 = vmax.f32 %v16169_v48, %v9473_v49  ;;  %v5729_v48 = vadd.f32 %v16332_v18, %v16176_v5  ;;  %v9825_v2 = vld [vmem:[#allocation4 + $0xc0] ss:$16 sps:$4 sm:$0xff]  }
 0x632   :  { %v6200_v14 = vpack.c.bf16 %v6184_v54, %v6182_v33  ;;  %v6128_v62 = vsel %vm6017_vm4, %v9472_v1, %v9473_v49  ;;  %v9476_v43 = vpop.permute.xlu1 %9475  ;;  %v9830_v33 = vld [vmem:[#allocation4 + $0xcc] ss:$16 sps:$4 sm:$0xff]   ;;  %v6051_v23 = vmax.f32 %v16058_v59, %v9468_v24  ;;  %v5762_v5 = vmax.f32 %v16395_v12, 0.0  ;;  %v9828_v59 = vld [vmem:[#allocation4 + $0xc8] ss:$16 sps:$4 sm:$0xff]  }
 0x633   :  { %v16429_v27 = vpop.permute.xlu0 %9480  ;;  %v6158_v53 = vmax.f32 %v16404_v8, %v6128_v62  ;;  %v9478_v28 = vunpack.i.h.bf16 %v9476_v43  ;;  %v9477_v16 = vunpack.i.l.bf16 %v9476_v43  ;;  %8851 = vmatprep.mubr.msk.bf16.mxu0 %vm6489_vm5, %v6201_v42  ;;  %8852 = vmatprep.mubr.msk.bf16.mxu1 %vm6489_vm5, %v6201_v42  ;;  %v6050_v21 = vmax.f32 %v16374_v52, %v6019_v10  ;;  %v9833_v52 = vld [vmem:[#allocation4 + $0xa4] ss:$16 sps:$4 sm:$0xff]   ;;  %v9836_v42 = vld [vmem:[#allocation4 + $0xac] ss:$16 sps:$4 sm:$0xff]  }
 0x634   :  { %v9483_v0 = vunpack.i.h.bf16 %v16429_v27  ;;  %v9482_v8 = vunpack.i.l.bf16 %v16429_v27  ;;  %6526 = vmatmul.mubr.bf16.vlgmr.msra.gmra.mxu0 %v6200_v14  ;;  %6569 = vmatmul.mubr.bf16.vlgmr.msra.gmra.mxu1 %v6200_v14  ;;  %v6179_v30 = vmax.f32 %v6049_v31, %v6159_v37  ;;  %v5789_v14 = vmax.f32 %v5729_v48, 0.0  ;;  %v9831_v37 = vld [vmem:[#allocation4 + $0xa0] ss:$16 sps:$4 sm:$0xff]   ;;  %v9842_v31 = vld [vmem:[#allocation4 + $0x8c] ss:$16 sps:$4 sm:$0xff]  }
 0x635   :  { %v6178_v51 = vmax.f32 %v6048_v4, %v6158_v53  ;;  %v6161_v61 = vmax.f32 %v16209_v25, %v9478_v28  ;;  %v6129_v9 = vsel %vm6017_vm4, %v9477_v16, %v9478_v28  ;;  %6783 = vmatpush1.bf16.msra.mxu0 %v9819_v11  ;;  %6826 = vmatpush1.bf16.msra.mxu1 %v9822_v20  ;;  %v5792_v10 = vmax.f32 %v16439_v6, 0.0  ;;  %v9834_v28 = vld [vmem:[#allocation4 + $0xa8] ss:$16 sps:$4 sm:$0xff]   ;;  %v9839_v16 = vld [vmem:[#allocation4 + $0x84] ss:$16 sps:$4 sm:$0xff]  }
 0x636   :  { %v6160_v55 = vmax.f32 %v16420_v60, %v6129_v9  ;;  %v16449_v13 = vpop.permute.xlu1 %9485  ;;  %6784 = vmatprep.subr.bf16.mxu0 %v9827_v41  ;;  %v6022_v25 = vsel %vm6017_vm4, %v9482_v8, %v9483_v0  ;;  %6827 = vmatprep.subr.bf16.mxu1 %v9830_v33  ;;  %v5864_v60 = vmul.f32 %v16346_v35, %v5786_v22  ;;  %v5765_v8 = vmax.f32 %v16401_v57, 0.0  ;;  %v9893_v27 = vld [vmem:[#allocation4 + $0x324] ss:$16 sps:$4 sm:$0xff]  }
 0x637   :  { %v16451_v46 = vpop.permute.xlu0 %9490  ;;  %v6181_v24 = vmax.f32 %v6051_v23, %v6161_v61  ;;  %v9488_v54 = vunpack.i.h.bf16 %v16449_v13  ;;  %v9487_v12 = vunpack.i.l.bf16 %v16449_v13  ;;  %v5939_v11 = vadd.f32 %v16359_v34, %v5861_v17  ;;  %v18481_v23 = vld [vmem:[#allocation60_spill] sm:$0xff] }
 0x638   :  { %v6180_v49 = vmax.f32 %v6050_v21, %v6160_v55  ;;  %v9493_v1 = vunpack.i.h.bf16 %v16451_v46  ;;  %v9492_v4 = vunpack.i.l.bf16 %v16451_v46  ;;  %v6056_v20 = vmax.f32 %v16382_v3, %v6022_v25  ;;  %v9837_v55 = vld [vmem:[#allocation4 + $0x80] ss:$16 sps:$4 sm:$0xff]   ;;  %v9887_v46 = vld [vmem:[#allocation4 + $0x344] ss:$16 sps:$4 sm:$0xff]  }
 0x639   :  { %6785 = vmatpush1.bf16.msra.mxu0 %v9825_v2  ;;  %v6199_v62 = vpack.c.bf16 %v6181_v24, %v6179_v30  ;;  %v6023_v22 = vsel %vm6017_vm4, %v9487_v12, %v9488_v54  ;;  %6828 = vmatpush1.bf16.msra.mxu1 %v9828_v59  ;;  %v5942_v61 = vadd.f32 %v16359_v34, %v5864_v60  ;;  %v9840_v60 = vld [vmem:[#allocation4 + $0x88] ss:$16 sps:$4 sm:$0xff]  }
 0x63a   :  { %v16463_v43 = vpack.c.bf16 %v6180_v49, %v6178_v51  ;;  %v6132_v41 = vsel %vm6017_vm4, %v9492_v4, %v9493_v1  ;;  %v16472_v17 = vpop.permute.xlu1 %9495  ;;  %6786 = vmatprep.subr.bf16.mxu0 %v9833_v52  ;;  %v16483_v51 = vadd.f32 %v16332_v18, %v18481_v23  ;;  %6829 = vmatprep.subr.bf16.mxu1 %v9836_v42  ;;  %v9848_v42 = vld [vmem:[#allocation4 + $0x6c] ss:$16 sps:$4 sm:$0xff]   ;;  %v9851_v23 = vld [vmem:[#allocation4 + $0x44] ss:$16 sps:$4 sm:$0xff]  }
 0x63b   :  { %v16474_v53 = vpop.permute.xlu0 %9500  ;;  %v6166_v33 = vmax.f32 %v5939_v11, %v6132_v41  ;;  %v9498_v48 = vunpack.i.h.bf16 %v16472_v17  ;;  %v9497_v3 = vunpack.i.l.bf16 %v16472_v17  ;;  %8893 = vmatprep.mubr.msk.bf16.mxu0 %vm6489_vm5, %v6199_v62  ;;  %8894 = vmatprep.mubr.msk.bf16.mxu1 %vm6489_vm5, %v6199_v62  ;;  %v5867_v2 = vmul.f32 %v16346_v35, %v5789_v14 }
 0x63c   :  { %v9503_v6 = vunpack.i.h.bf16 %v16474_v53  ;;  %v9502_v9 = vunpack.i.l.bf16 %v16474_v53  ;;  %v5735_v21 = vadd.f32 %v16332_v18, %v16226_v44  ;;  %v5840_v59 = vmul.f32 %v16346_v35, %v5762_v5  ;;  %v9953_v53 = vld [vmem:[#allocation4 + $0x464] ss:$16 sps:$4 sm:$0xff]  }
 0x63d   :  { %v6186_v30 = vmax.f32 %v6056_v20, %v6166_v33  ;;  %v6133_v57 = vsel %vm6017_vm4, %v9497_v3, %v9498_v48  ;;  %6787 = vmatpush1.bf16.msra.mxu0 %v9831_v37  ;;  %v6058_v24 = vmax.f32 %v16387_v29, %v6023_v22  ;;  %6830 = vmatpush1.bf16.msra.mxu1 %v9834_v28  ;;  %v9845_v29 = vld [vmem:[#allocation4 + $0x64] ss:$16 sps:$4 sm:$0xff]   ;;  %v5768_v20 = vmax.f32 %v16483_v51, 0.0  ;;  %v9843_v28 = vld [vmem:[#allocation4 + $0x60] ss:$16 sps:$4 sm:$0xff]  }
 0x63e   :  { %v6168_v25 = vmax.f32 %v5942_v61, %v6133_v57  ;;  %v16496_v12 = vpop.permute.xlu1 %9505  ;;  %6788 = vmatprep.subr.bf16.mxu0 %v9839_v16  ;;  %v5870_v44 = vmul.f32 %v16346_v35, %v5792_v10  ;;  %v6024_v49 = vsel %vm6017_vm4, %v9502_v9, %v9503_v6  ;;  %6831 = vmatprep.subr.bf16.mxu1 %v9842_v31  ;;  %v5795_v41 = vmax.f32 %v5735_v21, 0.0 }
 0x63f   :  { %v16498_v52 = vpop.permute.xlu0 %9510  ;;  %v9508_v4 = vunpack.i.h.bf16 %v16496_v12  ;;  %v9507_v5 = vunpack.i.l.bf16 %v16496_v12  ;;  %v5738_v11 = vadd.f32 %v16332_v18, %v16256_v63  ;;  %v5843_v10 = vmul.f32 %v16346_v35, %v5765_v8  ;;  %v9846_v8 = vld [vmem:[#allocation4 + $0x68] ss:$16 sps:$4 sm:$0xff]  }
 0x640   :  { %v6188_v14 = vmax.f32 %v6058_v24, %v6168_v25  ;;  %v9513_v37 = vunpack.i.h.bf16 %v16498_v52  ;;  %v9512_v62 = vunpack.i.l.bf16 %v16498_v52  ;;  %v5945_v22 = vadd.f32 %v16359_v34, %v5867_v2  ;;  %v9854_v2 = vld [vmem:[#allocation4 + $0x4c] ss:$16 sps:$4 sm:$0xff]   ;;  %v9947_v52 = vld [vmem:[#allocation4 + $0x484] ss:$16 sps:$4 sm:$0xff]  }
 0x641   :  { %6789 = vmatpush1.bf16.msra.mxu0 %v9837_v55  ;;  %v6060_v33 = vmax.f32 %v16391_v15, %v6024_v49  ;;  %v6025_v63 = vsel %vm6017_vm4, %v9507_v5, %v9508_v4  ;;  %6832 = vmatpush1.bf16.msra.mxu1 %v9840_v60  ;;  %v5918_v21 = vadd.f32 %v16359_v34, %v5840_v59  ;;  %v5798_v57 = vmax.f32 %v5738_v11, 0.0  ;;  %v9849_v49 = vld [vmem:[#allocation4 + $0x40] ss:$16 sps:$4 sm:$0xff]   ;;  %v9852_v11 = vld [vmem:[#allocation4 + $0x48] ss:$16 sps:$4 sm:$0xff]  }
 0x642   :  { %v16513_v16 = vpack.c.bf16 %v6188_v14, %v6186_v30  ;;  %v6134_v18 = vsel %vm6017_vm4, %v9512_v62, %v9513_v37  ;;  %v16522_v3 = vpop.permute.xlu1 %9515  ;;  %6790 = vmatprep.subr.bf16.mxu0 %v9845_v29  ;;  %6833 = vmatprep.subr.bf16.mxu1 %v9848_v42  ;;  %v5948_v30 = vadd.f32 %v16359_v34, %v5870_v44 }
 0x643   :  { %v16524_v31 = vpop.permute.xlu0 %9520  ;;  %v6170_v51 = vmax.f32 %v5945_v22, %v6134_v18  ;;  %v9518_v61 = vunpack.i.h.bf16 %v16522_v3  ;;  %v9517_v15 = vunpack.i.l.bf16 %v16522_v3  ;;  %v5873_v24 = vmul.f32 %v16346_v35, %v5795_v41 }
 0x644   :  { %v9523_v9 = vunpack.i.h.bf16 %v16524_v31  ;;  %v9522_v55 = vunpack.i.l.bf16 %v16524_v31  ;;  %v5921_v5 = vadd.f32 %v16359_v34, %v5843_v10  ;;  %v6062_v29 = vmax.f32 %v5918_v21, %v6025_v63  ;;  %v9857_v10 = vld [vmem:[#allocation4 + $0x24] ss:$16 sps:$4 sm:$0xff]  }
 0x645   :  { %v6190_v25 = vmax.f32 %v6060_v33, %v6170_v51  ;;  %v6135_v60 = vsel %vm6017_vm4, %v9517_v15, %v9518_v61  ;;  %6791 = vmatpush1.bf16.msra.mxu0 %v9843_v28  ;;  %6834 = vmatpush1.bf16.msra.mxu1 %v9846_v8  ;;  %v5846_v14 = vmul.f32 %v16346_v35, %v5768_v20  ;;  %v9860_v28 = vld [vmem:[#allocation4 + $0x2c] ss:$16 sps:$4 sm:$0xff]   ;;  %v10013_v31 = vld [vmem:[#allocation4 + $0x5a4] ss:$16 sps:$4 sm:$0xff]  }
 0x646   :  { %v6172_v42 = vmax.f32 %v5948_v30, %v6135_v60  ;;  %v16537_v59 = vpop.permute.xlu1 %9525  ;;  %6792 = vmatprep.subr.bf16.mxu0 %v9851_v23  ;;  %v6026_v62 = vsel %vm6017_vm4, %v9522_v55, %v9523_v9  ;;  %6835 = vmatprep.subr.bf16.mxu1 %v9854_v2  ;;  %v5876_v33 = vmul.f32 %v16346_v35, %v5798_v57  ;;  %v9855_v23 = vld [vmem:[#allocation4 + $0x20] ss:$16 sps:$4 sm:$0xff]   ;;  %v9858_v35 = vld [vmem:[#allocation4 + $0x28] ss:$16 sps:$4 sm:$0xff]   ;;  %v9863_v30 = vld [vmem:[#allocation4 + $0x4] ss:$16 sps:$4 sm:$0xff]  }
 0x647   :  { %v16539_v44 = vpop.permute.xlu0 %9530  ;;  %v9528_v22 = vunpack.i.h.bf16 %v16537_v59  ;;  %v9527_v41 = vunpack.i.l.bf16 %v16537_v59  ;;  %v5951_v20 = vadd.f32 %v16359_v34, %v5873_v24  ;;  %v6064_v15 = vmax.f32 %v5921_v5, %v6026_v62  ;;  %v9866_v60 = vld [vmem:[#allocation4 + $0xc] ss:$16 sps:$4 sm:$0xff]  }
 0x648   :  { %v6192_v63 = vmax.f32 %v6062_v29, %v6172_v42  ;;  %v9533_v18 = vunpack.i.h.bf16 %v16539_v44  ;;  %v9532_v8 = vunpack.i.l.bf16 %v16539_v44  ;;  %v5954_v5 = vadd.f32 %v16359_v34, %v5876_v33  ;;  %v9875_v33 = vld [vmem:[#allocation4 + $0x104] ss:$16 sps:$4 sm:$0xff]  }
 0x649   :  { %6793 = vmatpush1.bf16.msra.mxu0 %v9849_v49  ;;  %6836 = vmatpush1.bf16.msra.mxu1 %v9852_v11  ;;  %v6027_v57 = vsel %vm6017_vm4, %v9527_v41, %v9528_v22  ;;  %v5924_v49 = vadd.f32 %v16359_v34, %v5846_v14  ;;  %v9861_v11 = vld [vmem:[#allocation4] ss:$16 sps:$4 sm:$0xff]   ;;  %v9870_v34 = vld [vmem:[#allocation4 + $0x128] ss:$16 sps:$4 sm:$0xff]   ;;  %v10007_v44 = vld [vmem:[#allocation4 + $0x5c4] ss:$16 sps:$4 sm:$0xff]  }
 0x64a   :  { %v16551_v51 = vpack.c.bf16 %v6192_v63, %v6190_v25  ;;  %v6136_v2 = vsel %vm6017_vm4, %v9532_v8, %v9533_v18  ;;  %v16556_v21 = vpop.permute.xlu1 %9535  ;;  %6794 = vmatprep.subr.bf16.mxu0 %v9857_v10  ;;  %6837 = vmatprep.subr.bf16.mxu1 %v9860_v28  ;;  %v9864_v63 = vld [vmem:[#allocation4 + $0x8] ss:$16 sps:$4 sm:$0xff]   ;;  %v9869_v8 = vld [vmem:[#allocation4 + $0x124] ss:$16 sps:$4 sm:$0xff]   ;;  %v9872_v10 = vld [vmem:[#allocation4 + $0x12c] ss:$16 sps:$4 sm:$0xff]  }
 0x64b   :  { %v6174_v55 = vmax.f32 %v5951_v20, %v6136_v2  ;;  %v9538_v24 = vunpack.i.h.bf16 %v16556_v21  ;;  %v9537_v25 = vunpack.i.l.bf16 %v16556_v21  ;;  %v6066_v62 = vmax.f32 %v5924_v49, %v6027_v57  ;;  %v9867_v14 = vld [vmem:[#allocation4 + $0x120] ss:$16 sps:$4 sm:$0xff]   ;;  %v9876_v57 = vld [vmem:[#allocation4 + $0x108] ss:$16 sps:$4 sm:$0xff]  }
 0x64c   :  { %v9873_v2 = vld [vmem:[#allocation4 + $0x100] ss:$16 sps:$4 sm:$0xff]   ;;  %v9894_v49 = vld [vmem:[#allocation4 + $0x328] ss:$16 sps:$4 sm:$0xff]  }
 0x64d   :  { %v6194_v29 = vmax.f32 %v6064_v15, %v6174_v55  ;;  %v6137_v42 = vsel %vm6017_vm4, %v9537_v25, %v9538_v24  ;;  %6795 = vmatpush1.bf16.msra.mxu0 %v9855_v23  ;;  %6838 = vmatpush1.bf16.msra.mxu1 %v9858_v35  ;;  %v9878_v23 = vld [vmem:[#allocation4 + $0x10c] ss:$16 sps:$4 sm:$0xff]   ;;  %v6169_v15 = vmax.f32 %v16251_v47, %v9498_v48  ;;  %v9881_v55 = vld [vmem:[#allocation4 + $0x364] ss:$16 sps:$4 sm:$0xff]   ;;  %v9879_v48 = vld [vmem:[#allocation4 + $0x360] ss:$16 sps:$4 sm:$0xff]  }
 0x64e   :  { %v6176_v41 = vmax.f32 %v5954_v5, %v6137_v42  ;;  %6796 = vmatprep.subr.bf16.mxu0 %v9863_v30  ;;  %6839 = vmatprep.subr.bf16.mxu1 %v9866_v60  ;;  %v6059_v35 = vmax.f32 %v16102_v19, %v9488_v54  ;;  %v6167_v30 = vmax.f32 %v16233_v32, %v9493_v1  ;;  %v9884_v25 = vld [vmem:[#allocation4 + $0x36c] ss:$16 sps:$4 sm:$0xff]   ;;  %v9882_v19 = vld [vmem:[#allocation4 + $0x368] ss:$16 sps:$4 sm:$0xff]   ;;  %v9885_v1 = vld [vmem:[#allocation4 + $0x340] ss:$16 sps:$4 sm:$0xff]  }
 0x64f   :  { %v6057_v47 = vmax.f32 %v16068_v36, %v9483_v0  ;;  %v9890_v54 = vld [vmem:[#allocation4 + $0x34c] ss:$16 sps:$4 sm:$0xff]   ;;  %v9888_v36 = vld [vmem:[#allocation4 + $0x348] ss:$16 sps:$4 sm:$0xff]   ;;  %v9891_v60 = vld [vmem:[#allocation4 + $0x320] ss:$16 sps:$4 sm:$0xff]  }
 0x650   :  { %v6196_v28 = vmax.f32 %v6066_v62, %v6176_v41  ;;  %v6189_v17 = vmax.f32 %v6059_v35, %v6169_v15  ;;  %v9896_v0 = vld [vmem:[#allocation4 + $0x32c] ss:$16 sps:$4 sm:$0xff]   ;;  %v9899_v5 = vld [vmem:[#allocation4 + $0x304] ss:$16 sps:$4 sm:$0xff]   ;;  %v9900_v42 = vld [vmem:[#allocation4 + $0x308] ss:$16 sps:$4 sm:$0xff]  }
 0x651   :  { %6797 = vmatpush1.bf16.msra.mxu0 %v9861_v11  ;;  %6840 = vmatpush1.bf16.msra.mxu1 %v9864_v63  ;;  %v6187_v13 = vmax.f32 %v6057_v47, %v6167_v30  ;;  %v9905_v11 = vld [vmem:[#allocation4 + $0x2e4] ss:$16 sps:$4 sm:$0xff]   ;;  %v9908_v62 = vld [vmem:[#allocation4 + $0x2ec] ss:$16 sps:$4 sm:$0xff]   ;;  %v9903_v41 = vld [vmem:[#allocation4 + $0x2e0] ss:$16 sps:$4 sm:$0xff]  }
 0x652   :  { %v16568_v20 = vpack.c.bf16 %v6196_v28, %v6194_v29  ;;  %6810 = vmatprep.subr.bf16.mxu0 %v9869_v8  ;;  %6853 = vmatprep.subr.bf16.mxu1 %v9872_v10  ;;  %v9897_v29 = vld [vmem:[#allocation4 + $0x300] ss:$16 sps:$4 sm:$0xff]   ;;  %v9906_v63 = vld [vmem:[#allocation4 + $0x2e8] ss:$16 sps:$4 sm:$0xff]   ;;  %v9911_v8 = vld [vmem:[#allocation4 + $0x2c4] ss:$16 sps:$4 sm:$0xff]  }
 0x653   :  { %v6203_v32 = vpack.c.bf16 %v6189_v17, %v6187_v13  ;;  %v9914_v10 = vld [vmem:[#allocation4 + $0x2cc] ss:$16 sps:$4 sm:$0xff]   ;;  %v9909_v28 = vld [vmem:[#allocation4 + $0x2c0] ss:$16 sps:$4 sm:$0xff]   ;;  %v9918_v15 = vld [vmem:[#allocation4 + $0x2a8] ss:$16 sps:$4 sm:$0xff]  }
 0x654   :  { %v9926_v35 = vld [vmem:[#allocation4 + $0x28c] ss:$16 sps:$4 sm:$0xff]   ;;  %v9921_v30 = vld [vmem:[#allocation4 + $0x280] ss:$16 sps:$4 sm:$0xff]   ;;  %v9930_v17 = vld [vmem:[#allocation4 + $0x3a8] ss:$16 sps:$4 sm:$0xff]  }
 0x655   :  { %6811 = vmatpush2.bf16.msra.mxu0 %v9867_v14  ;;  %6854 = vmatpush2.bf16.msra.mxu1 %v9870_v34  ;;  %v9912_v14 = vld [vmem:[#allocation4 + $0x2c8] ss:$16 sps:$4 sm:$0xff]   ;;  %v9917_v34 = vld [vmem:[#allocation4 + $0x2a4] ss:$16 sps:$4 sm:$0xff]   ;;  %v9927_v47 = vld [vmem:[#allocation4 + $0x3a0] ss:$16 sps:$4 sm:$0xff]  }
 0x656   :  { %6812 = vmatprep.subr.bf16.mxu0 %v9875_v33  ;;  %6855 = vmatprep.subr.bf16.mxu1 %v9878_v23  ;;  %v9920_v33 = vld [vmem:[#allocation4 + $0x2ac] ss:$16 sps:$4 sm:$0xff]   ;;  %v9915_v23 = vld [vmem:[#allocation4 + $0x2a0] ss:$16 sps:$4 sm:$0xff]  }
 0x657   :  { %v9938_v13 = vld [vmem:[#allocation4 + $0x38c] ss:$16 sps:$4 sm:$0xff]  }
 0x659   :  { %6813 = vmatpush2.bf16.msra.mxu0 %v9873_v2  ;;  %6856 = vmatpush2.bf16.msra.mxu1 %v9876_v57  ;;  %v9923_v2 = vld [vmem:[#allocation4 + $0x284] ss:$16 sps:$4 sm:$0xff]   ;;  %v9924_v57 = vld [vmem:[#allocation4 + $0x288] ss:$16 sps:$4 sm:$0xff]  }
 0x65a   :  { %7112 = vmatprep.subr.bf16.mxu0 %v9881_v55  ;;  %7155 = vmatprep.subr.bf16.mxu1 %v9884_v25  ;;  %v9929_v55 = vld [vmem:[#allocation4 + $0x3a4] ss:$16 sps:$4 sm:$0xff]   ;;  %v9932_v25 = vld [vmem:[#allocation4 + $0x3ac] ss:$16 sps:$4 sm:$0xff]  }
 0x65c   :  { %6815 = vmatmul.mubr.bf16.vlgmr.msra.gmra.mxu0 %v16463_v43  ;;  %6858 = vmatmul.mubr.bf16.vlgmr.msra.gmra.mxu1 %v16463_v43  ;;  %v9902_v43 = vld [vmem:[#allocation4 + $0x30c] ss:$16 sps:$4 sm:$0xff]  }
 0x65d   :  { %7113 = vmatpush1.bf16.msra.mxu0 %v9879_v48  ;;  %8935 = vmatprep.mubr.msk.bf16.mxu0 %vm6489_vm5, %v6203_v32  ;;  %v9935_v48 = vld [vmem:[#allocation4 + $0x384] ss:$16 sps:$4 sm:$0xff]  }
 0x65e   :  { %7156 = vmatpush1.bf16.msra.mxu1 %v9882_v19  ;;  %8936 = vmatprep.mubr.msk.bf16.mxu1 %vm6489_vm5, %v6203_v32  ;;  %v6173_v19 = vmax.f32 %v16298_v39, %v9518_v61  ;;  %v6063_v32 = vmax.f32 %v16275_v38, %v9508_v4  ;;  %v6061_v39 = vmax.f32 %v16172_v26, %v9503_v6  ;;  %v9939_v61 = vld [vmem:[#allocation4 + $0x4a0] ss:$16 sps:$4 sm:$0xff]   ;;  %v9942_v38 = vld [vmem:[#allocation4 + $0x4a8] ss:$16 sps:$4 sm:$0xff]   ;;  %v9950_v4 = vld [vmem:[#allocation4 + $0x48c] ss:$16 sps:$4 sm:$0xff]  }
 0x65f   :  { %7114 = vmatprep.subr.bf16.mxu0 %v9887_v46  ;;  %7157 = vmatprep.subr.bf16.mxu1 %v9890_v54  ;;  %v9933_v46 = vld [vmem:[#allocation4 + $0x380] ss:$16 sps:$4 sm:$0xff]   ;;  %v6171_v54 = vmax.f32 %v16280_v45, %v9513_v37  ;;  %v9948_v26 = vld [vmem:[#allocation4 + $0x488] ss:$16 sps:$4 sm:$0xff]   ;;  %v9956_v6 = vld [vmem:[#allocation4 + $0x46c] ss:$16 sps:$4 sm:$0xff]  }
 0x660   :  { %v6193_v3 = vmax.f32 %v6063_v32, %v6173_v19  ;;  %v9945_v37 = vld [vmem:[#allocation4 + $0x480] ss:$16 sps:$4 sm:$0xff]   ;;  %v6067_v19 = vmax.f32 %v16310_v56, %v9528_v22  ;;  %v9996_v32 = vld [vmem:[#allocation4 + $0x4c8] ss:$16 sps:$4 sm:$0xff]   ;;  %v10010_v22 = vld [vmem:[#allocation4 + $0x5cc] ss:$16 sps:$4 sm:$0xff]  }
 0x661   :  { %7115 = vmatpush1.bf16.msra.mxu0 %v9885_v1  ;;  %v9936_v1 = vld [vmem:[#allocation4 + $0x388] ss:$16 sps:$4 sm:$0xff]   ;;  %v6191_v12 = vmax.f32 %v6061_v39, %v6171_v54  ;;  %v10001_v54 = vld [vmem:[#allocation4 + $0x5e4] ss:$16 sps:$4 sm:$0xff]  }
 0x662   :  { %7158 = vmatpush1.bf16.msra.mxu1 %v9888_v36  ;;  %7116 = vmatprep.subr.bf16.mxu0 %v9893_v27  ;;  %v9941_v36 = vld [vmem:[#allocation4 + $0x4a4] ss:$16 sps:$4 sm:$0xff]   ;;  %v9944_v27 = vld [vmem:[#allocation4 + $0x4ac] ss:$16 sps:$4 sm:$0xff]   ;;  %v10002_v56 = vld [vmem:[#allocation4 + $0x5e8] ss:$16 sps:$4 sm:$0xff]  }
 0x663   :  { %7159 = vmatprep.subr.bf16.mxu1 %v9896_v0  ;;  %v6205_v45 = vpack.c.bf16 %v6193_v3, %v6191_v12  ;;  %v9951_v0 = vld [vmem:[#allocation4 + $0x460] ss:$16 sps:$4 sm:$0xff]   ;;  %v10019_v39 = vld [vmem:[#allocation4 + $0x584] ss:$16 sps:$4 sm:$0xff]  }
 0x664   :  { %v10017_v3 = vld [vmem:[#allocation4 + $0x580] ss:$16 sps:$4 sm:$0xff]   ;;  %v10025_v12 = vld [vmem:[#allocation4 + $0x564] ss:$16 sps:$4 sm:$0xff]  }
 0x665   :  { %7117 = vmatpush1.bf16.msra.mxu0 %v9891_v60  ;;  %v9954_v60 = vld [vmem:[#allocation4 + $0x468] ss:$16 sps:$4 sm:$0xff]  }
 0x666   :  { %7160 = vmatpush1.bf16.msra.mxu1 %v9894_v49  ;;  %7118 = vmatprep.subr.bf16.mxu0 %v9899_v5  ;;  %v9959_v49 = vld [vmem:[#allocation4 + $0x444] ss:$16 sps:$4 sm:$0xff]   ;;  %v9957_v5 = vld [vmem:[#allocation4 + $0x440] ss:$16 sps:$4 sm:$0xff]  }
 0x667   :  { %7161 = vmatprep.subr.bf16.mxu1 %v9902_v43  ;;  %v9960_v43 = vld [vmem:[#allocation4 + $0x448] ss:$16 sps:$4 sm:$0xff]  }
 0x669   :  { %7119 = vmatpush1.bf16.msra.mxu0 %v9897_v29  ;;  %v9965_v29 = vld [vmem:[#allocation4 + $0x424] ss:$16 sps:$4 sm:$0xff]  }
 0x66a   :  { %7162 = vmatpush1.bf16.msra.mxu1 %v9900_v42  ;;  %7120 = vmatprep.subr.bf16.mxu0 %v9905_v11  ;;  %v9968_v42 = vld [vmem:[#allocation4 + $0x42c] ss:$16 sps:$4 sm:$0xff]   ;;  %v9963_v11 = vld [vmem:[#allocation4 + $0x420] ss:$16 sps:$4 sm:$0xff]  }
 0x66b   :  { %7163 = vmatprep.subr.bf16.mxu1 %v9908_v62  ;;  %v9966_v62 = vld [vmem:[#allocation4 + $0x428] ss:$16 sps:$4 sm:$0xff]  }
 0x66d   :  { %7121 = vmatpush1.bf16.msra.mxu0 %v9903_v41  ;;  %v9971_v41 = vld [vmem:[#allocation4 + $0x404] ss:$16 sps:$4 sm:$0xff]  }
 0x66e   :  { %7164 = vmatpush1.bf16.msra.mxu1 %v9906_v63  ;;  %7122 = vmatprep.subr.bf16.mxu0 %v9911_v8  ;;  %v9974_v63 = vld [vmem:[#allocation4 + $0x40c] ss:$16 sps:$4 sm:$0xff]   ;;  %v9969_v8 = vld [vmem:[#allocation4 + $0x400] ss:$16 sps:$4 sm:$0xff]  }
 0x66f   :  { %7165 = vmatprep.subr.bf16.mxu1 %v9914_v10  ;;  %v9972_v10 = vld [vmem:[#allocation4 + $0x408] ss:$16 sps:$4 sm:$0xff]  }
 0x671   :  { %7123 = vmatpush1.bf16.msra.mxu0 %v9909_v28  ;;  %v9977_v28 = vld [vmem:[#allocation4 + $0x3e4] ss:$16 sps:$4 sm:$0xff]  }
 0x672   :  { %7166 = vmatpush1.bf16.msra.mxu1 %v9912_v14  ;;  %7124 = vmatprep.subr.bf16.mxu0 %v9917_v34  ;;  %v9980_v14 = vld [vmem:[#allocation4 + $0x3ec] ss:$16 sps:$4 sm:$0xff]   ;;  %v9975_v34 = vld [vmem:[#allocation4 + $0x3e0] ss:$16 sps:$4 sm:$0xff]  }
 0x673   :  { %7167 = vmatprep.subr.bf16.mxu1 %v9920_v33  ;;  %v9978_v33 = vld [vmem:[#allocation4 + $0x3e8] ss:$16 sps:$4 sm:$0xff]  }
 0x675   :  { %7125 = vmatpush1.bf16.msra.mxu0 %v9915_v23  ;;  %v9983_v23 = vld [vmem:[#allocation4 + $0x3c4] ss:$16 sps:$4 sm:$0xff]  }
 0x676   :  { %7168 = vmatpush1.bf16.msra.mxu1 %v9918_v15  ;;  %7126 = vmatprep.subr.bf16.mxu0 %v9923_v2  ;;  %v9986_v15 = vld [vmem:[#allocation4 + $0x3cc] ss:$16 sps:$4 sm:$0xff]   ;;  %v9981_v2 = vld [vmem:[#allocation4 + $0x3c0] ss:$16 sps:$4 sm:$0xff]  }
 0x677   :  { %7169 = vmatprep.subr.bf16.mxu1 %v9926_v35  ;;  %v9984_v35 = vld [vmem:[#allocation4 + $0x3c8] ss:$16 sps:$4 sm:$0xff]  }
 0x679   :  { %7127 = vmatpush1.bf16.msra.mxu0 %v9921_v30  ;;  %v9989_v30 = vld [vmem:[#allocation4 + $0x4e4] ss:$16 sps:$4 sm:$0xff]  }
 0x67a   :  { %7170 = vmatpush1.bf16.msra.mxu1 %v9924_v57  ;;  %7140 = vmatprep.subr.bf16.mxu0 %v9929_v55  ;;  %v9992_v57 = vld [vmem:[#allocation4 + $0x4ec] ss:$16 sps:$4 sm:$0xff]   ;;  %v9987_v55 = vld [vmem:[#allocation4 + $0x4e0] ss:$16 sps:$4 sm:$0xff]  }
 0x67b   :  { %7183 = vmatprep.subr.bf16.mxu1 %v9932_v25  ;;  %v9990_v25 = vld [vmem:[#allocation4 + $0x4e8] ss:$16 sps:$4 sm:$0xff]  }
 0x67d   :  { %7141 = vmatpush2.bf16.msra.mxu0 %v9927_v47  ;;  %v9995_v47 = vld [vmem:[#allocation4 + $0x4c4] ss:$16 sps:$4 sm:$0xff]  }
 0x67e   :  { %7184 = vmatpush2.bf16.msra.mxu1 %v9930_v17  ;;  %7142 = vmatprep.subr.bf16.mxu0 %v9935_v48  ;;  %v9998_v17 = vld [vmem:[#allocation4 + $0x4cc] ss:$16 sps:$4 sm:$0xff]   ;;  %v6177_v48 = vmax.f32 %v16323_v40, %v9538_v24  ;;  %v6065_v40 = vmax.f32 %v16293_v58, %v9523_v9  ;;  %v9999_v24 = vld [vmem:[#allocation4 + $0x5e0] ss:$16 sps:$4 sm:$0xff]   ;;  %v10008_v58 = vld [vmem:[#allocation4 + $0x5c8] ss:$16 sps:$4 sm:$0xff]  }
 0x67f   :  { %7185 = vmatprep.subr.bf16.mxu1 %v9938_v13  ;;  %v9993_v13 = vld [vmem:[#allocation4 + $0x4c0] ss:$16 sps:$4 sm:$0xff]   ;;  %v10016_v9 = vld [vmem:[#allocation4 + $0x5ac] ss:$16 sps:$4 sm:$0xff]  }
 0x680   :  { %v6197_v21 = vmax.f32 %v6067_v19, %v6177_v48  ;;  %v10072_v48 = vld [vmem:[%s16748_s8 + $0x58] sm:$0xff]   ;;  %v10074_v19 = vld [vmem:[%s16748_s8 + $0x90] sm:$0xff]  }
 0x681   :  { %7143 = vmatpush2.bf16.msra.mxu0 %v9933_v46  ;;  %v6175_v46 = vmax.f32 %v16313_v50, %v9533_v18  ;;  %v10005_v18 = vld [vmem:[#allocation4 + $0x5c0] ss:$16 sps:$4 sm:$0xff]  }
 0x682   :  { %7186 = vmatpush2.bf16.msra.mxu1 %v9936_v1  ;;  %7450 = vmatprep.subr.bf16.mxu0 %v9941_v36  ;;  %v10004_v1 = vld [vmem:[#allocation4 + $0x5ec] ss:$16 sps:$4 sm:$0xff]   ;;  %v10011_v36 = vld [vmem:[#allocation4 + $0x5a0] ss:$16 sps:$4 sm:$0xff]  }
 0x683   :  { %7493 = vmatprep.subr.bf16.mxu1 %v9944_v27  ;;  %v6195_v59 = vmax.f32 %v6065_v40, %v6175_v46  ;;  %v10014_v27 = vld [vmem:[#allocation4 + $0x5a8] ss:$16 sps:$4 sm:$0xff]  }
 0x684   :  { %7145 = vmatmul.mubr.bf16.vlgmr.msra.gmra.mxu0 %v16513_v16  ;;  %v10075_v46 = vld [vmem:[%s16748_s8 + $0x50] sm:$0xff]   ;;  %v10080_v40 = vld [vmem:[%s16748_s8 + $0x80] sm:$0xff]  }
 0x685   :  { %7188 = vmatmul.mubr.bf16.vlgmr.msra.gmra.mxu1 %v16513_v16  ;;  %7451 = vmatpush1.bf16.msra.mxu0 %v9939_v61  ;;  %v9962_v16 = vld [vmem:[#allocation4 + $0x44c] ss:$16 sps:$4 sm:$0xff]   ;;  %v6207_v50 = vpack.c.bf16 %v6197_v21, %v6195_v59  ;;  %v10020_v61 = vld [vmem:[#allocation4 + $0x588] ss:$16 sps:$4 sm:$0xff]   ;;  %v10079_v21 = vld [vmem:[%s16748_s8 + $0x8] sm:$0xff]  }
 0x686   :  { %8977 = vmatprep.mubr.msk.bf16.mxu0 %vm6489_vm5, %v6205_v45  ;;  %7494 = vmatpush1.bf16.msra.mxu1 %v9942_v38  ;;  %v10028_v38 = vld [vmem:[#allocation4 + $0x56c] ss:$16 sps:$4 sm:$0xff]  }
 0x687   :  { %8978 = vmatprep.mubr.msk.bf16.mxu1 %vm6489_vm5, %v6205_v45  ;;  %7452 = vmatprep.subr.bf16.mxu0 %v9947_v52  ;;  %v10023_v52 = vld [vmem:[#allocation4 + $0x560] ss:$16 sps:$4 sm:$0xff]   ;;  %v10026_v45 = vld [vmem:[#allocation4 + $0x568] ss:$16 sps:$4 sm:$0xff]  }
 0x688   :  { %7495 = vmatprep.subr.bf16.mxu1 %v9950_v4  ;;  %v10031_v4 = vld [vmem:[#allocation4 + $0x544] ss:$16 sps:$4 sm:$0xff]   ;;  %v10083_v59 = vld [vmem:[%s16748_s8 + $0xc0] sm:$0xff]  }
 0x689   :  { %7453 = vmatpush1.bf16.msra.mxu0 %v9945_v37  ;;  %v10034_v37 = vld [vmem:[#allocation4 + $0x54c] ss:$16 sps:$4 sm:$0xff]  }
 0x68a   :  { %7496 = vmatpush1.bf16.msra.mxu1 %v9948_v26  ;;  %7454 = vmatprep.subr.bf16.mxu0 %v9953_v53  ;;  %v10029_v26 = vld [vmem:[#allocation4 + $0x540] ss:$16 sps:$4 sm:$0xff]   ;;  %v10032_v53 = vld [vmem:[#allocation4 + $0x548] ss:$16 sps:$4 sm:$0xff]  }
 0x68b   :  { %7497 = vmatprep.subr.bf16.mxu1 %v9956_v6  ;;  %v10037_v6 = vld [vmem:[#allocation4 + $0x524] ss:$16 sps:$4 sm:$0xff]  }
 0x68d   :  { %7455 = vmatpush1.bf16.msra.mxu0 %v9951_v0  ;;  %v10040_v0 = vld [vmem:[#allocation4 + $0x52c] ss:$16 sps:$4 sm:$0xff]  }
 0x68e   :  { %7498 = vmatpush1.bf16.msra.mxu1 %v9954_v60  ;;  %7456 = vmatprep.subr.bf16.mxu0 %v9959_v49  ;;  %v10035_v60 = vld [vmem:[#allocation4 + $0x520] ss:$16 sps:$4 sm:$0xff]   ;;  %v10038_v49 = vld [vmem:[#allocation4 + $0x528] ss:$16 sps:$4 sm:$0xff]  }
 0x68f   :  { %7499 = vmatprep.subr.bf16.mxu1 %v9962_v16  ;;  %v10043_v16 = vld [vmem:[#allocation4 + $0x504] ss:$16 sps:$4 sm:$0xff]  }
 0x691   :  { %7457 = vmatpush1.bf16.msra.mxu0 %v9957_v5  ;;  %v10046_v5 = vld [vmem:[#allocation4 + $0x50c] ss:$16 sps:$4 sm:$0xff]  }
 0x692   :  { %7500 = vmatpush1.bf16.msra.mxu1 %v9960_v43  ;;  %7458 = vmatprep.subr.bf16.mxu0 %v9965_v29  ;;  %v10041_v43 = vld [vmem:[#allocation4 + $0x500] ss:$16 sps:$4 sm:$0xff]   ;;  %v10044_v29 = vld [vmem:[#allocation4 + $0x508] ss:$16 sps:$4 sm:$0xff]  }
 0x693   :  { %7501 = vmatprep.subr.bf16.mxu1 %v9968_v42  ;;  %v10049_v42 = vld [vmem:[#allocation4 + $0x624] ss:$16 sps:$4 sm:$0xff]  }
 0x695   :  { %7459 = vmatpush1.bf16.msra.mxu0 %v9963_v11  ;;  %v10052_v11 = vld [vmem:[#allocation4 + $0x62c] ss:$16 sps:$4 sm:$0xff]  }
 0x696   :  { %7502 = vmatpush1.bf16.msra.mxu1 %v9966_v62  ;;  %7460 = vmatprep.subr.bf16.mxu0 %v9971_v41  ;;  %v10047_v62 = vld [vmem:[#allocation4 + $0x620] ss:$16 sps:$4 sm:$0xff]   ;;  %v10050_v41 = vld [vmem:[#allocation4 + $0x628] ss:$16 sps:$4 sm:$0xff]  }
 0x697   :  { %7503 = vmatprep.subr.bf16.mxu1 %v9974_v63  ;;  %v10055_v63 = vld [vmem:[#allocation4 + $0x604] ss:$16 sps:$4 sm:$0xff]  }
 0x699   :  { %7461 = vmatpush1.bf16.msra.mxu0 %v9969_v8  ;;  %v10058_v8 = vld [vmem:[#allocation4 + $0x60c] ss:$16 sps:$4 sm:$0xff]  }
 0x69a   :  { %7504 = vmatpush1.bf16.msra.mxu1 %v9972_v10  ;;  %7462 = vmatprep.subr.bf16.mxu0 %v9977_v28  ;;  %v10053_v10 = vld [vmem:[#allocation4 + $0x600] ss:$16 sps:$4 sm:$0xff]   ;;  %v10056_v28 = vld [vmem:[#allocation4 + $0x608] ss:$16 sps:$4 sm:$0xff]  }
 0x69b   :  { %7505 = vmatprep.subr.bf16.mxu1 %v9980_v14  ;;  %v18482_v14 = vmov 0  }
 0x69d   :  { %7463 = vmatpush1.bf16.msra.mxu0 %v9975_v34  ;;  %v10059_v34 = vld [vmem:[%s16748_s8 + $0xb8] sm:$0xff]  }
 0x69e   :  { %7506 = vmatpush1.bf16.msra.mxu1 %v9978_v33  ;;  %7464 = vmatprep.subr.bf16.mxu0 %v9983_v23  ;;  %v10060_v33 = vld [vmem:[%s16748_s8 + $0x78] sm:$0xff]  }
 0x69f   :  { %7507 = vmatprep.subr.bf16.mxu1 %v9986_v15  ;;  %v10061_v23 = vld [vmem:[%s16748_s8 + $0x38] sm:$0xff]   ;;  %v10063_v15 = vld [vmem:[%s16748_s8 + $0x70] sm:$0xff]  }
 0x6a1   :  { %7465 = vmatpush1.bf16.msra.mxu0 %v9981_v2  ;;  %v10064_v2 = vld [vmem:[%s16748_s8 + $0x30] sm:$0xff]  }
 0x6a2   :  { %7508 = vmatpush1.bf16.msra.mxu1 %v9984_v35  ;;  %7478 = vmatprep.subr.bf16.mxu0 %v9989_v30  ;;  %v10066_v35 = vld [vmem:[%s16748_s8 + $0x68] sm:$0xff]  }
 0x6a3   :  { %7521 = vmatprep.subr.bf16.mxu1 %v9992_v57  ;;  %v10065_v30 = vld [vmem:[%s16748_s8 + $0xa8] sm:$0xff]  }
 0x6a4   :  { %v10067_v57 = vld [vmem:[%s16748_s8 + $0x28] sm:$0xff]  }
 0x6a5   :  { %7479 = vmatpush2.bf16.msra.mxu0 %v9987_v55  ;;  %v10068_v55 = vld [vmem:[%s16748_s8 + $0xa0] sm:$0xff]  }
 0x6a6   :  { %7522 = vmatpush2.bf16.msra.mxu1 %v9990_v25  ;;  %7480 = vmatprep.subr.bf16.mxu0 %v9995_v47  ;;  %v10069_v25 = vld [vmem:[%s16748_s8 + $0x60] sm:$0xff]  }
 0x6a7   :  { %7523 = vmatprep.subr.bf16.mxu1 %v9998_v17  ;;  %v10070_v47 = vld [vmem:[%s16748_s8 + $0x20] sm:$0xff]   ;;  %v10071_v17 = vld [vmem:[%s16748_s8 + $0x98] sm:$0xff]  }
 0x6a9   :  { %7481 = vmatpush2.bf16.msra.mxu0 %v9993_v13  ;;  %v10073_v13 = vld [vmem:[%s16748_s8 + $0x18] sm:$0xff]  }
 0x6aa   :  { %7524 = vmatpush2.bf16.msra.mxu1 %v9996_v32  ;;  %7788 = vmatprep.subr.bf16.mxu0 %v10001_v54  ;;  %v10077_v32 = vld [vmem:[%s16748_s8 + $0x88] sm:$0xff]   ;;  %v10076_v54 = vld [vmem:[%s16748_s8 + $0x10] sm:$0xff]  }
 0x6ab   :  { %7831 = vmatprep.subr.bf16.mxu1 %v10004_v1  ;;  %v10078_v1 = vld [vmem:[%s16748_s8 + $0x48] sm:$0xff]  }
 0x6ac   :  { %7483 = vmatmul.mubr.bf16.vlgmr.msra.gmra.mxu0 %v16551_v51 }
 0x6ad   :  { %7526 = vmatmul.mubr.bf16.vlgmr.msra.gmra.mxu1 %v16551_v51  ;;  %7789 = vmatpush1.bf16.msra.mxu0 %v9999_v24  ;;  %v10022_v51 = vld [vmem:[#allocation4 + $0x58c] ss:$16 sps:$4 sm:$0xff]  }
 0x6ae   :  { %9019 = vmatprep.mubr.msk.bf16.mxu0 %vm6489_vm5, %v6207_v50  ;;  %7832 = vmatpush1.bf16.msra.mxu1 %v10002_v56  ;;  %v10081_v24 = vld [vmem:[%s16748_s8 + $0x40] sm:$0xff]  }
 0x6af   :  { %9020 = vmatprep.mubr.msk.bf16.mxu1 %vm6489_vm5, %v6207_v50  ;;  %7790 = vmatprep.subr.bf16.mxu0 %v10007_v44  ;;  %v10082_v56 = vld [vmem:[%s16748_s8] sm:$0xff]  }
 0x6b0   :  { %7833 = vmatprep.subr.bf16.mxu1 %v10010_v22 }
 0x6b1   :  { %7791 = vmatpush1.bf16.msra.mxu0 %v10005_v18 }
 0x6b2   :  { %7834 = vmatpush1.bf16.msra.mxu1 %v10008_v58  ;;  %7792 = vmatprep.subr.bf16.mxu0 %v10013_v31 }
 0x6b3   :  { %7835 = vmatprep.subr.bf16.mxu1 %v10016_v9 }
 0x6b5   :  { %7793 = vmatpush1.bf16.msra.mxu0 %v10011_v36 }
 0x6b6   :  { %7836 = vmatpush1.bf16.msra.mxu1 %v10014_v27  ;;  %7794 = vmatprep.subr.bf16.mxu0 %v10019_v39 }
 0x6b7   :  { %7837 = vmatprep.subr.bf16.mxu1 %v10022_v51 }
 0x6b9   :  { %7795 = vmatpush1.bf16.msra.mxu0 %v10017_v3 }
 0x6ba   :  { %7838 = vmatpush1.bf16.msra.mxu1 %v10020_v61  ;;  %7796 = vmatprep.subr.bf16.mxu0 %v10025_v12 }
 0x6bb   :  { %7839 = vmatprep.subr.bf16.mxu1 %v10028_v38 }
 0x6bd   :  { %7797 = vmatpush1.bf16.msra.mxu0 %v10023_v52 }
 0x6be   :  { %7840 = vmatpush1.bf16.msra.mxu1 %v10026_v45  ;;  %7798 = vmatprep.subr.bf16.mxu0 %v10031_v4 }
 0x6bf   :  { %7841 = vmatprep.subr.bf16.mxu1 %v10034_v37 }
 0x6c1   :  { %7799 = vmatpush1.bf16.msra.mxu0 %v10029_v26 }
 0x6c2   :  { %7842 = vmatpush1.bf16.msra.mxu1 %v10032_v53  ;;  %7800 = vmatprep.subr.bf16.mxu0 %v10037_v6 }
 0x6c3   :  { %7843 = vmatprep.subr.bf16.mxu1 %v10040_v0 }
 0x6c5   :  { %7801 = vmatpush1.bf16.msra.mxu0 %v10035_v60 }
 0x6c6   :  { %7844 = vmatpush1.bf16.msra.mxu1 %v10038_v49  ;;  %7802 = vmatprep.subr.bf16.mxu0 %v10043_v16 }
 0x6c7   :  { %7845 = vmatprep.subr.bf16.mxu1 %v10046_v5 }
 0x6c9   :  { %7803 = vmatpush1.bf16.msra.mxu0 %v10041_v43 }
 0x6ca   :  { %7846 = vmatpush1.bf16.msra.mxu1 %v10044_v29  ;;  %7816 = vmatprep.subr.bf16.mxu0 %v10049_v42 }
 0x6cb   :  { %7859 = vmatprep.subr.bf16.mxu1 %v10052_v11 }
 0x6cd   :  { %7817 = vmatpush2.bf16.msra.mxu0 %v10047_v62  ;;  %v7882_v62 = vld [vmem:[%s16747_s7] ss:$4 sm:$0xf] }
 0x6ce   :  { %7860 = vmatpush2.bf16.msra.mxu1 %v10050_v41  ;;  %7818 = vmatprep.subr.bf16.mxu0 %v10055_v63 }
 0x6cf   :  { %7861 = vmatprep.subr.bf16.mxu1 %v10058_v8 }
 0x6d1   :  { %7819 = vmatpush2.bf16.msra.mxu0 %v10053_v10 }
 0x6d2   :  { %7862 = vmatpush2.bf16.msra.mxu1 %v10056_v28  ;;  %9050 = vmatprep.subr.bf16.mxu0 %v10060_v33  ;;  %v18483_v33 = vld [vmem:[#allocation185_spill] sm:$0xff] }
 0x6d3   :  { %8238 = vmatprep.subr.bf16.mxu1 %v18482_v14 }
 0x6d4   :  { %7821 = vmatmul.mubr.bf16.vlgmr.msra.gmra.mxu0 %v16568_v20 }
 0x6d5   :  { %7864 = vmatmul.mubr.bf16.vlgmr.msra.gmra.mxu1 %v16568_v20  ;;  %v10062_v20 = vld [vmem:[%s16748_s8 + $0xb0] sm:$0xff]   ;;  %9051 = vmatpush3.bf16.msra.mxu0 %v10061_v23  ;;  %v7895_v23 = vrot.slane %v7882_v62, %v18483_v33 }
 0x6d6   :  { %8239 = vmatpush1.bf16.msra.mxu1 %v10059_v34  ;;  %9052 = vmatprep.subr.bf16.mxu0 %v10063_v15  ;;  %v7887_v34 = vrot.slane %v7882_v62, %v18464_v7 }
 0x6d7   :  { %8240 = vmatprep.subr.bf16.mxu1 %v18482_v14 }
 0x6d9   :  { %9053 = vmatpush3.bf16.msra.mxu0 %v10064_v2 }
 0x6da   :  { %8241 = vmatpush1.bf16.msra.mxu1 %v10062_v20  ;;  %9054 = vmatprep.subr.bf16.mxu0 %v10066_v35 }
 0x6db   :  { %8242 = vmatprep.subr.bf16.mxu1 %v18482_v14 }
 0x6dd   :  { %9055 = vmatpush3.bf16.msra.mxu0 %v10067_v57 }
 0x6de   :  { %8243 = vmatpush1.bf16.msra.mxu1 %v10065_v30  ;;  %9056 = vmatprep.subr.bf16.mxu0 %v10069_v25  ;;  %v18484_v30 = vld [vmem:[#allocation198_spill] sm:$0xff] }
 0x6df   :  { %8244 = vmatprep.subr.bf16.mxu1 %v18482_v14  ;;  %v7891_v57 = vrot.slane %v7882_v62, %v18484_v30 }
 0x6e1   :  { %9057 = vmatpush3.bf16.msra.mxu0 %v10070_v47 }
 0x6e2   :  { %8245 = vmatpush1.bf16.msra.mxu1 %v10068_v55  ;;  %9058 = vmatprep.subr.bf16.mxu0 %v10072_v48  ;;  %v9021_v48 = vld [vmem:[%s16747_s7 + $0x1] ss:$4 sm:$0xf] }
 0x6e3   :  { %8246 = vmatprep.subr.bf16.mxu1 %v18482_v14 }
 0x6e5   :  { %9059 = vmatpush3.bf16.msra.mxu0 %v10073_v13  ;;  %v18485_v13 = vld [vmem:[#allocation12_spill] sm:$0xff] }
 0x6e6   :  { %8247 = vmatpush1.bf16.msra.mxu1 %v10071_v17  ;;  %9060 = vmatprep.subr.bf16.mxu0 %v10075_v46 }
 0x6e7   :  { %8248 = vmatprep.subr.bf16.mxu1 %v18482_v14 }
 0x6e9   :  { %9061 = vmatpush3.bf16.msra.mxu0 %v10076_v54 }
 0x6ea   :  { %8249 = vmatpush1.bf16.msra.mxu1 %v10074_v19  ;;  %9062 = vmatprep.subr.bf16.mxu0 %v10078_v1  ;;  %v7899_v19 = vrot.slane %v7882_v62, %v18485_v13 }
 0x6eb   :  { %8250 = vmatprep.subr.bf16.mxu1 %v18482_v14 }
 0x6ed   :  { %9063 = vmatpush3.bf16.msra.mxu0 %v10079_v21 }
 0x6ee   :  { %8251 = vmatpush1.bf16.msra.mxu1 %v10077_v32  ;;  %9064 = vmatprep.subr.bf16.mxu0 %v10081_v24 }
 0x6ef   :  { %8252 = vmatprep.subr.bf16.mxu1 %v18482_v14 }
 0x6f1   :  { %9065 = vmatpush3.bf16.msra.mxu0 %v10082_v56 }
 0x6f2   :  { %8253 = vmatpush1.bf16.msra.mxu1 %v10080_v40 }
 0x6f3   :  { %8268 = vmatprep.subr.bf16.mxu1 %v18482_v14 }
 0x6f4   :  { %v6527_v44 = vpop.f32.mrf.mxu0  ;;  %v6570_v50 = vpop.f32.mrf.mxu1 }
 0x6f6   :  { %8269 = vmatpush2.bf16.msra.mxu1 %v10083_v59  ;;  %v6529_v22 = vpop.f32.mrf.mxu0  ;;  %v6572_v18 = vpop.f32.mrf.mxu1 }
 0x6f8   :  { %v6531_v58 = vpop.f32.mrf.mxu0  ;;  %v6574_v31 = vpop.f32.mrf.mxu1 }
 0x6fa   :  { %v6533_v9 = vpop.f32.mrf.mxu0  ;;  %v6576_v36 = vpop.f32.mrf.mxu1 }
 0x71c   :  { %v6816_v27 = vpop.f32.mrf.mxu0  ;;  %v6859_v39 = vpop.f32.mrf.mxu1 }
 0x71d   :  { %v6817_v42 = vadd.f32 %v6816_v27, %v6527_v44  ;;  %v6860_v41 = vadd.f32 %v6859_v39, %v6570_v50 }
 0x71e   :  { %v6818_v51 = vpop.f32.mrf.mxu0  ;;  %v6861_v3 = vpop.f32.mrf.mxu1 }
 0x71f   :  { %v6819_v63 = vadd.f32 %v6818_v51, %v6529_v22  ;;  %v6862_v10 = vadd.f32 %v6861_v3, %v6572_v18  ;;  %v7926_v18 = vrot.slane %v9021_v48, %v18464_v7 }
 0x720   :  { %v6820_v61 = vpop.f32.mrf.mxu0  ;;  %v6863_v12 = vpop.f32.mrf.mxu1 }
 0x721   :  { %v6821_v15 = vadd.f32 %v6820_v61, %v6531_v58  ;;  %v6864_v55 = vadd.f32 %v6863_v12, %v6574_v31 }
 0x722   :  { %v6822_v38 = vpop.f32.mrf.mxu0  ;;  %v6865_v52 = vpop.f32.mrf.mxu1 }
 0x723   :  { %v6823_v46 = vadd.f32 %v6822_v38, %v6533_v9  ;;  %v6866_v21 = vadd.f32 %v6865_v52, %v6576_v36 }
 0x744   :  { %v7146_v45 = vpop.f32.mrf.mxu0 }
 0x745   :  { %v7189_v4 = vpop.f32.mrf.mxu1  ;;  %v7198_v8 = vadd.f32 %v7146_v45, %v6817_v42 }
 0x746   :  { %v7148_v37 = vpop.f32.mrf.mxu0  ;;  %v7200_v28 = vadd.f32 %v7189_v4, %v6860_v41  ;;  %v7930_v4 = vrot.slane %v9021_v48, %v18484_v30  ;;  %v7934_v41 = vrot.slane %v9021_v48, %v18483_v33 }
 0x747   :  { %v7191_v26 = vpop.f32.mrf.mxu1  ;;  %v7199_v20 = vadd.f32 %v7148_v37, %v6819_v63 }
 0x748   :  { %v7150_v53 = vpop.f32.mrf.mxu0  ;;  %v7201_v25 = vadd.f32 %v7191_v26, %v6862_v10 }
 0x749   :  { %v7193_v6 = vpop.f32.mrf.mxu1  ;;  %v7202_v32 = vadd.f32 %v7150_v53, %v6821_v15 }
 0x74a   :  { %v7152_v0 = vpop.f32.mrf.mxu0  ;;  %v7204_v24 = vadd.f32 %v7193_v6, %v6864_v55  ;;  %v9022_v6 = vld [vmem:[%s16747_s7 + $0x2] ss:$4 sm:$0xf] }
 0x74b   :  { %v7195_v60 = vpop.f32.mrf.mxu1  ;;  %v7203_v50 = vadd.f32 %v7152_v0, %v6823_v46  ;;  %v7957_v10 = vrot.slane %v9022_v6, %v18464_v7 }
 0x74c   :  { %v7205_v27 = vadd.f32 %v7195_v60, %v6866_v21  ;;  %v7938_v60 = vrot.slane %v9021_v48, %v18485_v13  ;;  %v7965_v48 = vrot.slane %v9022_v6, %v18483_v33 }
 0x76c   :  { %v7484_v49 = vpop.f32.mrf.mxu0 }
 0x76d   :  { %v7527_v16 = vpop.f32.mrf.mxu1  ;;  %v7536_v2 = vadd.f32 %v7484_v49, %v7198_v8 }
 0x76e   :  { %v7486_v5 = vpop.f32.mrf.mxu0  ;;  %v7538_v47 = vadd.f32 %v7527_v16, %v7200_v28  ;;  %v7969_v28 = vrot.slane %v9022_v6, %v18485_v13 }
 0x76f   :  { %v7529_v43 = vpop.f32.mrf.mxu1  ;;  %v7537_v54 = vadd.f32 %v7486_v5, %v7199_v20 }
 0x770   :  { %v7488_v29 = vpop.f32.mrf.mxu0  ;;  %v7539_v59 = vadd.f32 %v7529_v43, %v7201_v25 }
 0x771   :  { %v7531_v11 = vpop.f32.mrf.mxu1  ;;  %v7540_v22 = vadd.f32 %v7488_v29, %v7202_v32 }
 0x772   :  { %v7490_v14 = vpop.f32.mrf.mxu0  ;;  %v7542_v39 = vadd.f32 %v7531_v11, %v7204_v24 }
 0x773   :  { %v7533_v35 = vpop.f32.mrf.mxu1  ;;  %v7541_v61 = vadd.f32 %v7490_v14, %v7203_v50  ;;  %v9023_v50 = vld [vmem:[%s16749_s9] ss:$0 sm:$0xff] }
 0x774   :  { %v7543_v52 = vadd.f32 %v7533_v35, %v7205_v27  ;;  %v7961_v35 = vrot.slane %v9022_v6, %v18484_v30 }
 0x794   :  { %v7822_v17 = vpop.f32.mrf.mxu0 }
 0x795   :  { %v7874_v1 = vadd.f32 %v7822_v17, %v7536_v2  ;;  %v7865_v40 = vpop.f32.mrf.mxu1 }
 0x796   :  { %v7876_v56 = vadd.f32 %v7865_v40, %v7538_v47  ;;  %v7824_v44 = vpop.f32.mrf.mxu0 }
 0x797   :  { %v7875_v58 = vadd.f32 %v7824_v44, %v7537_v54  ;;  %v7867_v31 = vpop.f32.mrf.mxu1  ;;  %v7904_v51 = vadd.f32 %v7887_v34, %v7874_v1 }
 0x798   :  { %v7877_v3 = vadd.f32 %v7867_v31, %v7539_v59  ;;  %v7826_v9 = vpop.f32.mrf.mxu0  ;;  %v7906_v12 = vadd.f32 %v7895_v23, %v7876_v56 }
 0x799   :  { %v7905_v38 = vadd.f32 %v7891_v57, %v7875_v58  ;;  %v7878_v45 = vadd.f32 %v7826_v9, %v7540_v22  ;;  %v7869_v36 = vpop.f32.mrf.mxu1  ;;  %v7912_v43 = vmax.f32 %v7904_v51, 0.0 }
 0x79a   :  { %v7907_v37 = vadd.f32 %v7899_v19, %v7877_v3  ;;  %v7880_v26 = vadd.f32 %v7869_v36, %v7542_v39  ;;  %v7828_v53 = vpop.f32.mrf.mxu0  ;;  %v7914_v62 = vmax.f32 %v7906_v12, 0.0 }
 0x79b   :  { %v7913_v0 = vmax.f32 %v7905_v38, 0.0  ;;  %v7908_v49 = vadd.f32 %v7887_v34, %v7878_v45  ;;  %v7879_v16 = vadd.f32 %v7828_v53, %v7541_v61  ;;  %v7871_v5 = vpop.f32.mrf.mxu1  ;;  %v7943_v55 = vmul.f32 %v7926_v18, %v7912_v43 }
 0x79c   :  { %v7915_v29 = vmax.f32 %v7907_v37, 0.0  ;;  %v7910_v42 = vadd.f32 %v7895_v23, %v7880_v26  ;;  %v7881_v11 = vadd.f32 %v7871_v5, %v7543_v52  ;;  %v7945_v17 = vmul.f32 %v7934_v41, %v7914_v62 }
 0x79d   :  { %v7916_v63 = vmax.f32 %v7908_v49, 0.0  ;;  %v7909_v8 = vadd.f32 %v7891_v57, %v7879_v16  ;;  %v7944_v20 = vmul.f32 %v7930_v4, %v7913_v0  ;;  %v7974_v1 = vadd.f32 %v7957_v10, %v7943_v55 }
 0x79e   :  { %v7918_v14 = vmax.f32 %v7910_v42, 0.0  ;;  %v7911_v15 = vadd.f32 %v7899_v19, %v7881_v11  ;;  %v7946_v25 = vmul.f32 %v7938_v60, %v7915_v29  ;;  %v7976_v21 = vadd.f32 %v7965_v48, %v7945_v17 }
 0x79f   :  { %v7947_v2 = vmul.f32 %v7926_v18, %v7916_v63  ;;  %v7917_v34 = vmax.f32 %v7909_v8, 0.0  ;;  %v7975_v54 = vadd.f32 %v7961_v35, %v7944_v20 }
 0x7a0   :  { %v7949_v23 = vmul.f32 %v7934_v41, %v7918_v14  ;;  %v7919_v47 = vmax.f32 %v7911_v15, 0.0  ;;  %v7977_v19 = vadd.f32 %v7969_v28, %v7946_v25 }
 0x7a1   :  { %v7948_v46 = vmul.f32 %v7930_v4, %v7917_v34  ;;  %v7978_v57 = vadd.f32 %v7957_v10, %v7947_v2 }
 0x7a2   :  { %v7950_v32 = vmul.f32 %v7938_v60, %v7919_v47  ;;  %v7980_v7 = vadd.f32 %v7965_v48, %v7949_v23 }
 0x7a3   :  { %v7979_v13 = vadd.f32 %v7961_v35, %v7948_v46  ;;  %v7982_v30 = vpack.c.bf16 %v7978_v57, %v7974_v1 }
 0x7a4   :  { %v7981_v40 = vadd.f32 %v7969_v28, %v7950_v32  ;;  %v7984_v56 = vpack.c.bf16 %v7980_v7, %v7976_v21 }
 0x7a5   :  { %v7983_v24 = vpack.c.bf16 %v7979_v13, %v7975_v54 }
 0x7a6   :  { %v7985_v59 = vpack.c.bf16 %v7981_v40, %v7977_v19 }
 0x7a7   :  { %8229 = vmatprep.mubr.bf16.mxu0 %v7983_v24 }
 0x7a8   :  { %9049 = vmatprep.mubr.msk.bf16.mxu1 %vm8193_vm6, %v7985_v59  ;;  %8230 = vmatmul.mubr.bf16.vlgmr.msra.gmra.mxu0 %v7982_v30 }
 0x7a9   :  { %8271 = vmatmul.mubr.bf16.vlgmr.msra.gmra.mxu1 %v7984_v56 }
 0x868   :  { %v9066_v33 = vpop.f32.mrf.mxu0 }
 0x869   :  { %v8272_v44 = vpop.f32.mrf.mxu1 }
 0x86a   :  { %v9067_v22 = vpop.f32.mrf.mxu0 }
 0x86b   :  { %v9068_v18 = vadd.f32 %v9067_v22, %v9066_v33  ;;  %v8274_v58 = vpop.f32.mrf.mxu1 }
 0x86c   :  { %v9069_v31 = vpop.f32.mrf.mxu0 }
 0x86d   :  { %v8232_v27 = vadd.f32 %v9068_v18, %v9023_v50  ;;  %v8275_v39 = vpop.f32.mrf.mxu1 }
 0x86e   :  { %v9070_v51 = vpop.f32.mrf.mxu0 }
 0x86f   :  { %v9071_v3 = vadd.f32 %v9070_v51, %v9069_v31  ;;  %v8277_v9 = vpop.f32.mrf.mxu1  ;;  %v8273_v61 = vadd.f32 %v8272_v44, %v8232_v27 }
 0x871   :  { %v8235_v12 = vadd.f32 %v9071_v3, %v9023_v50  ;;  %v8280_v38 = vsel %vm8279_vm7, %v8273_v61, -inf }
 0x872   :  { %8281 = vmax.xlane.f32.xlu0 %v8280_v38 }
 0x873   :  { %v8276_v45 = vadd.f32 %v8275_v39, %v8235_v12 }
 0x875   :  { %v8283_v36 = vsel %vm8279_vm7, %v8276_v45, -inf }
 0x876   :  { %8284 = vmax.xlane.f32.xlu1 %v8283_v36 }
 0x8fb   :  { %v8282_v52 = vpop.xlane.xlu0 %8281 }
 0x8fc   :  { %v8286_v4 = vsub.f32 %v8273_v61, %v8282_v52 }
 0x8fe   :  { %v8288_v37 = vmul.f32 1.442695, %v8286_v4 }
 0x8ff   :  { %v8285_v26 = vpop.xlane.xlu1 %8284 }
 0x900   :  { %10084 = vpow2.f32 %v8288_v37  ;;  %v8287_v53 = vsub.f32 %v8276_v45, %v8285_v26 }
 0x902   :  { %v8290_v6 = vmul.f32 1.442695, %v8287_v53 }
 0x904   :  { %10086 = vpow2.f32 %v8290_v6 }
 0x90d   :  { %v10085_v0 = vpop.eup %10084 }
 0x90e   :  { %v8292_v60 = vsel %vm8279_vm7, %v10085_v0, 0.0 }
 0x90f   :  { %8293 = vadd.xlane.f32.xlu0 %v8292_v60 }
 0x911   :  { %v10087_v49 = vpop.eup %10086 }
 0x912   :  { %v8295_v16 = vsel %vm8279_vm7, %v10087_v49, 0.0 }
 0x913   :  { %8296 = vadd.xlane.f32.xlu0 %v8295_v16 }
 0x998   :  { %v8294_v5 = vpop.xlane.xlu0 %8293 }
 0x999   :  { %10088 = vlog2.f32 %v8294_v5 }
 0x99c   :  { %v8297_v43 = vpop.xlane.xlu0 %8296 }
 0x99d   :  { %10090 = vlog2.f32 %v8297_v43 }
 0x9a6   :  { %v10089_v29 = vpop.eup %10088 }
 0x9a7   :  { %v8299_v42 = vmul.f32 0.6931472, %v10089_v29 }
 0x9a9   :  { %v8302_v11 = vsub.f32 %v8286_v4, %v8299_v42 }
 0x9aa   :  { %v10091_v62 = vpop.eup %10090 }
 0x9ab   :  { %8304 = vst.msk [vmem:[%s16750_s10] sm:$0xff] %vm8279_vm7, %v8302_v11  ;;  %v8301_v41 = vmul.f32 0.6931472, %v10091_v62 }
 0x9ad   :  { %v8303_v63 = vsub.f32 %v8287_v53, %v8301_v41 }
 0x9af   :  { %8305 = vst.msk [vmem:[%s16750_s10 + $0x8] sm:$0xff] %vm8279_vm7, %v8303_v63 }
 0x9b0   :  { %8310 = vsyncpa [#allocation3], 1 }
 0x9b1   :  { %8311 = vsyncpa [#allocation5], 1 }

</bundles_post_ra>
